<compile_context>
chip_gen: v7x
topology: tpu7x:2x2x1
jax: 0.10.0
libtpu: 0.0.40
codegen_flags: <defaults>
</compile_context>

<pallas_src>
import functools
import math

import jax
import jax.numpy as jnp
from jax import lax
from jax.experimental import pallas as pl
from jax.experimental.pallas import tpu as pltpu

# Working sets are a few MB; 32 MiB leaves headroom and is below the physical
# VMEM of every generation (incl. v7x's 64 MiB).
_VMEM_LIMIT = 32 * 1024 * 1024

CONV1_OUT = 32
CONV2_OUT = 64
_KSIZE = 5


def _round_up(x, m):
    return ((x + m - 1) // m) * m


def _cdiv(a, b):
    return -(-a // b)


def _tensorcores_per_chip():
    """Best-effort detection of dual-TensorCore parts (v7x / megacore chips).

    Only used to pick grid/tile sizes; defaulting to 1 is always correct.
    """
    try:
        kind = jax.devices()[0].device_kind.lower()
    except Exception:   # pragma: no cover - backend not initialised
        return 1
    return 2 if ("v7" in kind or "v4" in kind or "v5p" in kind) else 1


_NUM_TC = _tensorcores_per_chip()


# ----------------------------- Pallas kernels ------------------------------

def _conv_pool_kernel(p_ref, w_ref, b_ref, o_ref):
    """Fused conv(as ONE matmul) + 2x2 max-pool + bias + ReLU for one M-tile.

    p_ref: (4, TM, Kd)     bf16 -- im2col patches of the 4 pool-window members
    w_ref: (Kd, Cout_pad)  bf16 -- VMEM-resident across the whole grid
    b_ref: (1, Cout_pad)   f32
    o_ref: (TM, Cout_pad)  bf16 -- pooled output rows (lane-dense, 128 wide)
    """
    tm = o_ref.shape[0]
    kd = w_ref.shape[0]
    # (4, TM, Kd) -> (4*TM, Kd): TM % 16 == 0 and Kd % 128 == 0, so this
    # collapse is exactly bf16-tile aligned (layout-preserving view).
    p = p_ref[...].reshape(4 * tm, kd)
    y = jnp.dot(p, w_ref[...], preferred_element_type=jnp.float32)  # (4*TM, Cp)
    # Pool on the raw f32 accumulators, then a single bias add + ReLU:
    # relu(max_j(y_j) + b) == max_j relu(y_j + b) (per-column bias, monotone relu).
    m = jnp.maximum(jnp.maximum(y[0 * tm:1 * tm], y[1 * tm:2 * tm]),
                    jnp.maximum(y[2 * tm:3 * tm], y[3 * tm:4 * tm]))
    o_ref[...] = jnp.maximum(m + b_ref[...], 0.0).astype(o_ref.dtype)


def _fc_chain_kernel(x_ref, w1_ref, b1_ref, w2_ref, b2_ref, w3_ref, b3_ref,
                     o_ref):
    """fc1+ReLU -> fc2+ReLU -> fc3 with all weights VMEM-resident, f32 accum."""
    h = jnp.dot(x_ref[...], w1_ref[...], preferred_element_type=jnp.float32)
    h = jnp.maximum(h + b1_ref[...], 0.0)
    h = jnp.dot(h.astype(jnp.bfloat16), w2_ref[...],
                preferred_element_type=jnp.float32)
    h = jnp.maximum(h + b2_ref[...], 0.0)
    y = jnp.dot(h.astype(jnp.bfloat16), w3_ref[...],
                preferred_element_type=jnp.float32)
    o_ref[...] = y + b3_ref[...]


# ------------------------------ wrappers / glue -----------------------------

def _pool_grouped_patches(x, K):
    """Patches of a VALID KxK conv, grouped per 2x2 pool window.

    Returns (4, B*Hp*Wp, Cin*K*K): axis 0 is the pool-window member (dh, dw),
    rows are (b, hp, wp)-major, features are in the (channel-major) order of
    lax.conv_general_dilated_patches -- the prepared weight rows are permuted
    at init to match that order exactly.

    Note: assumes the valid-conv output height/width are even (true for the
    32x32 / 5x5 / 5x5 CifarCnn pipeline, same implicit floor as torch).
    """
    B, H, W, Cin = x.shape
    Ho, Wo = H - K + 1, W - K + 1
    Hp, Wp = Ho // 2, Wo // 2
    kd = Cin * K * K
    pat = lax.conv_general_dilated_patches(
        x, (K, K), (1, 1), "VALID",
        dimension_numbers=("NHWC", "HWIO", "NHWC"))          # (B, Ho, Wo, Kd)
    members = [pat[:, dh:dh + 2 * Hp:2, dw:dw + 2 * Wp:2, :]
               .reshape(B * Hp * Wp, kd)
               for dh in range(2) for dw in range(2)]
    return jnp.stack(members, axis=0), (B, Hp, Wp)


def conv_relu_pool(x_nhwc, w_mat, b_row, *, K):
    """max_pool2d(relu(conv2d_valid(x, w) + b), 2) as one Pallas call.

    Returns (B, Hp, Wp, Cout_pad) bf16 with the channel dim zero-padded to 128.
    """
    kd_pad, cout_pad = w_mat.shape
    patches, (B, Hp, Wp) = _pool_grouped_patches(x_nhwc, K)
    M, Kd = patches.shape[1], patches.shape[2]

    # Tile the pooled-row axis: single full tile on 1-TC chips (v5e/v6e),
    # balanced 2-way "parallel" split on dual-TC chips (v7x).  TM is rounded
    # to a multiple of 16 so the in-kernel bf16 (4,TM,Kd)->(4*TM,Kd) collapse
    # is tile-aligned.
    n_tiles = _NUM_TC if M >= 16 * _NUM_TC else 1
    tm = _round_up(_cdiv(M, n_tiles), 16)
    m_pad = tm * n_tiles

    patches = jnp.pad(patches, ((0, 0), (0, m_pad - M), (0, kd_pad - Kd)))

    out = pl.pallas_call(
        _conv_pool_kernel,
        grid=(n_tiles,),
        out_shape=jax.ShapeDtypeStruct((m_pad, cout_pad), jnp.bfloat16),
        in_specs=[pl.BlockSpec((4, tm, kd_pad), lambda i: (0, i, 0)),
                  pl.BlockSpec((kd_pad, cout_pad), lambda i: (0, 0)),
                  pl.BlockSpec((1, cout_pad), lambda i: (0, 0))],
        out_specs=pl.BlockSpec((tm, cout_pad), lambda i: (i, 0)),
        compiler_params=pltpu.CompilerParams(
            dimension_semantics=("parallel",),
            vmem_limit_bytes=_VMEM_LIMIT),
    )(patches, w_mat, b_row)

    return out[:M].reshape(B, Hp, Wp, cout_pad)


def fc_chain(x_flat, w1, b1, w2, b2, w3, b3):
    """relu(fc1) -> relu(fc2) -> fc3 as one Pallas call, batch-tiled."""
    B, D = x_flat.shape
    H1, H2, out_pad = w1.shape[1], w2.shape[1], w3.shape[1]

    n_tiles = _NUM_TC if B >= 16 * _NUM_TC else 1
    tb = _round_up(_cdiv(B, n_tiles), 8)
    b_pad = tb * n_tiles
    x_p = jnp.pad(x_flat, ((0, b_pad - B), (0, 0)))

    out = pl.pallas_call(
        _fc_chain_kernel,
        grid=(n_tiles,),
        out_shape=jax.ShapeDtypeStruct((b_pad, out_pad), jnp.float32),
        in_specs=[pl.BlockSpec((tb, D), lambda i: (i, 0)),
                  pl.BlockSpec((D, H1), lambda i: (0, 0)),
                  pl.BlockSpec((1, H1), lambda i: (0, 0)),
                  pl.BlockSpec((H1, H2), lambda i: (0, 0)),
                  pl.BlockSpec((1, H2), lambda i: (0, 0)),
                  pl.BlockSpec((H2, out_pad), lambda i: (0, 0)),
                  pl.BlockSpec((1, out_pad), lambda i: (0, 0))],
        out_specs=pl.BlockSpec((tb, out_pad), lambda i: (i, 0)),
        compiler_params=pltpu.CompilerParams(
            dimension_semantics=("parallel",),
            vmem_limit_bytes=_VMEM_LIMIT),
    )(x_p, w1, b1, w2, b2, w3, b3)
    return out[:B]


# --------------------------- parameter preparation --------------------------

def init_params(key, in_channels, out_dim):
    """Deterministic re-implementation of CifarCnn.__init__ weight init
    (raw, torch-layout-equivalent parameters; see prepare_params)."""
    k = jax.random.split(key, 8)

    def conv_init(kk, K, cin, cout):
        n = K * K * cout
        w = math.sqrt(2.0 / n) * jax.random.normal(kk, (K, K, cin, cout),
                                                   jnp.float32)
        return w, jnp.zeros((cout,), jnp.float32)        # HWIO weight, zero bias

    def linear_init(kw, kb, fan_in, fan_out):
        stdv = 1.0 / math.sqrt(fan_in)
        w = jax.random.uniform(kw, (fan_in, fan_out), jnp.float32, -stdv, stdv)
        b = jax.random.uniform(kb, (fan_out,), jnp.float32, -stdv, stdv)
        return w, b

    return {
        "conv1": conv_init(k[0], _KSIZE, in_channels, CONV1_OUT),
        "conv2": conv_init(k[1], _KSIZE, CONV1_OUT, CONV2_OUT),
        "fc1": linear_init(k[2], k[3], CONV2_OUT * 5 * 5, 512),  # torch CHW row order
        "fc2": linear_init(k[4], k[5], 512, 128),
        "fc3": linear_init(k[6], k[7], 128, out_dim),
    }


def _patch_feature_perm(K, cin):
    """Probe lax.conv_general_dilated_patches once with an index image so the
    weight-row order matches its feature order by construction."""
    idx = jnp.arange(K * K * cin, dtype=jnp.float32).reshape(1, K, K, cin)
    feat = lax.conv_general_dilated_patches(
        idx, (K, K), (1, 1), "VALID",
        dimension_numbers=("NHWC", "HWIO", "NHWC"))      # (1, 1, 1, K*K*cin)
    return jnp.round(feat.reshape(-1)).astype(jnp.int32)  # perm[f] = kh*K*cin + kw*cin + c


def _prep_conv(w_hwio, b):
    """(K,K,Cin,Cout) HWIO weight -> (Kd_pad, 128) bf16 matmul weight whose
    rows follow the runtime patch-feature order; bias -> (1, 128) f32."""
    K, _, cin, cout = w_hwio.shape
    kd = K * K * cin
    kd_pad, cout_pad = _round_up(kd, 128), _round_up(cout, 128)
    rows = w_hwio.reshape(kd, cout)[_patch_feature_perm(K, cin)]
    w_mat = jnp.pad(rows, ((0, kd_pad - kd), (0, cout_pad - cout)))
    b_row = jnp.pad(b, (0, cout_pad - cout)).astype(jnp.float32).reshape(1, cout_pad)
    return w_mat.astype(jnp.bfloat16), b_row


def prepare_params(raw):
    """One-time preprocessing (permute / pad / cast to bf16) so the jitted
    forward contains no per-call weight massaging (perf review)."""
    conv1 = _prep_conv(*raw["conv1"])
    conv2 = _prep_conv(*raw["conv2"])

    # fc1: torch flattens the pooled activation NCHW C-major; the conv2 kernel
    # output flattens NHWC with channels zero-padded to 128 lanes.  Permute +
    # zero-pad fc1's rows once here (identical numerics, no runtime transpose
    # or channel slice before the FC chain).
    w1, b1 = raw["fc1"]
    w1 = jnp.transpose(w1.reshape(CONV2_OUT, 5, 5, -1), (1, 2, 0, 3))   # (5,5,64,512)
    w1 = jnp.pad(w1, ((0, 0), (0, 0), (0, 128 - CONV2_OUT), (0, 0)))    # (5,5,128,512)
    w1 = w1.reshape(5 * 5 * 128, -1)

    w2, b2 = raw["fc2"]
    w3, b3 = raw["fc3"]
    out_pad = _round_up(w3.shape[1], 128)                # lane-dense fc3 output
    w3 = jnp.pad(w3, ((0, 0), (0, out_pad - w3.shape[1])))
    b3 = jnp.pad(b3, (0, out_pad - b3.shape[0]))

    def fc(w, b):
        return w.astype(jnp.bfloat16), b.astype(jnp.float32).reshape(1, -1)

    return {"conv1": conv1, "conv2": conv2,
            "fc": fc(w1, b1) + fc(w2, b2) + fc(w3, b3)}


# ------------------------------ model forward -------------------------------

def cifar_cnn_forward(params, x_nchw, *, out_dim):
    # Input layout glue only: NCHW -> NHWC plus a single cast to bf16.
    x = jnp.transpose(x_nchw, (0, 2, 3, 1)).astype(jnp.bfloat16)
    h = conv_relu_pool(x, *params["conv1"], K=_KSIZE)             # (B,14,14,128)
    # Drop conv1's channel padding before conv2's patches (keeps conv2's
    # contraction at 800, not 3200).
    h = conv_relu_pool(h[..., :CONV1_OUT], *params["conv2"], K=_KSIZE)  # (B,5,5,128)
    # NHWC flatten; conv2's padded channels hit zero rows of the prepared fc1
    # weight, so no channel slice is needed here.
    flat = h.reshape(h.shape[0], -1)                              # (B, 5*5*128)
    logits = fc_chain(flat, *params["fc"])                        # (B, 128) f32
    return logits[:, :out_dim]


if __name__ == "__main__":
    key = jax.random.PRNGKey(0)
    pkey, xkey = jax.random.split(key)

    out_dim = 10
    # One-time parameter preparation happens OUTSIDE the jitted forward.
    params = prepare_params(init_params(pkey, 3, out_dim))

    # fc1's 64*5*5 fan-in pins the spatial input to 32x32; batch kept small.
    x = jax.random.normal(xkey, (2, 3, 32, 32), jnp.float32)

    fwd = jax.jit(functools.partial(cifar_cnn_forward, out_dim=out_dim))
    out = fwd(params, x)
    jax.block_until_ready(out)

    assert out.shape == (2, out_dim), out.shape
    assert bool(jnp.all(jnp.isfinite(out)))
    print("KERNEL_OK")
</pallas_src>

<mosaic_0001>
module attributes {stable_mosaic.version = 11 : i64} {
  func.func @_conv_pool_kernel(%arg0: i32, %arg1: memref<4x400x128xbf16, #tpu.memory_space<vmem>>, %arg2: memref<128x128xbf16, #tpu.memory_space<vmem>>, %arg3: memref<1x128xf32, #tpu.memory_space<vmem>>, %arg4: memref<400x128xbf16, #tpu.memory_space<vmem>>) attributes {dimension_semantics = [#tpu.dimension_semantics<parallel>], iteration_bounds = array<i64: 1>, scalar_prefetch = 0 : i64, scratch_operands = 0 : i64, tpu.core_type = #tpu.core_type<tc>, window_params = [{transform_indices = @transform_0, window_bounds = array<i64: 4, 400, 128>}, {pipeline_mode = #tpu.pipeline_mode<synchronous>, transform_indices = @transform_1, window_bounds = array<i64: 128, 128>}, {pipeline_mode = #tpu.pipeline_mode<synchronous>, transform_indices = @transform_2, window_bounds = array<i64: 1, 128>}, {transform_indices = @transform_3, window_bounds = array<i64: 400, 128>}]} {
    %c0 = arith.constant 0 : index
    %c0_0 = arith.constant 0 : index
    %c0_1 = arith.constant 0 : index
    %0 = vector.load %arg1[%c0, %c0_0, %c0_1] : memref<4x400x128xbf16, #tpu.memory_space<vmem>>, vector<4x400x128xbf16>
    %1 = vector.shape_cast %0 : vector<4x400x128xbf16> to vector<1600x128xbf16>
    %c0_2 = arith.constant 0 : index
    %c0_3 = arith.constant 0 : index
    %2 = vector.load %arg2[%c0_2, %c0_3] : memref<128x128xbf16, #tpu.memory_space<vmem>>, vector<128x128xbf16>
    %cst = arith.constant dense<0.000000e+00> : vector<1600x128xf32>
    %3 = tpu.matmul %1, %2, %cst {dimension_numbers = #tpu.dot_dimension_numbers<[1], [0], [0], [1], [0, 0, 1, 1], [], []>} : vector<1600x128xbf16>, vector<128x128xbf16>, vector<1600x128xf32> -> vector<1600x128xf32>
    %4 = vector.extract_strided_slice %3 {offsets = [0, 0], sizes = [400, 128], strides = [1, 1]} : vector<1600x128xf32> to vector<400x128xf32>
    %5 = vector.extract_strided_slice %3 {offsets = [400, 0], sizes = [400, 128], strides = [1, 1]} : vector<1600x128xf32> to vector<400x128xf32>
    %6 = arith.maximumf %4, %5 : vector<400x128xf32>
    %7 = vector.extract_strided_slice %3 {offsets = [800, 0], sizes = [400, 128], strides = [1, 1]} : vector<1600x128xf32> to vector<400x128xf32>
    %8 = vector.extract_strided_slice %3 {offsets = [1200, 0], sizes = [400, 128], strides = [1, 1]} : vector<1600x128xf32> to vector<400x128xf32>
    %9 = arith.maximumf %7, %8 : vector<400x128xf32>
    %10 = arith.maximumf %6, %9 : vector<400x128xf32>
    %c0_4 = arith.constant 0 : index
    %c0_5 = arith.constant 0 : index
    %11 = vector.load %arg3[%c0_4, %c0_5] : memref<1x128xf32, #tpu.memory_space<vmem>>, vector<1x128xf32>
    %12 = vector.broadcast %11 : vector<1x128xf32> to vector<400x128xf32>
    %13 = arith.addf %10, %12 : vector<400x128xf32>
    %cst_6 = arith.constant 0.000000e+00 : f32
    %14 = vector.broadcast %cst_6 : f32 to vector<400x128xf32>
    %15 = arith.maximumf %13, %14 : vector<400x128xf32>
    %16 = arith.truncf %15 : vector<400x128xf32> to vector<400x128xbf16>
    %c0_7 = arith.constant 0 : index
    %c0_8 = arith.constant 0 : index
    %17 = vector.load %arg4[%c0_7, %c0_8] : memref<400x128xbf16, #tpu.memory_space<vmem>>, vector<400x128xbf16>
    tpu.vector_store %arg4[%c0_7, %c0_8], %16 {strides = array<i32>} : memref<400x128xbf16, #tpu.memory_space<vmem>>, vector<400x128xbf16>,
    return
  }
  func.func @transform_0(%arg0: i32) -> (i32, i32, i32) {
    %c0_i32 = arith.constant 0 : i32
    %c0_i32_0 = arith.constant 0 : i32
    %c0_i32_1 = arith.constant 0 : i32
    return %c0_i32, %arg0, %c0_i32_0 : i32, i32, i32
  }
  func.func @transform_1(%arg0: i32) -> (i32, i32) {
    %c0_i32 = arith.constant 0 : i32
    %c0_i32_0 = arith.constant 0 : i32
    %c0_i32_1 = arith.constant 0 : i32
    return %c0_i32, %c0_i32_0 : i32, i32
  }
  func.func @transform_2(%arg0: i32) -> (i32, i32) {
    %c0_i32 = arith.constant 0 : i32
    %c0_i32_0 = arith.constant 0 : i32
    %c0_i32_1 = arith.constant 0 : i32
    return %c0_i32, %c0_i32_0 : i32, i32
  }
  func.func @transform_3(%arg0: i32) -> (i32, i32) {
    %c0_i32 = arith.constant 0 : i32
    %c0_i32_0 = arith.constant 0 : i32
    return %arg0, %c0_i32 : i32, i32
  }
}

module attributes {stable_mosaic.version = 11 : i64} {
  func.func @_conv_pool_kernel(%arg0: i32, %arg1: memref<4x64x896xbf16, #tpu.memory_space<vmem>>, %arg2: memref<896x128xbf16, #tpu.memory_space<vmem>>, %arg3: memref<1x128xf32, #tpu.memory_space<vmem>>, %arg4: memref<64x128xbf16, #tpu.memory_space<vmem>>) attributes {dimension_semantics = [#tpu.dimension_semantics<parallel>], iteration_bounds = array<i64: 1>, scalar_prefetch = 0 : i64, scratch_operands = 0 : i64, tpu.core_type = #tpu.core_type<tc>, window_params = [{transform_indices = @transform_0, window_bounds = array<i64: 4, 64, 896>}, {pipeline_mode = #tpu.pipeline_mode<synchronous>, transform_indices = @transform_1, window_bounds = array<i64: 896, 128>}, {pipeline_mode = #tpu.pipeline_mode<synchronous>, transform_indices = @transform_2, window_bounds = array<i64: 1, 128>}, {transform_indices = @transform_3, window_bounds = array<i64: 64, 128>}]} {
    %c0 = arith.constant 0 : index
    %c0_0 = arith.constant 0 : index
    %c0_1 = arith.constant 0 : index
    %0 = vector.load %arg1[%c0, %c0_0, %c0_1] : memref<4x64x896xbf16, #tpu.memory_space<vmem>>, vector<4x64x896xbf16>
    %1 = vector.shape_cast %0 : vector<4x64x896xbf16> to vector<256x896xbf16>
    %c0_2 = arith.constant 0 : index
    %c0_3 = arith.constant 0 : index
    %2 = vector.load %arg2[%c0_2, %c0_3] : memref<896x128xbf16, #tpu.memory_space<vmem>>, vector<896x128xbf16>
    %cst = arith.constant dense<0.000000e+00> : vector<256x128xf32>
    %3 = tpu.matmul %1, %2, %cst {dimension_numbers = #tpu.dot_dimension_numbers<[1], [0], [0], [1], [0, 0, 1, 1], [], []>} : vector<256x896xbf16>, vector<896x128xbf16>, vector<256x128xf32> -> vector<256x128xf32>
    %4 = vector.extract_strided_slice %3 {offsets = [0, 0], sizes = [64, 128], strides = [1, 1]} : vector<256x128xf32> to vector<64x128xf32>
    %5 = vector.extract_strided_slice %3 {offsets = [64, 0], sizes = [64, 128], strides = [1, 1]} : vector<256x128xf32> to vector<64x128xf32>
    %6 = arith.maximumf %4, %5 : vector<64x128xf32>
    %7 = vector.extract_strided_slice %3 {offsets = [128, 0], sizes = [64, 128], strides = [1, 1]} : vector<256x128xf32> to vector<64x128xf32>
    %8 = vector.extract_strided_slice %3 {offsets = [192, 0], sizes = [64, 128], strides = [1, 1]} : vector<256x128xf32> to vector<64x128xf32>
    %9 = arith.maximumf %7, %8 : vector<64x128xf32>
    %10 = arith.maximumf %6, %9 : vector<64x128xf32>
    %c0_4 = arith.constant 0 : index
    %c0_5 = arith.constant 0 : index
    %11 = vector.load %arg3[%c0_4, %c0_5] : memref<1x128xf32, #tpu.memory_space<vmem>>, vector<1x128xf32>
    %12 = vector.broadcast %11 : vector<1x128xf32> to vector<64x128xf32>
    %13 = arith.addf %10, %12 : vector<64x128xf32>
    %cst_6 = arith.constant 0.000000e+00 : f32
    %14 = vector.broadcast %cst_6 : f32 to vector<64x128xf32>
    %15 = arith.maximumf %13, %14 : vector<64x128xf32>
    %16 = arith.truncf %15 : vector<64x128xf32> to vector<64x128xbf16>
    %c0_7 = arith.constant 0 : index
    %c0_8 = arith.constant 0 : index
    %17 = vector.load %arg4[%c0_7, %c0_8] : memref<64x128xbf16, #tpu.memory_space<vmem>>, vector<64x128xbf16>
    tpu.vector_store %arg4[%c0_7, %c0_8], %16 {strides = array<i32>} : memref<64x128xbf16, #tpu.memory_space<vmem>>, vector<64x128xbf16>,
    return
  }
  func.func @transform_0(%arg0: i32) -> (i32, i32, i32) {
    %c0_i32 = arith.constant 0 : i32
    %c0_i32_0 = arith.constant 0 : i32
    %c0_i32_1 = arith.constant 0 : i32
    return %c0_i32, %arg0, %c0_i32_0 : i32, i32, i32
  }
  func.func @transform_1(%arg0: i32) -> (i32, i32) {
    %c0_i32 = arith.constant 0 : i32
    %c0_i32_0 = arith.constant 0 : i32
    %c0_i32_1 = arith.constant 0 : i32
    return %c0_i32, %c0_i32_0 : i32, i32
  }
  func.func @transform_2(%arg0: i32) -> (i32, i32) {
    %c0_i32 = arith.constant 0 : i32
    %c0_i32_0 = arith.constant 0 : i32
    %c0_i32_1 = arith.constant 0 : i32
    return %c0_i32, %c0_i32_0 : i32, i32
  }
  func.func @transform_3(%arg0: i32) -> (i32, i32) {
    %c0_i32 = arith.constant 0 : i32
    %c0_i32_0 = arith.constant 0 : i32
    return %arg0, %c0_i32 : i32, i32
  }
}

module attributes {stable_mosaic.version = 11 : i64} {
  func.func @_fc_chain_kernel(%arg0: i32, %arg1: memref<8x3200xbf16, #tpu.memory_space<vmem>>, %arg2: memref<3200x512xbf16, #tpu.memory_space<vmem>>, %arg3: memref<1x512xf32, #tpu.memory_space<vmem>>, %arg4: memref<512x128xbf16, #tpu.memory_space<vmem>>, %arg5: memref<1x128xf32, #tpu.memory_space<vmem>>, %arg6: memref<128x128xbf16, #tpu.memory_space<vmem>>, %arg7: memref<1x128xf32, #tpu.memory_space<vmem>>, %arg8: memref<8x128xf32, #tpu.memory_space<vmem>>) attributes {dimension_semantics = [#tpu.dimension_semantics<parallel>], iteration_bounds = array<i64: 1>, scalar_prefetch = 0 : i64, scratch_operands = 0 : i64, tpu.core_type = #tpu.core_type<tc>, window_params = [{transform_indices = @transform_0, window_bounds = array<i64: 8, 3200>}, {pipeline_mode = #tpu.pipeline_mode<synchronous>, transform_indices = @transform_1, window_bounds = array<i64: 3200, 512>}, {pipeline_mode = #tpu.pipeline_mode<synchronous>, transform_indices = @transform_2, window_bounds = array<i64: 1, 512>}, {pipeline_mode = #tpu.pipeline_mode<synchronous>, transform_indices = @transform_3, window_bounds = array<i64: 512, 128>}, {pipeline_mode = #tpu.pipeline_mode<synchronous>, transform_indices = @transform_4, window_bounds = array<i64: 1, 128>}, {pipeline_mode = #tpu.pipeline_mode<synchronous>, transform_indices = @transform_5, window_bounds = array<i64: 128, 128>}, {pipeline_mode = #tpu.pipeline_mode<synchronous>, transform_indices = @transform_6, window_bounds = array<i64: 1, 128>}, {transform_indices = @transform_7, window_bounds = array<i64: 8, 128>}]} {
    %c0 = arith.constant 0 : index
    %c0_0 = arith.constant 0 : index
    %0 = vector.load %arg1[%c0, %c0_0] : memref<8x3200xbf16, #tpu.memory_space<vmem>>, vector<8x3200xbf16>
    %c0_1 = arith.constant 0 : index
    %c0_2 = arith.constant 0 : index
    %1 = vector.load %arg2[%c0_1, %c0_2] : memref<3200x512xbf16, #tpu.memory_space<vmem>>, vector<3200x512xbf16>
    %cst = arith.constant dense<0.000000e+00> : vector<8x512xf32>
    %2 = tpu.matmul %0, %1, %cst {dimension_numbers = #tpu.dot_dimension_numbers<[1], [0], [0], [1], [0, 0, 1, 1], [], []>} : vector<8x3200xbf16>, vector<3200x512xbf16>, vector<8x512xf32> -> vector<8x512xf32>
    %c0_3 = arith.constant 0 : index
    %c0_4 = arith.constant 0 : index
    %3 = vector.load %arg3[%c0_3, %c0_4] : memref<1x512xf32, #tpu.memory_space<vmem>>, vector<1x512xf32>
    %4 = vector.broadcast %3 : vector<1x512xf32> to vector<8x512xf32>
    %5 = arith.addf %2, %4 : vector<8x512xf32>
    %cst_5 = arith.constant 0.000000e+00 : f32
    %6 = vector.broadcast %cst_5 : f32 to vector<8x512xf32>
    %7 = arith.maximumf %5, %6 : vector<8x512xf32>
    %8 = arith.truncf %7 : vector<8x512xf32> to vector<8x512xbf16>
    %c0_6 = arith.constant 0 : index
    %c0_7 = arith.constant 0 : index
    %9 = vector.load %arg4[%c0_6, %c0_7] : memref<512x128xbf16, #tpu.memory_space<vmem>>, vector<512x128xbf16>
    %cst_8 = arith.constant dense<0.000000e+00> : vector<8x128xf32>
    %10 = tpu.matmul %8, %9, %cst_8 {dimension_numbers = #tpu.dot_dimension_numbers<[1], [0], [0], [1], [0, 0, 1, 1], [], []>} : vector<8x512xbf16>, vector<512x128xbf16>, vector<8x128xf32> -> vector<8x128xf32>
    %c0_9 = arith.constant 0 : index
    %c0_10 = arith.constant 0 : index
    %11 = vector.load %arg5[%c0_9, %c0_10] : memref<1x128xf32, #tpu.memory_space<vmem>>, vector<1x128xf32>
    %12 = vector.broadcast %11 : vector<1x128xf32> to vector<8x128xf32>
    %13 = arith.addf %10, %12 : vector<8x128xf32>
    %cst_11 = arith.constant 0.000000e+00 : f32
    %14 = vector.broadcast %cst_11 : f32 to vector<8x128xf32>
    %15 = arith.maximumf %13, %14 : vector<8x128xf32>
    %16 = arith.truncf %15 : vector<8x128xf32> to vector<8x128xbf16>
    %c0_12 = arith.constant 0 : index
    %c0_13 = arith.constant 0 : index
    %17 = vector.load %arg6[%c0_12, %c0_13] : memref<128x128xbf16, #tpu.memory_space<vmem>>, vector<128x128xbf16>
    %cst_14 = arith.constant dense<0.000000e+00> : vector<8x128xf32>
    %18 = tpu.matmul %16, %17, %cst_14 {dimension_numbers = #tpu.dot_dimension_numbers<[1], [0], [0], [1], [0, 0, 1, 1], [], []>} : vector<8x128xbf16>, vector<128x128xbf16>, vector<8x128xf32> -> vector<8x128xf32>
    %c0_15 = arith.constant 0 : index
    %c0_16 = arith.constant 0 : index
    %19 = vector.load %arg7[%c0_15, %c0_16] : memref<1x128xf32, #tpu.memory_space<vmem>>, vector<1x128xf32>
    %20 = vector.broadcast %19 : vector<1x128xf32> to vector<8x128xf32>
    %21 = arith.addf %18, %20 : vector<8x128xf32>
    %c0_17 = arith.constant 0 : index
    %c0_18 = arith.constant 0 : index
    %22 = vector.load %arg8[%c0_17, %c0_18] : memref<8x128xf32, #tpu.memory_space<vmem>>, vector<8x128xf32>
    tpu.vector_store %arg8[%c0_17, %c0_18], %21 {strides = array<i32>} : memref<8x128xf32, #tpu.memory_space<vmem>>, vector<8x128xf32>,
    return
  }
  func.func @transform_0(%arg0: i32) -> (i32, i32) {
    %c0_i32 = arith.constant 0 : i32
    %c0_i32_0 = arith.constant 0 : i32
    return %arg0, %c0_i32 : i32, i32
  }
  func.func @transform_1(%arg0: i32) -> (i32, i32) {
    %c0_i32 = arith.constant 0 : i32
    %c0_i32_0 = arith.constant 0 : i32
    %c0_i32_1 = arith.constant 0 : i32
    return %c0_i32, %c0_i32_0 : i32, i32
  }
  func.func @transform_2(%arg0: i32) -> (i32, i32) {
    %c0_i32 = arith.constant 0 : i32
    %c0_i32_0 = arith.constant 0 : i32
    %c0_i32_1 = arith.constant 0 : i32
    return %c0_i32, %c0_i32_0 : i32, i32
  }
  func.func @transform_3(%arg0: i32) -> (i32, i32) {
    %c0_i32 = arith.constant 0 : i32
    %c0_i32_0 = arith.constant 0 : i32
    %c0_i32_1 = arith.constant 0 : i32
    return %c0_i32, %c0_i32_0 : i32, i32
  }
  func.func @transform_4(%arg0: i32) -> (i32, i32) {
    %c0_i32 = arith.constant 0 : i32
    %c0_i32_0 = arith.constant 0 : i32
    %c0_i32_1 = arith.constant 0 : i32
    return %c0_i32, %c0_i32_0 : i32, i32
  }
  func.func @transform_5(%arg0: i32) -> (i32, i32) {
    %c0_i32 = arith.constant 0 : i32
    %c0_i32_0 = arith.constant 0 : i32
    %c0_i32_1 = arith.constant 0 : i32
    return %c0_i32, %c0_i32_0 : i32, i32
  }
  func.func @transform_6(%arg0: i32) -> (i32, i32) {
    %c0_i32 = arith.constant 0 : i32
    %c0_i32_0 = arith.constant 0 : i32
    %c0_i32_1 = arith.constant 0 : i32
    return %c0_i32, %c0_i32_0 : i32, i32
  }
  func.func @transform_7(%arg0: i32) -> (i32, i32) {
    %c0_i32 = arith.constant 0 : i32
    %c0_i32_0 = arith.constant 0 : i32
    return %arg0, %c0_i32 : i32, i32
  }
}

</mosaic_0001>

<bundles_post_ra>
// kernel: cifar_cnn_forward.3
= control target key start
LH: loop header
LB: loop body
LE: loop exit
PB: predicated region body
PF: predicated region fallthrough
CT: control target
= control target key end

     0   :  { %s3803_s1 = inlined_call_operand.vmem [shape: bf16[128,128], index: 1, kind: input, shape index: {}]   ;;  %s3804_s0 = inlined_call_operand.vmem [shape: bf16[4,400,128], index: 0, kind: input, shape index: {}]   ;;  %s3805_s2 = inlined_call_operand.vmem [shape: f32[1,128], index: 2, kind: input, shape index: {}]   ;;  %s3806_s3 = inlined_call_operand.vmem [shape: bf16[400,128], index: 3, kind: output, shape index: {}]  }
   0x1   :  { %v2921_v0 = vld [vmem:[%s3803_s1] sm:$0xff]   ;;  %v2922_v1 = vld [vmem:[%s3803_s1 + $0x8] sm:$0xff]   ;;  %v2923_v2 = vld [vmem:[%s3803_s1 + $0x10] sm:$0xff]  }
   0x2   :  { %2689 = vmatprep.subr.bf16.mxu0 %v2921_v0  ;;  %2905 = vmatprep.subr.bf16.mxu1 %v2921_v0  ;;  %v2924_v3 = vld [vmem:[%s3803_s1 + $0x18] sm:$0xff]   ;;  %v2929_v4 = vld [vmem:[%s3804_s0] sm:$0xff]   ;;  %v2930_v5 = vld [vmem:[%s3804_s0 + $0x190] sm:$0xff]  }
   0x3   :  { %2690 = vmatpush3.bf16.msra.mxu0 %v2921_v0  ;;  %2913 = vmatpush3.bf16.msra.mxu1 %v2921_v0  ;;  %v2925_v6 = vld [vmem:[%s3803_s1 + $0x20] sm:$0xff]   ;;  %v2926_v7 = vld [vmem:[%s3803_s1 + $0x28] sm:$0xff]   ;;  %v2927_v8 = vld [vmem:[%s3803_s1 + $0x30] sm:$0xff]  }
   0x4   :  { %2691 = vmatprep.subr.bf16.mxu0 %v2922_v1  ;;  %2906 = vmatprep.subr.bf16.mxu1 %v2922_v1  ;;  %v2928_v9 = vld [vmem:[%s3803_s1 + $0x38] sm:$0xff]   ;;  %v2931_v10 = vld [vmem:[%s3804_s0 + $0x8] sm:$0xff]   ;;  %v2933_v12 = vld [vmem:[%s3804_s0 + $0x10] sm:$0xff]  }
   0x5   :  { %2705 = vmatprep.mubr.bf16.mxu0 %v2929_v4  ;;  %2805 = vmatprep.mubr.bf16.mxu1 %v2930_v5  ;;  %v2932_v11 = vld [vmem:[%s3804_s0 + $0x198] sm:$0xff]   ;;  %v2934_v13 = vld [vmem:[%s3804_s0 + $0x1a0] sm:$0xff]   ;;  %v2936_v15 = vld [vmem:[%s3804_s0 + $0x1a8] sm:$0xff]  }
   0x6   :  { %v2935_v14 = vld [vmem:[%s3804_s0 + $0x18] sm:$0xff]   ;;  %v2937_v16 = vld [vmem:[%s3804_s0 + $0x20] sm:$0xff]   ;;  %v2938_v17 = vld [vmem:[%s3804_s0 + $0x1b0] sm:$0xff]  }
   0x7   :  { %2692 = vmatpush3.bf16.msra.mxu0 %v2922_v1  ;;  %2914 = vmatpush3.bf16.msra.mxu1 %v2922_v1  ;;  %v2939_v18 = vld [vmem:[%s3804_s0 + $0x28] sm:$0xff]   ;;  %v2940_v19 = vld [vmem:[%s3804_s0 + $0x1b8] sm:$0xff]   ;;  %v2941_v20 = vld [vmem:[%s3804_s0 + $0x30] sm:$0xff]  }
   0x8   :  { %2693 = vmatprep.subr.bf16.mxu0 %v2923_v2  ;;  %2907 = vmatprep.subr.bf16.mxu1 %v2923_v2  ;;  %v2942_v21 = vld [vmem:[%s3804_s0 + $0x1c0] sm:$0xff]   ;;  %v2943_v22 = vld [vmem:[%s3804_s0 + $0x38] sm:$0xff]   ;;  %v2944_v23 = vld [vmem:[%s3804_s0 + $0x1c8] sm:$0xff]  }
   0x9   :  { %v2945_v24 = vld [vmem:[%s3804_s0 + $0x40] sm:$0xff]   ;;  %v2946_v25 = vld [vmem:[%s3804_s0 + $0x1d0] sm:$0xff]   ;;  %v2947_v26 = vld [vmem:[%s3804_s0 + $0x48] sm:$0xff]  }
   0xa   :  { %v2948_v27 = vld [vmem:[%s3804_s0 + $0x1d8] sm:$0xff]   ;;  %v2949_v28 = vld [vmem:[%s3804_s0 + $0x50] sm:$0xff]   ;;  %v2950_v29 = vld [vmem:[%s3804_s0 + $0x1e0] sm:$0xff]  }
   0xb   :  { %2694 = vmatpush3.bf16.msra.mxu0 %v2923_v2  ;;  %2915 = vmatpush3.bf16.msra.mxu1 %v2923_v2  ;;  %v2951_v30 = vld [vmem:[%s3804_s0 + $0x58] sm:$0xff]   ;;  %v2952_v31 = vld [vmem:[%s3804_s0 + $0x1e8] sm:$0xff]   ;;  %v2953_v32 = vld [vmem:[%s3804_s0 + $0x60] sm:$0xff]  }
   0xc   :  { %2695 = vmatprep.subr.bf16.mxu0 %v2924_v3  ;;  %2908 = vmatprep.subr.bf16.mxu1 %v2924_v3  ;;  %v2954_v33 = vld [vmem:[%s3804_s0 + $0x1f0] sm:$0xff]   ;;  %v2955_v34 = vld [vmem:[%s3804_s0 + $0x68] sm:$0xff]   ;;  %v2956_v35 = vld [vmem:[%s3804_s0 + $0x1f8] sm:$0xff]  }
   0xd   :  { %v2957_v36 = vld [vmem:[%s3804_s0 + $0x70] sm:$0xff]   ;;  %v2958_v37 = vld [vmem:[%s3804_s0 + $0x200] sm:$0xff]   ;;  %v2959_v38 = vld [vmem:[%s3804_s0 + $0x78] sm:$0xff]  }
   0xe   :  { %v2960_v39 = vld [vmem:[%s3804_s0 + $0x208] sm:$0xff]   ;;  %v2961_v40 = vld [vmem:[%s3804_s0 + $0x80] sm:$0xff]   ;;  %v2962_v41 = vld [vmem:[%s3804_s0 + $0x210] sm:$0xff]  }
   0xf   :  { %2696 = vmatpush3.bf16.msra.mxu0 %v2924_v3  ;;  %2916 = vmatpush3.bf16.msra.mxu1 %v2924_v3  ;;  %v2963_v42 = vld [vmem:[%s3804_s0 + $0x88] sm:$0xff]   ;;  %v2964_v43 = vld [vmem:[%s3804_s0 + $0x218] sm:$0xff]   ;;  %v2965_v44 = vld [vmem:[%s3804_s0 + $0x90] sm:$0xff]  }
  0x10   :  { %2697 = vmatprep.subr.bf16.mxu0 %v2925_v6  ;;  %2909 = vmatprep.subr.bf16.mxu1 %v2925_v6  ;;  %v2966_v45 = vld [vmem:[%s3804_s0 + $0x220] sm:$0xff]   ;;  %v2967_v46 = vld [vmem:[%s3804_s0 + $0x98] sm:$0xff]   ;;  %v2968_v47 = vld [vmem:[%s3804_s0 + $0x228] sm:$0xff]  }
  0x11   :  { %v2969_v48 = vld [vmem:[%s3804_s0 + $0xa0] sm:$0xff]   ;;  %v2970_v49 = vld [vmem:[%s3804_s0 + $0x230] sm:$0xff]   ;;  %v2971_v50 = vld [vmem:[%s3804_s0 + $0xa8] sm:$0xff]  }
  0x12   :  { %v2972_v51 = vld [vmem:[%s3804_s0 + $0x238] sm:$0xff]   ;;  %v2973_v52 = vld [vmem:[%s3804_s0 + $0xb0] sm:$0xff]   ;;  %v2974_v53 = vld [vmem:[%s3804_s0 + $0x240] sm:$0xff]  }
  0x13   :  { %2698 = vmatpush3.bf16.msra.mxu0 %v2925_v6  ;;  %2917 = vmatpush3.bf16.msra.mxu1 %v2925_v6  ;;  %v2975_v54 = vld [vmem:[%s3804_s0 + $0xb8] sm:$0xff]   ;;  %v2976_v55 = vld [vmem:[%s3804_s0 + $0x248] sm:$0xff]   ;;  %v2977_v56 = vld [vmem:[%s3804_s0 + $0xc0] sm:$0xff]  }
  0x14   :  { %2699 = vmatprep.subr.bf16.mxu0 %v2926_v7  ;;  %2910 = vmatprep.subr.bf16.mxu1 %v2926_v7  ;;  %v2978_v57 = vld [vmem:[%s3804_s0 + $0x250] sm:$0xff]   ;;  %v2979_v58 = vld [vmem:[%s3804_s0 + $0xc8] sm:$0xff]   ;;  %v2980_v59 = vld [vmem:[%s3804_s0 + $0x258] sm:$0xff]  }
  0x15   :  { %v2981_v60 = vld [vmem:[%s3804_s0 + $0xd0] sm:$0xff]   ;;  %v2982_v61 = vld [vmem:[%s3804_s0 + $0x260] sm:$0xff]   ;;  %v2983_v62 = vld [vmem:[%s3804_s0 + $0xd8] sm:$0xff]  }
  0x16   :  { %v2984_v63 = vld [vmem:[%s3804_s0 + $0x268] sm:$0xff]   ;;  %v2985_v0 = vld [vmem:[%s3804_s0 + $0xe0] sm:$0xff]   ;;  %v2986_v1 = vld [vmem:[%s3804_s0 + $0x270] sm:$0xff]  }
  0x17   :  { %2700 = vmatpush3.bf16.msra.mxu0 %v2926_v7  ;;  %2918 = vmatpush3.bf16.msra.mxu1 %v2926_v7  ;;  %v2987_v2 = vld [vmem:[%s3804_s0 + $0xe8] sm:$0xff]   ;;  %v2988_v3 = vld [vmem:[%s3804_s0 + $0x278] sm:$0xff]   ;;  %v2989_v4 = vld [vmem:[%s3804_s0 + $0xf0] sm:$0xff]  }
  0x18   :  { %2701 = vmatprep.subr.bf16.mxu0 %v2927_v8  ;;  %2911 = vmatprep.subr.bf16.mxu1 %v2927_v8  ;;  %v2990_v5 = vld [vmem:[%s3804_s0 + $0x280] sm:$0xff]   ;;  %v2991_v6 = vld [vmem:[%s3804_s0 + $0xf8] sm:$0xff]   ;;  %v2992_v7 = vld [vmem:[%s3804_s0 + $0x288] sm:$0xff]  }
  0x1b   :  { %2702 = vmatpush3.bf16.msra.mxu0 %v2927_v8  ;;  %2919 = vmatpush3.bf16.msra.mxu1 %v2927_v8  ;;  %v2993_v8 = vld [vmem:[%s3804_s0 + $0x100] sm:$0xff]  }
  0x1c   :  { %2703 = vmatprep.subr.bf16.mxu0 %v2928_v9  ;;  %2912 = vmatprep.subr.bf16.mxu1 %v2928_v9 }
  0x1f   :  { %2704 = vmatpush3.bf16.msra.mxu0 %v2928_v9  ;;  %2920 = vmatpush3.bf16.msra.mxu1 %v2928_v9  ;;  %v2994_v9 = vld [vmem:[%s3804_s0 + $0x290] sm:$0xff]  }
  0x22   :  { %2706 = vmatmul.mubr.bf16.vlgmr.msra.gmra.mrb[0].mxu0 %v2931_v10  ;;  %2806 = vmatmul.mubr.bf16.vlgmr.msra.gmra.mrb[0].mxu1 %v2932_v11  ;;  %v2995_v10 = vld [vmem:[%s3804_s0 + $0x108] sm:$0xff]   ;;  %v2996_v11 = vld [vmem:[%s3804_s0 + $0x298] sm:$0xff]  }
  0x23   :  { %2709 = vmatprep.mubr.bf16.mxu0 %v2933_v12  ;;  %2809 = vmatprep.mubr.bf16.mxu1 %v2934_v13  ;;  %v2997_v12 = vld [vmem:[%s3804_s0 + $0x110] sm:$0xff]   ;;  %v2998_v13 = vld [vmem:[%s3804_s0 + $0x2a0] sm:$0xff]  }
  0x2a   :  { %2710 = vmatmul.mubr.bf16.gmra.mrb[4].mxu0 %v2935_v14  ;;  %2810 = vmatmul.mubr.bf16.gmra.mrb[4].mxu1 %v2936_v15  ;;  %v2999_v14 = vld [vmem:[%s3804_s0 + $0x118] sm:$0xff]   ;;  %v3000_v15 = vld [vmem:[%s3804_s0 + $0x2a8] sm:$0xff]  }
  0x2b   :  { %2713 = vmatprep.mubr.bf16.mxu0 %v2937_v16  ;;  %2813 = vmatprep.mubr.bf16.mxu1 %v2938_v17  ;;  %v3001_v16 = vld [vmem:[%s3804_s0 + $0x120] sm:$0xff]   ;;  %v3002_v17 = vld [vmem:[%s3804_s0 + $0x2b0] sm:$0xff]  }
  0x32   :  { %2714 = vmatmul.mubr.bf16.gmra.mrb[8].mxu0 %v2939_v18  ;;  %2814 = vmatmul.mubr.bf16.gmra.mrb[8].mxu1 %v2940_v19  ;;  %v3003_v18 = vld [vmem:[%s3804_s0 + $0x128] sm:$0xff]   ;;  %v3004_v19 = vld [vmem:[%s3804_s0 + $0x2b8] sm:$0xff]  }
  0x33   :  { %2717 = vmatprep.mubr.bf16.mxu0 %v2941_v20  ;;  %2817 = vmatprep.mubr.bf16.mxu1 %v2942_v21  ;;  %v3005_v20 = vld [vmem:[%s3804_s0 + $0x130] sm:$0xff]   ;;  %v3006_v21 = vld [vmem:[%s3804_s0 + $0x2c0] sm:$0xff]  }
  0x3a   :  { %2718 = vmatmul.mubr.bf16.gmra.mrb[12].mxu0 %v2943_v22  ;;  %2818 = vmatmul.mubr.bf16.gmra.mrb[12].mxu1 %v2944_v23  ;;  %v3007_v22 = vld [vmem:[%s3804_s0 + $0x138] sm:$0xff]   ;;  %v3008_v23 = vld [vmem:[%s3804_s0 + $0x2c8] sm:$0xff]  }
  0x3b   :  { %2721 = vmatprep.mubr.bf16.mxu0 %v2945_v24  ;;  %2821 = vmatprep.mubr.bf16.mxu1 %v2946_v25  ;;  %v3009_v24 = vld [vmem:[%s3804_s0 + $0x140] sm:$0xff]   ;;  %v3010_v25 = vld [vmem:[%s3804_s0 + $0x2d0] sm:$0xff]  }
  0x42   :  { %2722 = vmatmul.mubr.bf16.gmra.mrb[16].mxu0 %v2947_v26  ;;  %2822 = vmatmul.mubr.bf16.gmra.mrb[16].mxu1 %v2948_v27  ;;  %v3011_v26 = vld [vmem:[%s3804_s0 + $0x148] sm:$0xff]   ;;  %v3012_v27 = vld [vmem:[%s3804_s0 + $0x2d8] sm:$0xff]  }
  0x43   :  { %2725 = vmatprep.mubr.bf16.mxu0 %v2949_v28  ;;  %2825 = vmatprep.mubr.bf16.mxu1 %v2950_v29  ;;  %v3013_v28 = vld [vmem:[%s3804_s0 + $0x150] sm:$0xff]   ;;  %v3014_v29 = vld [vmem:[%s3804_s0 + $0x2e0] sm:$0xff]  }
  0x4a   :  { %2726 = vmatmul.mubr.bf16.gmra.mrb[20].mxu0 %v2951_v30  ;;  %2826 = vmatmul.mubr.bf16.gmra.mrb[20].mxu1 %v2952_v31  ;;  %v3015_v30 = vld [vmem:[%s3804_s0 + $0x158] sm:$0xff]   ;;  %v3016_v31 = vld [vmem:[%s3804_s0 + $0x2e8] sm:$0xff]  }
  0x4b   :  { %2729 = vmatprep.mubr.bf16.mxu0 %v2953_v32  ;;  %2829 = vmatprep.mubr.bf16.mxu1 %v2954_v33  ;;  %v3017_v32 = vld [vmem:[%s3804_s0 + $0x160] sm:$0xff]   ;;  %v3018_v33 = vld [vmem:[%s3804_s0 + $0x2f0] sm:$0xff]  }
  0x52   :  { %2730 = vmatmul.mubr.bf16.gmra.mrb[24].mxu0 %v2955_v34  ;;  %2830 = vmatmul.mubr.bf16.gmra.mrb[24].mxu1 %v2956_v35  ;;  %v3019_v34 = vld [vmem:[%s3804_s0 + $0x168] sm:$0xff]   ;;  %v3020_v35 = vld [vmem:[%s3804_s0 + $0x2f8] sm:$0xff]  }
  0x53   :  { %2733 = vmatprep.mubr.bf16.mxu0 %v2957_v36  ;;  %2833 = vmatprep.mubr.bf16.mxu1 %v2958_v37  ;;  %v3021_v36 = vld [vmem:[%s3804_s0 + $0x170] sm:$0xff]   ;;  %v3022_v37 = vld [vmem:[%s3804_s0 + $0x300] sm:$0xff]  }
  0x5a   :  { %2734 = vmatmul.mubr.bf16.gmra.mrb[28].mxu0 %v2959_v38  ;;  %2834 = vmatmul.mubr.bf16.gmra.mrb[28].mxu1 %v2960_v39  ;;  %v3023_v38 = vld [vmem:[%s3804_s0 + $0x178] sm:$0xff]   ;;  %v3024_v39 = vld [vmem:[%s3804_s0 + $0x308] sm:$0xff]  }
  0x5b   :  { %2737 = vmatprep.mubr.bf16.mxu0 %v2961_v40  ;;  %2837 = vmatprep.mubr.bf16.mxu1 %v2962_v41  ;;  %v3025_v40 = vld [vmem:[%s3804_s0 + $0x180] sm:$0xff]   ;;  %v3026_v41 = vld [vmem:[%s3804_s0 + $0x310] sm:$0xff]  }
  0x62   :  { %2738 = vmatmul.mubr.bf16.gmra.mrb[32].mxu0 %v2963_v42  ;;  %2838 = vmatmul.mubr.bf16.gmra.mrb[32].mxu1 %v2964_v43  ;;  %v3027_v42 = vld [vmem:[%s3804_s0 + $0x188] sm:$0xff]   ;;  %v3028_v43 = vld [vmem:[%s3804_s0 + $0x318] sm:$0xff]  }
  0x63   :  { %2741 = vmatprep.mubr.bf16.mxu0 %v2965_v44  ;;  %2841 = vmatprep.mubr.bf16.mxu1 %v2966_v45 }
  0x6a   :  { %2742 = vmatmul.mubr.bf16.gmra.mrb[36].mxu0 %v2967_v46  ;;  %2842 = vmatmul.mubr.bf16.gmra.mrb[36].mxu1 %v2968_v47 }
  0x6b   :  { %2745 = vmatprep.mubr.bf16.mxu0 %v2969_v48  ;;  %2845 = vmatprep.mubr.bf16.mxu1 %v2970_v49 }
  0x72   :  { %2746 = vmatmul.mubr.bf16.gmra.mrb[40].mxu0 %v2971_v50  ;;  %2846 = vmatmul.mubr.bf16.gmra.mrb[40].mxu1 %v2972_v51 }
  0x73   :  { %2749 = vmatprep.mubr.bf16.mxu0 %v2973_v52  ;;  %2849 = vmatprep.mubr.bf16.mxu1 %v2974_v53 }
  0x7a   :  { %2750 = vmatmul.mubr.bf16.gmra.mrb[44].mxu0 %v2975_v54  ;;  %2850 = vmatmul.mubr.bf16.gmra.mrb[44].mxu1 %v2976_v55 }
  0x7b   :  { %2753 = vmatprep.mubr.bf16.mxu0 %v2977_v56  ;;  %2853 = vmatprep.mubr.bf16.mxu1 %v2978_v57 }
  0x82   :  { %2754 = vmatmul.mubr.bf16.gmra.mrb[48].mxu0 %v2979_v58  ;;  %2854 = vmatmul.mubr.bf16.gmra.mrb[48].mxu1 %v2980_v59 }
  0x83   :  { %2757 = vmatprep.mubr.bf16.mxu0 %v2981_v60  ;;  %2857 = vmatprep.mubr.bf16.mxu1 %v2982_v61 }
  0x8a   :  { %2758 = vmatmul.mubr.bf16.gmra.mrb[52].mxu0 %v2983_v62  ;;  %2858 = vmatmul.mubr.bf16.gmra.mrb[52].mxu1 %v2984_v63 }
  0x8b   :  { %2761 = vmatprep.mubr.bf16.mxu0 %v2985_v0  ;;  %2861 = vmatprep.mubr.bf16.mxu1 %v2986_v1 }
  0x92   :  { %2762 = vmatmul.mubr.bf16.gmra.mrb[56].mxu0 %v2987_v2  ;;  %2862 = vmatmul.mubr.bf16.gmra.mrb[56].mxu1 %v2988_v3 }
  0x93   :  { %2765 = vmatprep.mubr.bf16.mxu0 %v2989_v4  ;;  %2865 = vmatprep.mubr.bf16.mxu1 %v2990_v5 }
  0x9a   :  { %2766 = vmatmul.mubr.bf16.gmra.mrb[60].mxu0 %v2991_v6  ;;  %2866 = vmatmul.mubr.bf16.gmra.mrb[60].mxu1 %v2992_v7 }
  0x9b   :  { %2769 = vmatprep.mubr.bf16.mxu0 %v2993_v8  ;;  %2869 = vmatprep.mubr.bf16.mxu1 %v2994_v9 }
  0xa2   :  { %2770 = vmatmul.mubr.bf16.gmra.mrb[64].mxu0 %v2995_v10  ;;  %2870 = vmatmul.mubr.bf16.gmra.mrb[64].mxu1 %v2996_v11 }
  0xa3   :  { %2773 = vmatprep.mubr.bf16.mxu0 %v2997_v12  ;;  %2873 = vmatprep.mubr.bf16.mxu1 %v2998_v13 }
  0xaa   :  { %2774 = vmatmul.mubr.bf16.gmra.mrb[68].mxu0 %v2999_v14  ;;  %2874 = vmatmul.mubr.bf16.gmra.mrb[68].mxu1 %v3000_v15 }
  0xab   :  { %2777 = vmatprep.mubr.bf16.mxu0 %v3001_v16  ;;  %2877 = vmatprep.mubr.bf16.mxu1 %v3002_v17 }
  0xb2   :  { %2778 = vmatmul.mubr.bf16.gmra.mrb[72].mxu0 %v3003_v18  ;;  %2878 = vmatmul.mubr.bf16.gmra.mrb[72].mxu1 %v3004_v19 }
  0xb3   :  { %2781 = vmatprep.mubr.bf16.mxu0 %v3005_v20  ;;  %2881 = vmatprep.mubr.bf16.mxu1 %v3006_v21 }
  0xba   :  { %2782 = vmatmul.mubr.bf16.gmra.mrb[76].mxu0 %v3007_v22  ;;  %2882 = vmatmul.mubr.bf16.gmra.mrb[76].mxu1 %v3008_v23 }
  0xbb   :  { %2785 = vmatprep.mubr.bf16.mxu0 %v3009_v24  ;;  %2885 = vmatprep.mubr.bf16.mxu1 %v3010_v25 }
  0xc2   :  { %2786 = vmatmul.mubr.bf16.gmra.mrb[80].mxu0 %v3011_v26  ;;  %2886 = vmatmul.mubr.bf16.gmra.mrb[80].mxu1 %v3012_v27 }
  0xc3   :  { %2789 = vmatprep.mubr.bf16.mxu0 %v3013_v28  ;;  %2889 = vmatprep.mubr.bf16.mxu1 %v3014_v29 }
  0xca   :  { %2790 = vmatmul.mubr.bf16.gmra.mrb[84].mxu0 %v3015_v30  ;;  %2890 = vmatmul.mubr.bf16.gmra.mrb[84].mxu1 %v3016_v31 }
  0xcb   :  { %2793 = vmatprep.mubr.bf16.mxu0 %v3017_v32  ;;  %2893 = vmatprep.mubr.bf16.mxu1 %v3018_v33 }
  0xd2   :  { %2794 = vmatmul.mubr.bf16.gmra.mrb[88].mxu0 %v3019_v34  ;;  %2894 = vmatmul.mubr.bf16.gmra.mrb[88].mxu1 %v3020_v35 }
  0xd3   :  { %2797 = vmatprep.mubr.bf16.mxu0 %v3021_v36  ;;  %2897 = vmatprep.mubr.bf16.mxu1 %v3022_v37 }
  0xda   :  { %2798 = vmatmul.mubr.bf16.gmra.mrb[92].mxu0 %v3023_v38  ;;  %2898 = vmatmul.mubr.bf16.gmra.mrb[92].mxu1 %v3024_v39 }
  0xdb   :  { %2801 = vmatprep.mubr.bf16.mxu0 %v3025_v40  ;;  %2901 = vmatprep.mubr.bf16.mxu1 %v3026_v41 }
  0xe2   :  { %2802 = vmatmul.mubr.bf16.gmra.mrb[96].mxu0 %v3027_v42  ;;  %2902 = vmatmul.mubr.bf16.gmra.mrb[96].mxu1 %v3028_v43 }
  0xf5   :  { %v3373_v44 = vpop.f32.mrb[0].mxu0  ;;  %v3375_v45 = vpop.f32.mrb[0].mxu1 }
  0xf6   :  { %v3377_v46 = vpop.f32.mrb[1].mxu0  ;;  %v3379_v47 = vpop.f32.mrb[1].mxu1 }
  0xf7   :  { %v3381_v48 = vpop.f32.mrb[2].mxu0  ;;  %v3383_v49 = vpop.f32.mrb[2].mxu1 }
  0xf8   :  { %v3385_v50 = vpop.f32.mrb[3].mxu0  ;;  %v3387_v51 = vpop.f32.mrb[3].mxu1 }
  0xfd   :  { %v3389_v52 = vpop.f32.mrb[4].mxu0  ;;  %v3391_v53 = vpop.f32.mrb[4].mxu1 }
  0xfe   :  { %v3393_v54 = vpop.f32.mrb[5].mxu0  ;;  %v3395_v55 = vpop.f32.mrb[5].mxu1 }
  0xff   :  { %v3397_v56 = vpop.f32.mrb[6].mxu0  ;;  %v3399_v57 = vpop.f32.mrb[6].mxu1 }
 0x100   :  { %v3401_v58 = vpop.f32.mrb[7].mxu0  ;;  %v3403_v59 = vpop.f32.mrb[7].mxu1 }
 0x105   :  { %v3405_v60 = vpop.f32.mrb[8].mxu0  ;;  %v3407_v61 = vpop.f32.mrb[8].mxu1 }
 0x106   :  { %v3409_v62 = vpop.f32.mrb[9].mxu0  ;;  %v3411_v63 = vpop.f32.mrb[9].mxu1 }
 0x107   :  { %v3413_v0 = vpop.f32.mrb[10].mxu0  ;;  %v3415_v1 = vpop.f32.mrb[10].mxu1 }
 0x108   :  { %v3417_v2 = vpop.f32.mrb[11].mxu0  ;;  %v3419_v3 = vpop.f32.mrb[11].mxu1 }
 0x10d   :  { %v3421_v4 = vpop.f32.mrb[12].mxu0  ;;  %v3423_v5 = vpop.f32.mrb[12].mxu1 }
 0x10e   :  { %v3425_v6 = vpop.f32.mrb[13].mxu0  ;;  %v3427_v7 = vpop.f32.mrb[13].mxu1 }
 0x10f   :  { %v3429_v8 = vpop.f32.mrb[14].mxu0  ;;  %v3431_v9 = vpop.f32.mrb[14].mxu1 }
 0x110   :  { %v3433_v10 = vpop.f32.mrb[15].mxu0  ;;  %v3435_v11 = vpop.f32.mrb[15].mxu1 }
 0x115   :  { %v3437_v12 = vpop.f32.mrb[16].mxu0  ;;  %v3439_v13 = vpop.f32.mrb[16].mxu1 }
 0x116   :  { %v3441_v14 = vpop.f32.mrb[17].mxu0  ;;  %v3443_v15 = vpop.f32.mrb[17].mxu1 }
 0x117   :  { %v3445_v16 = vpop.f32.mrb[18].mxu0  ;;  %v3447_v17 = vpop.f32.mrb[18].mxu1 }
 0x118   :  { %v3449_v18 = vpop.f32.mrb[19].mxu0  ;;  %v3451_v19 = vpop.f32.mrb[19].mxu1 }
 0x11d   :  { %v3453_v20 = vpop.f32.mrb[20].mxu0  ;;  %v3455_v21 = vpop.f32.mrb[20].mxu1 }
 0x11e   :  { %v3457_v22 = vpop.f32.mrb[21].mxu0  ;;  %v3459_v23 = vpop.f32.mrb[21].mxu1 }
 0x11f   :  { %v3461_v24 = vpop.f32.mrb[22].mxu0  ;;  %v3463_v25 = vpop.f32.mrb[22].mxu1 }
 0x120   :  { %3807 = vst [vmem:[#allocation2_spill] sm:$0xff] %v3461_v24  ;;  %3808 = vst [vmem:[#allocation3_spill] sm:$0xff] %v3463_v25  ;;  %v3465_v26 = vpop.f32.mrb[23].mxu0  ;;  %v3467_v27 = vpop.f32.mrb[23].mxu1 }
 0x125   :  { %v3469_v28 = vpop.f32.mrb[24].mxu0  ;;  %v3471_v29 = vpop.f32.mrb[24].mxu1 }
 0x126   :  { %3809 = vst [vmem:[#allocation4_spill] sm:$0xff] %v3469_v28  ;;  %3810 = vst [vmem:[#allocation5_spill] sm:$0xff] %v3471_v29  ;;  %v3473_v30 = vpop.f32.mrb[25].mxu0  ;;  %v3475_v31 = vpop.f32.mrb[25].mxu1 }
 0x127   :  { %v3477_v32 = vpop.f32.mrb[26].mxu0  ;;  %v3479_v33 = vpop.f32.mrb[26].mxu1 }
 0x128   :  { %3811 = vst [vmem:[#allocation6_spill] sm:$0xff] %v3477_v32  ;;  %3812 = vst [vmem:[#allocation7_spill] sm:$0xff] %v3479_v33  ;;  %v3481_v34 = vpop.f32.mrb[27].mxu0  ;;  %v3483_v35 = vpop.f32.mrb[27].mxu1 }
 0x129   :  { %3813 = vst [vmem:[#allocation8_spill] sm:$0xff] %v3481_v34  ;;  %3814 = vst [vmem:[#allocation9_spill] sm:$0xff] %v3483_v35 }
 0x12d   :  { %v3485_v36 = vpop.f32.mrb[28].mxu0  ;;  %v3487_v37 = vpop.f32.mrb[28].mxu1 }
 0x12e   :  { %3815 = vst [vmem:[#allocation10_spill] sm:$0xff] %v3485_v36  ;;  %3816 = vst [vmem:[#allocation11_spill] sm:$0xff] %v3487_v37  ;;  %v3489_v38 = vpop.f32.mrb[29].mxu0  ;;  %v3491_v39 = vpop.f32.mrb[29].mxu1 }
 0x12f   :  { %3817 = vst [vmem:[#allocation12_spill] sm:$0xff] %v3489_v38  ;;  %3818 = vst [vmem:[#allocation13_spill] sm:$0xff] %v3491_v39  ;;  %v3493_v40 = vpop.f32.mrb[30].mxu0  ;;  %v3495_v41 = vpop.f32.mrb[30].mxu1 }
 0x130   :  { %3819 = vst [vmem:[#allocation14_spill] sm:$0xff] %v3493_v40  ;;  %3820 = vst [vmem:[#allocation15_spill] sm:$0xff] %v3495_v41  ;;  %v3497_v42 = vpop.f32.mrb[31].mxu0  ;;  %v3499_v43 = vpop.f32.mrb[31].mxu1 }
 0x131   :  { %3821 = vst [vmem:[#allocation16_spill] sm:$0xff] %v3497_v42  ;;  %3822 = vst [vmem:[#allocation17_spill] sm:$0xff] %v3499_v43 }
 0x135   :  { %v3501_v33 = vpop.f32.mrb[32].mxu0  ;;  %v3503_v32 = vpop.f32.mrb[32].mxu1 }
 0x136   :  { %3823 = vst [vmem:[#allocation18_spill] sm:$0xff] %v3501_v33  ;;  %3824 = vst [vmem:[#allocation19_spill] sm:$0xff] %v3503_v32  ;;  %v3505_v29 = vpop.f32.mrb[33].mxu0  ;;  %v3507_v36 = vpop.f32.mrb[33].mxu1 }
 0x137   :  { %3825 = vst [vmem:[#allocation20_spill] sm:$0xff] %v3505_v29  ;;  %3826 = vst [vmem:[#allocation21_spill] sm:$0xff] %v3507_v36  ;;  %v3509_v37 = vpop.f32.mrb[34].mxu0  ;;  %v3511_v28 = vpop.f32.mrb[34].mxu1 }
 0x138   :  { %3827 = vst [vmem:[#allocation22_spill] sm:$0xff] %v3509_v37  ;;  %3828 = vst [vmem:[#allocation23_spill] sm:$0xff] %v3511_v28  ;;  %v3513_v39 = vpop.f32.mrb[35].mxu0  ;;  %v3515_v40 = vpop.f32.mrb[35].mxu1 }
 0x139   :  { %3829 = vst [vmem:[#allocation24_spill] sm:$0xff] %v3513_v39  ;;  %3830 = vst [vmem:[#allocation25_spill] sm:$0xff] %v3515_v40 }
 0x13d   :  { %v3517_v41 = vpop.f32.mrb[36].mxu0  ;;  %v3519_v42 = vpop.f32.mrb[36].mxu1 }
 0x13e   :  { %3831 = vst [vmem:[#allocation26_spill] sm:$0xff] %v3517_v41  ;;  %3832 = vst [vmem:[#allocation27_spill] sm:$0xff] %v3519_v42  ;;  %v3521_v43 = vpop.f32.mrb[37].mxu0  ;;  %v3523_v33 = vpop.f32.mrb[37].mxu1 }
 0x13f   :  { %3833 = vst [vmem:[#allocation28_spill] sm:$0xff] %v3521_v43  ;;  %3834 = vst [vmem:[#allocation29_spill] sm:$0xff] %v3523_v33  ;;  %v3525_v32 = vpop.f32.mrb[38].mxu0  ;;  %v3527_v29 = vpop.f32.mrb[38].mxu1 }
 0x140   :  { %3835 = vst [vmem:[#allocation30_spill] sm:$0xff] %v3525_v32  ;;  %3836 = vst [vmem:[#allocation31_spill] sm:$0xff] %v3527_v29  ;;  %v3529_v36 = vpop.f32.mrb[39].mxu0  ;;  %v3531_v37 = vpop.f32.mrb[39].mxu1 }
 0x141   :  { %3837 = vst [vmem:[#allocation32_spill] sm:$0xff] %v3529_v36  ;;  %3838 = vst [vmem:[#allocation33_spill] sm:$0xff] %v3531_v37 }
 0x145   :  { %v3533_v28 = vpop.f32.mrb[40].mxu0  ;;  %v3535_v39 = vpop.f32.mrb[40].mxu1 }
 0x146   :  { %3839 = vst [vmem:[#allocation34_spill] sm:$0xff] %v3533_v28  ;;  %3840 = vst [vmem:[#allocation35_spill] sm:$0xff] %v3535_v39  ;;  %v3537_v40 = vpop.f32.mrb[41].mxu0  ;;  %v3539_v41 = vpop.f32.mrb[41].mxu1 }
 0x147   :  { %3841 = vst [vmem:[#allocation36_spill] sm:$0xff] %v3537_v40  ;;  %3842 = vst [vmem:[#allocation37_spill] sm:$0xff] %v3539_v41  ;;  %v3541_v42 = vpop.f32.mrb[42].mxu0  ;;  %v3543_v43 = vpop.f32.mrb[42].mxu1 }
 0x148   :  { %3843 = vst [vmem:[#allocation38_spill] sm:$0xff] %v3541_v42  ;;  %3844 = vst [vmem:[#allocation39_spill] sm:$0xff] %v3543_v43  ;;  %v3545_v33 = vpop.f32.mrb[43].mxu0  ;;  %v3547_v32 = vpop.f32.mrb[43].mxu1 }
 0x149   :  { %3845 = vst [vmem:[#allocation40_spill] sm:$0xff] %v3545_v33  ;;  %3846 = vst [vmem:[#allocation41_spill] sm:$0xff] %v3547_v32 }
 0x14d   :  { %v3549_v29 = vpop.f32.mrb[44].mxu0  ;;  %v3551_v36 = vpop.f32.mrb[44].mxu1 }
 0x14e   :  { %3847 = vst [vmem:[#allocation42_spill] sm:$0xff] %v3549_v29  ;;  %3848 = vst [vmem:[#allocation43_spill] sm:$0xff] %v3551_v36  ;;  %v3553_v37 = vpop.f32.mrb[45].mxu0  ;;  %v3555_v28 = vpop.f32.mrb[45].mxu1 }
 0x14f   :  { %3849 = vst [vmem:[#allocation44_spill] sm:$0xff] %v3553_v37  ;;  %3850 = vst [vmem:[#allocation45_spill] sm:$0xff] %v3555_v28  ;;  %v3557_v39 = vpop.f32.mrb[46].mxu0  ;;  %v3559_v40 = vpop.f32.mrb[46].mxu1 }
 0x150   :  { %3851 = vst [vmem:[#allocation46_spill] sm:$0xff] %v3557_v39  ;;  %3852 = vst [vmem:[#allocation47_spill] sm:$0xff] %v3559_v40  ;;  %v3561_v41 = vpop.f32.mrb[47].mxu0  ;;  %v3563_v42 = vpop.f32.mrb[47].mxu1  ;;  %v3574_v39 = vld [vmem:[%s3805_s2] ss:$0 sm:$0xff] }
 0x151   :  { %3853 = vst [vmem:[#allocation48_spill] sm:$0xff] %v3561_v41  ;;  %3854 = vst [vmem:[#allocation49_spill] sm:$0xff] %v3563_v42 }
 0x155   :  { %v2755_v43 = vpop.f32.mrb[48].mxu0  ;;  %v2855_v33 = vpop.f32.mrb[48].mxu1 }
 0x156   :  { %v1712_v32 = vmax.f32 %v3377_v46, %v2755_v43  ;;  %v1762_v29 = vmax.f32 %v3379_v47, %v2855_v33  ;;  %v3567_v38 = vpop.f32.mrb[49].mxu0  ;;  %v3569_v36 = vpop.f32.mrb[49].mxu1 }
 0x157   :  { %3855 = vst [vmem:[#allocation50_spill] sm:$0xff] %v3567_v38  ;;  %3856 = vst [vmem:[#allocation51_spill] sm:$0xff] %v3569_v36  ;;  %v2756_v40 = vpop.f32.mrb[50].mxu0  ;;  %v2856_v28 = vpop.f32.mrb[50].mxu1 }
 0x158   :  { %v1812_v41 = vmax.f32 %v1712_v32, %v1762_v29  ;;  %v1713_v42 = vmax.f32 %v3385_v50, %v2756_v40  ;;  %v1763_v37 = vmax.f32 %v3387_v51, %v2856_v28  ;;  %v3578_v25 = vpop.f32.mrb[51].mxu0  ;;  %v3580_v46 = vpop.f32.mrb[51].mxu1 }
 0x159   :  { %3857 = vst [vmem:[#allocation52_spill] sm:$0xff] %v3578_v25  ;;  %3858 = vst [vmem:[#allocation53_spill] sm:$0xff] %v3580_v46 }
 0x15a   :  { %v1869_v47 = vadd.f32 %v3574_v39, %v1812_v41  ;;  %v1813_v33 = vmax.f32 %v1713_v42, %v1763_v37 }
 0x15c   :  { %v1870_v43 = vadd.f32 %v3574_v39, %v1813_v33  ;;  %v1919_v24 = vmax.f32 %v1869_v47, 0.0 }
 0x15d   :  { %v2759_v36 = vpop.f32.mrb[52].mxu0  ;;  %v2859_v38 = vpop.f32.mrb[52].mxu1 }
 0x15e   :  { %v1920_v35 = vmax.f32 %v1870_v43, 0.0  ;;  %v1716_v34 = vmax.f32 %v3393_v54, %v2759_v36  ;;  %v1766_v29 = vmax.f32 %v3395_v55, %v2859_v38  ;;  %v1121_v50 = vpop.f32.mrb[53].mxu0  ;;  %v1521_v32 = vpop.f32.mrb[53].mxu1 }
 0x15f   :  { %v1714_v51 = vmax.f32 %v3373_v44, %v1121_v50  ;;  %v1764_v28 = vmax.f32 %v3375_v45, %v1521_v32  ;;  %v2760_v40 = vpop.f32.mrb[54].mxu0  ;;  %v2860_v46 = vpop.f32.mrb[54].mxu1 }
 0x160   :  { %v2435_v41 = vpack.c.bf16 %v1920_v35, %v1919_v24  ;;  %v1816_v37 = vmax.f32 %v1716_v34, %v1766_v29  ;;  %v1717_v42 = vmax.f32 %v3401_v58, %v2760_v40  ;;  %v1767_v33 = vmax.f32 %v3403_v59, %v2860_v46  ;;  %v1124_v47 = vpop.f32.mrb[55].mxu0  ;;  %v1524_v43 = vpop.f32.mrb[55].mxu1 }
 0x161   :  { %v1814_v25 = vmax.f32 %v1714_v51, %v1764_v28  ;;  %v1715_v54 = vmax.f32 %v3381_v48, %v1124_v47  ;;  %v1765_v55 = vmax.f32 %v3383_v49, %v1524_v43 }
 0x162   :  { %2436 = vst [vmem:[%s3806_s3] sm:$0xff] %v2435_v41   ;;  %v1873_v44 = vadd.f32 %v3574_v39, %v1816_v37  ;;  %v1817_v45 = vmax.f32 %v1717_v42, %v1767_v33 }
 0x163   :  { %v1871_v24 = vadd.f32 %v3574_v39, %v1814_v25  ;;  %v1815_v34 = vmax.f32 %v1715_v54, %v1765_v55 }
 0x164   :  { %v1874_v58 = vadd.f32 %v3574_v39, %v1817_v45  ;;  %v1923_v38 = vmax.f32 %v1873_v44, 0.0 }
 0x165   :  { %v1872_v59 = vadd.f32 %v3574_v39, %v1815_v34  ;;  %v2763_v35 = vpop.f32.mrb[56].mxu0  ;;  %v2863_v36 = vpop.f32.mrb[56].mxu1  ;;  %v1921_v32 = vmax.f32 %v1871_v24, 0.0 }
 0x166   :  { %v1924_v48 = vmax.f32 %v1874_v58, 0.0  ;;  %v1720_v49 = vmax.f32 %v3409_v62, %v2763_v35  ;;  %v1770_v46 = vmax.f32 %v3411_v63, %v2863_v36  ;;  %v1137_v29 = vpop.f32.mrb[57].mxu0  ;;  %v1537_v50 = vpop.f32.mrb[57].mxu1 }
 0x167   :  { %v1922_v51 = vmax.f32 %v1872_v59, 0.0  ;;  %v1718_v28 = vmax.f32 %v3389_v52, %v1137_v29  ;;  %v1768_v25 = vmax.f32 %v3391_v53, %v1537_v50  ;;  %v2764_v40 = vpop.f32.mrb[58].mxu0  ;;  %v2864_v41 = vpop.f32.mrb[58].mxu1 }
 0x168   :  { %v2445_v37 = vpack.c.bf16 %v1924_v48, %v1923_v38  ;;  %v1820_v42 = vmax.f32 %v1720_v49, %v1770_v46  ;;  %v1721_v33 = vmax.f32 %v3417_v2, %v2764_v40  ;;  %v1771_v47 = vmax.f32 %v3419_v3, %v2864_v41  ;;  %v1140_v43 = vpop.f32.mrb[59].mxu0  ;;  %v1540_v62 = vpop.f32.mrb[59].mxu1 }
 0x169   :  { %v2440_v54 = vpack.c.bf16 %v1922_v51, %v1921_v32  ;;  %v1818_v63 = vmax.f32 %v1718_v28, %v1768_v25  ;;  %v1719_v55 = vmax.f32 %v3397_v56, %v1140_v43  ;;  %v1769_v44 = vmax.f32 %v3399_v57, %v1540_v62 }
 0x16a   :  { %2558 = vst [vmem:[%s3806_s3 + $0x10] sm:$0xff] %v2445_v37   ;;  %v1877_v52 = vadd.f32 %v3574_v39, %v1820_v42  ;;  %v1821_v53 = vmax.f32 %v1721_v33, %v1771_v47 }
 0x16b   :  { %2557 = vst [vmem:[%s3806_s3 + $0x8] sm:$0xff] %v2440_v54   ;;  %v1875_v2 = vadd.f32 %v3574_v39, %v1818_v63  ;;  %v1819_v3 = vmax.f32 %v1719_v55, %v1769_v44 }
 0x16c   :  { %v1878_v45 = vadd.f32 %v3574_v39, %v1821_v53  ;;  %v1927_v34 = vmax.f32 %v1877_v52, 0.0 }
 0x16d   :  { %v1876_v56 = vadd.f32 %v3574_v39, %v1819_v3  ;;  %v2767_v24 = vpop.f32.mrb[60].mxu0  ;;  %v2867_v57 = vpop.f32.mrb[60].mxu1  ;;  %v1925_v48 = vmax.f32 %v1875_v2, 0.0 }
 0x16e   :  { %v1928_v58 = vmax.f32 %v1878_v45, 0.0  ;;  %v1724_v59 = vmax.f32 %v3425_v6, %v2767_v24  ;;  %v1774_v35 = vmax.f32 %v3427_v7, %v2867_v57  ;;  %v1153_v36 = vpop.f32.mrb[61].mxu0  ;;  %v1553_v38 = vpop.f32.mrb[61].mxu1 }
 0x16f   :  { %v1926_v49 = vmax.f32 %v1876_v56, 0.0  ;;  %v1722_v46 = vmax.f32 %v3405_v60, %v1153_v36  ;;  %v1772_v29 = vmax.f32 %v3407_v61, %v1553_v38  ;;  %v2768_v50 = vpop.f32.mrb[62].mxu0  ;;  %v2868_v32 = vpop.f32.mrb[62].mxu1 }
 0x170   :  { %v2455_v51 = vpack.c.bf16 %v1928_v58, %v1927_v34  ;;  %v1824_v28 = vmax.f32 %v1724_v59, %v1774_v35  ;;  %v1725_v25 = vmax.f32 %v3433_v10, %v2768_v50  ;;  %v1775_v40 = vmax.f32 %v3435_v11, %v2868_v32  ;;  %v1156_v41 = vpop.f32.mrb[63].mxu0  ;;  %v1556_v6 = vpop.f32.mrb[63].mxu1 }
 0x171   :  { %v2450_v37 = vpack.c.bf16 %v1926_v49, %v1925_v48  ;;  %v1822_v7 = vmax.f32 %v1722_v46, %v1772_v29  ;;  %v1723_v42 = vmax.f32 %v3413_v0, %v1156_v41  ;;  %v1773_v33 = vmax.f32 %v3415_v1, %v1556_v6 }
 0x172   :  { %2560 = vst [vmem:[%s3806_s3 + $0x20] sm:$0xff] %v2455_v51   ;;  %v1881_v60 = vadd.f32 %v3574_v39, %v1824_v28  ;;  %v1825_v61 = vmax.f32 %v1725_v25, %v1775_v40 }
 0x173   :  { %2559 = vst [vmem:[%s3806_s3 + $0x18] sm:$0xff] %v2450_v37   ;;  %v1879_v10 = vadd.f32 %v3574_v39, %v1822_v7  ;;  %v1823_v11 = vmax.f32 %v1723_v42, %v1773_v33 }
 0x174   :  { %v1882_v47 = vadd.f32 %v3574_v39, %v1825_v61  ;;  %v1931_v62 = vmax.f32 %v1881_v60, 0.0 }
 0x175   :  { %v1880_v0 = vadd.f32 %v3574_v39, %v1823_v11  ;;  %v2771_v43 = vpop.f32.mrb[64].mxu0  ;;  %v2871_v1 = vpop.f32.mrb[64].mxu1  ;;  %v1929_v53 = vmax.f32 %v1879_v10, 0.0 }
 0x176   :  { %v1932_v54 = vmax.f32 %v1882_v47, 0.0  ;;  %v1728_v63 = vmax.f32 %v3441_v14, %v2771_v43  ;;  %v1778_v55 = vmax.f32 %v3443_v15, %v2871_v1  ;;  %v1169_v44 = vpop.f32.mrb[65].mxu0  ;;  %v1569_v52 = vpop.f32.mrb[65].mxu1 }
 0x177   :  { %v1930_v2 = vmax.f32 %v1880_v0, 0.0  ;;  %v1726_v3 = vmax.f32 %v3421_v4, %v1169_v44  ;;  %v1776_v45 = vmax.f32 %v3423_v5, %v1569_v52  ;;  %v2772_v56 = vpop.f32.mrb[66].mxu0  ;;  %v2872_v24 = vpop.f32.mrb[66].mxu1 }
 0x178   :  { %v2465_v57 = vpack.c.bf16 %v1932_v54, %v1931_v62  ;;  %v1828_v34 = vmax.f32 %v1728_v63, %v1778_v55  ;;  %v1729_v58 = vmax.f32 %v3449_v18, %v2772_v56  ;;  %v1779_v59 = vmax.f32 %v3451_v19, %v2872_v24  ;;  %v1172_v35 = vpop.f32.mrb[67].mxu0  ;;  %v1572_v14 = vpop.f32.mrb[67].mxu1 }
 0x179   :  { %v2460_v36 = vpack.c.bf16 %v1930_v2, %v1929_v53  ;;  %v1826_v15 = vmax.f32 %v1726_v3, %v1776_v45  ;;  %v1727_v38 = vmax.f32 %v3429_v8, %v1172_v35  ;;  %v1777_v48 = vmax.f32 %v3431_v9, %v1572_v14  ;;  %v3860_v14 = vld [vmem:[#allocation9_spill] sm:$0xff] }
 0x17a   :  { %2562 = vst [vmem:[%s3806_s3 + $0x30] sm:$0xff] %v2465_v57   ;;  %v1885_v4 = vadd.f32 %v3574_v39, %v1828_v34  ;;  %v1829_v5 = vmax.f32 %v1729_v58, %v1779_v59  ;;  %v3859_v59 = vld [vmem:[#allocation8_spill] sm:$0xff] }
 0x17b   :  { %2561 = vst [vmem:[%s3806_s3 + $0x28] sm:$0xff] %v2460_v36   ;;  %v1883_v18 = vadd.f32 %v3574_v39, %v1826_v15  ;;  %v1827_v19 = vmax.f32 %v1727_v38, %v1777_v48  ;;  %v3861_v48 = vld [vmem:[#allocation2_spill] sm:$0xff] }
 0x17c   :  { %v1886_v49 = vadd.f32 %v3574_v39, %v1829_v5  ;;  %v1935_v29 = vmax.f32 %v1885_v4, 0.0  ;;  %v3862_v5 = vld [vmem:[#allocation3_spill] sm:$0xff] }
 0x17d   :  { %v1884_v8 = vadd.f32 %v3574_v39, %v1827_v19  ;;  %v2775_v46 = vpop.f32.mrb[68].mxu0  ;;  %v2875_v9 = vpop.f32.mrb[68].mxu1  ;;  %v1933_v40 = vmax.f32 %v1883_v18, 0.0 }
 0x17e   :  { %v1936_v50 = vmax.f32 %v1886_v49, 0.0  ;;  %v1732_v32 = vmax.f32 %v3457_v22, %v2775_v46  ;;  %v1782_v51 = vmax.f32 %v3459_v23, %v2875_v9  ;;  %v1185_v28 = vpop.f32.mrb[69].mxu0  ;;  %v1585_v25 = vpop.f32.mrb[69].mxu1 }
 0x17f   :  { %v1934_v41 = vmax.f32 %v1884_v8, 0.0  ;;  %v1730_v6 = vmax.f32 %v3437_v12, %v1185_v28  ;;  %v1780_v37 = vmax.f32 %v3439_v13, %v1585_v25  ;;  %v2776_v7 = vpop.f32.mrb[70].mxu0  ;;  %v2876_v42 = vpop.f32.mrb[70].mxu1  ;;  %v3864_v25 = vld [vmem:[#allocation13_spill] sm:$0xff] }
 0x180   :  { %v2475_v33 = vpack.c.bf16 %v1936_v50, %v1935_v29  ;;  %v1832_v60 = vmax.f32 %v1732_v32, %v1782_v51  ;;  %v1733_v61 = vmax.f32 %v3465_v26, %v2776_v7  ;;  %v1783_v10 = vmax.f32 %v3467_v27, %v2876_v42  ;;  %v1188_v11 = vpop.f32.mrb[71].mxu0  ;;  %v1588_v22 = vpop.f32.mrb[71].mxu1  ;;  %v3863_v51 = vld [vmem:[#allocation12_spill] sm:$0xff] }
 0x181   :  { %v2470_v47 = vpack.c.bf16 %v1934_v41, %v1933_v40  ;;  %v1830_v23 = vmax.f32 %v1730_v6, %v1780_v37  ;;  %v1731_v0 = vmax.f32 %v3445_v16, %v1188_v11  ;;  %v1781_v43 = vmax.f32 %v3447_v17, %v1588_v22  ;;  %v3865_v42 = vld [vmem:[#allocation4_spill] sm:$0xff] }
 0x182   :  { %2564 = vst [vmem:[%s3806_s3 + $0x40] sm:$0xff] %v2475_v33   ;;  %v1889_v12 = vadd.f32 %v3574_v39, %v1832_v60  ;;  %v1833_v13 = vmax.f32 %v1733_v61, %v1783_v10  ;;  %v3866_v60 = vld [vmem:[#allocation5_spill] sm:$0xff] }
 0x183   :  { %2563 = vst [vmem:[%s3806_s3 + $0x38] sm:$0xff] %v2470_v47   ;;  %v1887_v26 = vadd.f32 %v3574_v39, %v1830_v23  ;;  %v1831_v27 = vmax.f32 %v1731_v0, %v1781_v43  ;;  %v3867_v23 = vld [vmem:[#allocation16_spill] sm:$0xff]  ;;  %v3868_v43 = vld [vmem:[#allocation17_spill] sm:$0xff] }
 0x184   :  { %v1890_v1 = vadd.f32 %v3574_v39, %v1833_v13  ;;  %v1939_v54 = vmax.f32 %v1889_v12, 0.0 }
 0x185   :  { %v1888_v16 = vadd.f32 %v3574_v39, %v1831_v27  ;;  %v2779_v62 = vpop.f32.mrb[72].mxu0  ;;  %v2879_v17 = vpop.f32.mrb[72].mxu1  ;;  %v1937_v2 = vmax.f32 %v1887_v26, 0.0 }
 0x186   :  { %v1940_v63 = vmax.f32 %v1890_v1, 0.0  ;;  %v1736_v55 = vmax.f32 %v3473_v30, %v2779_v62  ;;  %v1786_v44 = vmax.f32 %v3475_v31, %v2879_v17  ;;  %v1201_v52 = vpop.f32.mrb[73].mxu0  ;;  %v1601_v53 = vpop.f32.mrb[73].mxu1  ;;  %v3870_v17 = vld [vmem:[#allocation7_spill] sm:$0xff] }
 0x187   :  { %v1938_v3 = vmax.f32 %v1888_v16, 0.0  ;;  %v1734_v45 = vmax.f32 %v3453_v20, %v1201_v52  ;;  %v1784_v56 = vmax.f32 %v3455_v21, %v1601_v53  ;;  %v2780_v24 = vpop.f32.mrb[74].mxu0  ;;  %v2880_v57 = vpop.f32.mrb[74].mxu1  ;;  %v3869_v16 = vld [vmem:[#allocation6_spill] sm:$0xff] }
 0x188   :  { %v2485_v34 = vpack.c.bf16 %v1940_v63, %v1939_v54  ;;  %v1836_v58 = vmax.f32 %v1736_v55, %v1786_v44  ;;  %v1737_v35 = vmax.f32 %v3859_v59, %v2780_v24  ;;  %v1787_v36 = vmax.f32 %v3860_v14, %v2880_v57  ;;  %v1204_v15 = vpop.f32.mrb[75].mxu0  ;;  %v1604_v30 = vpop.f32.mrb[75].mxu1  ;;  %v3871_v57 = vld [vmem:[#allocation20_spill] sm:$0xff] }
 0x189   :  { %v2480_v38 = vpack.c.bf16 %v1938_v3, %v1937_v2  ;;  %v1834_v31 = vmax.f32 %v1734_v45, %v1784_v56  ;;  %v1735_v4 = vmax.f32 %v3861_v48, %v1204_v15  ;;  %v1785_v18 = vmax.f32 %v3862_v5, %v1604_v30  ;;  %v3873_v30 = vld [vmem:[#allocation10_spill] sm:$0xff] }
 0x18a   :  { %2566 = vst [vmem:[%s3806_s3 + $0x50] sm:$0xff] %v2485_v34   ;;  %v1893_v20 = vadd.f32 %v3574_v39, %v1836_v58  ;;  %v1837_v21 = vmax.f32 %v1737_v35, %v1787_v36  ;;  %v3872_v58 = vld [vmem:[#allocation21_spill] sm:$0xff] }
 0x18b   :  { %2565 = vst [vmem:[%s3806_s3 + $0x48] sm:$0xff] %v2480_v38   ;;  %v1891_v19 = vadd.f32 %v3574_v39, %v1834_v31  ;;  %v1835_v49 = vmax.f32 %v1735_v4, %v1785_v18  ;;  %v3874_v31 = vld [vmem:[#allocation11_spill] sm:$0xff] }
 0x18c   :  { %v1894_v8 = vadd.f32 %v3574_v39, %v1837_v21  ;;  %v1943_v50 = vmax.f32 %v1893_v20, 0.0  ;;  %v3875_v21 = vld [vmem:[#allocation24_spill] sm:$0xff] }
 0x18d   :  { %v1892_v46 = vadd.f32 %v3574_v39, %v1835_v49  ;;  %v2783_v9 = vpop.f32.mrb[76].mxu0  ;;  %v2883_v29 = vpop.f32.mrb[76].mxu1  ;;  %v1941_v37 = vmax.f32 %v1891_v19, 0.0  ;;  %v3876_v49 = vld [vmem:[#allocation25_spill] sm:$0xff] }
 0x18e   :  { %v1944_v32 = vmax.f32 %v1894_v8, 0.0  ;;  %v1740_v28 = vmax.f32 %v3863_v51, %v2783_v9  ;;  %v1790_v40 = vmax.f32 %v3864_v25, %v2883_v29  ;;  %v1217_v41 = vpop.f32.mrb[77].mxu0  ;;  %v1617_v6 = vpop.f32.mrb[77].mxu1 }
 0x18f   :  { %v1942_v7 = vmax.f32 %v1892_v46, 0.0  ;;  %v1738_v33 = vmax.f32 %v3865_v42, %v1217_v41  ;;  %v1788_v61 = vmax.f32 %v3866_v60, %v1617_v6  ;;  %v2784_v10 = vpop.f32.mrb[78].mxu0  ;;  %v2884_v11 = vpop.f32.mrb[78].mxu1 }
 0x190   :  { %v2495_v22 = vpack.c.bf16 %v1944_v32, %v1943_v50  ;;  %v1840_v47 = vmax.f32 %v1740_v28, %v1790_v40  ;;  %v1741_v0 = vmax.f32 %v3867_v23, %v2784_v10  ;;  %v1791_v12 = vmax.f32 %v3868_v43, %v2884_v11  ;;  %v1220_v13 = vpop.f32.mrb[79].mxu0  ;;  %v1620_v26 = vpop.f32.mrb[79].mxu1  ;;  %v3877_v32 = vld [vmem:[#allocation14_spill] sm:$0xff]  ;;  %v3878_v28 = vld [vmem:[#allocation15_spill] sm:$0xff]  ;;  %v3879_v11 = vld [vmem:[#allocation28_spill] sm:$0xff] }
 0x191   :  { %v2490_v27 = vpack.c.bf16 %v1942_v7, %v1941_v37  ;;  %v1838_v1 = vmax.f32 %v1738_v33, %v1788_v61  ;;  %v1739_v62 = vmax.f32 %v3869_v16, %v1220_v13  ;;  %v1789_v54 = vmax.f32 %v3870_v17, %v1620_v26  ;;  %v3881_v26 = vld [vmem:[#allocation18_spill] sm:$0xff] }
 0x192   :  { %2568 = vst [vmem:[%s3806_s3 + $0x60] sm:$0xff] %v2495_v22   ;;  %v1897_v63 = vadd.f32 %v3574_v39, %v1840_v47  ;;  %v1841_v55 = vmax.f32 %v1741_v0, %v1791_v12  ;;  %v3880_v47 = vld [vmem:[#allocation29_spill] sm:$0xff] }
 0x193   :  { %2567 = vst [vmem:[%s3806_s3 + $0x58] sm:$0xff] %v2490_v27   ;;  %v1895_v44 = vadd.f32 %v3574_v39, %v1838_v1  ;;  %v1839_v52 = vmax.f32 %v1739_v62, %v1789_v54  ;;  %v3882_v1 = vld [vmem:[#allocation19_spill] sm:$0xff] }
 0x194   :  { %v1898_v53 = vadd.f32 %v3574_v39, %v1841_v55  ;;  %v1947_v56 = vmax.f32 %v1897_v63, 0.0  ;;  %v3883_v55 = vld [vmem:[#allocation32_spill] sm:$0xff] }
 0x195   :  { %v1896_v2 = vadd.f32 %v3574_v39, %v1839_v52  ;;  %v2787_v3 = vpop.f32.mrb[80].mxu0  ;;  %v2887_v45 = vpop.f32.mrb[80].mxu1  ;;  %v1945_v36 = vmax.f32 %v1895_v44, 0.0  ;;  %v3884_v52 = vld [vmem:[#allocation33_spill] sm:$0xff] }
 0x196   :  { %v1948_v24 = vmax.f32 %v1898_v53, 0.0  ;;  %v1744_v34 = vmax.f32 %v3871_v57, %v2787_v3  ;;  %v1794_v59 = vmax.f32 %v3872_v58, %v2887_v45  ;;  %v1233_v35 = vpop.f32.mrb[81].mxu0  ;;  %v1633_v14 = vpop.f32.mrb[81].mxu1 }
 0x197   :  { %v1946_v15 = vmax.f32 %v1896_v2, 0.0  ;;  %v1742_v38 = vmax.f32 %v3873_v30, %v1233_v35  ;;  %v1792_v48 = vmax.f32 %v3874_v31, %v1633_v14  ;;  %v2788_v4 = vpop.f32.mrb[82].mxu0  ;;  %v2888_v5 = vpop.f32.mrb[82].mxu1 }
 0x198   :  { %v2505_v18 = vpack.c.bf16 %v1948_v24, %v1947_v56  ;;  %v1844_v20 = vmax.f32 %v1744_v34, %v1794_v59  ;;  %v1745_v19 = vmax.f32 %v3875_v21, %v2788_v4  ;;  %v1795_v8 = vmax.f32 %v3876_v49, %v2888_v5  ;;  %v1236_v46 = vpop.f32.mrb[83].mxu0  ;;  %v1636_v9 = vpop.f32.mrb[83].mxu1  ;;  %v3885_v24 = vld [vmem:[#allocation22_spill] sm:$0xff]  ;;  %v3886_v34 = vld [vmem:[#allocation23_spill] sm:$0xff]  ;;  %v3887_v5 = vld [vmem:[#allocation36_spill] sm:$0xff] }
 0x199   :  { %v2500_v29 = vpack.c.bf16 %v1946_v15, %v1945_v36  ;;  %v1842_v50 = vmax.f32 %v1742_v38, %v1792_v48  ;;  %v1743_v51 = vmax.f32 %v3877_v32, %v1236_v46  ;;  %v1793_v25 = vmax.f32 %v3878_v28, %v1636_v9  ;;  %v3889_v9 = vld [vmem:[#allocation26_spill] sm:$0xff] }
 0x19a   :  { %2570 = vst [vmem:[%s3806_s3 + $0x70] sm:$0xff] %v2505_v18   ;;  %v1901_v40 = vadd.f32 %v3574_v39, %v1844_v20  ;;  %v1845_v41 = vmax.f32 %v1745_v19, %v1795_v8  ;;  %v3888_v20 = vld [vmem:[#allocation37_spill] sm:$0xff] }
 0x19b   :  { %2569 = vst [vmem:[%s3806_s3 + $0x68] sm:$0xff] %v2500_v29   ;;  %v1899_v6 = vadd.f32 %v3574_v39, %v1842_v50  ;;  %v1843_v37 = vmax.f32 %v1743_v51, %v1793_v25  ;;  %v3890_v50 = vld [vmem:[#allocation27_spill] sm:$0xff] }
 0x19c   :  { %v1902_v7 = vadd.f32 %v3574_v39, %v1845_v41  ;;  %v1951_v61 = vmax.f32 %v1901_v40, 0.0  ;;  %v3891_v41 = vld [vmem:[#allocation40_spill] sm:$0xff] }
 0x19d   :  { %v1900_v42 = vadd.f32 %v3574_v39, %v1843_v37  ;;  %v2791_v33 = vpop.f32.mrb[84].mxu0  ;;  %v2891_v60 = vpop.f32.mrb[84].mxu1  ;;  %v1949_v12 = vmax.f32 %v1899_v6, 0.0  ;;  %v3892_v37 = vld [vmem:[#allocation41_spill] sm:$0xff] }
 0x19e   :  { %v1952_v10 = vmax.f32 %v1902_v7, 0.0  ;;  %v1748_v22 = vmax.f32 %v3879_v11, %v2791_v33  ;;  %v1798_v23 = vmax.f32 %v3880_v47, %v2891_v60  ;;  %v1249_v0 = vpop.f32.mrb[85].mxu0  ;;  %v1649_v43 = vpop.f32.mrb[85].mxu1 }
 0x19f   :  { %v1950_v13 = vmax.f32 %v1900_v42, 0.0  ;;  %v1746_v27 = vmax.f32 %v3881_v26, %v1249_v0  ;;  %v1796_v16 = vmax.f32 %v3882_v1, %v1649_v43  ;;  %v2792_v62 = vpop.f32.mrb[86].mxu0  ;;  %v2892_v17 = vpop.f32.mrb[86].mxu1 }
 0x1a0   :  { %v2515_v54 = vpack.c.bf16 %v1952_v10, %v1951_v61  ;;  %v1848_v63 = vmax.f32 %v1748_v22, %v1798_v23  ;;  %v1749_v44 = vmax.f32 %v3883_v55, %v2792_v62  ;;  %v1799_v53 = vmax.f32 %v3884_v52, %v2892_v17  ;;  %v1252_v2 = vpop.f32.mrb[87].mxu0  ;;  %v1652_v3 = vpop.f32.mrb[87].mxu1  ;;  %v3893_v10 = vld [vmem:[#allocation30_spill] sm:$0xff]  ;;  %v3894_v22 = vld [vmem:[#allocation31_spill] sm:$0xff]  ;;  %v3895_v17 = vld [vmem:[#allocation44_spill] sm:$0xff] }
 0x1a1   :  { %v2510_v45 = vpack.c.bf16 %v1950_v13, %v1949_v12  ;;  %v1846_v56 = vmax.f32 %v1746_v27, %v1796_v16  ;;  %v1747_v57 = vmax.f32 %v3885_v24, %v1252_v2  ;;  %v1797_v58 = vmax.f32 %v3886_v34, %v1652_v3  ;;  %v3897_v3 = vld [vmem:[#allocation34_spill] sm:$0xff] }
 0x1a2   :  { %2572 = vst [vmem:[%s3806_s3 + $0x80] sm:$0xff] %v2515_v54   ;;  %v1905_v59 = vadd.f32 %v3574_v39, %v1848_v63  ;;  %v1849_v35 = vmax.f32 %v1749_v44, %v1799_v53  ;;  %v3896_v63 = vld [vmem:[#allocation45_spill] sm:$0xff] }
 0x1a3   :  { %2571 = vst [vmem:[%s3806_s3 + $0x78] sm:$0xff] %v2510_v45   ;;  %v1903_v14 = vadd.f32 %v3574_v39, %v1846_v56  ;;  %v1847_v36 = vmax.f32 %v1747_v57, %v1797_v58  ;;  %v3898_v56 = vld [vmem:[#allocation35_spill] sm:$0xff] }
 0x1a4   :  { %v1906_v15 = vadd.f32 %v3574_v39, %v1849_v35  ;;  %v1955_v48 = vmax.f32 %v1905_v59, 0.0  ;;  %v3899_v35 = vld [vmem:[#allocation48_spill] sm:$0xff] }
 0x1a5   :  { %v1904_v30 = vadd.f32 %v3574_v39, %v1847_v36  ;;  %v2795_v38 = vpop.f32.mrb[88].mxu0  ;;  %v2895_v31 = vpop.f32.mrb[88].mxu1  ;;  %v1953_v8 = vmax.f32 %v1903_v14, 0.0  ;;  %v3900_v36 = vld [vmem:[#allocation49_spill] sm:$0xff] }
 0x1a6   :  { %v1956_v4 = vmax.f32 %v1906_v15, 0.0  ;;  %v1752_v18 = vmax.f32 %v3887_v5, %v2795_v38  ;;  %v1802_v21 = vmax.f32 %v3888_v20, %v2895_v31  ;;  %v1265_v19 = vpop.f32.mrb[89].mxu0  ;;  %v1665_v49 = vpop.f32.mrb[89].mxu1 }
 0x1a7   :  { %v1954_v46 = vmax.f32 %v1904_v30, 0.0  ;;  %v1750_v29 = vmax.f32 %v3889_v9, %v1265_v19  ;;  %v1800_v32 = vmax.f32 %v3890_v50, %v1665_v49  ;;  %v2796_v51 = vpop.f32.mrb[90].mxu0  ;;  %v2896_v28 = vpop.f32.mrb[90].mxu1 }
 0x1a8   :  { %v2525_v25 = vpack.c.bf16 %v1956_v4, %v1955_v48  ;;  %v1852_v40 = vmax.f32 %v1752_v18, %v1802_v21  ;;  %v1753_v6 = vmax.f32 %v3891_v41, %v2796_v51  ;;  %v1803_v7 = vmax.f32 %v3892_v37, %v2896_v28  ;;  %v1268_v42 = vpop.f32.mrb[91].mxu0  ;;  %v1668_v33 = vpop.f32.mrb[91].mxu1  ;;  %v3901_v4 = vld [vmem:[#allocation38_spill] sm:$0xff]  ;;  %v3902_v18 = vld [vmem:[#allocation39_spill] sm:$0xff] }
 0x1a9   :  { %v2520_v60 = vpack.c.bf16 %v1954_v46, %v1953_v8  ;;  %v1850_v61 = vmax.f32 %v1750_v29, %v1800_v32  ;;  %v1751_v11 = vmax.f32 %v3893_v10, %v1268_v42  ;;  %v1801_v47 = vmax.f32 %v3894_v22, %v1668_v33  ;;  %v3903_v28 = vld [vmem:[#allocation50_spill] sm:$0xff] }
 0x1aa   :  { %2574 = vst [vmem:[%s3806_s3 + $0x90] sm:$0xff] %v2525_v25   ;;  %v1909_v23 = vadd.f32 %v3574_v39, %v1852_v40  ;;  %v1853_v0 = vmax.f32 %v1753_v6, %v1803_v7  ;;  %v3904_v40 = vld [vmem:[#allocation51_spill] sm:$0xff]  ;;  %v3905_v33 = vld [vmem:[#allocation42_spill] sm:$0xff] }
 0x1ab   :  { %2573 = vst [vmem:[%s3806_s3 + $0x88] sm:$0xff] %v2520_v60   ;;  %v1907_v43 = vadd.f32 %v3574_v39, %v1850_v61  ;;  %v1851_v12 = vmax.f32 %v1751_v11, %v1801_v47  ;;  %v3906_v61 = vld [vmem:[#allocation43_spill] sm:$0xff] }
 0x1ac   :  { %v1910_v13 = vadd.f32 %v3574_v39, %v1853_v0  ;;  %v1959_v16 = vmax.f32 %v1909_v23, 0.0  ;;  %v3907_v0 = vld [vmem:[#allocation52_spill] sm:$0xff] }
 0x1ad   :  { %v1908_v26 = vadd.f32 %v3574_v39, %v1851_v12  ;;  %v2799_v27 = vpop.f32.mrb[92].mxu0  ;;  %v2899_v1 = vpop.f32.mrb[92].mxu1  ;;  %v1957_v53 = vmax.f32 %v1907_v43, 0.0  ;;  %v3908_v12 = vld [vmem:[#allocation53_spill] sm:$0xff] }
 0x1ae   :  { %v1960_v62 = vmax.f32 %v1910_v13, 0.0  ;;  %v1756_v54 = vmax.f32 %v3895_v17, %v2799_v27  ;;  %v1806_v55 = vmax.f32 %v3896_v63, %v2899_v1  ;;  %v1281_v44 = vpop.f32.mrb[93].mxu0  ;;  %v1681_v52 = vpop.f32.mrb[93].mxu1 }
 0x1af   :  { %v1958_v2 = vmax.f32 %v1908_v26, 0.0  ;;  %v1754_v45 = vmax.f32 %v3897_v3, %v1281_v44  ;;  %v1804_v24 = vmax.f32 %v3898_v56, %v1681_v52  ;;  %v2800_v57 = vpop.f32.mrb[94].mxu0  ;;  %v2900_v34 = vpop.f32.mrb[94].mxu1 }
 0x1b0   :  { %v2535_v58 = vpack.c.bf16 %v1960_v62, %v1959_v16  ;;  %v1856_v59 = vmax.f32 %v1756_v54, %v1806_v55  ;;  %v1757_v14 = vmax.f32 %v3899_v35, %v2800_v57  ;;  %v1807_v15 = vmax.f32 %v3900_v36, %v2900_v34  ;;  %v1284_v30 = vpop.f32.mrb[95].mxu0  ;;  %v1684_v38 = vpop.f32.mrb[95].mxu1  ;;  %v3909_v62 = vld [vmem:[#allocation46_spill] sm:$0xff]  ;;  %v3910_v54 = vld [vmem:[#allocation47_spill] sm:$0xff] }
 0x1b1   :  { %v2530_v31 = vpack.c.bf16 %v1958_v2, %v1957_v53  ;;  %v1854_v48 = vmax.f32 %v1754_v45, %v1804_v24  ;;  %v1755_v5 = vmax.f32 %v3901_v4, %v1284_v30  ;;  %v1805_v20 = vmax.f32 %v3902_v18, %v1684_v38 }
 0x1b2   :  { %2576 = vst [vmem:[%s3806_s3 + $0xa0] sm:$0xff] %v2535_v58   ;;  %v1913_v21 = vadd.f32 %v3574_v39, %v1856_v59  ;;  %v1857_v19 = vmax.f32 %v1757_v14, %v1807_v15 }
 0x1b3   :  { %2575 = vst [vmem:[%s3806_s3 + $0x98] sm:$0xff] %v2530_v31   ;;  %v1911_v49 = vadd.f32 %v3574_v39, %v1854_v48  ;;  %v1855_v8 = vmax.f32 %v1755_v5, %v1805_v20 }
 0x1b4   :  { %v1914_v46 = vadd.f32 %v3574_v39, %v1857_v19  ;;  %v1963_v32 = vmax.f32 %v1913_v21, 0.0 }
 0x1b5   :  { %v1912_v9 = vadd.f32 %v3574_v39, %v1855_v8  ;;  %v2803_v29 = vpop.f32.mrb[96].mxu0  ;;  %v2903_v50 = vpop.f32.mrb[96].mxu1  ;;  %v1961_v7 = vmax.f32 %v1911_v49, 0.0 }
 0x1b6   :  { %v1964_v51 = vmax.f32 %v1914_v46, 0.0  ;;  %v1760_v25 = vmax.f32 %v3903_v28, %v2803_v29  ;;  %v1810_v41 = vmax.f32 %v3904_v40, %v2903_v50  ;;  %v1297_v6 = vpop.f32.mrb[97].mxu0  ;;  %v1697_v37 = vpop.f32.mrb[97].mxu1 }
 0x1b7   :  { %v1962_v42 = vmax.f32 %v1912_v9, 0.0  ;;  %v1758_v60 = vmax.f32 %v3905_v33, %v1297_v6  ;;  %v1808_v10 = vmax.f32 %v3906_v61, %v1697_v37  ;;  %v2804_v11 = vpop.f32.mrb[98].mxu0  ;;  %v2904_v22 = vpop.f32.mrb[98].mxu1 }
 0x1b8   :  { %v2545_v47 = vpack.c.bf16 %v1964_v51, %v1963_v32  ;;  %v1860_v23 = vmax.f32 %v1760_v25, %v1810_v41  ;;  %v1761_v43 = vmax.f32 %v3907_v0, %v2804_v11  ;;  %v1811_v13 = vmax.f32 %v3908_v12, %v2904_v22  ;;  %v1300_v26 = vpop.f32.mrb[99].mxu0  ;;  %v1700_v27 = vpop.f32.mrb[99].mxu1 }
 0x1b9   :  { %v2540_v1 = vpack.c.bf16 %v1962_v42, %v1961_v7  ;;  %v1858_v16 = vmax.f32 %v1758_v60, %v1808_v10  ;;  %v1759_v17 = vmax.f32 %v3909_v62, %v1300_v26  ;;  %v1809_v63 = vmax.f32 %v3910_v54, %v1700_v27 }
 0x1ba   :  { %2578 = vst [vmem:[%s3806_s3 + $0xb0] sm:$0xff] %v2545_v47   ;;  %v1917_v55 = vadd.f32 %v3574_v39, %v1860_v23  ;;  %v1861_v44 = vmax.f32 %v1761_v43, %v1811_v13 }
 0x1bb   :  { %2577 = vst [vmem:[%s3806_s3 + $0xa8] sm:$0xff] %v2540_v1   ;;  %v1915_v52 = vadd.f32 %v3574_v39, %v1858_v16  ;;  %v1859_v53 = vmax.f32 %v1759_v17, %v1809_v63 }
 0x1bc   :  { %v1918_v2 = vadd.f32 %v3574_v39, %v1861_v44  ;;  %v1967_v45 = vmax.f32 %v1917_v55, 0.0 }
 0x1bd   :  { %v1916_v3 = vadd.f32 %v3574_v39, %v1859_v53  ;;  %v1965_v24 = vmax.f32 %v1915_v52, 0.0 }
 0x1be   :  { %v1968_v56 = vmax.f32 %v1918_v2, 0.0 }
 0x1bf   :  { %v1966_v57 = vmax.f32 %v1916_v3, 0.0 }
 0x1c0   :  { %v2555_v34 = vpack.c.bf16 %v1968_v56, %v1967_v45 }
 0x1c1   :  { %v2550_v58 = vpack.c.bf16 %v1966_v57, %v1965_v24 }
 0x1c2   :  { %2580 = vst [vmem:[%s3806_s3 + $0xc0] sm:$0xff] %v2555_v34  }
 0x1c3   :  { %2579 = vst [vmem:[%s3806_s3 + $0xb8] sm:$0xff] %v2550_v58  }

// kernel: cifar_cnn_forward.4
= control target key start
LH: loop header
LB: loop body
LE: loop exit
PB: predicated region body
PF: predicated region fallthrough
CT: control target
= control target key end

     0   :  { %s3559_s1 = inlined_call_operand.vmem [shape: bf16[896,128], index: 1, kind: input, shape index: {}]   ;;  %s3560_s0 = inlined_call_operand.vmem [shape: bf16[4,64,896], index: 0, kind: input, shape index: {}]   ;;  %s3561_s2 = inlined_call_operand.vmem [shape: f32[1,128], index: 2, kind: input, shape index: {}]   ;;  %s3562_s3 = inlined_call_operand.vmem [shape: bf16[64,128], index: 3, kind: output, shape index: {}]  }
   0x1   :  { %v2534_v0 = vld [vmem:[%s3559_s1 + $0x40] sm:$0xff]   ;;  %v2536_v2 = vld [vmem:[%s3559_s1 + $0x48] sm:$0xff]   ;;  %v2538_v4 = vld [vmem:[%s3559_s1 + $0x50] sm:$0xff]  }
   0x2   :  { %v2535_v1 = vld [vmem:[%s3559_s1] sm:$0xff]   ;;  %2110 = vmatprep.subr.bf16.mxu0 %v2534_v0  ;;  %2518 = vmatprep.subr.bf16.mxu1 %v2534_v0  ;;  %v2537_v3 = vld [vmem:[%s3559_s1 + $0x8] sm:$0xff]   ;;  %v2539_v5 = vld [vmem:[%s3559_s1 + $0x10] sm:$0xff]  }
   0x3   :  { %2111 = vmatpush3.bf16.msra.mxu0 %v2535_v1  ;;  %2526 = vmatpush3.bf16.msra.mxu1 %v2535_v1  ;;  %v2540_v6 = vld [vmem:[%s3559_s1 + $0x58] sm:$0xff]   ;;  %v2542_v8 = vld [vmem:[%s3559_s1 + $0x60] sm:$0xff]   ;;  %v2544_v10 = vld [vmem:[%s3559_s1 + $0x68] sm:$0xff]  }
   0x4   :  { %2112 = vmatprep.subr.bf16.mxu0 %v2536_v2  ;;  %2519 = vmatprep.subr.bf16.mxu1 %v2536_v2  ;;  %v2541_v7 = vld [vmem:[%s3559_s1 + $0x18] sm:$0xff]   ;;  %v2543_v9 = vld [vmem:[%s3559_s1 + $0x20] sm:$0xff]   ;;  %v2545_v13 = vld [vmem:[%s3559_s1 + $0x28] sm:$0xff]  }
   0x5   :  { %v2552_v11 = vld [vmem:[%s3560_s0 + $0x4] ss:$28 sps:$4 sm:$0xff]   ;;  %v2546_v14 = vld [vmem:[%s3559_s1 + $0x70] sm:$0xff]   ;;  %v2548_v16 = vld [vmem:[%s3559_s1 + $0x78] sm:$0xff]  }
   0x6   :  { %v2555_v12 = vld [vmem:[%s3560_s0 + $0x2a4] ss:$28 sps:$4 sm:$0xff]   ;;  %1199 = vmatprep.mubr.bf16.mxu0 %v2552_v11  ;;  %v2547_v15 = vld [vmem:[%s3559_s1 + $0x30] sm:$0xff]   ;;  %v2549_v17 = vld [vmem:[%s3559_s1 + $0x38] sm:$0xff]  }
   0x7   :  { %2113 = vmatpush3.bf16.msra.mxu0 %v2537_v3  ;;  %2527 = vmatpush3.bf16.msra.mxu1 %v2537_v3  ;;  %v2556_v18 = vld [vmem:[%s3559_s1 + $0xc0] sm:$0xff]   ;;  %v2560_v24 = vld [vmem:[%s3559_s1 + $0xc8] sm:$0xff]   ;;  %v2562_v25 = vld [vmem:[%s3560_s0 + $0x3c] ss:$28 sps:$4 sm:$0xff]  }
   0x8   :  { %2114 = vmatprep.subr.bf16.mxu0 %v2538_v4  ;;  %2520 = vmatprep.subr.bf16.mxu1 %v2538_v4  ;;  %v2550_v19 = vld [vmem:[%s3560_s0] ss:$28 sps:$4 sm:$0xff]   ;;  %v2571_v27 = vld [vmem:[%s3559_s1 + $0x148] sm:$0xff]   ;;  %v2566_v30 = vld [vmem:[%s3560_s0 + $0x38] ss:$28 sps:$4 sm:$0xff]  }
   0x9   :  { %1295 = vmatprep.mubr.bf16.mxu1 %v2555_v12  ;;  %v2553_v20 = vld [vmem:[%s3560_s0 + $0x2a0] ss:$28 sps:$4 sm:$0xff]   ;;  %v2561_v28 = vld [vmem:[%s3559_s1 + $0x88] sm:$0xff]   ;;  %v2567_v31 = vld [vmem:[%s3560_s0 + $0x2d8] ss:$28 sps:$4 sm:$0xff]  }
   0xa   :  { %v2557_v21 = vld [vmem:[%s3559_s1 + $0x140] sm:$0xff]   ;;  %v2564_v26 = vld [vmem:[%s3560_s0 + $0x2dc] ss:$28 sps:$4 sm:$0xff]   ;;  %v2573_v29 = vld [vmem:[%s3559_s1 + $0x108] sm:$0xff]  }
   0xb   :  { %2115 = vmatpush3.bf16.msra.mxu0 %v2539_v5  ;;  %2528 = vmatpush3.bf16.msra.mxu1 %v2539_v5  ;;  %v2558_v22 = vld [vmem:[%s3559_s1 + $0x80] sm:$0xff]   ;;  %v2568_v32 = vld [vmem:[%s3559_s1 + $0xd0] sm:$0xff]   ;;  %v2570_v34 = vld [vmem:[%s3559_s1 + $0xd8] sm:$0xff]  }
   0xc   :  { %2116 = vmatprep.subr.bf16.mxu0 %v2540_v6  ;;  %2521 = vmatprep.subr.bf16.mxu1 %v2540_v6  ;;  %v2559_v23 = vld [vmem:[%s3559_s1 + $0x100] sm:$0xff]   ;;  %v2569_v33 = vld [vmem:[%s3559_s1 + $0x90] sm:$0xff]   ;;  %v2572_v37 = vld [vmem:[%s3559_s1 + $0x98] sm:$0xff]  }
   0xd   :  { %v2574_v35 = vld [vmem:[%s3560_s0 + $0x74] ss:$28 sps:$4 sm:$0xff]   ;;  %v2580_v38 = vld [vmem:[%s3559_s1 + $0xe0] sm:$0xff]   ;;  %v2582_v43 = vld [vmem:[%s3559_s1 + $0xe8] sm:$0xff]  }
   0xe   :  { %v2576_v36 = vld [vmem:[%s3560_s0 + $0x314] ss:$28 sps:$4 sm:$0xff]   ;;  %v2581_v42 = vld [vmem:[%s3559_s1 + $0xa0] sm:$0xff]   ;;  %v2584_v45 = vld [vmem:[%s3560_s0 + $0xac] ss:$28 sps:$4 sm:$0xff]  }
   0xf   :  { %2117 = vmatpush3.bf16.msra.mxu0 %v2541_v7  ;;  %2529 = vmatpush3.bf16.msra.mxu1 %v2541_v7  ;;  %v2578_v39 = vld [vmem:[%s3560_s0 + $0x70] ss:$28 sps:$4 sm:$0xff]   ;;  %v2588_v49 = vld [vmem:[%s3560_s0 + $0xa8] ss:$28 sps:$4 sm:$0xff]   ;;  %v2602_v51 = vld [vmem:[%s3559_s1 + $0x158] sm:$0xff]  }
  0x10   :  { %2118 = vmatprep.subr.bf16.mxu0 %v2542_v8  ;;  %2522 = vmatprep.subr.bf16.mxu1 %v2542_v8  ;;  %v2579_v40 = vld [vmem:[%s3560_s0 + $0x310] ss:$28 sps:$4 sm:$0xff]   ;;  %v2589_v50 = vld [vmem:[%s3560_s0 + $0x348] ss:$28 sps:$4 sm:$0xff]   ;;  %v2604_v53 = vld [vmem:[%s3559_s1 + $0x118] sm:$0xff]  }
  0x11   :  { %v2591_v41 = vld [vmem:[%s3559_s1 + $0x150] sm:$0xff]   ;;  %v2586_v46 = vld [vmem:[%s3560_s0 + $0x34c] ss:$28 sps:$4 sm:$0xff]   ;;  %v2596_v54 = vld [vmem:[%s3560_s0 + $0xe4] ss:$28 sps:$4 sm:$0xff]  }
  0x12   :  { %v2593_v44 = vld [vmem:[%s3559_s1 + $0x110] sm:$0xff]   ;;  %v2583_v47 = vld [vmem:[%s3559_s1 + $0xa8] sm:$0xff]   ;;  %v2594_v55 = vld [vmem:[%s3559_s1 + $0xf8] sm:$0xff]  }
  0x13   :  { %2119 = vmatpush3.bf16.msra.mxu0 %v2543_v9  ;;  %2530 = vmatpush3.bf16.msra.mxu1 %v2543_v9  ;;  %v2590_v48 = vld [vmem:[%s3559_s1 + $0xf0] sm:$0xff]   ;;  %v2600_v56 = vld [vmem:[%s3560_s0 + $0xc] ss:$28 sps:$4 sm:$0xff]   ;;  %v2595_v57 = vld [vmem:[%s3559_s1 + $0xb8] sm:$0xff]  }
  0x14   :  { %2120 = vmatprep.subr.bf16.mxu0 %v2544_v10  ;;  %2523 = vmatprep.subr.bf16.mxu1 %v2544_v10  ;;  %v2592_v52 = vld [vmem:[%s3559_s1 + $0xb0] sm:$0xff]   ;;  %v2603_v58 = vld [vmem:[%s3559_s1 + $0x180] sm:$0xff]   ;;  %v2605_v63 = vld [vmem:[%s3560_s0 + $0x11c] ss:$28 sps:$4 sm:$0xff]  }
  0x15   :  { %v2598_v59 = vld [vmem:[%s3560_s0 + $0x8] ss:$28 sps:$4 sm:$0xff]   ;;  %v2601_v62 = vld [vmem:[%s3560_s0 + $0xe0] ss:$28 sps:$4 sm:$0xff]   ;;  %v2609_v4 = vld [vmem:[%s3560_s0 + $0x118] ss:$28 sps:$4 sm:$0xff]  }
  0x16   :  { %v2617_v60 = vld [vmem:[%s3559_s1 + $0x160] sm:$0xff]   ;;  %v2619_v1 = vld [vmem:[%s3559_s1 + $0x188] sm:$0xff]   ;;  %v2611_v6 = vld [vmem:[%s3560_s0 + $0x154] ss:$28 sps:$4 sm:$0xff]  }
  0x17   :  { %2121 = vmatpush3.bf16.msra.mxu0 %v2545_v13  ;;  %2531 = vmatpush3.bf16.msra.mxu1 %v2545_v13  ;;  %v2618_v61 = vld [vmem:[%s3559_s1 + $0x120] sm:$0xff]   ;;  %v2626_v2 = vld [vmem:[%s3559_s1 + $0x168] sm:$0xff]   ;;  %v2634_v7 = vld [vmem:[%s3559_s1 + $0x190] sm:$0xff]  }
  0x18   :  { %2122 = vmatprep.subr.bf16.mxu0 %v2546_v14  ;;  %2524 = vmatprep.subr.bf16.mxu1 %v2546_v14  ;;  %v2607_v0 = vld [vmem:[%s3560_s0 + $0x44] ss:$28 sps:$4 sm:$0xff]   ;;  %v2627_v3 = vld [vmem:[%s3559_s1 + $0x128] sm:$0xff]   ;;  %v2613_v8 = vld [vmem:[%s3560_s0 + $0x7c] ss:$28 sps:$4 sm:$0xff]  }
  0x19   :  { %v2610_v5 = vld [vmem:[%s3560_s0 + $0x40] ss:$28 sps:$4 sm:$0xff]   ;;  %v2641_v9 = vld [vmem:[%s3559_s1 + $0x170] sm:$0xff]   ;;  %v2620_v13 = vld [vmem:[%s3560_s0 + $0x18c] ss:$28 sps:$4 sm:$0xff]  }
  0x1a   :  { %v2642_v10 = vld [vmem:[%s3559_s1 + $0x130] sm:$0xff]  }
  0x1b   :  { %2123 = vmatpush3.bf16.msra.mxu0 %v2547_v15  ;;  %2532 = vmatpush3.bf16.msra.mxu1 %v2547_v15  ;;  %v2615_v11 = vld [vmem:[%s3560_s0 + $0x150] ss:$28 sps:$4 sm:$0xff]   ;;  %v2616_v12 = vld [vmem:[%s3560_s0 + $0x78] ss:$28 sps:$4 sm:$0xff]  }
  0x1c   :  { %2124 = vmatprep.subr.bf16.mxu0 %v2548_v16  ;;  %2525 = vmatprep.subr.bf16.mxu1 %v2548_v16  ;;  %v2622_v14 = vld [vmem:[%s3560_s0 + $0xb4] ss:$28 sps:$4 sm:$0xff]   ;;  %v2649_v15 = vld [vmem:[%s3559_s1 + $0x178] sm:$0xff]  }
  0x1d   :  { %v2650_v16 = vld [vmem:[%s3559_s1 + $0x198] sm:$0xff]  }
  0x1f   :  { %2125 = vmatpush3.bf16.msra.mxu0 %v2549_v17  ;;  %2533 = vmatpush3.bf16.msra.mxu1 %v2549_v17  ;;  %v2651_v17 = vld [vmem:[%s3559_s1 + $0x138] sm:$0xff]  }
  0x20   :  { %2222 = vmatprep.subr.bf16.mxu1 %v2556_v18  ;;  %2334 = vmatprep.subr.bf16.mxu0 %v2557_v21  ;;  %v2624_v18 = vld [vmem:[%s3560_s0 + $0x188] ss:$28 sps:$4 sm:$0xff]  }
  0x21   :  { %v2630_v21 = vld [vmem:[%s3560_s0 + $0xec] ss:$28 sps:$4 sm:$0xff]  }
  0x22   :  { %1200 = vmatmul.mubr.bf16.vlgmr.msra.gmra.mrb[0].mxu0 %v2550_v19  ;;  %1296 = vmatmul.mubr.bf16.vlgmr.msra.gmra.mrb[0].mxu1 %v2553_v20  ;;  %v2625_v19 = vld [vmem:[%s3560_s0 + $0xb0] ss:$28 sps:$4 sm:$0xff]   ;;  %v2628_v20 = vld [vmem:[%s3560_s0 + $0x1c4] ss:$28 sps:$4 sm:$0xff]  }
  0x23   :  { %2223 = vmatpush3.bf16.msra.mxu1 %v2558_v22  ;;  %2335 = vmatpush3.bf16.msra.mxu0 %v2559_v23  ;;  %v2664_v22 = vld [vmem:[%s3559_s1 + $0x1a0] sm:$0xff]  }
  0x24   :  { %2224 = vmatprep.subr.bf16.mxu1 %v2560_v24  ;;  %1207 = vmatprep.mubr.bf16.mxu0 %v2562_v25  ;;  %v2632_v23 = vld [vmem:[%s3560_s0 + $0x1c0] ss:$28 sps:$4 sm:$0xff]   ;;  %v2633_v24 = vld [vmem:[%s3560_s0 + $0xe8] ss:$28 sps:$4 sm:$0xff]  }
  0x25   :  { %1303 = vmatprep.mubr.bf16.mxu1 %v2564_v26  ;;  %2336 = vmatprep.subr.bf16.mxu0 %v2571_v27  ;;  %v2677_v25 = vld [vmem:[%s3559_s1 + $0x1a8] sm:$0xff]   ;;  %v2635_v26 = vld [vmem:[%s3560_s0 + $0x1fc] ss:$28 sps:$4 sm:$0xff]   ;;  %v2637_v27 = vld [vmem:[%s3560_s0 + $0x124] ss:$28 sps:$4 sm:$0xff]  }
  0x27   :  { %2225 = vmatpush3.bf16.msra.mxu1 %v2561_v28  ;;  %2337 = vmatpush3.bf16.msra.mxu0 %v2573_v29  ;;  %v2690_v28 = vld [vmem:[%s3559_s1 + $0x1b0] sm:$0xff]  }
  0x28   :  { %2226 = vmatprep.subr.bf16.mxu1 %v2568_v32  ;;  %2338 = vmatprep.subr.bf16.mxu0 %v2591_v41  ;;  %v2639_v29 = vld [vmem:[%s3560_s0 + $0x1f8] ss:$28 sps:$4 sm:$0xff]  }
  0x29   :  { %v2645_v32 = vld [vmem:[%s3560_s0 + $0x15c] ss:$28 sps:$4 sm:$0xff]   ;;  %v2662_v41 = vld [vmem:[%s3560_s0 + $0x14] ss:$28 sps:$4 sm:$0xff]  }
  0x2a   :  { %1208 = vmatmul.mubr.bf16.gmra.mrb[4].mxu0 %v2566_v30  ;;  %1304 = vmatmul.mubr.bf16.gmra.mrb[4].mxu1 %v2567_v31  ;;  %v2640_v30 = vld [vmem:[%s3560_s0 + $0x120] ss:$28 sps:$4 sm:$0xff]   ;;  %v2643_v31 = vld [vmem:[%s3560_s0 + $0x234] ss:$28 sps:$4 sm:$0xff]  }
  0x2b   :  { %2227 = vmatpush3.bf16.msra.mxu1 %v2569_v33  ;;  %1215 = vmatprep.mubr.bf16.mxu0 %v2574_v35  ;;  %v2703_v33 = vld [vmem:[%s3559_s1 + $0x1b8] sm:$0xff]  }
  0x2c   :  { %2228 = vmatprep.subr.bf16.mxu1 %v2570_v34  ;;  %1311 = vmatprep.mubr.bf16.mxu1 %v2576_v36  ;;  %v2647_v34 = vld [vmem:[%s3560_s0 + $0x230] ss:$28 sps:$4 sm:$0xff]   ;;  %v2648_v35 = vld [vmem:[%s3560_s0 + $0x158] ss:$28 sps:$4 sm:$0xff]  }
  0x2d   :  { %2339 = vmatpush3.bf16.msra.mxu0 %v2593_v44  ;;  %v2652_v36 = vld [vmem:[%s3560_s0 + $0x26c] ss:$28 sps:$4 sm:$0xff]   ;;  %v2665_v44 = vld [vmem:[%s3560_s0 + $0x204] ss:$28 sps:$4 sm:$0xff]  }
  0x2e   :  { %2340 = vmatprep.subr.bf16.mxu0 %v2602_v51  ;;  %v2676_v51 = vld [vmem:[%s3560_s0 + $0x80] ss:$28 sps:$4 sm:$0xff]  }
  0x2f   :  { %2229 = vmatpush3.bf16.msra.mxu1 %v2572_v37  ;;  %v2654_v37 = vld [vmem:[%s3560_s0 + $0x194] ss:$28 sps:$4 sm:$0xff]  }
  0x30   :  { %2230 = vmatprep.subr.bf16.mxu1 %v2580_v38  ;;  %v2656_v38 = vld [vmem:[%s3560_s0 + $0x268] ss:$28 sps:$4 sm:$0xff]  }
  0x31   :  { %2341 = vmatpush3.bf16.msra.mxu0 %v2604_v53  ;;  %v2680_v53 = vld [vmem:[%s3560_s0 + $0xbc] ss:$28 sps:$4 sm:$0xff]  }
  0x32   :  { %1216 = vmatmul.mubr.bf16.gmra.mrb[8].mxu0 %v2578_v39  ;;  %1312 = vmatmul.mubr.bf16.gmra.mrb[8].mxu1 %v2579_v40  ;;  %v2657_v39 = vld [vmem:[%s3560_s0 + $0x190] ss:$28 sps:$4 sm:$0xff]  }
  0x33   :  { %2231 = vmatpush3.bf16.msra.mxu1 %v2581_v42  ;;  %1223 = vmatprep.mubr.bf16.mxu0 %v2584_v45  ;;  %v2658_v40 = vld [vmem:[%s3560_s0 + $0x1cc] ss:$28 sps:$4 sm:$0xff]  }
  0x34   :  { %2232 = vmatprep.subr.bf16.mxu1 %v2582_v43  ;;  %1319 = vmatprep.mubr.bf16.mxu1 %v2586_v46  ;;  %v2660_v42 = vld [vmem:[%s3560_s0 + $0x10] ss:$28 sps:$4 sm:$0xff]   ;;  %v2663_v43 = vld [vmem:[%s3560_s0 + $0x1c8] ss:$28 sps:$4 sm:$0xff]   ;;  %v2669_v46 = vld [vmem:[%s3560_s0 + $0x200] ss:$28 sps:$4 sm:$0xff]  }
  0x35   :  { %2342 = vmatprep.subr.bf16.mxu0 %v2617_v60  ;;  %v2667_v45 = vld [vmem:[%s3560_s0 + $0x4c] ss:$28 sps:$4 sm:$0xff]   ;;  %v2691_v60 = vld [vmem:[%s3560_s0 + $0x2e4] ss:$28 sps:$4 sm:$0xff]  }
  0x36   :  { %2343 = vmatpush3.bf16.msra.mxu0 %v2618_v61  ;;  %v2693_v61 = vld [vmem:[%s3560_s0 + $0x12c] ss:$28 sps:$4 sm:$0xff]  }
  0x37   :  { %2233 = vmatpush3.bf16.msra.mxu1 %v2583_v47  ;;  %2344 = vmatprep.subr.bf16.mxu0 %v2626_v2  ;;  %v2670_v47 = vld [vmem:[%s3560_s0 + $0x48] ss:$28 sps:$4 sm:$0xff]   ;;  %v2701_v2 = vld [vmem:[%s3560_s0 + $0x318] ss:$28 sps:$4 sm:$0xff]  }
  0x38   :  { %2234 = vmatprep.subr.bf16.mxu1 %v2590_v48  ;;  %v2671_v48 = vld [vmem:[%s3560_s0 + $0x23c] ss:$28 sps:$4 sm:$0xff]  }
  0x3a   :  { %1224 = vmatmul.mubr.bf16.gmra.mrb[12].mxu0 %v2588_v49  ;;  %1320 = vmatmul.mubr.bf16.gmra.mrb[12].mxu1 %v2589_v50  ;;  %v2673_v49 = vld [vmem:[%s3560_s0 + $0x84] ss:$28 sps:$4 sm:$0xff]   ;;  %v2675_v50 = vld [vmem:[%s3560_s0 + $0x238] ss:$28 sps:$4 sm:$0xff]  }
  0x3b   :  { %2235 = vmatpush3.bf16.msra.mxu1 %v2592_v52  ;;  %1231 = vmatprep.mubr.bf16.mxu0 %v2596_v54  ;;  %v2678_v52 = vld [vmem:[%s3560_s0 + $0x274] ss:$28 sps:$4 sm:$0xff]  }
  0x3c   :  { %2236 = vmatprep.subr.bf16.mxu1 %v2594_v55  ;;  %1360 = vmatprep.mubr.bf16.mxu1 %v2600_v56  ;;  %v2682_v54 = vld [vmem:[%s3560_s0 + $0x270] ss:$28 sps:$4 sm:$0xff]   ;;  %v2683_v55 = vld [vmem:[%s3560_s0 + $0xb8] ss:$28 sps:$4 sm:$0xff]  }
  0x3d   :  { %2345 = vmatpush3.bf16.msra.mxu0 %v2627_v3  ;;  %v2684_v56 = vld [vmem:[%s3560_s0 + $0x2ac] ss:$28 sps:$4 sm:$0xff]   ;;  %v2702_v3 = vld [vmem:[%s3560_s0 + $0x160] ss:$28 sps:$4 sm:$0xff]  }
  0x3e   :  { %2346 = vmatprep.subr.bf16.mxu0 %v2641_v9  ;;  %v2712_v9 = vld [vmem:[%s3560_s0 + $0x18] ss:$28 sps:$4 sm:$0xff]  }
  0x3f   :  { %2237 = vmatpush3.bf16.msra.mxu1 %v2595_v57  ;;  %v2686_v57 = vld [vmem:[%s3560_s0 + $0xf4] ss:$28 sps:$4 sm:$0xff]  }
  0x40   :  { %2470 = vmatprep.subr.bf16.mxu1 %v2603_v58 }
  0x41   :  { %2347 = vmatpush3.bf16.msra.mxu0 %v2642_v10  ;;  %v2713_v10 = vld [vmem:[%s3560_s0 + $0x1d0] ss:$28 sps:$4 sm:$0xff]  }
  0x42   :  { %1232 = vmatmul.mubr.bf16.gmra.mrb[16].mxu0 %v2601_v62  ;;  %1361 = vmatmul.mubr.bf16.vlgmr.msra.gmra.mrb[16].mxu1 %v2598_v59  ;;  %v2689_v59 = vld [vmem:[%s3560_s0 + $0xf0] ss:$28 sps:$4 sm:$0xff]   ;;  %v2695_v62 = vld [vmem:[%s3560_s0 + $0x2e0] ss:$28 sps:$4 sm:$0xff]  }
  0x43   :  { %2471 = vmatpush3.bf16.msra.mxu1 %v2603_v58  ;;  %1239 = vmatprep.mubr.bf16.mxu0 %v2605_v63  ;;  %v2688_v58 = vld [vmem:[%s3560_s0 + $0x2a8] ss:$28 sps:$4 sm:$0xff]  }
  0x44   :  { %1368 = vmatprep.mubr.bf16.mxu1 %v2607_v0  ;;  %2472 = vmatprep.subr.bf16.mxu1 %v2619_v1  ;;  %v2696_v63 = vld [vmem:[%s3560_s0 + $0x128] ss:$28 sps:$4 sm:$0xff]   ;;  %v2697_v0 = vld [vmem:[%s3560_s0 + $0x31c] ss:$28 sps:$4 sm:$0xff]  }
  0x45   :  { %2348 = vmatprep.subr.bf16.mxu0 %v2649_v15  ;;  %v2719_v15 = vld [vmem:[%s3560_s0 + $0xc0] ss:$28 sps:$4 sm:$0xff]  }
  0x46   :  { %2349 = vmatpush3.bf16.msra.mxu0 %v2651_v17  ;;  %v2722_v17 = vld [vmem:[%s3560_s0 + $0xf8] ss:$28 sps:$4 sm:$0xff]  }
  0x47   :  { %2473 = vmatpush3.bf16.msra.mxu1 %v2619_v1  ;;  %v2699_v1 = vld [vmem:[%s3560_s0 + $0x164] ss:$28 sps:$4 sm:$0xff]  }
  0x48   :  { %2474 = vmatprep.subr.bf16.mxu1 %v2634_v7 }
  0x4a   :  { %1240 = vmatmul.mubr.bf16.gmra.mrb[20].mxu0 %v2609_v4  ;;  %1369 = vmatmul.mubr.bf16.gmra.mrb[20].mxu1 %v2610_v5  ;;  %v2704_v4 = vld [vmem:[%s3560_s0 + $0x354] ss:$28 sps:$4 sm:$0xff]   ;;  %v2706_v5 = vld [vmem:[%s3560_s0 + $0x19c] ss:$28 sps:$4 sm:$0xff]  }
  0x4b   :  { %1247 = vmatprep.mubr.bf16.mxu0 %v2611_v6  ;;  %1376 = vmatprep.mubr.bf16.mxu1 %v2613_v8  ;;  %v2708_v6 = vld [vmem:[%s3560_s0 + $0x350] ss:$28 sps:$4 sm:$0xff]  }
  0x4c   :  { %2475 = vmatpush3.bf16.msra.mxu1 %v2634_v7  ;;  %v2709_v7 = vld [vmem:[%s3560_s0 + $0x198] ss:$28 sps:$4 sm:$0xff]  }
  0x4d   :  { %2476 = vmatprep.subr.bf16.mxu1 %v2650_v16  ;;  %v2710_v8 = vld [vmem:[%s3560_s0 + $0x1d4] ss:$28 sps:$4 sm:$0xff]  }
  0x50   :  { %2477 = vmatpush3.bf16.msra.mxu1 %v2650_v16  ;;  %v2720_v16 = vld [vmem:[%s3560_s0 + $0x244] ss:$28 sps:$4 sm:$0xff]  }
  0x51   :  { %2478 = vmatprep.subr.bf16.mxu1 %v2664_v22 }
  0x52   :  { %1248 = vmatmul.mubr.bf16.gmra.mrb[24].mxu0 %v2615_v11  ;;  %1377 = vmatmul.mubr.bf16.gmra.mrb[24].mxu1 %v2616_v12  ;;  %v2714_v11 = vld [vmem:[%s3560_s0 + $0x50] ss:$28 sps:$4 sm:$0xff]  }
  0x53   :  { %1255 = vmatprep.mubr.bf16.mxu0 %v2620_v13  ;;  %1384 = vmatprep.mubr.bf16.mxu1 %v2622_v14  ;;  %v2715_v12 = vld [vmem:[%s3560_s0 + $0x20c] ss:$28 sps:$4 sm:$0xff]  }
  0x54   :  { %2479 = vmatpush3.bf16.msra.mxu1 %v2664_v22  ;;  %v2717_v13 = vld [vmem:[%s3560_s0 + $0x88] ss:$28 sps:$4 sm:$0xff]   ;;  %v2728_v22 = vld [vmem:[%s3560_s0 + $0x278] ss:$28 sps:$4 sm:$0xff]  }
  0x55   :  { %2480 = vmatprep.subr.bf16.mxu1 %v2677_v25  ;;  %v2718_v14 = vld [vmem:[%s3560_s0 + $0x208] ss:$28 sps:$4 sm:$0xff]  }
  0x58   :  { %2481 = vmatpush3.bf16.msra.mxu1 %v2677_v25  ;;  %v2732_v25 = vld [vmem:[%s3560_s0 + $0x1d8] ss:$28 sps:$4 sm:$0xff]  }
  0x59   :  { %2482 = vmatprep.subr.bf16.mxu1 %v2690_v28 }
  0x5a   :  { %1256 = vmatmul.mubr.bf16.gmra.mrb[28].mxu0 %v2624_v18  ;;  %1385 = vmatmul.mubr.bf16.gmra.mrb[28].mxu1 %v2625_v19  ;;  %v2723_v18 = vld [vmem:[%s3560_s0 + $0x240] ss:$28 sps:$4 sm:$0xff]   ;;  %v2724_v19 = vld [vmem:[%s3560_s0 + $0x130] ss:$28 sps:$4 sm:$0xff]  }
  0x5b   :  { %1263 = vmatprep.mubr.bf16.mxu0 %v2628_v20  ;;  %1392 = vmatprep.mubr.bf16.mxu1 %v2630_v21  ;;  %v2725_v20 = vld [vmem:[%s3560_s0 + $0x27c] ss:$28 sps:$4 sm:$0xff]   ;;  %v2727_v21 = vld [vmem:[%s3560_s0 + $0x168] ss:$28 sps:$4 sm:$0xff]  }
  0x5c   :  { %2483 = vmatpush3.bf16.msra.mxu1 %v2690_v28  ;;  %v2735_v28 = vld [vmem:[%s3560_s0 + $0x2ec] ss:$28 sps:$4 sm:$0xff]  }
  0x5d   :  { %2484 = vmatprep.subr.bf16.mxu1 %v2703_v33 }
  0x60   :  { %2485 = vmatpush3.bf16.msra.mxu1 %v2703_v33  ;;  %v2742_v33 = vld [vmem:[%s3560_s0 + $0x2b8] ss:$28 sps:$4 sm:$0xff]  }
  0x62   :  { %1264 = vmatmul.mubr.bf16.gmra.mrb[32].mxu0 %v2632_v23  ;;  %1393 = vmatmul.mubr.bf16.gmra.mrb[32].mxu1 %v2633_v24  ;;  %v2729_v23 = vld [vmem:[%s3560_s0 + $0x1a0] ss:$28 sps:$4 sm:$0xff]   ;;  %v2730_v24 = vld [vmem:[%s3560_s0 + $0x2b4] ss:$28 sps:$4 sm:$0xff]  }
  0x63   :  { %1271 = vmatprep.mubr.bf16.mxu0 %v2635_v26  ;;  %1400 = vmatprep.mubr.bf16.mxu1 %v2637_v27  ;;  %v2733_v26 = vld [vmem:[%s3560_s0 + $0x2b0] ss:$28 sps:$4 sm:$0xff]  }
  0x64   :  { %v2734_v27 = vld [vmem:[%s3560_s0 + $0x210] ss:$28 sps:$4 sm:$0xff]  }
  0x6a   :  { %1272 = vmatmul.mubr.bf16.gmra.mrb[36].mxu0 %v2639_v29  ;;  %1401 = vmatmul.mubr.bf16.gmra.mrb[36].mxu1 %v2640_v30  ;;  %v2737_v29 = vld [vmem:[%s3560_s0 + $0x248] ss:$28 sps:$4 sm:$0xff]  }
  0x6b   :  { %1279 = vmatprep.mubr.bf16.mxu0 %v2643_v31  ;;  %1408 = vmatprep.mubr.bf16.mxu1 %v2645_v32  ;;  %v2738_v30 = vld [vmem:[%s3560_s0 + $0x2e8] ss:$28 sps:$4 sm:$0xff]   ;;  %v2739_v31 = vld [vmem:[%s3560_s0 + $0x280] ss:$28 sps:$4 sm:$0xff]  }
  0x6c   :  { %v2740_v32 = vld [vmem:[%s3560_s0 + $0x324] ss:$28 sps:$4 sm:$0xff]  }
  0x72   :  { %1280 = vmatmul.mubr.bf16.gmra.mrb[40].mxu0 %v2647_v34  ;;  %1409 = vmatmul.mubr.bf16.gmra.mrb[40].mxu1 %v2648_v35  ;;  %v2743_v34 = vld [vmem:[%s3560_s0 + $0x320] ss:$28 sps:$4 sm:$0xff]   ;;  %v2744_v35 = vld [vmem:[%s3560_s0 + $0x2f0] ss:$28 sps:$4 sm:$0xff]  }
  0x73   :  { %1287 = vmatprep.mubr.bf16.mxu0 %v2652_v36  ;;  %1416 = vmatprep.mubr.bf16.mxu1 %v2654_v37  ;;  %v2745_v36 = vld [vmem:[%s3560_s0 + $0x35c] ss:$28 sps:$4 sm:$0xff]   ;;  %v2747_v37 = vld [vmem:[%s3560_s0 + $0x328] ss:$28 sps:$4 sm:$0xff]  }
  0x7a   :  { %1288 = vmatmul.mubr.bf16.gmra.mrb[44].mxu0 %v2656_v38  ;;  %1417 = vmatmul.mubr.bf16.gmra.mrb[44].mxu1 %v2657_v39 }
  0x7b   :  { %1424 = vmatprep.mubr.bf16.mxu1 %v2658_v40  ;;  %1521 = vmatprep.mubr.bf16.mxu0 %v2662_v41 }
  0x82   :  { %1425 = vmatmul.mubr.bf16.gmra.mrb[48].mxu1 %v2663_v43  ;;  %1522 = vmatmul.mubr.bf16.vlgmr.msra.gmra.mrb[48].mxu0 %v2660_v42  ;;  %v2748_v42 = vld [vmem:[%s3560_s0 + $0x358] ss:$28 sps:$4 sm:$0xff]   ;;  %v2749_v43 = vld [vmem:[%s3560_s0 + $0x360] ss:$28 sps:$4 sm:$0xff]  }
  0x83   :  { %1432 = vmatprep.mubr.bf16.mxu1 %v2665_v44  ;;  %1529 = vmatprep.mubr.bf16.mxu0 %v2667_v45 }
  0x8a   :  { %1433 = vmatmul.mubr.bf16.gmra.mrb[52].mxu1 %v2669_v46  ;;  %1530 = vmatmul.mubr.bf16.gmra.mrb[52].mxu0 %v2670_v47 }
  0x8b   :  { %1440 = vmatprep.mubr.bf16.mxu1 %v2671_v48  ;;  %1537 = vmatprep.mubr.bf16.mxu0 %v2673_v49 }
  0x92   :  { %1441 = vmatmul.mubr.bf16.gmra.mrb[56].mxu1 %v2675_v50  ;;  %1538 = vmatmul.mubr.bf16.gmra.mrb[56].mxu0 %v2676_v51 }
  0x93   :  { %1448 = vmatprep.mubr.bf16.mxu1 %v2678_v52  ;;  %1545 = vmatprep.mubr.bf16.mxu0 %v2680_v53 }
  0x9a   :  { %1449 = vmatmul.mubr.bf16.gmra.mrb[60].mxu1 %v2682_v54  ;;  %1546 = vmatmul.mubr.bf16.gmra.mrb[60].mxu0 %v2683_v55 }
  0x9b   :  { %1456 = vmatprep.mubr.bf16.mxu1 %v2684_v56  ;;  %1553 = vmatprep.mubr.bf16.mxu0 %v2686_v57 }
  0xa2   :  { %1457 = vmatmul.mubr.bf16.gmra.mrb[64].mxu1 %v2688_v58  ;;  %1554 = vmatmul.mubr.bf16.gmra.mrb[64].mxu0 %v2689_v59 }
  0xa3   :  { %1464 = vmatprep.mubr.bf16.mxu1 %v2691_v60  ;;  %1561 = vmatprep.mubr.bf16.mxu0 %v2693_v61 }
  0xaa   :  { %1465 = vmatmul.mubr.bf16.gmra.mrb[68].mxu1 %v2695_v62  ;;  %1562 = vmatmul.mubr.bf16.gmra.mrb[68].mxu0 %v2696_v63 }
  0xab   :  { %1472 = vmatprep.mubr.bf16.mxu1 %v2697_v0  ;;  %1569 = vmatprep.mubr.bf16.mxu0 %v2699_v1 }
  0xb2   :  { %1473 = vmatmul.mubr.bf16.gmra.mrb[72].mxu1 %v2701_v2  ;;  %1570 = vmatmul.mubr.bf16.gmra.mrb[72].mxu0 %v2702_v3 }
  0xb3   :  { %1480 = vmatprep.mubr.bf16.mxu1 %v2704_v4  ;;  %1577 = vmatprep.mubr.bf16.mxu0 %v2706_v5 }
  0xba   :  { %1481 = vmatmul.mubr.bf16.gmra.mrb[76].mxu1 %v2708_v6  ;;  %1578 = vmatmul.mubr.bf16.gmra.mrb[76].mxu0 %v2709_v7 }
  0xbb   :  { %1585 = vmatprep.mubr.bf16.mxu0 %v2710_v8  ;;  %2486 = vmatprep.mubr.bf16.mxu1 %v2712_v9 }
  0xc2   :  { %1586 = vmatmul.mubr.bf16.gmra.mrb[80].mxu0 %v2713_v10  ;;  %2487 = vmatmul.mubr.bf16.vlgmr.msra.gmra.mrb[80].mxu1 %v2714_v11 }
  0xc3   :  { %1593 = vmatprep.mubr.bf16.mxu0 %v2715_v12  ;;  %2490 = vmatprep.mubr.bf16.mxu1 %v2717_v13 }
  0xca   :  { %1594 = vmatmul.mubr.bf16.gmra.mrb[84].mxu0 %v2718_v14  ;;  %2491 = vmatmul.mubr.bf16.gmra.mrb[84].mxu1 %v2719_v15 }
  0xcb   :  { %1601 = vmatprep.mubr.bf16.mxu0 %v2720_v16  ;;  %2494 = vmatprep.mubr.bf16.mxu1 %v2722_v17 }
  0xd2   :  { %1602 = vmatmul.mubr.bf16.gmra.mrb[88].mxu0 %v2723_v18  ;;  %2495 = vmatmul.mubr.bf16.gmra.mrb[88].mxu1 %v2724_v19 }
  0xd3   :  { %1609 = vmatprep.mubr.bf16.mxu0 %v2725_v20  ;;  %2498 = vmatprep.mubr.bf16.mxu1 %v2727_v21 }
  0xda   :  { %1610 = vmatmul.mubr.bf16.gmra.mrb[92].mxu0 %v2728_v22  ;;  %2499 = vmatmul.mubr.bf16.gmra.mrb[92].mxu1 %v2729_v23 }
  0xdb   :  { %1617 = vmatprep.mubr.bf16.mxu0 %v2730_v24  ;;  %2502 = vmatprep.mubr.bf16.mxu1 %v2732_v25 }
  0xe2   :  { %1618 = vmatmul.mubr.bf16.gmra.mrb[96].mxu0 %v2733_v26  ;;  %2503 = vmatmul.mubr.bf16.gmra.mrb[96].mxu1 %v2734_v27 }
  0xe3   :  { %1625 = vmatprep.mubr.bf16.mxu0 %v2735_v28  ;;  %2506 = vmatprep.mubr.bf16.mxu1 %v2737_v29 }
  0xea   :  { %1626 = vmatmul.mubr.bf16.gmra.mrb[100].mxu0 %v2738_v30  ;;  %2507 = vmatmul.mubr.bf16.gmra.mrb[100].mxu1 %v2739_v31 }
  0xeb   :  { %1633 = vmatprep.mubr.bf16.mxu0 %v2740_v32  ;;  %2510 = vmatprep.mubr.bf16.mxu1 %v2742_v33 }
  0xf2   :  { %1634 = vmatmul.mubr.bf16.gmra.mrb[104].mxu0 %v2743_v34  ;;  %2511 = vmatmul.mubr.bf16.gmra.mrb[104].mxu1 %v2744_v35 }
  0xf3   :  { %1641 = vmatprep.mubr.bf16.mxu0 %v2745_v36  ;;  %2514 = vmatprep.mubr.bf16.mxu1 %v2747_v37 }
  0xf5   :  { %v2126_v38 = vpop.f32.mrb[0].mxu0  ;;  %v2198_v39 = vpop.f32.mrb[0].mxu1 }
  0xf6   :  { %v2127_v40 = vpop.f32.mrb[1].mxu0  ;;  %v2199_v41 = vpop.f32.mrb[1].mxu1 }
  0xf7   :  { %v2128_v44 = vadd.f32 %v2127_v40, %v2126_v38  ;;  %v2129_v45 = vpop.f32.mrb[2].mxu0  ;;  %v3274_v46 = vadd.f32 %v2199_v41, %v2198_v39  ;;  %v2201_v47 = vpop.f32.mrb[2].mxu1 }
  0xf8   :  { %v2130_v48 = vpop.f32.mrb[3].mxu0  ;;  %v2202_v49 = vpop.f32.mrb[3].mxu1 }
  0xf9   :  { %v2131_v50 = vadd.f32 %v2130_v48, %v2129_v45  ;;  %v3276_v51 = vadd.f32 %v2202_v49, %v2201_v47 }
  0xfa   :  { %1642 = vmatmul.mubr.bf16.gmra.mrb[108].mxu0 %v2748_v42  ;;  %2515 = vmatmul.mubr.bf16.gmra.mrb[108].mxu1 %v2749_v43 }
  0xfd   :  { %v2132_v52 = vpop.f32.mrb[4].mxu0  ;;  %v2204_v53 = vpop.f32.mrb[4].mxu1 }
  0xfe   :  { %v2133_v54 = vpop.f32.mrb[5].mxu0  ;;  %v2205_v55 = vpop.f32.mrb[5].mxu1 }
  0xff   :  { %v2134_v56 = vadd.f32 %v2133_v54, %v2132_v52  ;;  %v2135_v57 = vpop.f32.mrb[6].mxu0  ;;  %v3278_v58 = vadd.f32 %v2205_v55, %v2204_v53  ;;  %v2207_v59 = vpop.f32.mrb[6].mxu1 }
 0x100   :  { %v2136_v60 = vpop.f32.mrb[7].mxu0  ;;  %v2208_v61 = vpop.f32.mrb[7].mxu1 }
 0x101   :  { %v2137_v62 = vadd.f32 %v2136_v60, %v2135_v57  ;;  %v3280_v63 = vadd.f32 %v2208_v61, %v2207_v59 }
 0x105   :  { %v2138_v0 = vpop.f32.mrb[8].mxu0  ;;  %v2210_v1 = vpop.f32.mrb[8].mxu1 }
 0x106   :  { %v2139_v2 = vpop.f32.mrb[9].mxu0  ;;  %v2211_v3 = vpop.f32.mrb[9].mxu1 }
 0x107   :  { %v2140_v4 = vadd.f32 %v2139_v2, %v2138_v0  ;;  %v2141_v5 = vpop.f32.mrb[10].mxu0  ;;  %v3282_v6 = vadd.f32 %v2211_v3, %v2210_v1  ;;  %v2213_v7 = vpop.f32.mrb[10].mxu1 }
 0x108   :  { %v2142_v8 = vpop.f32.mrb[11].mxu0  ;;  %v2214_v9 = vpop.f32.mrb[11].mxu1 }
 0x109   :  { %v2143_v10 = vadd.f32 %v2142_v8, %v2141_v5  ;;  %v3284_v11 = vadd.f32 %v2214_v9, %v2213_v7 }
 0x10d   :  { %v2144_v12 = vpop.f32.mrb[12].mxu0  ;;  %v2216_v13 = vpop.f32.mrb[12].mxu1 }
 0x10e   :  { %v2145_v14 = vpop.f32.mrb[13].mxu0  ;;  %v2217_v15 = vpop.f32.mrb[13].mxu1 }
 0x10f   :  { %v2146_v16 = vadd.f32 %v2145_v14, %v2144_v12  ;;  %v2147_v17 = vpop.f32.mrb[14].mxu0  ;;  %v3286_v18 = vadd.f32 %v2217_v15, %v2216_v13  ;;  %v2219_v19 = vpop.f32.mrb[14].mxu1 }
 0x110   :  { %v2148_v20 = vpop.f32.mrb[15].mxu0  ;;  %v2220_v21 = vpop.f32.mrb[15].mxu1 }
 0x111   :  { %v2149_v22 = vadd.f32 %v2148_v20, %v2147_v17  ;;  %v3288_v23 = vadd.f32 %v2220_v21, %v2219_v19 }
 0x115   :  { %v2150_v24 = vpop.f32.mrb[16].mxu0  ;;  %v2238_v25 = vpop.f32.mrb[16].mxu1 }
 0x116   :  { %v2151_v26 = vpop.f32.mrb[17].mxu0  ;;  %v2239_v27 = vpop.f32.mrb[17].mxu1 }
 0x117   :  { %v2152_v28 = vadd.f32 %v2151_v26, %v2150_v24  ;;  %v2240_v29 = vadd.f32 %v2239_v27, %v2238_v25  ;;  %v2153_v30 = vpop.f32.mrb[18].mxu0  ;;  %v2241_v31 = vpop.f32.mrb[18].mxu1 }
 0x118   :  { %v2154_v32 = vpop.f32.mrb[19].mxu0  ;;  %v2242_v33 = vpop.f32.mrb[19].mxu1 }
 0x119   :  { %v3290_v34 = vadd.f32 %v2240_v29, %v2128_v44  ;;  %v2155_v35 = vadd.f32 %v2154_v32, %v2153_v30  ;;  %v2243_v36 = vadd.f32 %v2242_v33, %v2241_v31 }
 0x11b   :  { %v3292_v37 = vadd.f32 %v2243_v36, %v2131_v50 }
 0x11d   :  { %v2156_v38 = vpop.f32.mrb[20].mxu0  ;;  %v2244_v39 = vpop.f32.mrb[20].mxu1 }
 0x11e   :  { %v2157_v40 = vpop.f32.mrb[21].mxu0  ;;  %v2245_v41 = vpop.f32.mrb[21].mxu1 }
 0x11f   :  { %v2158_v42 = vadd.f32 %v2157_v40, %v2156_v38  ;;  %v2246_v43 = vadd.f32 %v2245_v41, %v2244_v39  ;;  %v2159_v45 = vpop.f32.mrb[22].mxu0  ;;  %v2247_v47 = vpop.f32.mrb[22].mxu1 }
 0x120   :  { %v2160_v48 = vpop.f32.mrb[23].mxu0  ;;  %v2248_v49 = vpop.f32.mrb[23].mxu1 }
 0x121   :  { %v3294_v52 = vadd.f32 %v2246_v43, %v2134_v56  ;;  %v2161_v53 = vadd.f32 %v2160_v48, %v2159_v45  ;;  %v2249_v54 = vadd.f32 %v2248_v49, %v2247_v47 }
 0x123   :  { %v3296_v44 = vadd.f32 %v2249_v54, %v2137_v62 }
 0x125   :  { %v2162_v55 = vpop.f32.mrb[24].mxu0  ;;  %v2250_v57 = vpop.f32.mrb[24].mxu1 }
 0x126   :  { %v2163_v50 = vpop.f32.mrb[25].mxu0  ;;  %v2251_v59 = vpop.f32.mrb[25].mxu1 }
 0x127   :  { %v2164_v60 = vadd.f32 %v2163_v50, %v2162_v55  ;;  %v2252_v61 = vadd.f32 %v2251_v59, %v2250_v57  ;;  %v2165_v0 = vpop.f32.mrb[26].mxu0  ;;  %v2253_v1 = vpop.f32.mrb[26].mxu1 }
 0x128   :  { %v2166_v2 = vpop.f32.mrb[27].mxu0  ;;  %v2254_v3 = vpop.f32.mrb[27].mxu1 }
 0x129   :  { %v3298_v5 = vadd.f32 %v2252_v61, %v2140_v4  ;;  %v2167_v7 = vadd.f32 %v2166_v2, %v2165_v0  ;;  %v2255_v8 = vadd.f32 %v2254_v3, %v2253_v1 }
 0x12b   :  { %v3300_v56 = vadd.f32 %v2255_v8, %v2143_v10 }
 0x12d   :  { %v2168_v9 = vpop.f32.mrb[28].mxu0  ;;  %v2256_v12 = vpop.f32.mrb[28].mxu1 }
 0x12e   :  { %v2169_v62 = vpop.f32.mrb[29].mxu0  ;;  %v2257_v13 = vpop.f32.mrb[29].mxu1 }
 0x12f   :  { %v2170_v14 = vadd.f32 %v2169_v62, %v2168_v9  ;;  %v2258_v15 = vadd.f32 %v2257_v13, %v2256_v12  ;;  %v2171_v17 = vpop.f32.mrb[30].mxu0  ;;  %v2259_v19 = vpop.f32.mrb[30].mxu1 }
 0x130   :  { %v2172_v20 = vpop.f32.mrb[31].mxu0  ;;  %v2260_v21 = vpop.f32.mrb[31].mxu1 }
 0x131   :  { %v3302_v24 = vadd.f32 %v2258_v15, %v2146_v16  ;;  %v2173_v25 = vadd.f32 %v2172_v20, %v2171_v17  ;;  %v2261_v26 = vadd.f32 %v2260_v21, %v2259_v19 }
 0x133   :  { %v3304_v4 = vadd.f32 %v2261_v26, %v2149_v22 }
 0x135   :  { %v2174_v27 = vpop.f32.mrb[32].mxu0  ;;  %v2262_v29 = vpop.f32.mrb[32].mxu1 }
 0x136   :  { %v2175_v10 = vpop.f32.mrb[33].mxu0  ;;  %v2263_v30 = vpop.f32.mrb[33].mxu1 }
 0x137   :  { %v2176_v31 = vadd.f32 %v2175_v10, %v2174_v27  ;;  %v2264_v32 = vadd.f32 %v2263_v30, %v2262_v29  ;;  %v2177_v33 = vpop.f32.mrb[34].mxu0  ;;  %v2265_v36 = vpop.f32.mrb[34].mxu1 }
 0x138   :  { %v2178_v38 = vpop.f32.mrb[35].mxu0  ;;  %v2266_v39 = vpop.f32.mrb[35].mxu1 }
 0x139   :  { %v3306_v40 = vadd.f32 %v2264_v32, %v2152_v28  ;;  %v2179_v41 = vadd.f32 %v2178_v38, %v2177_v33  ;;  %v2267_v43 = vadd.f32 %v2266_v39, %v2265_v36 }
 0x13b   :  { %v3308_v16 = vadd.f32 %v2267_v43, %v2155_v35 }
 0x13d   :  { %v2180_v45 = vpop.f32.mrb[36].mxu0  ;;  %v2268_v47 = vpop.f32.mrb[36].mxu1 }
 0x13e   :  { %v2181_v22 = vpop.f32.mrb[37].mxu0  ;;  %v2269_v48 = vpop.f32.mrb[37].mxu1 }
 0x13f   :  { %v3310_v49 = vadd.f32 %v2181_v22, %v2180_v45  ;;  %v2270_v54 = vadd.f32 %v2269_v48, %v2268_v47  ;;  %v2183_v55 = vpop.f32.mrb[38].mxu0  ;;  %v2271_v57 = vpop.f32.mrb[38].mxu1 }
 0x140   :  { %v2184_v50 = vpop.f32.mrb[39].mxu0  ;;  %v2272_v59 = vpop.f32.mrb[39].mxu1 }
 0x141   :  { %v3312_v61 = vadd.f32 %v2270_v54, %v2158_v42  ;;  %v2185_v0 = vadd.f32 %v2184_v50, %v2183_v55  ;;  %v2273_v28 = vadd.f32 %v2272_v59, %v2271_v57 }
 0x143   :  { %v3314_v1 = vadd.f32 %v2273_v28, %v2161_v53 }
 0x145   :  { %v2186_v2 = vpop.f32.mrb[40].mxu0  ;;  %v2274_v35 = vpop.f32.mrb[40].mxu1 }
 0x146   :  { %v2187_v3 = vpop.f32.mrb[41].mxu0  ;;  %v2275_v8 = vpop.f32.mrb[41].mxu1 }
 0x147   :  { %v3316_v9 = vadd.f32 %v2187_v3, %v2186_v2  ;;  %v2276_v12 = vadd.f32 %v2275_v8, %v2274_v35  ;;  %v2189_v62 = vpop.f32.mrb[42].mxu0  ;;  %v2277_v13 = vpop.f32.mrb[42].mxu1 }
 0x148   :  { %v2190_v15 = vpop.f32.mrb[43].mxu0  ;;  %v2278_v17 = vpop.f32.mrb[43].mxu1 }
 0x149   :  { %v3318_v19 = vadd.f32 %v2276_v12, %v2164_v60  ;;  %v3320_v20 = vadd.f32 %v2190_v15, %v2189_v62  ;;  %v2279_v42 = vadd.f32 %v2278_v17, %v2277_v13 }
 0x14b   :  { %v3322_v21 = vadd.f32 %v2279_v42, %v2167_v7 }
 0x14d   :  { %v2192_v53 = vpop.f32.mrb[44].mxu0  ;;  %v2280_v26 = vpop.f32.mrb[44].mxu1 }
 0x14e   :  { %v2193_v27 = vpop.f32.mrb[45].mxu0  ;;  %v2281_v29 = vpop.f32.mrb[45].mxu1 }
 0x14f   :  { %v3324_v10 = vadd.f32 %v2193_v27, %v2192_v53  ;;  %v2282_v30 = vadd.f32 %v2281_v29, %v2280_v26  ;;  %v2195_v32 = vpop.f32.mrb[46].mxu0  ;;  %v2283_v33 = vpop.f32.mrb[46].mxu1 }
 0x150   :  { %v2196_v36 = vpop.f32.mrb[47].mxu0  ;;  %v2284_v38 = vpop.f32.mrb[47].mxu1 }
 0x151   :  { %v3326_v39 = vadd.f32 %v2282_v30, %v2170_v14  ;;  %v3328_v60 = vadd.f32 %v2196_v36, %v2195_v32  ;;  %v2285_v43 = vadd.f32 %v2284_v38, %v2283_v33 }
 0x153   :  { %v3330_v45 = vadd.f32 %v2285_v43, %v2173_v25 }
 0x155   :  { %v2286_v7 = vpop.f32.mrb[48].mxu1  ;;  %v2350_v47 = vpop.f32.mrb[48].mxu0 }
 0x156   :  { %v2287_v22 = vpop.f32.mrb[49].mxu1  ;;  %v2351_v48 = vpop.f32.mrb[49].mxu0 }
 0x157   :  { %v2288_v54 = vadd.f32 %v2287_v22, %v2286_v7  ;;  %v2352_v55 = vadd.f32 %v2351_v48, %v2350_v47  ;;  %v2289_v57 = vpop.f32.mrb[50].mxu1  ;;  %v2353_v50 = vpop.f32.mrb[50].mxu0 }
 0x158   :  { %v2290_v59 = vpop.f32.mrb[51].mxu1  ;;  %v2354_v28 = vpop.f32.mrb[51].mxu0 }
 0x159   :  { %v3332_v2 = vadd.f32 %v2288_v54, %v2176_v31  ;;  %v2291_v35 = vadd.f32 %v2290_v59, %v2289_v57  ;;  %v2355_v14 = vadd.f32 %v2354_v28, %v2353_v50  ;;  %v3335_v3 = vadd.f32 %v2352_v55, %v3290_v34 }
 0x15b   :  { %v3337_v8 = vadd.f32 %v2291_v35, %v2179_v41  ;;  %v3340_v25 = vadd.f32 %v2355_v14, %v3292_v37 }
 0x15d   :  { %v2292_v12 = vpop.f32.mrb[52].mxu1  ;;  %v2356_v62 = vpop.f32.mrb[52].mxu0 }
 0x15e   :  { %v2293_v13 = vpop.f32.mrb[53].mxu1  ;;  %v2357_v15 = vpop.f32.mrb[53].mxu0 }
 0x15f   :  { %v2294_v17 = vadd.f32 %v2293_v13, %v2292_v12  ;;  %v2358_v42 = vadd.f32 %v2357_v15, %v2356_v62  ;;  %v2295_v53 = vpop.f32.mrb[54].mxu1  ;;  %v2359_v26 = vpop.f32.mrb[54].mxu0 }
 0x160   :  { %v2296_v31 = vpop.f32.mrb[55].mxu1  ;;  %v2360_v27 = vpop.f32.mrb[55].mxu0 }
 0x161   :  { %v3343_v29 = vadd.f32 %v2294_v17, %v3310_v49  ;;  %v2297_v34 = vadd.f32 %v2296_v31, %v2295_v53  ;;  %v2361_v30 = vadd.f32 %v2360_v27, %v2359_v26  ;;  %v3346_v41 = vadd.f32 %v2358_v42, %v3294_v52 }
 0x163   :  { %v3348_v37 = vadd.f32 %v2297_v34, %v2185_v0  ;;  %v3351_v32 = vadd.f32 %v2361_v30, %v3296_v44 }
 0x165   :  { %v2298_v33 = vpop.f32.mrb[56].mxu1  ;;  %v2362_v36 = vpop.f32.mrb[56].mxu0 }
 0x166   :  { %v2299_v38 = vpop.f32.mrb[57].mxu1  ;;  %v2363_v43 = vpop.f32.mrb[57].mxu0 }
 0x167   :  { %v2300_v7 = vadd.f32 %v2299_v38, %v2298_v33  ;;  %v2364_v47 = vadd.f32 %v2363_v43, %v2362_v36  ;;  %v2301_v22 = vpop.f32.mrb[58].mxu1  ;;  %v2365_v48 = vpop.f32.mrb[58].mxu0 }
 0x168   :  { %v2302_v49 = vpop.f32.mrb[59].mxu1  ;;  %v2366_v54 = vpop.f32.mrb[59].mxu0 }
 0x169   :  { %v3354_v55 = vadd.f32 %v2300_v7, %v3316_v9  ;;  %v2303_v52 = vadd.f32 %v2302_v49, %v2301_v22  ;;  %v2367_v57 = vadd.f32 %v2366_v54, %v2365_v48  ;;  %v3357_v0 = vadd.f32 %v2364_v47, %v3298_v5 }
 0x16b   :  { %v3360_v44 = vadd.f32 %v2303_v52, %v3320_v20  ;;  %v3363_v50 = vadd.f32 %v2367_v57, %v3300_v56 }
 0x16d   :  { %v2304_v59 = vpop.f32.mrb[60].mxu1  ;;  %v2368_v28 = vpop.f32.mrb[60].mxu0 }
 0x16e   :  { %v2305_v35 = vpop.f32.mrb[61].mxu1  ;;  %v2369_v14 = vpop.f32.mrb[61].mxu0 }
 0x16f   :  { %v2306_v12 = vadd.f32 %v2305_v35, %v2304_v59  ;;  %v2370_v62 = vadd.f32 %v2369_v14, %v2368_v28  ;;  %v2307_v13 = vpop.f32.mrb[62].mxu1  ;;  %v2371_v9 = vpop.f32.mrb[62].mxu0 }
 0x170   :  { %v2308_v15 = vpop.f32.mrb[63].mxu1  ;;  %v2372_v17 = vpop.f32.mrb[63].mxu0 }
 0x171   :  { %v3366_v42 = vadd.f32 %v2306_v12, %v3324_v10  ;;  %v2309_v5 = vadd.f32 %v2308_v15, %v2307_v13  ;;  %v2373_v53 = vadd.f32 %v2372_v17, %v2371_v9  ;;  %v3369_v20 = vadd.f32 %v2370_v62, %v3302_v24 }
 0x173   :  { %v3372_v56 = vadd.f32 %v2309_v5, %v3328_v60  ;;  %v3375_v26 = vadd.f32 %v2373_v53, %v3304_v4 }
 0x175   :  { %v2310_v31 = vpop.f32.mrb[64].mxu1  ;;  %v2374_v27 = vpop.f32.mrb[64].mxu0 }
 0x176   :  { %v2311_v34 = vpop.f32.mrb[65].mxu1  ;;  %v2375_v30 = vpop.f32.mrb[65].mxu0 }
 0x177   :  { %v2312_v33 = vadd.f32 %v2311_v34, %v2310_v31  ;;  %v2376_v36 = vadd.f32 %v2375_v30, %v2374_v27  ;;  %v2313_v38 = vpop.f32.mrb[66].mxu1  ;;  %v2377_v10 = vpop.f32.mrb[66].mxu0 }
 0x178   :  { %v2314_v43 = vpop.f32.mrb[67].mxu1  ;;  %v2378_v7 = vpop.f32.mrb[67].mxu0 }
 0x179   :  { %v3378_v47 = vadd.f32 %v2312_v33, %v3274_v46  ;;  %v2315_v24 = vadd.f32 %v2314_v43, %v2313_v38  ;;  %v2379_v22 = vadd.f32 %v2378_v7, %v2377_v10  ;;  %v3381_v60 = vadd.f32 %v2376_v36, %v3306_v40 }
 0x17b   :  { %v3384_v4 = vadd.f32 %v2315_v24, %v3276_v51  ;;  %v3387_v48 = vadd.f32 %v2379_v22, %v3308_v16 }
 0x17d   :  { %v2316_v49 = vpop.f32.mrb[68].mxu1  ;;  %v2380_v54 = vpop.f32.mrb[68].mxu0 }
 0x17e   :  { %v2317_v52 = vpop.f32.mrb[69].mxu1  ;;  %v2381_v57 = vpop.f32.mrb[69].mxu0 }
 0x17f   :  { %v2318_v59 = vadd.f32 %v2317_v52, %v2316_v49  ;;  %v2382_v28 = vadd.f32 %v2381_v57, %v2380_v54  ;;  %v2319_v35 = vpop.f32.mrb[70].mxu1  ;;  %v2383_v46 = vpop.f32.mrb[70].mxu0 }
 0x180   :  { %v2320_v14 = vpop.f32.mrb[71].mxu1  ;;  %v2384_v12 = vpop.f32.mrb[71].mxu0 }
 0x181   :  { %v3390_v62 = vadd.f32 %v2318_v59, %v3278_v58  ;;  %v2321_v40 = vadd.f32 %v2320_v14, %v2319_v35  ;;  %v2385_v13 = vadd.f32 %v2384_v12, %v2383_v46  ;;  %v3393_v51 = vadd.f32 %v2382_v28, %v3312_v61 }
 0x183   :  { %v3396_v16 = vadd.f32 %v2321_v40, %v3280_v63  ;;  %v3399_v9 = vadd.f32 %v2385_v13, %v3314_v1 }
 0x185   :  { %v2322_v15 = vpop.f32.mrb[72].mxu1  ;;  %v2386_v17 = vpop.f32.mrb[72].mxu0 }
 0x186   :  { %v2323_v5 = vpop.f32.mrb[73].mxu1  ;;  %v2387_v53 = vpop.f32.mrb[73].mxu0 }
 0x187   :  { %v2324_v31 = vadd.f32 %v2323_v5, %v2322_v15  ;;  %v2388_v27 = vadd.f32 %v2387_v53, %v2386_v17  ;;  %v2325_v34 = vpop.f32.mrb[74].mxu1  ;;  %v2389_v58 = vpop.f32.mrb[74].mxu0 }
 0x188   :  { %v2326_v30 = vpop.f32.mrb[75].mxu1  ;;  %v2390_v33 = vpop.f32.mrb[75].mxu0 }
 0x189   :  { %v3402_v36 = vadd.f32 %v2324_v31, %v3282_v6  ;;  %v2327_v61 = vadd.f32 %v2326_v30, %v2325_v34  ;;  %v2391_v38 = vadd.f32 %v2390_v33, %v2389_v58  ;;  %v3405_v63 = vadd.f32 %v2388_v27, %v3318_v19 }
 0x18b   :  { %v3408_v1 = vadd.f32 %v2327_v61, %v3284_v11  ;;  %v3411_v10 = vadd.f32 %v2391_v38, %v3322_v21 }
 0x18d   :  { %v2328_v43 = vpop.f32.mrb[76].mxu1  ;;  %v2392_v7 = vpop.f32.mrb[76].mxu0 }
 0x18e   :  { %v2329_v24 = vpop.f32.mrb[77].mxu1  ;;  %v2393_v22 = vpop.f32.mrb[77].mxu0 }
 0x18f   :  { %v2330_v49 = vadd.f32 %v2329_v24, %v2328_v43  ;;  %v2394_v54 = vadd.f32 %v2393_v22, %v2392_v7  ;;  %v2331_v52 = vpop.f32.mrb[78].mxu1  ;;  %v2395_v6 = vpop.f32.mrb[78].mxu0 }
 0x190   :  { %v2332_v57 = vpop.f32.mrb[79].mxu1  ;;  %v2396_v59 = vpop.f32.mrb[79].mxu0 }
 0x191   :  { %v3414_v28 = vadd.f32 %v2330_v49, %v3286_v18  ;;  %v2333_v19 = vadd.f32 %v2332_v57, %v2331_v52  ;;  %v2397_v35 = vadd.f32 %v2396_v59, %v2395_v6  ;;  %v1580_v11 = vadd.f32 %v2394_v54, %v3326_v39 }
 0x193   :  { %v3418_v21 = vadd.f32 %v2333_v19, %v3288_v23  ;;  %v3421_v46 = vadd.f32 %v2397_v35, %v3330_v45 }
 0x195   :  { %v2398_v14 = vpop.f32.mrb[80].mxu0  ;;  %v2488_v12 = vpop.f32.mrb[80].mxu1 }
 0x196   :  { %v3424_v40 = vadd.f32 %v2488_v12, %v3346_v41  ;;  %v2399_v13 = vpop.f32.mrb[81].mxu0  ;;  %v1684_v15 = vpop.f32.mrb[81].mxu1 }
 0x197   :  { %v2400_v17 = vadd.f32 %v2399_v13, %v2398_v14  ;;  %v3427_v18 = vadd.f32 %v1684_v15, %v3335_v3  ;;  %v2401_v5 = vpop.f32.mrb[82].mxu0  ;;  %v2489_v53 = vpop.f32.mrb[82].mxu1 }
 0x198   :  { %v3430_v39 = vadd.f32 %v2489_v53, %v3351_v32  ;;  %v2402_v23 = vpop.f32.mrb[83].mxu0  ;;  %v1687_v31 = vpop.f32.mrb[83].mxu1 }
 0x199   :  { %v2403_v45 = vadd.f32 %v2402_v23, %v2401_v5  ;;  %v3433_v27 = vadd.f32 %v1687_v31, %v3340_v25  ;;  %v3436_v41 = vadd.f32 %v2400_v17, %v3332_v2 }
 0x19b   :  { %v3439_v34 = vadd.f32 %v2403_v45, %v3337_v8 }
 0x19d   :  { %v2404_v58 = vpop.f32.mrb[84].mxu0  ;;  %v2492_v3 = vpop.f32.mrb[84].mxu1 }
 0x19e   :  { %v3442_v30 = vadd.f32 %v2492_v3, %v3369_v20  ;;  %v2405_v33 = vpop.f32.mrb[85].mxu0  ;;  %v1700_v32 = vpop.f32.mrb[85].mxu1 }
 0x19f   :  { %v2406_v61 = vadd.f32 %v2405_v33, %v2404_v58  ;;  %v3445_v38 = vadd.f32 %v1700_v32, %v3357_v0  ;;  %v2407_v43 = vpop.f32.mrb[86].mxu0  ;;  %v2493_v25 = vpop.f32.mrb[86].mxu1 }
 0x1a0   :  { %v3448_v7 = vadd.f32 %v2493_v25, %v3375_v26  ;;  %v2408_v2 = vpop.f32.mrb[87].mxu0  ;;  %v1703_v24 = vpop.f32.mrb[87].mxu1 }
 0x1a1   :  { %v2409_v8 = vadd.f32 %v2408_v2, %v2407_v43  ;;  %v3451_v22 = vadd.f32 %v1703_v24, %v3363_v50  ;;  %v1596_v20 = vadd.f32 %v2406_v61, %v3343_v29 }
 0x1a3   :  { %v1599_v49 = vadd.f32 %v2409_v8, %v3348_v37 }
 0x1a5   :  { %v2410_v54 = vpop.f32.mrb[88].mxu0  ;;  %v2496_v52 = vpop.f32.mrb[88].mxu1 }
 0x1a6   :  { %v3456_v0 = vadd.f32 %v2496_v52, %v3393_v51  ;;  %v2411_v6 = vpop.f32.mrb[89].mxu0  ;;  %v1716_v57 = vpop.f32.mrb[89].mxu1 }
 0x1a7   :  { %v2412_v59 = vadd.f32 %v2411_v6, %v2410_v54  ;;  %v3459_v26 = vadd.f32 %v1716_v57, %v3381_v60  ;;  %v2413_v19 = vpop.f32.mrb[90].mxu0  ;;  %v2497_v35 = vpop.f32.mrb[90].mxu1 }
 0x1a8   :  { %v1813_v50 = vmax.f32 %v3424_v40, %v3456_v0  ;;  %v3464_v29 = vadd.f32 %v2497_v35, %v3399_v9  ;;  %v2414_v37 = vpop.f32.mrb[91].mxu0  ;;  %v1719_v14 = vpop.f32.mrb[91].mxu1 }
 0x1a9   :  { %v1811_v51 = vmax.f32 %v3427_v18, %v3459_v26  ;;  %v2415_v12 = vadd.f32 %v2414_v37, %v2413_v19  ;;  %v3469_v13 = vadd.f32 %v1719_v14, %v3387_v48  ;;  %v1604_v60 = vadd.f32 %v2412_v59, %v3354_v55 }
 0x1aa   :  { %v1814_v15 = vmax.f32 %v3430_v39, %v3464_v29 }
 0x1ab   :  { %v1812_v17 = vmax.f32 %v3433_v27, %v3469_v13  ;;  %v1607_v9 = vadd.f32 %v2415_v12, %v3360_v44 }
 0x1ad   :  { %v2416_v5 = vpop.f32.mrb[92].mxu0  ;;  %v2500_v53 = vpop.f32.mrb[92].mxu1 }
 0x1ae   :  { %v3477_v23 = vadd.f32 %v2500_v53, %v1580_v11  ;;  %v2417_v31 = vpop.f32.mrb[93].mxu0  ;;  %v1732_v45 = vpop.f32.mrb[93].mxu1 }
 0x1af   :  { %v2418_v58 = vadd.f32 %v2417_v31, %v2416_v5  ;;  %v3480_v48 = vadd.f32 %v1732_v45, %v3405_v63  ;;  %v2419_v3 = vpop.f32.mrb[94].mxu0  ;;  %v2501_v55 = vpop.f32.mrb[94].mxu1 }
 0x1b0   :  { %v1817_v33 = vmax.f32 %v3442_v30, %v3477_v23  ;;  %v3485_v32 = vadd.f32 %v2501_v55, %v3421_v46  ;;  %v2420_v61 = vpop.f32.mrb[95].mxu0  ;;  %v1735_v44 = vpop.f32.mrb[95].mxu1 }
 0x1b1   :  { %v1815_v11 = vmax.f32 %v3445_v38, %v3480_v48  ;;  %v2421_v43 = vadd.f32 %v2420_v61, %v2419_v3  ;;  %v3490_v25 = vadd.f32 %v1735_v44, %v3411_v10  ;;  %v1612_v63 = vadd.f32 %v2418_v58, %v3366_v42 }
 0x1b2   :  { %v1818_v2 = vmax.f32 %v3448_v7, %v3485_v32 }
 0x1b3   :  { %v1816_v24 = vmax.f32 %v3451_v22, %v3490_v25  ;;  %v1615_v46 = vadd.f32 %v2421_v43, %v3372_v56 }
 0x1b5   :  { %v2422_v8 = vpop.f32.mrb[96].mxu0  ;;  %v2504_v54 = vpop.f32.mrb[96].mxu1 }
 0x1b6   :  { %v1757_v52 = vadd.f32 %v2504_v54, %v1596_v20  ;;  %v2423_v6 = vpop.f32.mrb[97].mxu0  ;;  %v1748_v57 = vpop.f32.mrb[97].mxu1 }
 0x1b7   :  { %v2424_v59 = vadd.f32 %v2423_v6, %v2422_v8  ;;  %v1749_v19 = vadd.f32 %v1748_v57, %v3436_v41  ;;  %v2425_v10 = vpop.f32.mrb[98].mxu0  ;;  %v2505_v35 = vpop.f32.mrb[98].mxu1 }
 0x1b8   :  { %v1760_v37 = vadd.f32 %v2505_v35, %v1599_v49  ;;  %v2426_v42 = vpop.f32.mrb[99].mxu0  ;;  %v1751_v14 = vpop.f32.mrb[99].mxu1 }
 0x1b9   :  { %v2427_v12 = vadd.f32 %v2426_v42, %v2425_v10  ;;  %v1752_v5 = vadd.f32 %v1751_v14, %v3439_v34  ;;  %v1620_v53 = vadd.f32 %v2424_v59, %v3378_v47 }
 0x1bb   :  { %v1623_v56 = vadd.f32 %v2427_v12, %v3384_v4 }
 0x1bd   :  { %v2428_v31 = vpop.f32.mrb[100].mxu0  ;;  %v2508_v45 = vpop.f32.mrb[100].mxu1 }
 0x1be   :  { %v3502_v20 = vadd.f32 %v2508_v45, %v1612_v63  ;;  %v2429_v58 = vpop.f32.mrb[101].mxu0  ;;  %v1764_v3 = vpop.f32.mrb[101].mxu1 }
 0x1bf   :  { %v2430_v55 = vadd.f32 %v2429_v58, %v2428_v31  ;;  %v3504_v41 = vadd.f32 %v1764_v3, %v1604_v60  ;;  %v2431_v61 = vpop.f32.mrb[102].mxu0  ;;  %v2509_v49 = vpop.f32.mrb[102].mxu1 }
 0x1c0   :  { %v3506_v44 = vadd.f32 %v2509_v49, %v1615_v46  ;;  %v2432_v43 = vpop.f32.mrb[103].mxu0  ;;  %v1767_v8 = vpop.f32.mrb[103].mxu1 }
 0x1c1   :  { %v2433_v34 = vadd.f32 %v2432_v43, %v2431_v61  ;;  %v3508_v54 = vadd.f32 %v1767_v8, %v1607_v9  ;;  %v1628_v47 = vadd.f32 %v2430_v55, %v3390_v62  ;;  %v2070_v9 = vld [vmem:[%s3561_s2] ss:$0 sm:$0xff] }
 0x1c3   :  { %v1631_v4 = vadd.f32 %v2433_v34, %v3396_v16 }
 0x1c5   :  { %v2434_v63 = vpop.f32.mrb[104].mxu0  ;;  %v2512_v6 = vpop.f32.mrb[104].mxu1 }
 0x1c6   :  { %v1789_v57 = vadd.f32 %v2512_v6, %v1628_v47  ;;  %v2435_v59 = vpop.f32.mrb[105].mxu0  ;;  %v1780_v10 = vpop.f32.mrb[105].mxu1 }
 0x1c7   :  { %v2436_v60 = vadd.f32 %v2435_v59, %v2434_v63  ;;  %v1781_v35 = vadd.f32 %v1780_v10, %v1620_v53  ;;  %v2437_v42 = vpop.f32.mrb[106].mxu0  ;;  %v2513_v14 = vpop.f32.mrb[106].mxu1 }
 0x1c8   :  { %v1821_v46 = vmax.f32 %v1757_v52, %v1789_v57  ;;  %v1792_v12 = vadd.f32 %v2513_v14, %v1631_v4  ;;  %v2438_v31 = vpop.f32.mrb[107].mxu0  ;;  %v1783_v45 = vpop.f32.mrb[107].mxu1 }
 0x1c9   :  { %v1819_v62 = vmax.f32 %v1749_v19, %v1781_v35  ;;  %v2439_v58 = vadd.f32 %v2438_v31, %v2437_v42  ;;  %v1784_v16 = vadd.f32 %v1783_v45, %v1623_v56  ;;  %v1636_v3 = vadd.f32 %v2436_v60, %v3402_v36 }
 0x1ca   :  { %v1829_v55 = vmax.f32 %v1813_v50, %v1821_v46  ;;  %v1822_v53 = vmax.f32 %v1760_v37, %v1792_v12 }
 0x1cb   :  { %v1827_v52 = vmax.f32 %v1811_v51, %v1819_v62  ;;  %v1820_v61 = vmax.f32 %v1752_v5, %v1784_v16  ;;  %v1639_v49 = vadd.f32 %v2439_v58, %v3408_v1 }
 0x1cc   :  { %v1844_v43 = vadd.f32 %v2070_v9, %v1829_v55  ;;  %v1830_v19 = vmax.f32 %v1814_v15, %v1822_v53 }
 0x1cd   :  { %v1842_v56 = vadd.f32 %v2070_v9, %v1827_v52  ;;  %v1828_v36 = vmax.f32 %v1812_v17, %v1820_v61  ;;  %v2440_v40 = vpop.f32.mrb[108].mxu0  ;;  %v2516_v0 = vpop.f32.mrb[108].mxu1 }
 0x1ce   :  { %v1845_v50 = vadd.f32 %v2070_v9, %v1830_v19  ;;  %v2441_v37 = vpop.f32.mrb[109].mxu0  ;;  %v1796_v8 = vpop.f32.mrb[109].mxu1  ;;  %v1852_v34 = vmax.f32 %v1844_v43, 0.0 }
 0x1cf   :  { %v1843_v18 = vadd.f32 %v2070_v9, %v1828_v36  ;;  %v2442_v26 = vadd.f32 %v2441_v37, %v2440_v40  ;;  %v1797_v51 = vadd.f32 %v1796_v8, %v1636_v3  ;;  %v2443_v5 = vpop.f32.mrb[110].mxu0  ;;  %v2517_v1 = vpop.f32.mrb[110].mxu1  ;;  %v1850_v47 = vmax.f32 %v1842_v56, 0.0 }
 0x1d0   :  { %v1853_v4 = vmax.f32 %v1845_v50, 0.0  ;;  %v2444_v39 = vpop.f32.mrb[111].mxu0  ;;  %v1799_v29 = vpop.f32.mrb[111].mxu1 }
 0x1d1   :  { %v1851_v15 = vmax.f32 %v1843_v18, 0.0  ;;  %v1644_v63 = vadd.f32 %v2442_v26, %v3414_v28  ;;  %v1823_v27 = vmax.f32 %v3504_v41, %v1797_v51  ;;  %v2445_v13 = vadd.f32 %v2444_v39, %v2443_v5 }
 0x1d2   :  { %v2095_v17 = vpack.c.bf16 %v1853_v4, %v1852_v34  ;;  %v1800_v6 = vadd.f32 %v1799_v29, %v1639_v49 }
 0x1d3   :  { %v2090_v57 = vpack.c.bf16 %v1851_v15, %v1850_v47  ;;  %v1805_v59 = vadd.f32 %v2516_v0, %v1644_v63  ;;  %v1831_v10 = vmax.f32 %v1815_v11, %v1823_v27  ;;  %v1647_v60 = vadd.f32 %v2445_v13, %v3418_v21 }
 0x1d4   :  { %2107 = vst [vmem:[%s3562_s3 + $0x8] sm:$0xff] %v2095_v17   ;;  %v1824_v35 = vmax.f32 %v3508_v54, %v1800_v6 }
 0x1d5   :  { %2091 = vst [vmem:[%s3562_s3] sm:$0xff] %v2090_v57   ;;  %v1825_v28 = vmax.f32 %v3502_v20, %v1805_v59  ;;  %v1808_v41 = vadd.f32 %v2517_v1, %v1647_v60  ;;  %v1846_v42 = vadd.f32 %v2070_v9, %v1831_v10 }
 0x1d6   :  { %v1832_v38 = vmax.f32 %v1816_v24, %v1824_v35 }
 0x1d7   :  { %v1833_v21 = vmax.f32 %v1817_v33, %v1825_v28  ;;  %v1826_v48 = vmax.f32 %v3506_v44, %v1808_v41  ;;  %v1854_v46 = vmax.f32 %v1846_v42, 0.0 }
 0x1d8   :  { %v1847_v11 = vadd.f32 %v2070_v9, %v1832_v38 }
 0x1d9   :  { %v1848_v54 = vadd.f32 %v2070_v9, %v1833_v21  ;;  %v1834_v14 = vmax.f32 %v1818_v2, %v1826_v48 }
 0x1da   :  { %v1855_v20 = vmax.f32 %v1847_v11, 0.0 }
 0x1db   :  { %v1849_v12 = vadd.f32 %v2070_v9, %v1834_v14  ;;  %v1856_v45 = vmax.f32 %v1848_v54, 0.0 }
 0x1dc   :  { %v2100_v31 = vpack.c.bf16 %v1855_v20, %v1854_v46 }
 0x1dd   :  { %v1857_v62 = vmax.f32 %v1849_v12, 0.0 }
 0x1de   :  { %2108 = vst [vmem:[%s3562_s3 + $0x10] sm:$0xff] %v2100_v31  }
 0x1df   :  { %v2105_v30 = vpack.c.bf16 %v1857_v62, %v1856_v45 }
 0x1e1   :  { %2109 = vst [vmem:[%s3562_s3 + $0x18] sm:$0xff] %v2105_v30  }

// kernel: cifar_cnn_forward.5
= control target key start
LH: loop header
LB: loop body
LE: loop exit
PB: predicated region body
PF: predicated region fallthrough
CT: control target
= control target key end

     0   :  { %vm8795_vm0 = vmmov 0   ;;  %s11473_s1 = inlined_call_operand.vmem [shape: bf16[3200,512], index: 1, kind: input, shape index: {}]   ;;  %s11474_s0 = inlined_call_operand.vmem [shape: bf16[8,3200], index: 0, kind: input, shape index: {}]   ;;  %s11475_s3 = inlined_call_operand.vmem [shape: bf16[512,128], index: 3, kind: input, shape index: {}]   ;;  %s11476_s5 = inlined_call_operand.vmem [shape: bf16[128,128], index: 5, kind: input, shape index: {}]   ;;  %s11477_s2 = inlined_call_operand.vmem [shape: f32[1,512], index: 2, kind: input, shape index: {}]   ;;  %s11478_s4 = inlined_call_operand.vmem [shape: f32[1,128], index: 4, kind: input, shape index: {}]   ;;  %s11479_s6 = inlined_call_operand.vmem [shape: f32[1,128], index: 6, kind: input, shape index: {}]   ;;  %s11480_s7 = inlined_call_operand.vmem [shape: f32[8,128], index: 7, kind: output, shape index: {}]  }
   0x1   :  { %v7528_v0 = vld [vmem:[%s11473_s1 + $0x4] ss:$16 sps:$4 sm:$0xff]   ;;  %v7530_v1 = vld [vmem:[%s11473_s1 + $0xc] ss:$16 sps:$4 sm:$0xff]   ;;  %v7532_v2 = vld [vmem:[%s11473_s1] ss:$16 sps:$4 sm:$0xff]  }
   0x2   :  { %4950 = vmatprep.subr.bf16.mxu0 %v7528_v0  ;;  %v7533_v3 = vld [vmem:[%s11473_s1 + $0x8] ss:$16 sps:$4 sm:$0xff]   ;;  %5483 = vmatprep.subr.bf16.mxu1 %v7530_v1  ;;  %v7534_v4 = vld [vmem:[%s11473_s1 + $0x24] ss:$16 sps:$4 sm:$0xff]   ;;  %v7536_v5 = vld [vmem:[%s11473_s1 + $0x2c] ss:$16 sps:$4 sm:$0xff]  }
   0x3   :  { %4951 = vmatpush1.bf16.msra.mxu0 %v7532_v2  ;;  %5484 = vmatpush1.bf16.msra.mxu1 %v7533_v3  ;;  %v7538_v6 = vld [vmem:[%s11473_s1 + $0x20] ss:$16 sps:$4 sm:$0xff]   ;;  %v7539_v7 = vld [vmem:[%s11473_s1 + $0x28] ss:$16 sps:$4 sm:$0xff]   ;;  %v7540_v8 = vld [vmem:[%s11473_s1 + $0x44] ss:$16 sps:$4 sm:$0xff]  }
   0x4   :  { %4952 = vmatprep.subr.bf16.mxu0 %v7534_v4  ;;  %5485 = vmatprep.subr.bf16.mxu1 %v7536_v5  ;;  %v7542_v9 = vld [vmem:[%s11473_s1 + $0x4c] ss:$16 sps:$4 sm:$0xff]   ;;  %v7544_v10 = vld [vmem:[%s11473_s1 + $0x40] ss:$16 sps:$4 sm:$0xff]   ;;  %v7545_v11 = vld [vmem:[%s11473_s1 + $0x48] ss:$16 sps:$4 sm:$0xff]  }
   0x5   :  { %v7546_v12 = vld [vmem:[%s11473_s1 + $0x64] ss:$16 sps:$4 sm:$0xff]   ;;  %v7548_v13 = vld [vmem:[%s11473_s1 + $0x6c] ss:$16 sps:$4 sm:$0xff]   ;;  %v7550_v14 = vld [vmem:[%s11473_s1 + $0x60] ss:$16 sps:$4 sm:$0xff]  }
   0x6   :  { %v7551_v15 = vld [vmem:[%s11473_s1 + $0x68] ss:$16 sps:$4 sm:$0xff]   ;;  %v7552_v16 = vld [vmem:[%s11473_s1 + $0x84] ss:$16 sps:$4 sm:$0xff]   ;;  %v7554_v17 = vld [vmem:[%s11473_s1 + $0x8c] ss:$16 sps:$4 sm:$0xff]  }
   0x7   :  { %4953 = vmatpush1.bf16.msra.mxu0 %v7538_v6  ;;  %5486 = vmatpush1.bf16.msra.mxu1 %v7539_v7  ;;  %v7556_v18 = vld [vmem:[%s11473_s1 + $0x80] ss:$16 sps:$4 sm:$0xff]   ;;  %v7557_v19 = vld [vmem:[%s11473_s1 + $0x88] ss:$16 sps:$4 sm:$0xff]   ;;  %v7558_v20 = vld [vmem:[%s11473_s1 + $0xa4] ss:$16 sps:$4 sm:$0xff]  }
   0x8   :  { %4954 = vmatprep.subr.bf16.mxu0 %v7540_v8  ;;  %5487 = vmatprep.subr.bf16.mxu1 %v7542_v9  ;;  %v7560_v21 = vld [vmem:[%s11473_s1 + $0xac] ss:$16 sps:$4 sm:$0xff]   ;;  %v7562_v22 = vld [vmem:[%s11473_s1 + $0xa0] ss:$16 sps:$4 sm:$0xff]   ;;  %v7563_v23 = vld [vmem:[%s11473_s1 + $0xa8] ss:$16 sps:$4 sm:$0xff]  }
   0x9   :  { %v7564_v24 = vld [vmem:[%s11473_s1 + $0xc4] ss:$16 sps:$4 sm:$0xff]   ;;  %v7566_v25 = vld [vmem:[%s11473_s1 + $0xcc] ss:$16 sps:$4 sm:$0xff]   ;;  %v7568_v26 = vld [vmem:[%s11473_s1 + $0xc0] ss:$16 sps:$4 sm:$0xff]  }
   0xa   :  { %v7569_v27 = vld [vmem:[%s11473_s1 + $0xc8] ss:$16 sps:$4 sm:$0xff]   ;;  %v7570_v28 = vld [vmem:[%s11473_s1 + $0xe4] ss:$16 sps:$4 sm:$0xff]   ;;  %v7572_v29 = vld [vmem:[%s11473_s1 + $0xec] ss:$16 sps:$4 sm:$0xff]  }
   0xb   :  { %4955 = vmatpush1.bf16.msra.mxu0 %v7544_v10  ;;  %5488 = vmatpush1.bf16.msra.mxu1 %v7545_v11  ;;  %v7574_v30 = vld [vmem:[%s11473_s1 + $0xe0] ss:$16 sps:$4 sm:$0xff]   ;;  %v7575_v31 = vld [vmem:[%s11473_s1 + $0xe8] ss:$16 sps:$4 sm:$0xff]   ;;  %v7576_v32 = vld [vmem:[%s11473_s1 + $0x104] ss:$16 sps:$4 sm:$0xff]  }
   0xc   :  { %4956 = vmatprep.subr.bf16.mxu0 %v7546_v12  ;;  %5489 = vmatprep.subr.bf16.mxu1 %v7548_v13  ;;  %v7578_v33 = vld [vmem:[%s11473_s1 + $0x10c] ss:$16 sps:$4 sm:$0xff]   ;;  %v7580_v34 = vld [vmem:[%s11473_s1 + $0x100] ss:$16 sps:$4 sm:$0xff]   ;;  %v7581_v35 = vld [vmem:[%s11473_s1 + $0x108] ss:$16 sps:$4 sm:$0xff]  }
   0xd   :  { %v7582_v36 = vld [vmem:[%s11473_s1 + $0x124] ss:$16 sps:$4 sm:$0xff]   ;;  %v7584_v37 = vld [vmem:[%s11473_s1 + $0x12c] ss:$16 sps:$4 sm:$0xff]   ;;  %v7586_v38 = vld [vmem:[%s11473_s1 + $0x120] ss:$16 sps:$4 sm:$0xff]  }
   0xe   :  { %v7587_v39 = vld [vmem:[%s11473_s1 + $0x128] ss:$16 sps:$4 sm:$0xff]   ;;  %v7588_v40 = vld [vmem:[%s11473_s1 + $0x144] ss:$16 sps:$4 sm:$0xff]   ;;  %v7590_v41 = vld [vmem:[%s11473_s1 + $0x14c] ss:$16 sps:$4 sm:$0xff]  }
   0xf   :  { %4957 = vmatpush1.bf16.msra.mxu0 %v7550_v14  ;;  %5490 = vmatpush1.bf16.msra.mxu1 %v7551_v15  ;;  %v7592_v42 = vld [vmem:[%s11473_s1 + $0x140] ss:$16 sps:$4 sm:$0xff]   ;;  %v7593_v43 = vld [vmem:[%s11473_s1 + $0x148] ss:$16 sps:$4 sm:$0xff]   ;;  %v7594_v44 = vld [vmem:[%s11473_s1 + $0x164] ss:$16 sps:$4 sm:$0xff]  }
  0x10   :  { %4958 = vmatprep.subr.bf16.mxu0 %v7552_v16  ;;  %5491 = vmatprep.subr.bf16.mxu1 %v7554_v17  ;;  %v7596_v45 = vld [vmem:[%s11473_s1 + $0x16c] ss:$16 sps:$4 sm:$0xff]   ;;  %v27_v46 = vld [vmem:[%s11474_s0] sm:$0xff]  ;;  %v7599_v49 = vld [vmem:[%s11473_s1 + $0x168] ss:$16 sps:$4 sm:$0xff]  }
  0x11   :  { %v7598_v47 = vld [vmem:[%s11473_s1 + $0x160] ss:$16 sps:$4 sm:$0xff]   ;;  %v6486_v48 = vcombine.high %v27_v46, %v27_v46  ;;  %v7600_v50 = vld [vmem:[%s11473_s1 + $0x184] ss:$16 sps:$4 sm:$0xff]   ;;  %v7602_v51 = vld [vmem:[%s11473_s1 + $0x18c] ss:$16 sps:$4 sm:$0xff]   ;;  %v6485_v4 = vcombine.low %v27_v46, %v27_v46 }
  0x12   :  { %v7604_v52 = vld [vmem:[%s11473_s1 + $0x180] ss:$16 sps:$4 sm:$0xff]   ;;  %v7605_v53 = vld [vmem:[%s11473_s1 + $0x188] ss:$16 sps:$4 sm:$0xff]   ;;  %v7606_v54 = vld [vmem:[%s11473_s1 + $0x1a4] ss:$16 sps:$4 sm:$0xff]  }
  0x13   :  { %4959 = vmatpush1.bf16.msra.mxu0 %v7556_v18  ;;  %5492 = vmatpush1.bf16.msra.mxu1 %v7557_v19  ;;  %v7608_v55 = vld [vmem:[%s11473_s1 + $0x1ac] ss:$16 sps:$4 sm:$0xff]   ;;  %v7610_v56 = vld [vmem:[%s11473_s1 + $0x1a0] ss:$16 sps:$4 sm:$0xff]   ;;  %v7611_v57 = vld [vmem:[%s11473_s1 + $0x1a8] ss:$16 sps:$4 sm:$0xff]  }
  0x14   :  { %4960 = vmatprep.subr.bf16.mxu0 %v7558_v20  ;;  %5493 = vmatprep.subr.bf16.mxu1 %v7560_v21  ;;  %v7612_v58 = vld [vmem:[%s11473_s1 + $0x1c4] ss:$16 sps:$4 sm:$0xff]   ;;  %v7614_v59 = vld [vmem:[%s11473_s1 + $0x1cc] ss:$16 sps:$4 sm:$0xff]   ;;  %v7616_v60 = vld [vmem:[%s11473_s1 + $0x1c0] ss:$16 sps:$4 sm:$0xff]  }
  0x15   :  { %4982 = vmatprep.mubr.bf16.mxu0 %v6486_v48  ;;  %5515 = vmatprep.mubr.bf16.mxu1 %v6486_v48  ;;  %v7617_v61 = vld [vmem:[%s11473_s1 + $0x1c8] ss:$16 sps:$4 sm:$0xff]   ;;  %v7618_v62 = vld [vmem:[%s11473_s1 + $0x1e4] ss:$16 sps:$4 sm:$0xff]   ;;  %v7620_v63 = vld [vmem:[%s11473_s1 + $0x1ec] ss:$16 sps:$4 sm:$0xff]  }
  0x16   :  { %v7622_v0 = vld [vmem:[%s11473_s1 + $0x1e0] ss:$16 sps:$4 sm:$0xff]   ;;  %v7623_v1 = vld [vmem:[%s11473_s1 + $0x1e8] ss:$16 sps:$4 sm:$0xff]   ;;  %v7628_v2 = vld [vmem:[%s11473_s1 + $0x204] ss:$16 sps:$4 sm:$0xff]  }
  0x17   :  { %4961 = vmatpush1.bf16.msra.mxu0 %v7562_v22  ;;  %5494 = vmatpush1.bf16.msra.mxu1 %v7563_v23  ;;  %v7631_v3 = vld [vmem:[%s11473_s1 + $0x20c] ss:$16 sps:$4 sm:$0xff]   ;;  %v7626_v5 = vld [vmem:[%s11473_s1 + $0x200] ss:$16 sps:$4 sm:$0xff]   ;;  %v7629_v6 = vld [vmem:[%s11473_s1 + $0x208] ss:$16 sps:$4 sm:$0xff]  }
  0x18   :  { %4962 = vmatprep.subr.bf16.mxu0 %v7564_v24  ;;  %5495 = vmatprep.subr.bf16.mxu1 %v7566_v25  ;;  %v7634_v7 = vld [vmem:[%s11473_s1 + $0x224] ss:$16 sps:$4 sm:$0xff]   ;;  %v7637_v8 = vld [vmem:[%s11473_s1 + $0x22c] ss:$16 sps:$4 sm:$0xff]   ;;  %v7632_v9 = vld [vmem:[%s11473_s1 + $0x220] ss:$16 sps:$4 sm:$0xff]  }
  0x19   :  { %v7635_v10 = vld [vmem:[%s11473_s1 + $0x228] ss:$16 sps:$4 sm:$0xff]   ;;  %v7640_v11 = vld [vmem:[%s11473_s1 + $0x244] ss:$16 sps:$4 sm:$0xff]   ;;  %v7643_v12 = vld [vmem:[%s11473_s1 + $0x24c] ss:$16 sps:$4 sm:$0xff]  }
  0x1a   :  { %v7638_v13 = vld [vmem:[%s11473_s1 + $0x240] ss:$16 sps:$4 sm:$0xff]   ;;  %v7641_v14 = vld [vmem:[%s11473_s1 + $0x248] ss:$16 sps:$4 sm:$0xff]   ;;  %v7646_v15 = vld [vmem:[%s11473_s1 + $0x264] ss:$16 sps:$4 sm:$0xff]  }
  0x1b   :  { %4963 = vmatpush1.bf16.msra.mxu0 %v7568_v26  ;;  %5496 = vmatpush1.bf16.msra.mxu1 %v7569_v27  ;;  %v7649_v16 = vld [vmem:[%s11473_s1 + $0x26c] ss:$16 sps:$4 sm:$0xff]   ;;  %v7644_v17 = vld [vmem:[%s11473_s1 + $0x260] ss:$16 sps:$4 sm:$0xff]   ;;  %v7647_v18 = vld [vmem:[%s11473_s1 + $0x268] ss:$16 sps:$4 sm:$0xff]  }
  0x1c   :  { %4964 = vmatprep.subr.bf16.mxu0 %v7570_v28  ;;  %5497 = vmatprep.subr.bf16.mxu1 %v7572_v29  ;;  %v7652_v19 = vld [vmem:[%s11473_s1 + $0x284] ss:$16 sps:$4 sm:$0xff]   ;;  %v7655_v20 = vld [vmem:[%s11473_s1 + $0x28c] ss:$16 sps:$4 sm:$0xff]   ;;  %v7650_v21 = vld [vmem:[%s11473_s1 + $0x280] ss:$16 sps:$4 sm:$0xff]  }
  0x1d   :  { %v7653_v22 = vld [vmem:[%s11473_s1 + $0x288] ss:$16 sps:$4 sm:$0xff]   ;;  %v7658_v23 = vld [vmem:[%s11473_s1 + $0x2a4] ss:$16 sps:$4 sm:$0xff]   ;;  %v7661_v24 = vld [vmem:[%s11473_s1 + $0x2ac] ss:$16 sps:$4 sm:$0xff]  }
  0x1e   :  { %v7656_v25 = vld [vmem:[%s11473_s1 + $0x2a0] ss:$16 sps:$4 sm:$0xff]   ;;  %v7659_v26 = vld [vmem:[%s11473_s1 + $0x2a8] ss:$16 sps:$4 sm:$0xff]   ;;  %v7664_v27 = vld [vmem:[%s11473_s1 + $0x2c4] ss:$16 sps:$4 sm:$0xff]  }
  0x1f   :  { %4965 = vmatpush1.bf16.msra.mxu0 %v7574_v30  ;;  %5498 = vmatpush1.bf16.msra.mxu1 %v7575_v31  ;;  %v7667_v28 = vld [vmem:[%s11473_s1 + $0x2cc] ss:$16 sps:$4 sm:$0xff]   ;;  %v7662_v31 = vld [vmem:[%s11473_s1 + $0x2c0] ss:$16 sps:$4 sm:$0xff]   ;;  %v7689_v48 = vld [vmem:[%s11473_s1 + $0x348] ss:$16 sps:$4 sm:$0xff]  }
  0x20   :  { %4966 = vmatprep.subr.bf16.mxu0 %v7576_v32  ;;  %5499 = vmatprep.subr.bf16.mxu1 %v7578_v33  ;;  %v9112_v29 = vld [vmem:[%s11474_s0 + $0x8] sm:$0xff]  ;;  %v7670_v33 = vld [vmem:[%s11473_s1 + $0x2e4] ss:$16 sps:$4 sm:$0xff]  }
  0x21   :  { %v6488_v30 = vcombine.high %v9112_v29, %v9112_v29  ;;  %v7665_v32 = vld [vmem:[%s11473_s1 + $0x2c8] ss:$16 sps:$4 sm:$0xff]   ;;  %v7691_v46 = vld [vmem:[%s11473_s1 + $0x34c] ss:$16 sps:$4 sm:$0xff]  }
  0x23   :  { %4967 = vmatpush1.bf16.msra.mxu0 %v7580_v34  ;;  %5500 = vmatpush1.bf16.msra.mxu1 %v7581_v35  ;;  %v7673_v34 = vld [vmem:[%s11473_s1 + $0x2ec] ss:$16 sps:$4 sm:$0xff]   ;;  %v7668_v35 = vld [vmem:[%s11473_s1 + $0x2e0] ss:$16 sps:$4 sm:$0xff]  }
  0x24   :  { %4968 = vmatprep.subr.bf16.mxu0 %v7582_v36  ;;  %5501 = vmatprep.subr.bf16.mxu1 %v7584_v37  ;;  %v7671_v36 = vld [vmem:[%s11473_s1 + $0x2e8] ss:$16 sps:$4 sm:$0xff]   ;;  %v7676_v37 = vld [vmem:[%s11473_s1 + $0x304] ss:$16 sps:$4 sm:$0xff]  }
  0x27   :  { %4969 = vmatpush1.bf16.msra.mxu0 %v7586_v38  ;;  %5502 = vmatpush1.bf16.msra.mxu1 %v7587_v39  ;;  %v7679_v38 = vld [vmem:[%s11473_s1 + $0x30c] ss:$16 sps:$4 sm:$0xff]   ;;  %v7674_v39 = vld [vmem:[%s11473_s1 + $0x300] ss:$16 sps:$4 sm:$0xff]  }
  0x28   :  { %4970 = vmatprep.subr.bf16.mxu0 %v7588_v40  ;;  %5503 = vmatprep.subr.bf16.mxu1 %v7590_v41  ;;  %v7677_v40 = vld [vmem:[%s11473_s1 + $0x308] ss:$16 sps:$4 sm:$0xff]   ;;  %v7682_v41 = vld [vmem:[%s11473_s1 + $0x324] ss:$16 sps:$4 sm:$0xff]  }
  0x2b   :  { %4971 = vmatpush1.bf16.msra.mxu0 %v7592_v42  ;;  %5504 = vmatpush1.bf16.msra.mxu1 %v7593_v43  ;;  %v7685_v42 = vld [vmem:[%s11473_s1 + $0x32c] ss:$16 sps:$4 sm:$0xff]   ;;  %v7680_v43 = vld [vmem:[%s11473_s1 + $0x320] ss:$16 sps:$4 sm:$0xff]  }
  0x2c   :  { %4972 = vmatprep.subr.bf16.mxu0 %v7594_v44  ;;  %5505 = vmatprep.subr.bf16.mxu1 %v7596_v45  ;;  %v7683_v44 = vld [vmem:[%s11473_s1 + $0x328] ss:$16 sps:$4 sm:$0xff]   ;;  %v7688_v45 = vld [vmem:[%s11473_s1 + $0x344] ss:$16 sps:$4 sm:$0xff]  }
  0x2f   :  { %4973 = vmatpush1.bf16.msra.mxu0 %v7598_v47  ;;  %5506 = vmatpush1.bf16.msra.mxu1 %v7599_v49  ;;  %v7686_v47 = vld [vmem:[%s11473_s1 + $0x340] ss:$16 sps:$4 sm:$0xff]   ;;  %v7694_v49 = vld [vmem:[%s11473_s1 + $0x364] ss:$16 sps:$4 sm:$0xff]  }
  0x30   :  { %4974 = vmatprep.subr.bf16.mxu0 %v7600_v50  ;;  %5507 = vmatprep.subr.bf16.mxu1 %v7602_v51  ;;  %v7697_v50 = vld [vmem:[%s11473_s1 + $0x36c] ss:$16 sps:$4 sm:$0xff]   ;;  %v7692_v51 = vld [vmem:[%s11473_s1 + $0x360] ss:$16 sps:$4 sm:$0xff]  }
  0x33   :  { %4975 = vmatpush1.bf16.msra.mxu0 %v7604_v52  ;;  %5508 = vmatpush1.bf16.msra.mxu1 %v7605_v53  ;;  %v7695_v52 = vld [vmem:[%s11473_s1 + $0x368] ss:$16 sps:$4 sm:$0xff]   ;;  %v7700_v53 = vld [vmem:[%s11473_s1 + $0x384] ss:$16 sps:$4 sm:$0xff]  }
  0x34   :  { %4976 = vmatprep.subr.bf16.mxu0 %v7606_v54  ;;  %5509 = vmatprep.subr.bf16.mxu1 %v7608_v55  ;;  %v7703_v54 = vld [vmem:[%s11473_s1 + $0x38c] ss:$16 sps:$4 sm:$0xff]   ;;  %v7698_v55 = vld [vmem:[%s11473_s1 + $0x380] ss:$16 sps:$4 sm:$0xff]  }
  0x37   :  { %4977 = vmatpush1.bf16.msra.mxu0 %v7610_v56  ;;  %5510 = vmatpush1.bf16.msra.mxu1 %v7611_v57  ;;  %v7701_v56 = vld [vmem:[%s11473_s1 + $0x388] ss:$16 sps:$4 sm:$0xff]   ;;  %v7706_v57 = vld [vmem:[%s11473_s1 + $0x3a4] ss:$16 sps:$4 sm:$0xff]  }
  0x38   :  { %4978 = vmatprep.subr.bf16.mxu0 %v7612_v58  ;;  %5511 = vmatprep.subr.bf16.mxu1 %v7614_v59  ;;  %v7709_v58 = vld [vmem:[%s11473_s1 + $0x3ac] ss:$16 sps:$4 sm:$0xff]   ;;  %v7704_v59 = vld [vmem:[%s11473_s1 + $0x3a0] ss:$16 sps:$4 sm:$0xff]  }
  0x3b   :  { %4979 = vmatpush1.bf16.msra.mxu0 %v7616_v60  ;;  %5512 = vmatpush1.bf16.msra.mxu1 %v7617_v61  ;;  %v7707_v60 = vld [vmem:[%s11473_s1 + $0x3a8] ss:$16 sps:$4 sm:$0xff]   ;;  %v7712_v61 = vld [vmem:[%s11473_s1 + $0x3c4] ss:$16 sps:$4 sm:$0xff]  }
  0x3c   :  { %4980 = vmatprep.subr.bf16.mxu0 %v7618_v62  ;;  %5513 = vmatprep.subr.bf16.mxu1 %v7620_v63  ;;  %v7715_v62 = vld [vmem:[%s11473_s1 + $0x3cc] ss:$16 sps:$4 sm:$0xff]   ;;  %v7710_v63 = vld [vmem:[%s11473_s1 + $0x3c0] ss:$16 sps:$4 sm:$0xff]  }
  0x3f   :  { %4981 = vmatpush1.bf16.msra.mxu0 %v7622_v0  ;;  %5514 = vmatpush1.bf16.msra.mxu1 %v7623_v1  ;;  %v7713_v0 = vld [vmem:[%s11473_s1 + $0x3c8] ss:$16 sps:$4 sm:$0xff]   ;;  %v7718_v1 = vld [vmem:[%s11473_s1 + $0x3e4] ss:$16 sps:$4 sm:$0xff]  }
  0x40   :  { %4991 = vmatprep.subr.bf16.mxu0 %v7628_v2  ;;  %5524 = vmatprep.subr.bf16.mxu1 %v7631_v3  ;;  %v7721_v2 = vld [vmem:[%s11473_s1 + $0x3ec] ss:$16 sps:$4 sm:$0xff]   ;;  %v7716_v3 = vld [vmem:[%s11473_s1 + $0x3e0] ss:$16 sps:$4 sm:$0xff]  }
  0x42   :  { %4983 = vmatmul.mubr.bf16.vlgmr.msra.gmra.mrb[0].mxu0 %v6485_v4  ;;  %5516 = vmatmul.mubr.bf16.vlgmr.msra.gmra.mrb[0].mxu1 %v6485_v4  ;;  %v7719_v4 = vld [vmem:[%s11473_s1 + $0x3e8] ss:$16 sps:$4 sm:$0xff]  }
  0x43   :  { %4992 = vmatpush1.bf16.msra.mxu0 %v7626_v5  ;;  %5525 = vmatpush1.bf16.msra.mxu1 %v7629_v6  ;;  %v7726_v5 = vld [vmem:[%s11473_s1 + $0x404] ss:$16 sps:$4 sm:$0xff]   ;;  %v7729_v6 = vld [vmem:[%s11473_s1 + $0x40c] ss:$16 sps:$4 sm:$0xff]  }
  0x44   :  { %4993 = vmatprep.subr.bf16.mxu0 %v7634_v7  ;;  %5526 = vmatprep.subr.bf16.mxu1 %v7637_v8  ;;  %v6487_v7 = vcombine.low %v9112_v29, %v9112_v29  ;;  %v7724_v8 = vld [vmem:[%s11473_s1 + $0x400] ss:$16 sps:$4 sm:$0xff]   ;;  %v7759_v29 = vld [vmem:[%s11473_s1 + $0x4ac] ss:$16 sps:$4 sm:$0xff]  }
  0x45   :  { %5023 = vmatprep.mubr.bf16.mxu0 %v6488_v30  ;;  %5556 = vmatprep.mubr.bf16.mxu1 %v6488_v30  ;;  %v7754_v30 = vld [vmem:[%s11473_s1 + $0x4a0] ss:$16 sps:$4 sm:$0xff]  }
  0x47   :  { %4994 = vmatpush1.bf16.msra.mxu0 %v7632_v9  ;;  %5527 = vmatpush1.bf16.msra.mxu1 %v7635_v10  ;;  %v7727_v9 = vld [vmem:[%s11473_s1 + $0x408] ss:$16 sps:$4 sm:$0xff]   ;;  %v7732_v10 = vld [vmem:[%s11473_s1 + $0x424] ss:$16 sps:$4 sm:$0xff]  }
  0x48   :  { %4995 = vmatprep.subr.bf16.mxu0 %v7640_v11  ;;  %5528 = vmatprep.subr.bf16.mxu1 %v7643_v12  ;;  %v9250_v11 = vld [vmem:[%s11474_s0 + $0x10] sm:$0xff]  ;;  %v7735_v12 = vld [vmem:[%s11473_s1 + $0x42c] ss:$16 sps:$4 sm:$0xff]  }
  0x4b   :  { %4996 = vmatpush1.bf16.msra.mxu0 %v7638_v13  ;;  %5529 = vmatpush1.bf16.msra.mxu1 %v7641_v14  ;;  %v6490_v13 = vcombine.high %v9250_v11, %v9250_v11  ;;  %v7730_v14 = vld [vmem:[%s11473_s1 + $0x420] ss:$16 sps:$4 sm:$0xff]  }
  0x4c   :  { %4997 = vmatprep.subr.bf16.mxu0 %v7646_v15  ;;  %5530 = vmatprep.subr.bf16.mxu1 %v7649_v16  ;;  %v7733_v15 = vld [vmem:[%s11473_s1 + $0x428] ss:$16 sps:$4 sm:$0xff]   ;;  %v7738_v16 = vld [vmem:[%s11473_s1 + $0x444] ss:$16 sps:$4 sm:$0xff]  }
  0x4f   :  { %4998 = vmatpush1.bf16.msra.mxu0 %v7644_v17  ;;  %5531 = vmatpush1.bf16.msra.mxu1 %v7647_v18  ;;  %v7741_v17 = vld [vmem:[%s11473_s1 + $0x44c] ss:$16 sps:$4 sm:$0xff]   ;;  %v7736_v18 = vld [vmem:[%s11473_s1 + $0x440] ss:$16 sps:$4 sm:$0xff]  }
  0x50   :  { %4999 = vmatprep.subr.bf16.mxu0 %v7652_v19  ;;  %5532 = vmatprep.subr.bf16.mxu1 %v7655_v20  ;;  %v7739_v19 = vld [vmem:[%s11473_s1 + $0x448] ss:$16 sps:$4 sm:$0xff]   ;;  %v7744_v20 = vld [vmem:[%s11473_s1 + $0x464] ss:$16 sps:$4 sm:$0xff]  }
  0x53   :  { %5000 = vmatpush1.bf16.msra.mxu0 %v7650_v21  ;;  %5533 = vmatpush1.bf16.msra.mxu1 %v7653_v22  ;;  %v7747_v21 = vld [vmem:[%s11473_s1 + $0x46c] ss:$16 sps:$4 sm:$0xff]   ;;  %v7742_v22 = vld [vmem:[%s11473_s1 + $0x460] ss:$16 sps:$4 sm:$0xff]  }
  0x54   :  { %5001 = vmatprep.subr.bf16.mxu0 %v7658_v23  ;;  %5534 = vmatprep.subr.bf16.mxu1 %v7661_v24  ;;  %v7745_v23 = vld [vmem:[%s11473_s1 + $0x468] ss:$16 sps:$4 sm:$0xff]   ;;  %v7750_v24 = vld [vmem:[%s11473_s1 + $0x484] ss:$16 sps:$4 sm:$0xff]  }
  0x57   :  { %5002 = vmatpush1.bf16.msra.mxu0 %v7656_v25  ;;  %5535 = vmatpush1.bf16.msra.mxu1 %v7659_v26  ;;  %v7753_v25 = vld [vmem:[%s11473_s1 + $0x48c] ss:$16 sps:$4 sm:$0xff]   ;;  %v7748_v26 = vld [vmem:[%s11473_s1 + $0x480] ss:$16 sps:$4 sm:$0xff]  }
  0x58   :  { %5003 = vmatprep.subr.bf16.mxu0 %v7664_v27  ;;  %5536 = vmatprep.subr.bf16.mxu1 %v7667_v28  ;;  %v7751_v27 = vld [vmem:[%s11473_s1 + $0x488] ss:$16 sps:$4 sm:$0xff]   ;;  %v7756_v28 = vld [vmem:[%s11473_s1 + $0x4a4] ss:$16 sps:$4 sm:$0xff]  }
  0x5b   :  { %5004 = vmatpush1.bf16.msra.mxu0 %v7662_v31  ;;  %5537 = vmatpush1.bf16.msra.mxu1 %v7665_v32  ;;  %v7757_v31 = vld [vmem:[%s11473_s1 + $0x4a8] ss:$16 sps:$4 sm:$0xff]   ;;  %v7762_v32 = vld [vmem:[%s11473_s1 + $0x4c4] ss:$16 sps:$4 sm:$0xff]  }
  0x5c   :  { %5005 = vmatprep.subr.bf16.mxu0 %v7670_v33  ;;  %5538 = vmatprep.subr.bf16.mxu1 %v7673_v34  ;;  %v7765_v33 = vld [vmem:[%s11473_s1 + $0x4cc] ss:$16 sps:$4 sm:$0xff]   ;;  %v7760_v34 = vld [vmem:[%s11473_s1 + $0x4c0] ss:$16 sps:$4 sm:$0xff]  }
  0x5f   :  { %5006 = vmatpush1.bf16.msra.mxu0 %v7668_v35  ;;  %5539 = vmatpush1.bf16.msra.mxu1 %v7671_v36  ;;  %v7763_v35 = vld [vmem:[%s11473_s1 + $0x4c8] ss:$16 sps:$4 sm:$0xff]   ;;  %v7768_v36 = vld [vmem:[%s11473_s1 + $0x4e4] ss:$16 sps:$4 sm:$0xff]  }
  0x60   :  { %5007 = vmatprep.subr.bf16.mxu0 %v7676_v37  ;;  %5540 = vmatprep.subr.bf16.mxu1 %v7679_v38  ;;  %v7771_v37 = vld [vmem:[%s11473_s1 + $0x4ec] ss:$16 sps:$4 sm:$0xff]   ;;  %v7766_v38 = vld [vmem:[%s11473_s1 + $0x4e0] ss:$16 sps:$4 sm:$0xff]  }
  0x63   :  { %5008 = vmatpush1.bf16.msra.mxu0 %v7674_v39  ;;  %5541 = vmatpush1.bf16.msra.mxu1 %v7677_v40  ;;  %v7769_v39 = vld [vmem:[%s11473_s1 + $0x4e8] ss:$16 sps:$4 sm:$0xff]   ;;  %v7774_v40 = vld [vmem:[%s11473_s1 + $0x504] ss:$16 sps:$4 sm:$0xff]  }
  0x64   :  { %5009 = vmatprep.subr.bf16.mxu0 %v7682_v41  ;;  %5542 = vmatprep.subr.bf16.mxu1 %v7685_v42  ;;  %v7777_v41 = vld [vmem:[%s11473_s1 + $0x50c] ss:$16 sps:$4 sm:$0xff]   ;;  %v7772_v42 = vld [vmem:[%s11473_s1 + $0x500] ss:$16 sps:$4 sm:$0xff]  }
  0x67   :  { %5010 = vmatpush1.bf16.msra.mxu0 %v7680_v43  ;;  %5543 = vmatpush1.bf16.msra.mxu1 %v7683_v44  ;;  %v7775_v43 = vld [vmem:[%s11473_s1 + $0x508] ss:$16 sps:$4 sm:$0xff]   ;;  %v7780_v44 = vld [vmem:[%s11473_s1 + $0x524] ss:$16 sps:$4 sm:$0xff]  }
  0x68   :  { %5011 = vmatprep.subr.bf16.mxu0 %v7688_v45  ;;  %5544 = vmatprep.subr.bf16.mxu1 %v7691_v46  ;;  %v7783_v45 = vld [vmem:[%s11473_s1 + $0x52c] ss:$16 sps:$4 sm:$0xff]   ;;  %v7778_v46 = vld [vmem:[%s11473_s1 + $0x520] ss:$16 sps:$4 sm:$0xff]  }
  0x6b   :  { %5012 = vmatpush1.bf16.msra.mxu0 %v7686_v47  ;;  %5545 = vmatpush1.bf16.msra.mxu1 %v7689_v48  ;;  %v7781_v47 = vld [vmem:[%s11473_s1 + $0x528] ss:$16 sps:$4 sm:$0xff]   ;;  %v7786_v48 = vld [vmem:[%s11473_s1 + $0x544] ss:$16 sps:$4 sm:$0xff]  }
  0x6c   :  { %5013 = vmatprep.subr.bf16.mxu0 %v7694_v49  ;;  %5546 = vmatprep.subr.bf16.mxu1 %v7697_v50  ;;  %v7789_v49 = vld [vmem:[%s11473_s1 + $0x54c] ss:$16 sps:$4 sm:$0xff]   ;;  %v7784_v50 = vld [vmem:[%s11473_s1 + $0x540] ss:$16 sps:$4 sm:$0xff]  }
  0x6f   :  { %5014 = vmatpush1.bf16.msra.mxu0 %v7692_v51  ;;  %5547 = vmatpush1.bf16.msra.mxu1 %v7695_v52  ;;  %v7787_v51 = vld [vmem:[%s11473_s1 + $0x548] ss:$16 sps:$4 sm:$0xff]   ;;  %v7792_v52 = vld [vmem:[%s11473_s1 + $0x564] ss:$16 sps:$4 sm:$0xff]  }
  0x70   :  { %5015 = vmatprep.subr.bf16.mxu0 %v7700_v53  ;;  %5548 = vmatprep.subr.bf16.mxu1 %v7703_v54  ;;  %v7795_v53 = vld [vmem:[%s11473_s1 + $0x56c] ss:$16 sps:$4 sm:$0xff]   ;;  %v7790_v54 = vld [vmem:[%s11473_s1 + $0x560] ss:$16 sps:$4 sm:$0xff]  }
  0x73   :  { %5016 = vmatpush1.bf16.msra.mxu0 %v7698_v55  ;;  %5549 = vmatpush1.bf16.msra.mxu1 %v7701_v56  ;;  %v7793_v55 = vld [vmem:[%s11473_s1 + $0x568] ss:$16 sps:$4 sm:$0xff]   ;;  %v7798_v56 = vld [vmem:[%s11473_s1 + $0x584] ss:$16 sps:$4 sm:$0xff]  }
  0x74   :  { %5017 = vmatprep.subr.bf16.mxu0 %v7706_v57  ;;  %5550 = vmatprep.subr.bf16.mxu1 %v7709_v58  ;;  %v7801_v57 = vld [vmem:[%s11473_s1 + $0x58c] ss:$16 sps:$4 sm:$0xff]   ;;  %v7796_v58 = vld [vmem:[%s11473_s1 + $0x580] ss:$16 sps:$4 sm:$0xff]  }
  0x77   :  { %5018 = vmatpush1.bf16.msra.mxu0 %v7704_v59  ;;  %5551 = vmatpush1.bf16.msra.mxu1 %v7707_v60  ;;  %v7799_v59 = vld [vmem:[%s11473_s1 + $0x588] ss:$16 sps:$4 sm:$0xff]   ;;  %v7804_v60 = vld [vmem:[%s11473_s1 + $0x5a4] ss:$16 sps:$4 sm:$0xff]  }
  0x78   :  { %5019 = vmatprep.subr.bf16.mxu0 %v7712_v61  ;;  %5552 = vmatprep.subr.bf16.mxu1 %v7715_v62  ;;  %v7807_v61 = vld [vmem:[%s11473_s1 + $0x5ac] ss:$16 sps:$4 sm:$0xff]   ;;  %v7802_v62 = vld [vmem:[%s11473_s1 + $0x5a0] ss:$16 sps:$4 sm:$0xff]  }
  0x7b   :  { %5020 = vmatpush1.bf16.msra.mxu0 %v7710_v63  ;;  %5553 = vmatpush1.bf16.msra.mxu1 %v7713_v0  ;;  %v7805_v63 = vld [vmem:[%s11473_s1 + $0x5a8] ss:$16 sps:$4 sm:$0xff]   ;;  %v7810_v0 = vld [vmem:[%s11473_s1 + $0x5c4] ss:$16 sps:$4 sm:$0xff]  }
  0x7c   :  { %5021 = vmatprep.subr.bf16.mxu0 %v7718_v1  ;;  %5554 = vmatprep.subr.bf16.mxu1 %v7721_v2  ;;  %v7813_v1 = vld [vmem:[%s11473_s1 + $0x5cc] ss:$16 sps:$4 sm:$0xff]   ;;  %v7808_v2 = vld [vmem:[%s11473_s1 + $0x5c0] ss:$16 sps:$4 sm:$0xff]  }
  0x7f   :  { %5022 = vmatpush1.bf16.msra.mxu0 %v7716_v3  ;;  %5555 = vmatpush1.bf16.msra.mxu1 %v7719_v4  ;;  %v7811_v3 = vld [vmem:[%s11473_s1 + $0x5c8] ss:$16 sps:$4 sm:$0xff]   ;;  %v7816_v4 = vld [vmem:[%s11473_s1 + $0x5e4] ss:$16 sps:$4 sm:$0xff]  }
  0x80   :  { %5032 = vmatprep.subr.bf16.mxu0 %v7726_v5  ;;  %5565 = vmatprep.subr.bf16.mxu1 %v7729_v6  ;;  %v7819_v5 = vld [vmem:[%s11473_s1 + $0x5ec] ss:$16 sps:$4 sm:$0xff]   ;;  %v7814_v6 = vld [vmem:[%s11473_s1 + $0x5e0] ss:$16 sps:$4 sm:$0xff]  }
  0x82   :  { %5024 = vmatmul.mubr.bf16.vlgmr.msra.gmra.mrb[0].mxu0 %v6487_v7  ;;  %5557 = vmatmul.mubr.bf16.vlgmr.msra.gmra.mrb[0].mxu1 %v6487_v7  ;;  %v7817_v7 = vld [vmem:[%s11473_s1 + $0x5e8] ss:$16 sps:$4 sm:$0xff]  }
  0x83   :  { %5033 = vmatpush1.bf16.msra.mxu0 %v7724_v8  ;;  %5566 = vmatpush1.bf16.msra.mxu1 %v7727_v9  ;;  %v7824_v8 = vld [vmem:[%s11473_s1 + $0x604] ss:$16 sps:$4 sm:$0xff]   ;;  %v7827_v9 = vld [vmem:[%s11473_s1 + $0x60c] ss:$16 sps:$4 sm:$0xff]  }
  0x84   :  { %5034 = vmatprep.subr.bf16.mxu0 %v7732_v10  ;;  %5567 = vmatprep.subr.bf16.mxu1 %v7735_v12  ;;  %v7822_v10 = vld [vmem:[%s11473_s1 + $0x600] ss:$16 sps:$4 sm:$0xff]   ;;  %v6489_v12 = vcombine.low %v9250_v11, %v9250_v11  ;;  %v7833_v11 = vld [vmem:[%s11473_s1 + $0x62c] ss:$16 sps:$4 sm:$0xff]  }
  0x85   :  { %5064 = vmatprep.mubr.bf16.mxu0 %v6490_v13  ;;  %5597 = vmatprep.mubr.bf16.mxu1 %v6490_v13  ;;  %v7825_v13 = vld [vmem:[%s11473_s1 + $0x608] ss:$16 sps:$4 sm:$0xff]  }
  0x87   :  { %5035 = vmatpush1.bf16.msra.mxu0 %v7730_v14  ;;  %5568 = vmatpush1.bf16.msra.mxu1 %v7733_v15  ;;  %v9448_v14 = vld [vmem:[%s11474_s0 + $0x18] sm:$0xff]  ;;  %v7830_v15 = vld [vmem:[%s11473_s1 + $0x624] ss:$16 sps:$4 sm:$0xff]  }
  0x88   :  { %5036 = vmatprep.subr.bf16.mxu0 %v7738_v16  ;;  %5569 = vmatprep.subr.bf16.mxu1 %v7741_v17  ;;  %v6492_v16 = vcombine.high %v9448_v14, %v9448_v14  ;;  %v7828_v17 = vld [vmem:[%s11473_s1 + $0x620] ss:$16 sps:$4 sm:$0xff]  }
  0x8b   :  { %5037 = vmatpush1.bf16.msra.mxu0 %v7736_v18  ;;  %5570 = vmatpush1.bf16.msra.mxu1 %v7739_v19  ;;  %v7831_v18 = vld [vmem:[%s11473_s1 + $0x628] ss:$16 sps:$4 sm:$0xff]   ;;  %v7836_v19 = vld [vmem:[%s11473_s1 + $0x644] ss:$16 sps:$4 sm:$0xff]  }
  0x8c   :  { %5038 = vmatprep.subr.bf16.mxu0 %v7744_v20  ;;  %5571 = vmatprep.subr.bf16.mxu1 %v7747_v21  ;;  %v7839_v20 = vld [vmem:[%s11473_s1 + $0x64c] ss:$16 sps:$4 sm:$0xff]   ;;  %v7834_v21 = vld [vmem:[%s11473_s1 + $0x640] ss:$16 sps:$4 sm:$0xff]  }
  0x8f   :  { %5039 = vmatpush1.bf16.msra.mxu0 %v7742_v22  ;;  %5572 = vmatpush1.bf16.msra.mxu1 %v7745_v23  ;;  %v7837_v22 = vld [vmem:[%s11473_s1 + $0x648] ss:$16 sps:$4 sm:$0xff]   ;;  %v7842_v23 = vld [vmem:[%s11473_s1 + $0x664] ss:$16 sps:$4 sm:$0xff]  }
  0x90   :  { %5040 = vmatprep.subr.bf16.mxu0 %v7750_v24  ;;  %5573 = vmatprep.subr.bf16.mxu1 %v7753_v25  ;;  %v7845_v24 = vld [vmem:[%s11473_s1 + $0x66c] ss:$16 sps:$4 sm:$0xff]   ;;  %v7840_v25 = vld [vmem:[%s11473_s1 + $0x660] ss:$16 sps:$4 sm:$0xff]  }
  0x93   :  { %5041 = vmatpush1.bf16.msra.mxu0 %v7748_v26  ;;  %5574 = vmatpush1.bf16.msra.mxu1 %v7751_v27  ;;  %v7843_v26 = vld [vmem:[%s11473_s1 + $0x668] ss:$16 sps:$4 sm:$0xff]   ;;  %v7848_v27 = vld [vmem:[%s11473_s1 + $0x684] ss:$16 sps:$4 sm:$0xff]  }
  0x94   :  { %5042 = vmatprep.subr.bf16.mxu0 %v7756_v28  ;;  %5575 = vmatprep.subr.bf16.mxu1 %v7759_v29  ;;  %v7851_v28 = vld [vmem:[%s11473_s1 + $0x68c] ss:$16 sps:$4 sm:$0xff]   ;;  %v7846_v29 = vld [vmem:[%s11473_s1 + $0x680] ss:$16 sps:$4 sm:$0xff]  }
  0x97   :  { %5043 = vmatpush1.bf16.msra.mxu0 %v7754_v30  ;;  %5576 = vmatpush1.bf16.msra.mxu1 %v7757_v31  ;;  %v7849_v30 = vld [vmem:[%s11473_s1 + $0x688] ss:$16 sps:$4 sm:$0xff]   ;;  %v7854_v31 = vld [vmem:[%s11473_s1 + $0x6a4] ss:$16 sps:$4 sm:$0xff]  }
  0x98   :  { %5044 = vmatprep.subr.bf16.mxu0 %v7762_v32  ;;  %5577 = vmatprep.subr.bf16.mxu1 %v7765_v33  ;;  %v7857_v32 = vld [vmem:[%s11473_s1 + $0x6ac] ss:$16 sps:$4 sm:$0xff]   ;;  %v7852_v33 = vld [vmem:[%s11473_s1 + $0x6a0] ss:$16 sps:$4 sm:$0xff]  }
  0x9b   :  { %5045 = vmatpush1.bf16.msra.mxu0 %v7760_v34  ;;  %5578 = vmatpush1.bf16.msra.mxu1 %v7763_v35  ;;  %v7855_v34 = vld [vmem:[%s11473_s1 + $0x6a8] ss:$16 sps:$4 sm:$0xff]   ;;  %v7860_v35 = vld [vmem:[%s11473_s1 + $0x6c4] ss:$16 sps:$4 sm:$0xff]  }
  0x9c   :  { %5046 = vmatprep.subr.bf16.mxu0 %v7768_v36  ;;  %5579 = vmatprep.subr.bf16.mxu1 %v7771_v37  ;;  %v7863_v36 = vld [vmem:[%s11473_s1 + $0x6cc] ss:$16 sps:$4 sm:$0xff]   ;;  %v7858_v37 = vld [vmem:[%s11473_s1 + $0x6c0] ss:$16 sps:$4 sm:$0xff]  }
  0x9f   :  { %5047 = vmatpush1.bf16.msra.mxu0 %v7766_v38  ;;  %5580 = vmatpush1.bf16.msra.mxu1 %v7769_v39  ;;  %v7861_v38 = vld [vmem:[%s11473_s1 + $0x6c8] ss:$16 sps:$4 sm:$0xff]   ;;  %v7866_v39 = vld [vmem:[%s11473_s1 + $0x6e4] ss:$16 sps:$4 sm:$0xff]  }
  0xa0   :  { %5048 = vmatprep.subr.bf16.mxu0 %v7774_v40  ;;  %5581 = vmatprep.subr.bf16.mxu1 %v7777_v41  ;;  %v7869_v40 = vld [vmem:[%s11473_s1 + $0x6ec] ss:$16 sps:$4 sm:$0xff]   ;;  %v7864_v41 = vld [vmem:[%s11473_s1 + $0x6e0] ss:$16 sps:$4 sm:$0xff]  }
  0xa3   :  { %5049 = vmatpush1.bf16.msra.mxu0 %v7772_v42  ;;  %5582 = vmatpush1.bf16.msra.mxu1 %v7775_v43  ;;  %v7867_v42 = vld [vmem:[%s11473_s1 + $0x6e8] ss:$16 sps:$4 sm:$0xff]   ;;  %v7872_v43 = vld [vmem:[%s11473_s1 + $0x704] ss:$16 sps:$4 sm:$0xff]  }
  0xa4   :  { %5050 = vmatprep.subr.bf16.mxu0 %v7780_v44  ;;  %5583 = vmatprep.subr.bf16.mxu1 %v7783_v45  ;;  %v7875_v44 = vld [vmem:[%s11473_s1 + $0x70c] ss:$16 sps:$4 sm:$0xff]   ;;  %v7870_v45 = vld [vmem:[%s11473_s1 + $0x700] ss:$16 sps:$4 sm:$0xff]  }
  0xa7   :  { %5051 = vmatpush1.bf16.msra.mxu0 %v7778_v46  ;;  %5584 = vmatpush1.bf16.msra.mxu1 %v7781_v47  ;;  %v7873_v46 = vld [vmem:[%s11473_s1 + $0x708] ss:$16 sps:$4 sm:$0xff]   ;;  %v7878_v47 = vld [vmem:[%s11473_s1 + $0x724] ss:$16 sps:$4 sm:$0xff]  }
  0xa8   :  { %5052 = vmatprep.subr.bf16.mxu0 %v7786_v48  ;;  %5585 = vmatprep.subr.bf16.mxu1 %v7789_v49  ;;  %v7881_v48 = vld [vmem:[%s11473_s1 + $0x72c] ss:$16 sps:$4 sm:$0xff]   ;;  %v7876_v49 = vld [vmem:[%s11473_s1 + $0x720] ss:$16 sps:$4 sm:$0xff]  }
  0xab   :  { %5053 = vmatpush1.bf16.msra.mxu0 %v7784_v50  ;;  %5586 = vmatpush1.bf16.msra.mxu1 %v7787_v51  ;;  %v7879_v50 = vld [vmem:[%s11473_s1 + $0x728] ss:$16 sps:$4 sm:$0xff]   ;;  %v7884_v51 = vld [vmem:[%s11473_s1 + $0x744] ss:$16 sps:$4 sm:$0xff]  }
  0xac   :  { %5054 = vmatprep.subr.bf16.mxu0 %v7792_v52  ;;  %5587 = vmatprep.subr.bf16.mxu1 %v7795_v53  ;;  %v7887_v52 = vld [vmem:[%s11473_s1 + $0x74c] ss:$16 sps:$4 sm:$0xff]   ;;  %v7882_v53 = vld [vmem:[%s11473_s1 + $0x740] ss:$16 sps:$4 sm:$0xff]  }
  0xaf   :  { %5055 = vmatpush1.bf16.msra.mxu0 %v7790_v54  ;;  %5588 = vmatpush1.bf16.msra.mxu1 %v7793_v55  ;;  %v7885_v54 = vld [vmem:[%s11473_s1 + $0x748] ss:$16 sps:$4 sm:$0xff]   ;;  %v7890_v55 = vld [vmem:[%s11473_s1 + $0x764] ss:$16 sps:$4 sm:$0xff]  }
  0xb0   :  { %5056 = vmatprep.subr.bf16.mxu0 %v7798_v56  ;;  %5589 = vmatprep.subr.bf16.mxu1 %v7801_v57  ;;  %v7893_v56 = vld [vmem:[%s11473_s1 + $0x76c] ss:$16 sps:$4 sm:$0xff]   ;;  %v7888_v57 = vld [vmem:[%s11473_s1 + $0x760] ss:$16 sps:$4 sm:$0xff]  }
  0xb3   :  { %5057 = vmatpush1.bf16.msra.mxu0 %v7796_v58  ;;  %5590 = vmatpush1.bf16.msra.mxu1 %v7799_v59  ;;  %v7891_v58 = vld [vmem:[%s11473_s1 + $0x768] ss:$16 sps:$4 sm:$0xff]   ;;  %v7896_v59 = vld [vmem:[%s11473_s1 + $0x784] ss:$16 sps:$4 sm:$0xff]  }
  0xb4   :  { %5058 = vmatprep.subr.bf16.mxu0 %v7804_v60  ;;  %5591 = vmatprep.subr.bf16.mxu1 %v7807_v61  ;;  %v7899_v60 = vld [vmem:[%s11473_s1 + $0x78c] ss:$16 sps:$4 sm:$0xff]   ;;  %v7894_v61 = vld [vmem:[%s11473_s1 + $0x780] ss:$16 sps:$4 sm:$0xff]  }
  0xb7   :  { %5059 = vmatpush1.bf16.msra.mxu0 %v7802_v62  ;;  %5592 = vmatpush1.bf16.msra.mxu1 %v7805_v63  ;;  %v7897_v62 = vld [vmem:[%s11473_s1 + $0x788] ss:$16 sps:$4 sm:$0xff]   ;;  %v7902_v63 = vld [vmem:[%s11473_s1 + $0x7a4] ss:$16 sps:$4 sm:$0xff]  }
  0xb8   :  { %5060 = vmatprep.subr.bf16.mxu0 %v7810_v0  ;;  %5593 = vmatprep.subr.bf16.mxu1 %v7813_v1  ;;  %v7905_v0 = vld [vmem:[%s11473_s1 + $0x7ac] ss:$16 sps:$4 sm:$0xff]   ;;  %v7900_v1 = vld [vmem:[%s11473_s1 + $0x7a0] ss:$16 sps:$4 sm:$0xff]  }
  0xbb   :  { %5061 = vmatpush1.bf16.msra.mxu0 %v7808_v2  ;;  %5594 = vmatpush1.bf16.msra.mxu1 %v7811_v3  ;;  %v7903_v2 = vld [vmem:[%s11473_s1 + $0x7a8] ss:$16 sps:$4 sm:$0xff]   ;;  %v7908_v3 = vld [vmem:[%s11473_s1 + $0x7c4] ss:$16 sps:$4 sm:$0xff]  }
  0xbc   :  { %5062 = vmatprep.subr.bf16.mxu0 %v7816_v4  ;;  %5595 = vmatprep.subr.bf16.mxu1 %v7819_v5  ;;  %v7911_v4 = vld [vmem:[%s11473_s1 + $0x7cc] ss:$16 sps:$4 sm:$0xff]   ;;  %v7906_v5 = vld [vmem:[%s11473_s1 + $0x7c0] ss:$16 sps:$4 sm:$0xff]  }
  0xbf   :  { %5063 = vmatpush1.bf16.msra.mxu0 %v7814_v6  ;;  %5596 = vmatpush1.bf16.msra.mxu1 %v7817_v7  ;;  %v7909_v6 = vld [vmem:[%s11473_s1 + $0x7c8] ss:$16 sps:$4 sm:$0xff]   ;;  %v7914_v7 = vld [vmem:[%s11473_s1 + $0x7e4] ss:$16 sps:$4 sm:$0xff]  }
  0xc0   :  { %5073 = vmatprep.subr.bf16.mxu0 %v7824_v8  ;;  %5606 = vmatprep.subr.bf16.mxu1 %v7827_v9  ;;  %v7917_v8 = vld [vmem:[%s11473_s1 + $0x7ec] ss:$16 sps:$4 sm:$0xff]   ;;  %v7912_v9 = vld [vmem:[%s11473_s1 + $0x7e0] ss:$16 sps:$4 sm:$0xff]  }
  0xc2   :  { %5065 = vmatmul.mubr.bf16.vlgmr.msra.gmra.mrb[0].mxu0 %v6489_v12  ;;  %5598 = vmatmul.mubr.bf16.vlgmr.msra.gmra.mrb[0].mxu1 %v6489_v12  ;;  %v7922_v12 = vld [vmem:[%s11473_s1 + $0x804] ss:$16 sps:$4 sm:$0xff]  }
  0xc3   :  { %5074 = vmatpush1.bf16.msra.mxu0 %v7822_v10  ;;  %5607 = vmatpush1.bf16.msra.mxu1 %v7825_v13  ;;  %v7915_v10 = vld [vmem:[%s11473_s1 + $0x7e8] ss:$16 sps:$4 sm:$0xff]   ;;  %v7925_v13 = vld [vmem:[%s11473_s1 + $0x80c] ss:$16 sps:$4 sm:$0xff]  }
  0xc4   :  { %5075 = vmatprep.subr.bf16.mxu0 %v7830_v15  ;;  %5608 = vmatprep.subr.bf16.mxu1 %v7833_v11  ;;  %v7920_v15 = vld [vmem:[%s11473_s1 + $0x800] ss:$16 sps:$4 sm:$0xff]   ;;  %v6491_v11 = vcombine.low %v9448_v14, %v9448_v14  ;;  %v7931_v14 = vld [vmem:[%s11473_s1 + $0x82c] ss:$16 sps:$4 sm:$0xff]  }
  0xc5   :  { %5105 = vmatprep.mubr.bf16.mxu0 %v6492_v16  ;;  %5638 = vmatprep.mubr.bf16.mxu1 %v6492_v16  ;;  %v9646_v16 = vld [vmem:[%s11474_s0 + $0x20] sm:$0xff] }
  0xc7   :  { %5076 = vmatpush1.bf16.msra.mxu0 %v7828_v17  ;;  %5609 = vmatpush1.bf16.msra.mxu1 %v7831_v18  ;;  %v7923_v17 = vld [vmem:[%s11473_s1 + $0x808] ss:$16 sps:$4 sm:$0xff]   ;;  %v7928_v18 = vld [vmem:[%s11473_s1 + $0x824] ss:$16 sps:$4 sm:$0xff]  }
  0xc8   :  { %5077 = vmatprep.subr.bf16.mxu0 %v7836_v19  ;;  %5610 = vmatprep.subr.bf16.mxu1 %v7839_v20  ;;  %v6494_v19 = vcombine.high %v9646_v16, %v9646_v16  ;;  %v7926_v20 = vld [vmem:[%s11473_s1 + $0x820] ss:$16 sps:$4 sm:$0xff]  }
  0xcb   :  { %5078 = vmatpush1.bf16.msra.mxu0 %v7834_v21  ;;  %5611 = vmatpush1.bf16.msra.mxu1 %v7837_v22  ;;  %v7929_v21 = vld [vmem:[%s11473_s1 + $0x828] ss:$16 sps:$4 sm:$0xff]   ;;  %v7934_v22 = vld [vmem:[%s11473_s1 + $0x844] ss:$16 sps:$4 sm:$0xff]  }
  0xcc   :  { %5079 = vmatprep.subr.bf16.mxu0 %v7842_v23  ;;  %5612 = vmatprep.subr.bf16.mxu1 %v7845_v24  ;;  %v7937_v23 = vld [vmem:[%s11473_s1 + $0x84c] ss:$16 sps:$4 sm:$0xff]   ;;  %v7932_v24 = vld [vmem:[%s11473_s1 + $0x840] ss:$16 sps:$4 sm:$0xff]  }
  0xcf   :  { %5080 = vmatpush1.bf16.msra.mxu0 %v7840_v25  ;;  %5613 = vmatpush1.bf16.msra.mxu1 %v7843_v26  ;;  %v7935_v25 = vld [vmem:[%s11473_s1 + $0x848] ss:$16 sps:$4 sm:$0xff]   ;;  %v7940_v26 = vld [vmem:[%s11473_s1 + $0x864] ss:$16 sps:$4 sm:$0xff]  }
  0xd0   :  { %5081 = vmatprep.subr.bf16.mxu0 %v7848_v27  ;;  %5614 = vmatprep.subr.bf16.mxu1 %v7851_v28  ;;  %v7943_v27 = vld [vmem:[%s11473_s1 + $0x86c] ss:$16 sps:$4 sm:$0xff]   ;;  %v7938_v28 = vld [vmem:[%s11473_s1 + $0x860] ss:$16 sps:$4 sm:$0xff]  }
  0xd3   :  { %5082 = vmatpush1.bf16.msra.mxu0 %v7846_v29  ;;  %5615 = vmatpush1.bf16.msra.mxu1 %v7849_v30  ;;  %v7941_v29 = vld [vmem:[%s11473_s1 + $0x868] ss:$16 sps:$4 sm:$0xff]   ;;  %v7946_v30 = vld [vmem:[%s11473_s1 + $0x884] ss:$16 sps:$4 sm:$0xff]  }
  0xd4   :  { %5083 = vmatprep.subr.bf16.mxu0 %v7854_v31  ;;  %5616 = vmatprep.subr.bf16.mxu1 %v7857_v32  ;;  %v7949_v31 = vld [vmem:[%s11473_s1 + $0x88c] ss:$16 sps:$4 sm:$0xff]   ;;  %v7944_v32 = vld [vmem:[%s11473_s1 + $0x880] ss:$16 sps:$4 sm:$0xff]  }
  0xd7   :  { %5084 = vmatpush1.bf16.msra.mxu0 %v7852_v33  ;;  %5617 = vmatpush1.bf16.msra.mxu1 %v7855_v34  ;;  %v7947_v33 = vld [vmem:[%s11473_s1 + $0x888] ss:$16 sps:$4 sm:$0xff]   ;;  %v7952_v34 = vld [vmem:[%s11473_s1 + $0x8a4] ss:$16 sps:$4 sm:$0xff]  }
  0xd8   :  { %5085 = vmatprep.subr.bf16.mxu0 %v7860_v35  ;;  %5618 = vmatprep.subr.bf16.mxu1 %v7863_v36  ;;  %v7955_v35 = vld [vmem:[%s11473_s1 + $0x8ac] ss:$16 sps:$4 sm:$0xff]   ;;  %v7950_v36 = vld [vmem:[%s11473_s1 + $0x8a0] ss:$16 sps:$4 sm:$0xff]  }
  0xdb   :  { %5086 = vmatpush1.bf16.msra.mxu0 %v7858_v37  ;;  %5619 = vmatpush1.bf16.msra.mxu1 %v7861_v38  ;;  %v7953_v37 = vld [vmem:[%s11473_s1 + $0x8a8] ss:$16 sps:$4 sm:$0xff]   ;;  %v7958_v38 = vld [vmem:[%s11473_s1 + $0x8c4] ss:$16 sps:$4 sm:$0xff]  }
  0xdc   :  { %5087 = vmatprep.subr.bf16.mxu0 %v7866_v39  ;;  %5620 = vmatprep.subr.bf16.mxu1 %v7869_v40  ;;  %v7961_v39 = vld [vmem:[%s11473_s1 + $0x8cc] ss:$16 sps:$4 sm:$0xff]   ;;  %v7956_v40 = vld [vmem:[%s11473_s1 + $0x8c0] ss:$16 sps:$4 sm:$0xff]  }
  0xdf   :  { %5088 = vmatpush1.bf16.msra.mxu0 %v7864_v41  ;;  %5621 = vmatpush1.bf16.msra.mxu1 %v7867_v42  ;;  %v7959_v41 = vld [vmem:[%s11473_s1 + $0x8c8] ss:$16 sps:$4 sm:$0xff]   ;;  %v7964_v42 = vld [vmem:[%s11473_s1 + $0x8e4] ss:$16 sps:$4 sm:$0xff]  }
  0xe0   :  { %5089 = vmatprep.subr.bf16.mxu0 %v7872_v43  ;;  %5622 = vmatprep.subr.bf16.mxu1 %v7875_v44  ;;  %v7967_v43 = vld [vmem:[%s11473_s1 + $0x8ec] ss:$16 sps:$4 sm:$0xff]   ;;  %v7962_v44 = vld [vmem:[%s11473_s1 + $0x8e0] ss:$16 sps:$4 sm:$0xff]  }
  0xe3   :  { %5090 = vmatpush1.bf16.msra.mxu0 %v7870_v45  ;;  %5623 = vmatpush1.bf16.msra.mxu1 %v7873_v46  ;;  %v7965_v45 = vld [vmem:[%s11473_s1 + $0x8e8] ss:$16 sps:$4 sm:$0xff]   ;;  %v7970_v46 = vld [vmem:[%s11473_s1 + $0x904] ss:$16 sps:$4 sm:$0xff]  }
  0xe4   :  { %5091 = vmatprep.subr.bf16.mxu0 %v7878_v47  ;;  %5624 = vmatprep.subr.bf16.mxu1 %v7881_v48  ;;  %v7973_v47 = vld [vmem:[%s11473_s1 + $0x90c] ss:$16 sps:$4 sm:$0xff]   ;;  %v7968_v48 = vld [vmem:[%s11473_s1 + $0x900] ss:$16 sps:$4 sm:$0xff]  }
  0xe7   :  { %5092 = vmatpush1.bf16.msra.mxu0 %v7876_v49  ;;  %5625 = vmatpush1.bf16.msra.mxu1 %v7879_v50  ;;  %v7971_v49 = vld [vmem:[%s11473_s1 + $0x908] ss:$16 sps:$4 sm:$0xff]   ;;  %v7976_v50 = vld [vmem:[%s11473_s1 + $0x924] ss:$16 sps:$4 sm:$0xff]  }
  0xe8   :  { %5093 = vmatprep.subr.bf16.mxu0 %v7884_v51  ;;  %5626 = vmatprep.subr.bf16.mxu1 %v7887_v52  ;;  %v7979_v51 = vld [vmem:[%s11473_s1 + $0x92c] ss:$16 sps:$4 sm:$0xff]   ;;  %v7974_v52 = vld [vmem:[%s11473_s1 + $0x920] ss:$16 sps:$4 sm:$0xff]  }
  0xeb   :  { %5094 = vmatpush1.bf16.msra.mxu0 %v7882_v53  ;;  %5627 = vmatpush1.bf16.msra.mxu1 %v7885_v54  ;;  %v7977_v53 = vld [vmem:[%s11473_s1 + $0x928] ss:$16 sps:$4 sm:$0xff]   ;;  %v7982_v54 = vld [vmem:[%s11473_s1 + $0x944] ss:$16 sps:$4 sm:$0xff]  }
  0xec   :  { %5095 = vmatprep.subr.bf16.mxu0 %v7890_v55  ;;  %5628 = vmatprep.subr.bf16.mxu1 %v7893_v56  ;;  %v7985_v55 = vld [vmem:[%s11473_s1 + $0x94c] ss:$16 sps:$4 sm:$0xff]   ;;  %v7980_v56 = vld [vmem:[%s11473_s1 + $0x940] ss:$16 sps:$4 sm:$0xff]  }
  0xef   :  { %5096 = vmatpush1.bf16.msra.mxu0 %v7888_v57  ;;  %5629 = vmatpush1.bf16.msra.mxu1 %v7891_v58  ;;  %v7983_v57 = vld [vmem:[%s11473_s1 + $0x948] ss:$16 sps:$4 sm:$0xff]   ;;  %v7988_v58 = vld [vmem:[%s11473_s1 + $0x964] ss:$16 sps:$4 sm:$0xff]  }
  0xf0   :  { %5097 = vmatprep.subr.bf16.mxu0 %v7896_v59  ;;  %5630 = vmatprep.subr.bf16.mxu1 %v7899_v60  ;;  %v7991_v59 = vld [vmem:[%s11473_s1 + $0x96c] ss:$16 sps:$4 sm:$0xff]   ;;  %v7986_v60 = vld [vmem:[%s11473_s1 + $0x960] ss:$16 sps:$4 sm:$0xff]  }
  0xf3   :  { %5098 = vmatpush1.bf16.msra.mxu0 %v7894_v61  ;;  %5631 = vmatpush1.bf16.msra.mxu1 %v7897_v62  ;;  %v7989_v61 = vld [vmem:[%s11473_s1 + $0x968] ss:$16 sps:$4 sm:$0xff]   ;;  %v7994_v62 = vld [vmem:[%s11473_s1 + $0x984] ss:$16 sps:$4 sm:$0xff]  }
  0xf4   :  { %5099 = vmatprep.subr.bf16.mxu0 %v7902_v63  ;;  %5632 = vmatprep.subr.bf16.mxu1 %v7905_v0  ;;  %v7997_v63 = vld [vmem:[%s11473_s1 + $0x98c] ss:$16 sps:$4 sm:$0xff]   ;;  %v7992_v0 = vld [vmem:[%s11473_s1 + $0x980] ss:$16 sps:$4 sm:$0xff]  }
  0xf7   :  { %5100 = vmatpush1.bf16.msra.mxu0 %v7900_v1  ;;  %5633 = vmatpush1.bf16.msra.mxu1 %v7903_v2  ;;  %v7995_v1 = vld [vmem:[%s11473_s1 + $0x988] ss:$16 sps:$4 sm:$0xff]   ;;  %v8000_v2 = vld [vmem:[%s11473_s1 + $0x9a4] ss:$16 sps:$4 sm:$0xff]  }
  0xf8   :  { %5101 = vmatprep.subr.bf16.mxu0 %v7908_v3  ;;  %5634 = vmatprep.subr.bf16.mxu1 %v7911_v4  ;;  %v8003_v3 = vld [vmem:[%s11473_s1 + $0x9ac] ss:$16 sps:$4 sm:$0xff]   ;;  %v7998_v4 = vld [vmem:[%s11473_s1 + $0x9a0] ss:$16 sps:$4 sm:$0xff]  }
  0xfb   :  { %5102 = vmatpush1.bf16.msra.mxu0 %v7906_v5  ;;  %5635 = vmatpush1.bf16.msra.mxu1 %v7909_v6  ;;  %v8001_v5 = vld [vmem:[%s11473_s1 + $0x9a8] ss:$16 sps:$4 sm:$0xff]   ;;  %v8006_v6 = vld [vmem:[%s11473_s1 + $0x9c4] ss:$16 sps:$4 sm:$0xff]  }
  0xfc   :  { %5103 = vmatprep.subr.bf16.mxu0 %v7914_v7  ;;  %5636 = vmatprep.subr.bf16.mxu1 %v7917_v8  ;;  %v8009_v7 = vld [vmem:[%s11473_s1 + $0x9cc] ss:$16 sps:$4 sm:$0xff]   ;;  %v8004_v8 = vld [vmem:[%s11473_s1 + $0x9c0] ss:$16 sps:$4 sm:$0xff]  }
  0xff   :  { %5104 = vmatpush1.bf16.msra.mxu0 %v7912_v9  ;;  %5637 = vmatpush1.bf16.msra.mxu1 %v7915_v10  ;;  %v8007_v9 = vld [vmem:[%s11473_s1 + $0x9c8] ss:$16 sps:$4 sm:$0xff]   ;;  %v8012_v10 = vld [vmem:[%s11473_s1 + $0x9e4] ss:$16 sps:$4 sm:$0xff]  }
 0x100   :  { %5114 = vmatprep.subr.bf16.mxu0 %v7922_v12  ;;  %5647 = vmatprep.subr.bf16.mxu1 %v7925_v13  ;;  %v8015_v12 = vld [vmem:[%s11473_s1 + $0x9ec] ss:$16 sps:$4 sm:$0xff]   ;;  %v8010_v13 = vld [vmem:[%s11473_s1 + $0x9e0] ss:$16 sps:$4 sm:$0xff]  }
 0x102   :  { %5106 = vmatmul.mubr.bf16.vlgmr.msra.gmra.mrb[0].mxu0 %v6491_v11  ;;  %5639 = vmatmul.mubr.bf16.vlgmr.msra.gmra.mrb[0].mxu1 %v6491_v11  ;;  %v8020_v11 = vld [vmem:[%s11473_s1 + $0xa04] ss:$16 sps:$4 sm:$0xff]  }
 0x103   :  { %5115 = vmatpush1.bf16.msra.mxu0 %v7920_v15  ;;  %5648 = vmatpush1.bf16.msra.mxu1 %v7923_v17  ;;  %v8013_v15 = vld [vmem:[%s11473_s1 + $0x9e8] ss:$16 sps:$4 sm:$0xff]   ;;  %v8023_v17 = vld [vmem:[%s11473_s1 + $0xa0c] ss:$16 sps:$4 sm:$0xff]  }
 0x104   :  { %5116 = vmatprep.subr.bf16.mxu0 %v7928_v18  ;;  %5649 = vmatprep.subr.bf16.mxu1 %v7931_v14  ;;  %v9842_v18 = vld [vmem:[%s11474_s0 + $0x28] sm:$0xff]  ;;  %v6493_v14 = vcombine.low %v9646_v16, %v9646_v16 }
 0x105   :  { %5146 = vmatprep.mubr.bf16.mxu0 %v6494_v19  ;;  %5679 = vmatprep.mubr.bf16.mxu1 %v6494_v19  ;;  %v8018_v19 = vld [vmem:[%s11473_s1 + $0xa00] ss:$16 sps:$4 sm:$0xff]   ;;  %v8029_v16 = vld [vmem:[%s11473_s1 + $0xa2c] ss:$16 sps:$4 sm:$0xff]  }
 0x107   :  { %5117 = vmatpush1.bf16.msra.mxu0 %v7926_v20  ;;  %5650 = vmatpush1.bf16.msra.mxu1 %v7929_v21  ;;  %v8021_v20 = vld [vmem:[%s11473_s1 + $0xa08] ss:$16 sps:$4 sm:$0xff]   ;;  %v8026_v21 = vld [vmem:[%s11473_s1 + $0xa24] ss:$16 sps:$4 sm:$0xff]  }
 0x108   :  { %5118 = vmatprep.subr.bf16.mxu0 %v7934_v22  ;;  %5651 = vmatprep.subr.bf16.mxu1 %v7937_v23  ;;  %v6496_v22 = vcombine.high %v9842_v18, %v9842_v18  ;;  %v8024_v23 = vld [vmem:[%s11473_s1 + $0xa20] ss:$16 sps:$4 sm:$0xff]  }
 0x10b   :  { %5119 = vmatpush1.bf16.msra.mxu0 %v7932_v24  ;;  %5652 = vmatpush1.bf16.msra.mxu1 %v7935_v25  ;;  %v8027_v24 = vld [vmem:[%s11473_s1 + $0xa28] ss:$16 sps:$4 sm:$0xff]   ;;  %v8032_v25 = vld [vmem:[%s11473_s1 + $0xa44] ss:$16 sps:$4 sm:$0xff]  }
 0x10c   :  { %5120 = vmatprep.subr.bf16.mxu0 %v7940_v26  ;;  %5653 = vmatprep.subr.bf16.mxu1 %v7943_v27  ;;  %v8035_v26 = vld [vmem:[%s11473_s1 + $0xa4c] ss:$16 sps:$4 sm:$0xff]   ;;  %v8030_v27 = vld [vmem:[%s11473_s1 + $0xa40] ss:$16 sps:$4 sm:$0xff]  }
 0x10f   :  { %5121 = vmatpush1.bf16.msra.mxu0 %v7938_v28  ;;  %5654 = vmatpush1.bf16.msra.mxu1 %v7941_v29  ;;  %v8033_v28 = vld [vmem:[%s11473_s1 + $0xa48] ss:$16 sps:$4 sm:$0xff]   ;;  %v8038_v29 = vld [vmem:[%s11473_s1 + $0xa64] ss:$16 sps:$4 sm:$0xff]  }
 0x110   :  { %5122 = vmatprep.subr.bf16.mxu0 %v7946_v30  ;;  %5655 = vmatprep.subr.bf16.mxu1 %v7949_v31  ;;  %v8041_v30 = vld [vmem:[%s11473_s1 + $0xa6c] ss:$16 sps:$4 sm:$0xff]   ;;  %v8036_v31 = vld [vmem:[%s11473_s1 + $0xa60] ss:$16 sps:$4 sm:$0xff]  }
 0x113   :  { %5123 = vmatpush1.bf16.msra.mxu0 %v7944_v32  ;;  %5656 = vmatpush1.bf16.msra.mxu1 %v7947_v33  ;;  %v8039_v32 = vld [vmem:[%s11473_s1 + $0xa68] ss:$16 sps:$4 sm:$0xff]   ;;  %v8044_v33 = vld [vmem:[%s11473_s1 + $0xa84] ss:$16 sps:$4 sm:$0xff]  }
 0x114   :  { %5124 = vmatprep.subr.bf16.mxu0 %v7952_v34  ;;  %5657 = vmatprep.subr.bf16.mxu1 %v7955_v35  ;;  %v8047_v34 = vld [vmem:[%s11473_s1 + $0xa8c] ss:$16 sps:$4 sm:$0xff]   ;;  %v8042_v35 = vld [vmem:[%s11473_s1 + $0xa80] ss:$16 sps:$4 sm:$0xff]  }
 0x117   :  { %5125 = vmatpush1.bf16.msra.mxu0 %v7950_v36  ;;  %5658 = vmatpush1.bf16.msra.mxu1 %v7953_v37  ;;  %v8045_v36 = vld [vmem:[%s11473_s1 + $0xa88] ss:$16 sps:$4 sm:$0xff]   ;;  %v8050_v37 = vld [vmem:[%s11473_s1 + $0xaa4] ss:$16 sps:$4 sm:$0xff]  }
 0x118   :  { %5126 = vmatprep.subr.bf16.mxu0 %v7958_v38  ;;  %5659 = vmatprep.subr.bf16.mxu1 %v7961_v39  ;;  %v8053_v38 = vld [vmem:[%s11473_s1 + $0xaac] ss:$16 sps:$4 sm:$0xff]   ;;  %v8048_v39 = vld [vmem:[%s11473_s1 + $0xaa0] ss:$16 sps:$4 sm:$0xff]  }
 0x11b   :  { %5127 = vmatpush1.bf16.msra.mxu0 %v7956_v40  ;;  %5660 = vmatpush1.bf16.msra.mxu1 %v7959_v41  ;;  %v8051_v40 = vld [vmem:[%s11473_s1 + $0xaa8] ss:$16 sps:$4 sm:$0xff]   ;;  %v8056_v41 = vld [vmem:[%s11473_s1 + $0xac4] ss:$16 sps:$4 sm:$0xff]  }
 0x11c   :  { %5128 = vmatprep.subr.bf16.mxu0 %v7964_v42  ;;  %5661 = vmatprep.subr.bf16.mxu1 %v7967_v43  ;;  %v8059_v42 = vld [vmem:[%s11473_s1 + $0xacc] ss:$16 sps:$4 sm:$0xff]   ;;  %v8054_v43 = vld [vmem:[%s11473_s1 + $0xac0] ss:$16 sps:$4 sm:$0xff]  }
 0x11f   :  { %5129 = vmatpush1.bf16.msra.mxu0 %v7962_v44  ;;  %5662 = vmatpush1.bf16.msra.mxu1 %v7965_v45  ;;  %v8057_v44 = vld [vmem:[%s11473_s1 + $0xac8] ss:$16 sps:$4 sm:$0xff]   ;;  %v8062_v45 = vld [vmem:[%s11473_s1 + $0xae4] ss:$16 sps:$4 sm:$0xff]  }
 0x120   :  { %5130 = vmatprep.subr.bf16.mxu0 %v7970_v46  ;;  %5663 = vmatprep.subr.bf16.mxu1 %v7973_v47  ;;  %v8065_v46 = vld [vmem:[%s11473_s1 + $0xaec] ss:$16 sps:$4 sm:$0xff]   ;;  %v8060_v47 = vld [vmem:[%s11473_s1 + $0xae0] ss:$16 sps:$4 sm:$0xff]  }
 0x123   :  { %5131 = vmatpush1.bf16.msra.mxu0 %v7968_v48  ;;  %5664 = vmatpush1.bf16.msra.mxu1 %v7971_v49  ;;  %v8063_v48 = vld [vmem:[%s11473_s1 + $0xae8] ss:$16 sps:$4 sm:$0xff]   ;;  %v8068_v49 = vld [vmem:[%s11473_s1 + $0xb04] ss:$16 sps:$4 sm:$0xff]  }
 0x124   :  { %5132 = vmatprep.subr.bf16.mxu0 %v7976_v50  ;;  %5665 = vmatprep.subr.bf16.mxu1 %v7979_v51  ;;  %v8071_v50 = vld [vmem:[%s11473_s1 + $0xb0c] ss:$16 sps:$4 sm:$0xff]   ;;  %v8066_v51 = vld [vmem:[%s11473_s1 + $0xb00] ss:$16 sps:$4 sm:$0xff]  }
 0x127   :  { %5133 = vmatpush1.bf16.msra.mxu0 %v7974_v52  ;;  %5666 = vmatpush1.bf16.msra.mxu1 %v7977_v53  ;;  %v8069_v52 = vld [vmem:[%s11473_s1 + $0xb08] ss:$16 sps:$4 sm:$0xff]   ;;  %v8074_v53 = vld [vmem:[%s11473_s1 + $0xb24] ss:$16 sps:$4 sm:$0xff]  }
 0x128   :  { %5134 = vmatprep.subr.bf16.mxu0 %v7982_v54  ;;  %5667 = vmatprep.subr.bf16.mxu1 %v7985_v55  ;;  %v8077_v54 = vld [vmem:[%s11473_s1 + $0xb2c] ss:$16 sps:$4 sm:$0xff]   ;;  %v8072_v55 = vld [vmem:[%s11473_s1 + $0xb20] ss:$16 sps:$4 sm:$0xff]  }
 0x12b   :  { %5135 = vmatpush1.bf16.msra.mxu0 %v7980_v56  ;;  %5668 = vmatpush1.bf16.msra.mxu1 %v7983_v57  ;;  %v8075_v56 = vld [vmem:[%s11473_s1 + $0xb28] ss:$16 sps:$4 sm:$0xff]   ;;  %v8080_v57 = vld [vmem:[%s11473_s1 + $0xb44] ss:$16 sps:$4 sm:$0xff]  }
 0x12c   :  { %5136 = vmatprep.subr.bf16.mxu0 %v7988_v58  ;;  %5669 = vmatprep.subr.bf16.mxu1 %v7991_v59  ;;  %v8083_v58 = vld [vmem:[%s11473_s1 + $0xb4c] ss:$16 sps:$4 sm:$0xff]   ;;  %v8078_v59 = vld [vmem:[%s11473_s1 + $0xb40] ss:$16 sps:$4 sm:$0xff]  }
 0x12f   :  { %5137 = vmatpush1.bf16.msra.mxu0 %v7986_v60  ;;  %5670 = vmatpush1.bf16.msra.mxu1 %v7989_v61  ;;  %v8081_v60 = vld [vmem:[%s11473_s1 + $0xb48] ss:$16 sps:$4 sm:$0xff]   ;;  %v8086_v61 = vld [vmem:[%s11473_s1 + $0xb64] ss:$16 sps:$4 sm:$0xff]  }
 0x130   :  { %5138 = vmatprep.subr.bf16.mxu0 %v7994_v62  ;;  %5671 = vmatprep.subr.bf16.mxu1 %v7997_v63  ;;  %v8089_v62 = vld [vmem:[%s11473_s1 + $0xb6c] ss:$16 sps:$4 sm:$0xff]   ;;  %v8084_v63 = vld [vmem:[%s11473_s1 + $0xb60] ss:$16 sps:$4 sm:$0xff]  }
 0x133   :  { %5139 = vmatpush1.bf16.msra.mxu0 %v7992_v0  ;;  %5672 = vmatpush1.bf16.msra.mxu1 %v7995_v1  ;;  %v8087_v0 = vld [vmem:[%s11473_s1 + $0xb68] ss:$16 sps:$4 sm:$0xff]   ;;  %v8092_v1 = vld [vmem:[%s11473_s1 + $0xb84] ss:$16 sps:$4 sm:$0xff]  }
 0x134   :  { %5140 = vmatprep.subr.bf16.mxu0 %v8000_v2  ;;  %5673 = vmatprep.subr.bf16.mxu1 %v8003_v3  ;;  %v8095_v2 = vld [vmem:[%s11473_s1 + $0xb8c] ss:$16 sps:$4 sm:$0xff]   ;;  %v8090_v3 = vld [vmem:[%s11473_s1 + $0xb80] ss:$16 sps:$4 sm:$0xff]  }
 0x137   :  { %5141 = vmatpush1.bf16.msra.mxu0 %v7998_v4  ;;  %5674 = vmatpush1.bf16.msra.mxu1 %v8001_v5  ;;  %v8093_v4 = vld [vmem:[%s11473_s1 + $0xb88] ss:$16 sps:$4 sm:$0xff]   ;;  %v8098_v5 = vld [vmem:[%s11473_s1 + $0xba4] ss:$16 sps:$4 sm:$0xff]  }
 0x138   :  { %5142 = vmatprep.subr.bf16.mxu0 %v8006_v6  ;;  %5675 = vmatprep.subr.bf16.mxu1 %v8009_v7  ;;  %v8101_v6 = vld [vmem:[%s11473_s1 + $0xbac] ss:$16 sps:$4 sm:$0xff]   ;;  %v8096_v7 = vld [vmem:[%s11473_s1 + $0xba0] ss:$16 sps:$4 sm:$0xff]  }
 0x13b   :  { %5143 = vmatpush1.bf16.msra.mxu0 %v8004_v8  ;;  %5676 = vmatpush1.bf16.msra.mxu1 %v8007_v9  ;;  %v8099_v8 = vld [vmem:[%s11473_s1 + $0xba8] ss:$16 sps:$4 sm:$0xff]   ;;  %v8104_v9 = vld [vmem:[%s11473_s1 + $0xbc4] ss:$16 sps:$4 sm:$0xff]  }
 0x13c   :  { %5144 = vmatprep.subr.bf16.mxu0 %v8012_v10  ;;  %5677 = vmatprep.subr.bf16.mxu1 %v8015_v12  ;;  %v8107_v10 = vld [vmem:[%s11473_s1 + $0xbcc] ss:$16 sps:$4 sm:$0xff]   ;;  %v8102_v12 = vld [vmem:[%s11473_s1 + $0xbc0] ss:$16 sps:$4 sm:$0xff]  }
 0x13f   :  { %5145 = vmatpush1.bf16.msra.mxu0 %v8010_v13  ;;  %5678 = vmatpush1.bf16.msra.mxu1 %v8013_v15  ;;  %v8105_v13 = vld [vmem:[%s11473_s1 + $0xbc8] ss:$16 sps:$4 sm:$0xff]   ;;  %v8110_v15 = vld [vmem:[%s11473_s1 + $0xbe4] ss:$16 sps:$4 sm:$0xff]  }
 0x140   :  { %5155 = vmatprep.subr.bf16.mxu0 %v8020_v11  ;;  %5688 = vmatprep.subr.bf16.mxu1 %v8023_v17  ;;  %v8113_v11 = vld [vmem:[%s11473_s1 + $0xbec] ss:$16 sps:$4 sm:$0xff]   ;;  %v8108_v17 = vld [vmem:[%s11473_s1 + $0xbe0] ss:$16 sps:$4 sm:$0xff]  }
 0x142   :  { %5147 = vmatmul.mubr.bf16.vlgmr.msra.gmra.mrb[0].mxu0 %v6493_v14  ;;  %5680 = vmatmul.mubr.bf16.vlgmr.msra.gmra.mrb[0].mxu1 %v6493_v14  ;;  %v8111_v14 = vld [vmem:[%s11473_s1 + $0xbe8] ss:$16 sps:$4 sm:$0xff]  }
 0x143   :  { %5156 = vmatpush1.bf16.msra.mxu0 %v8018_v19  ;;  %5689 = vmatpush1.bf16.msra.mxu1 %v8021_v20  ;;  %v8118_v19 = vld [vmem:[%s11473_s1 + $0xc04] ss:$16 sps:$4 sm:$0xff]   ;;  %v8121_v20 = vld [vmem:[%s11473_s1 + $0xc0c] ss:$16 sps:$4 sm:$0xff]  }
 0x144   :  { %5157 = vmatprep.subr.bf16.mxu0 %v8026_v21  ;;  %5690 = vmatprep.subr.bf16.mxu1 %v8029_v16  ;;  %v10043_v21 = vld [vmem:[%s11474_s0 + $0x30] sm:$0xff]  ;;  %v6495_v16 = vcombine.low %v9842_v18, %v9842_v18  ;;  %v8127_v18 = vld [vmem:[%s11473_s1 + $0xc2c] ss:$16 sps:$4 sm:$0xff]  }
 0x145   :  { %5187 = vmatprep.mubr.bf16.mxu0 %v6496_v22  ;;  %5720 = vmatprep.mubr.bf16.mxu1 %v6496_v22  ;;  %v8116_v22 = vld [vmem:[%s11473_s1 + $0xc00] ss:$16 sps:$4 sm:$0xff]  }
 0x147   :  { %5158 = vmatpush1.bf16.msra.mxu0 %v8024_v23  ;;  %5691 = vmatpush1.bf16.msra.mxu1 %v8027_v24  ;;  %v8119_v23 = vld [vmem:[%s11473_s1 + $0xc08] ss:$16 sps:$4 sm:$0xff]   ;;  %v8124_v24 = vld [vmem:[%s11473_s1 + $0xc24] ss:$16 sps:$4 sm:$0xff]  }
 0x148   :  { %5159 = vmatprep.subr.bf16.mxu0 %v8032_v25  ;;  %5692 = vmatprep.subr.bf16.mxu1 %v8035_v26  ;;  %v6498_v25 = vcombine.high %v10043_v21, %v10043_v21  ;;  %v8122_v26 = vld [vmem:[%s11473_s1 + $0xc20] ss:$16 sps:$4 sm:$0xff]  }
 0x14b   :  { %5160 = vmatpush1.bf16.msra.mxu0 %v8030_v27  ;;  %5693 = vmatpush1.bf16.msra.mxu1 %v8033_v28  ;;  %v8125_v27 = vld [vmem:[%s11473_s1 + $0xc28] ss:$16 sps:$4 sm:$0xff]   ;;  %v8130_v28 = vld [vmem:[%s11473_s1 + $0xc44] ss:$16 sps:$4 sm:$0xff]  }
 0x14c   :  { %5161 = vmatprep.subr.bf16.mxu0 %v8038_v29  ;;  %5694 = vmatprep.subr.bf16.mxu1 %v8041_v30  ;;  %v8133_v29 = vld [vmem:[%s11473_s1 + $0xc4c] ss:$16 sps:$4 sm:$0xff]   ;;  %v8128_v30 = vld [vmem:[%s11473_s1 + $0xc40] ss:$16 sps:$4 sm:$0xff]  }
 0x14f   :  { %5162 = vmatpush1.bf16.msra.mxu0 %v8036_v31  ;;  %5695 = vmatpush1.bf16.msra.mxu1 %v8039_v32  ;;  %v8131_v31 = vld [vmem:[%s11473_s1 + $0xc48] ss:$16 sps:$4 sm:$0xff]   ;;  %v8136_v32 = vld [vmem:[%s11473_s1 + $0xc64] ss:$16 sps:$4 sm:$0xff]  }
 0x150   :  { %5163 = vmatprep.subr.bf16.mxu0 %v8044_v33  ;;  %5696 = vmatprep.subr.bf16.mxu1 %v8047_v34  ;;  %v8139_v33 = vld [vmem:[%s11473_s1 + $0xc6c] ss:$16 sps:$4 sm:$0xff]   ;;  %v8134_v34 = vld [vmem:[%s11473_s1 + $0xc60] ss:$16 sps:$4 sm:$0xff]  }
 0x153   :  { %5164 = vmatpush1.bf16.msra.mxu0 %v8042_v35  ;;  %5697 = vmatpush1.bf16.msra.mxu1 %v8045_v36  ;;  %v8137_v35 = vld [vmem:[%s11473_s1 + $0xc68] ss:$16 sps:$4 sm:$0xff]   ;;  %v8142_v36 = vld [vmem:[%s11473_s1 + $0xc84] ss:$16 sps:$4 sm:$0xff]  }
 0x154   :  { %5165 = vmatprep.subr.bf16.mxu0 %v8050_v37  ;;  %5698 = vmatprep.subr.bf16.mxu1 %v8053_v38  ;;  %v8145_v37 = vld [vmem:[%s11473_s1 + $0xc8c] ss:$16 sps:$4 sm:$0xff]   ;;  %v8140_v38 = vld [vmem:[%s11473_s1 + $0xc80] ss:$16 sps:$4 sm:$0xff]  }
 0x157   :  { %5166 = vmatpush1.bf16.msra.mxu0 %v8048_v39  ;;  %5699 = vmatpush1.bf16.msra.mxu1 %v8051_v40  ;;  %v8143_v39 = vld [vmem:[%s11473_s1 + $0xc88] ss:$16 sps:$4 sm:$0xff]   ;;  %v8148_v40 = vld [vmem:[%s11473_s1 + $0xca4] ss:$16 sps:$4 sm:$0xff]  }
 0x158   :  { %5167 = vmatprep.subr.bf16.mxu0 %v8056_v41  ;;  %5700 = vmatprep.subr.bf16.mxu1 %v8059_v42  ;;  %v8151_v41 = vld [vmem:[%s11473_s1 + $0xcac] ss:$16 sps:$4 sm:$0xff]   ;;  %v8146_v42 = vld [vmem:[%s11473_s1 + $0xca0] ss:$16 sps:$4 sm:$0xff]  }
 0x15b   :  { %5168 = vmatpush1.bf16.msra.mxu0 %v8054_v43  ;;  %5701 = vmatpush1.bf16.msra.mxu1 %v8057_v44  ;;  %v8149_v43 = vld [vmem:[%s11473_s1 + $0xca8] ss:$16 sps:$4 sm:$0xff]   ;;  %v8154_v44 = vld [vmem:[%s11473_s1 + $0xcc4] ss:$16 sps:$4 sm:$0xff]  }
 0x15c   :  { %5169 = vmatprep.subr.bf16.mxu0 %v8062_v45  ;;  %5702 = vmatprep.subr.bf16.mxu1 %v8065_v46  ;;  %v8157_v45 = vld [vmem:[%s11473_s1 + $0xccc] ss:$16 sps:$4 sm:$0xff]   ;;  %v8152_v46 = vld [vmem:[%s11473_s1 + $0xcc0] ss:$16 sps:$4 sm:$0xff]  }
 0x15f   :  { %5170 = vmatpush1.bf16.msra.mxu0 %v8060_v47  ;;  %5703 = vmatpush1.bf16.msra.mxu1 %v8063_v48  ;;  %v8155_v47 = vld [vmem:[%s11473_s1 + $0xcc8] ss:$16 sps:$4 sm:$0xff]   ;;  %v8160_v48 = vld [vmem:[%s11473_s1 + $0xce4] ss:$16 sps:$4 sm:$0xff]  }
 0x160   :  { %5171 = vmatprep.subr.bf16.mxu0 %v8068_v49  ;;  %5704 = vmatprep.subr.bf16.mxu1 %v8071_v50  ;;  %v8163_v49 = vld [vmem:[%s11473_s1 + $0xcec] ss:$16 sps:$4 sm:$0xff]   ;;  %v8158_v50 = vld [vmem:[%s11473_s1 + $0xce0] ss:$16 sps:$4 sm:$0xff]  }
 0x163   :  { %5172 = vmatpush1.bf16.msra.mxu0 %v8066_v51  ;;  %5705 = vmatpush1.bf16.msra.mxu1 %v8069_v52  ;;  %v8161_v51 = vld [vmem:[%s11473_s1 + $0xce8] ss:$16 sps:$4 sm:$0xff]   ;;  %v8166_v52 = vld [vmem:[%s11473_s1 + $0xd04] ss:$16 sps:$4 sm:$0xff]  }
 0x164   :  { %5173 = vmatprep.subr.bf16.mxu0 %v8074_v53  ;;  %5706 = vmatprep.subr.bf16.mxu1 %v8077_v54  ;;  %v8169_v53 = vld [vmem:[%s11473_s1 + $0xd0c] ss:$16 sps:$4 sm:$0xff]   ;;  %v8164_v54 = vld [vmem:[%s11473_s1 + $0xd00] ss:$16 sps:$4 sm:$0xff]  }
 0x167   :  { %5174 = vmatpush1.bf16.msra.mxu0 %v8072_v55  ;;  %5707 = vmatpush1.bf16.msra.mxu1 %v8075_v56  ;;  %v8167_v55 = vld [vmem:[%s11473_s1 + $0xd08] ss:$16 sps:$4 sm:$0xff]   ;;  %v8172_v56 = vld [vmem:[%s11473_s1 + $0xd24] ss:$16 sps:$4 sm:$0xff]  }
 0x168   :  { %5175 = vmatprep.subr.bf16.mxu0 %v8080_v57  ;;  %5708 = vmatprep.subr.bf16.mxu1 %v8083_v58  ;;  %v8175_v57 = vld [vmem:[%s11473_s1 + $0xd2c] ss:$16 sps:$4 sm:$0xff]   ;;  %v8170_v58 = vld [vmem:[%s11473_s1 + $0xd20] ss:$16 sps:$4 sm:$0xff]  }
 0x16b   :  { %5176 = vmatpush1.bf16.msra.mxu0 %v8078_v59  ;;  %5709 = vmatpush1.bf16.msra.mxu1 %v8081_v60  ;;  %v8173_v59 = vld [vmem:[%s11473_s1 + $0xd28] ss:$16 sps:$4 sm:$0xff]   ;;  %v8178_v60 = vld [vmem:[%s11473_s1 + $0xd44] ss:$16 sps:$4 sm:$0xff]  }
 0x16c   :  { %5177 = vmatprep.subr.bf16.mxu0 %v8086_v61  ;;  %5710 = vmatprep.subr.bf16.mxu1 %v8089_v62  ;;  %v8181_v61 = vld [vmem:[%s11473_s1 + $0xd4c] ss:$16 sps:$4 sm:$0xff]   ;;  %v8176_v62 = vld [vmem:[%s11473_s1 + $0xd40] ss:$16 sps:$4 sm:$0xff]  }
 0x16f   :  { %5178 = vmatpush1.bf16.msra.mxu0 %v8084_v63  ;;  %5711 = vmatpush1.bf16.msra.mxu1 %v8087_v0  ;;  %v8179_v63 = vld [vmem:[%s11473_s1 + $0xd48] ss:$16 sps:$4 sm:$0xff]   ;;  %v8184_v0 = vld [vmem:[%s11473_s1 + $0xd64] ss:$16 sps:$4 sm:$0xff]  }
 0x170   :  { %5179 = vmatprep.subr.bf16.mxu0 %v8092_v1  ;;  %5712 = vmatprep.subr.bf16.mxu1 %v8095_v2  ;;  %v8187_v1 = vld [vmem:[%s11473_s1 + $0xd6c] ss:$16 sps:$4 sm:$0xff]   ;;  %v8182_v2 = vld [vmem:[%s11473_s1 + $0xd60] ss:$16 sps:$4 sm:$0xff]  }
 0x173   :  { %5180 = vmatpush1.bf16.msra.mxu0 %v8090_v3  ;;  %5713 = vmatpush1.bf16.msra.mxu1 %v8093_v4  ;;  %v8185_v3 = vld [vmem:[%s11473_s1 + $0xd68] ss:$16 sps:$4 sm:$0xff]   ;;  %v8190_v4 = vld [vmem:[%s11473_s1 + $0xd84] ss:$16 sps:$4 sm:$0xff]  }
 0x174   :  { %5181 = vmatprep.subr.bf16.mxu0 %v8098_v5  ;;  %5714 = vmatprep.subr.bf16.mxu1 %v8101_v6  ;;  %v8193_v5 = vld [vmem:[%s11473_s1 + $0xd8c] ss:$16 sps:$4 sm:$0xff]   ;;  %v8188_v6 = vld [vmem:[%s11473_s1 + $0xd80] ss:$16 sps:$4 sm:$0xff]  }
 0x177   :  { %5182 = vmatpush1.bf16.msra.mxu0 %v8096_v7  ;;  %5715 = vmatpush1.bf16.msra.mxu1 %v8099_v8  ;;  %v8191_v7 = vld [vmem:[%s11473_s1 + $0xd88] ss:$16 sps:$4 sm:$0xff]   ;;  %v8196_v8 = vld [vmem:[%s11473_s1 + $0xda4] ss:$16 sps:$4 sm:$0xff]  }
 0x178   :  { %5183 = vmatprep.subr.bf16.mxu0 %v8104_v9  ;;  %5716 = vmatprep.subr.bf16.mxu1 %v8107_v10  ;;  %v8199_v9 = vld [vmem:[%s11473_s1 + $0xdac] ss:$16 sps:$4 sm:$0xff]   ;;  %v8194_v10 = vld [vmem:[%s11473_s1 + $0xda0] ss:$16 sps:$4 sm:$0xff]  }
 0x17b   :  { %5184 = vmatpush1.bf16.msra.mxu0 %v8102_v12  ;;  %5717 = vmatpush1.bf16.msra.mxu1 %v8105_v13  ;;  %v8197_v12 = vld [vmem:[%s11473_s1 + $0xda8] ss:$16 sps:$4 sm:$0xff]   ;;  %v8202_v13 = vld [vmem:[%s11473_s1 + $0xdc4] ss:$16 sps:$4 sm:$0xff]  }
 0x17c   :  { %5185 = vmatprep.subr.bf16.mxu0 %v8110_v15  ;;  %5718 = vmatprep.subr.bf16.mxu1 %v8113_v11  ;;  %v8205_v15 = vld [vmem:[%s11473_s1 + $0xdcc] ss:$16 sps:$4 sm:$0xff]   ;;  %v8200_v11 = vld [vmem:[%s11473_s1 + $0xdc0] ss:$16 sps:$4 sm:$0xff]  }
 0x17f   :  { %5186 = vmatpush1.bf16.msra.mxu0 %v8108_v17  ;;  %5719 = vmatpush1.bf16.msra.mxu1 %v8111_v14  ;;  %v8203_v17 = vld [vmem:[%s11473_s1 + $0xdc8] ss:$16 sps:$4 sm:$0xff]   ;;  %v8208_v14 = vld [vmem:[%s11473_s1 + $0xde4] ss:$16 sps:$4 sm:$0xff]  }
 0x180   :  { %5196 = vmatprep.subr.bf16.mxu0 %v8118_v19  ;;  %5729 = vmatprep.subr.bf16.mxu1 %v8121_v20  ;;  %v8211_v19 = vld [vmem:[%s11473_s1 + $0xdec] ss:$16 sps:$4 sm:$0xff]   ;;  %v8206_v20 = vld [vmem:[%s11473_s1 + $0xde0] ss:$16 sps:$4 sm:$0xff]  }
 0x182   :  { %5188 = vmatmul.mubr.bf16.vlgmr.msra.gmra.mrb[0].mxu0 %v6495_v16  ;;  %5721 = vmatmul.mubr.bf16.vlgmr.msra.gmra.mrb[0].mxu1 %v6495_v16  ;;  %v8209_v16 = vld [vmem:[%s11473_s1 + $0xde8] ss:$16 sps:$4 sm:$0xff]  }
 0x183   :  { %5197 = vmatpush1.bf16.msra.mxu0 %v8116_v22  ;;  %5730 = vmatpush1.bf16.msra.mxu1 %v8119_v23  ;;  %v8216_v22 = vld [vmem:[%s11473_s1 + $0xe04] ss:$16 sps:$4 sm:$0xff]   ;;  %v8219_v23 = vld [vmem:[%s11473_s1 + $0xe0c] ss:$16 sps:$4 sm:$0xff]  }
 0x184   :  { %5198 = vmatprep.subr.bf16.mxu0 %v8124_v24  ;;  %5731 = vmatprep.subr.bf16.mxu1 %v8127_v18  ;;  %v10244_v24 = vld [vmem:[%s11474_s0 + $0x38] sm:$0xff]  ;;  %v6497_v18 = vcombine.low %v10043_v21, %v10043_v21 }
 0x185   :  { %5228 = vmatprep.mubr.bf16.mxu0 %v6498_v25  ;;  %5761 = vmatprep.mubr.bf16.mxu1 %v6498_v25  ;;  %v8214_v25 = vld [vmem:[%s11473_s1 + $0xe00] ss:$16 sps:$4 sm:$0xff]   ;;  %v8225_v21 = vld [vmem:[%s11473_s1 + $0xe2c] ss:$16 sps:$4 sm:$0xff]  }
 0x187   :  { %5199 = vmatpush1.bf16.msra.mxu0 %v8122_v26  ;;  %5732 = vmatpush1.bf16.msra.mxu1 %v8125_v27  ;;  %v8217_v26 = vld [vmem:[%s11473_s1 + $0xe08] ss:$16 sps:$4 sm:$0xff]   ;;  %v8222_v27 = vld [vmem:[%s11473_s1 + $0xe24] ss:$16 sps:$4 sm:$0xff]  }
 0x188   :  { %5200 = vmatprep.subr.bf16.mxu0 %v8130_v28  ;;  %5733 = vmatprep.subr.bf16.mxu1 %v8133_v29  ;;  %v6500_v28 = vcombine.high %v10244_v24, %v10244_v24  ;;  %v8220_v29 = vld [vmem:[%s11473_s1 + $0xe20] ss:$16 sps:$4 sm:$0xff]  }
 0x18b   :  { %5201 = vmatpush1.bf16.msra.mxu0 %v8128_v30  ;;  %5734 = vmatpush1.bf16.msra.mxu1 %v8131_v31  ;;  %v8223_v30 = vld [vmem:[%s11473_s1 + $0xe28] ss:$16 sps:$4 sm:$0xff]   ;;  %v8228_v31 = vld [vmem:[%s11473_s1 + $0xe44] ss:$16 sps:$4 sm:$0xff]  }
 0x18c   :  { %5202 = vmatprep.subr.bf16.mxu0 %v8136_v32  ;;  %5735 = vmatprep.subr.bf16.mxu1 %v8139_v33  ;;  %v8231_v32 = vld [vmem:[%s11473_s1 + $0xe4c] ss:$16 sps:$4 sm:$0xff]   ;;  %v8226_v33 = vld [vmem:[%s11473_s1 + $0xe40] ss:$16 sps:$4 sm:$0xff]  }
 0x18f   :  { %5203 = vmatpush1.bf16.msra.mxu0 %v8134_v34  ;;  %5736 = vmatpush1.bf16.msra.mxu1 %v8137_v35  ;;  %v8229_v34 = vld [vmem:[%s11473_s1 + $0xe48] ss:$16 sps:$4 sm:$0xff]   ;;  %v8234_v35 = vld [vmem:[%s11473_s1 + $0xe64] ss:$16 sps:$4 sm:$0xff]  }
 0x190   :  { %5204 = vmatprep.subr.bf16.mxu0 %v8142_v36  ;;  %5737 = vmatprep.subr.bf16.mxu1 %v8145_v37  ;;  %v8237_v36 = vld [vmem:[%s11473_s1 + $0xe6c] ss:$16 sps:$4 sm:$0xff]   ;;  %v8232_v37 = vld [vmem:[%s11473_s1 + $0xe60] ss:$16 sps:$4 sm:$0xff]  }
 0x193   :  { %5205 = vmatpush1.bf16.msra.mxu0 %v8140_v38  ;;  %5738 = vmatpush1.bf16.msra.mxu1 %v8143_v39  ;;  %v8235_v38 = vld [vmem:[%s11473_s1 + $0xe68] ss:$16 sps:$4 sm:$0xff]   ;;  %v8240_v39 = vld [vmem:[%s11473_s1 + $0xe84] ss:$16 sps:$4 sm:$0xff]  }
 0x194   :  { %5206 = vmatprep.subr.bf16.mxu0 %v8148_v40  ;;  %5739 = vmatprep.subr.bf16.mxu1 %v8151_v41  ;;  %v8243_v40 = vld [vmem:[%s11473_s1 + $0xe8c] ss:$16 sps:$4 sm:$0xff]   ;;  %v8238_v41 = vld [vmem:[%s11473_s1 + $0xe80] ss:$16 sps:$4 sm:$0xff]  }
 0x197   :  { %5207 = vmatpush1.bf16.msra.mxu0 %v8146_v42  ;;  %5740 = vmatpush1.bf16.msra.mxu1 %v8149_v43  ;;  %v8241_v42 = vld [vmem:[%s11473_s1 + $0xe88] ss:$16 sps:$4 sm:$0xff]   ;;  %v8246_v43 = vld [vmem:[%s11473_s1 + $0xea4] ss:$16 sps:$4 sm:$0xff]  }
 0x198   :  { %5208 = vmatprep.subr.bf16.mxu0 %v8154_v44  ;;  %5741 = vmatprep.subr.bf16.mxu1 %v8157_v45  ;;  %v8249_v44 = vld [vmem:[%s11473_s1 + $0xeac] ss:$16 sps:$4 sm:$0xff]   ;;  %v8244_v45 = vld [vmem:[%s11473_s1 + $0xea0] ss:$16 sps:$4 sm:$0xff]  }
 0x19b   :  { %5209 = vmatpush1.bf16.msra.mxu0 %v8152_v46  ;;  %5742 = vmatpush1.bf16.msra.mxu1 %v8155_v47  ;;  %v8247_v46 = vld [vmem:[%s11473_s1 + $0xea8] ss:$16 sps:$4 sm:$0xff]   ;;  %v8252_v47 = vld [vmem:[%s11473_s1 + $0xec4] ss:$16 sps:$4 sm:$0xff]  }
 0x19c   :  { %5210 = vmatprep.subr.bf16.mxu0 %v8160_v48  ;;  %5743 = vmatprep.subr.bf16.mxu1 %v8163_v49  ;;  %v8255_v48 = vld [vmem:[%s11473_s1 + $0xecc] ss:$16 sps:$4 sm:$0xff]   ;;  %v8250_v49 = vld [vmem:[%s11473_s1 + $0xec0] ss:$16 sps:$4 sm:$0xff]  }
 0x19f   :  { %5211 = vmatpush1.bf16.msra.mxu0 %v8158_v50  ;;  %5744 = vmatpush1.bf16.msra.mxu1 %v8161_v51  ;;  %v8253_v50 = vld [vmem:[%s11473_s1 + $0xec8] ss:$16 sps:$4 sm:$0xff]   ;;  %v8258_v51 = vld [vmem:[%s11473_s1 + $0xee4] ss:$16 sps:$4 sm:$0xff]  }
 0x1a0   :  { %5212 = vmatprep.subr.bf16.mxu0 %v8166_v52  ;;  %5745 = vmatprep.subr.bf16.mxu1 %v8169_v53  ;;  %v8261_v52 = vld [vmem:[%s11473_s1 + $0xeec] ss:$16 sps:$4 sm:$0xff]   ;;  %v8256_v53 = vld [vmem:[%s11473_s1 + $0xee0] ss:$16 sps:$4 sm:$0xff]  }
 0x1a3   :  { %5213 = vmatpush1.bf16.msra.mxu0 %v8164_v54  ;;  %5746 = vmatpush1.bf16.msra.mxu1 %v8167_v55  ;;  %v8259_v54 = vld [vmem:[%s11473_s1 + $0xee8] ss:$16 sps:$4 sm:$0xff]   ;;  %v8264_v55 = vld [vmem:[%s11473_s1 + $0xf04] ss:$16 sps:$4 sm:$0xff]  }
 0x1a4   :  { %5214 = vmatprep.subr.bf16.mxu0 %v8172_v56  ;;  %5747 = vmatprep.subr.bf16.mxu1 %v8175_v57  ;;  %v8267_v56 = vld [vmem:[%s11473_s1 + $0xf0c] ss:$16 sps:$4 sm:$0xff]   ;;  %v8262_v57 = vld [vmem:[%s11473_s1 + $0xf00] ss:$16 sps:$4 sm:$0xff]  }
 0x1a7   :  { %5215 = vmatpush1.bf16.msra.mxu0 %v8170_v58  ;;  %5748 = vmatpush1.bf16.msra.mxu1 %v8173_v59  ;;  %v8265_v58 = vld [vmem:[%s11473_s1 + $0xf08] ss:$16 sps:$4 sm:$0xff]   ;;  %v8270_v59 = vld [vmem:[%s11473_s1 + $0xf24] ss:$16 sps:$4 sm:$0xff]  }
 0x1a8   :  { %5216 = vmatprep.subr.bf16.mxu0 %v8178_v60  ;;  %5749 = vmatprep.subr.bf16.mxu1 %v8181_v61  ;;  %v8273_v60 = vld [vmem:[%s11473_s1 + $0xf2c] ss:$16 sps:$4 sm:$0xff]   ;;  %v8268_v61 = vld [vmem:[%s11473_s1 + $0xf20] ss:$16 sps:$4 sm:$0xff]  }
 0x1ab   :  { %5217 = vmatpush1.bf16.msra.mxu0 %v8176_v62  ;;  %5750 = vmatpush1.bf16.msra.mxu1 %v8179_v63  ;;  %v8271_v62 = vld [vmem:[%s11473_s1 + $0xf28] ss:$16 sps:$4 sm:$0xff]   ;;  %v8276_v63 = vld [vmem:[%s11473_s1 + $0xf44] ss:$16 sps:$4 sm:$0xff]  }
 0x1ac   :  { %5218 = vmatprep.subr.bf16.mxu0 %v8184_v0  ;;  %5751 = vmatprep.subr.bf16.mxu1 %v8187_v1  ;;  %v8279_v0 = vld [vmem:[%s11473_s1 + $0xf4c] ss:$16 sps:$4 sm:$0xff]   ;;  %v8274_v1 = vld [vmem:[%s11473_s1 + $0xf40] ss:$16 sps:$4 sm:$0xff]  }
 0x1af   :  { %5219 = vmatpush1.bf16.msra.mxu0 %v8182_v2  ;;  %5752 = vmatpush1.bf16.msra.mxu1 %v8185_v3  ;;  %v8277_v2 = vld [vmem:[%s11473_s1 + $0xf48] ss:$16 sps:$4 sm:$0xff]   ;;  %v8282_v3 = vld [vmem:[%s11473_s1 + $0xf64] ss:$16 sps:$4 sm:$0xff]  }
 0x1b0   :  { %5220 = vmatprep.subr.bf16.mxu0 %v8190_v4  ;;  %5753 = vmatprep.subr.bf16.mxu1 %v8193_v5  ;;  %v8285_v4 = vld [vmem:[%s11473_s1 + $0xf6c] ss:$16 sps:$4 sm:$0xff]   ;;  %v8280_v5 = vld [vmem:[%s11473_s1 + $0xf60] ss:$16 sps:$4 sm:$0xff]  }
 0x1b3   :  { %5221 = vmatpush1.bf16.msra.mxu0 %v8188_v6  ;;  %5754 = vmatpush1.bf16.msra.mxu1 %v8191_v7  ;;  %v8283_v6 = vld [vmem:[%s11473_s1 + $0xf68] ss:$16 sps:$4 sm:$0xff]   ;;  %v8288_v7 = vld [vmem:[%s11473_s1 + $0xf84] ss:$16 sps:$4 sm:$0xff]  }
 0x1b4   :  { %5222 = vmatprep.subr.bf16.mxu0 %v8196_v8  ;;  %5755 = vmatprep.subr.bf16.mxu1 %v8199_v9  ;;  %v8291_v8 = vld [vmem:[%s11473_s1 + $0xf8c] ss:$16 sps:$4 sm:$0xff]   ;;  %v8286_v9 = vld [vmem:[%s11473_s1 + $0xf80] ss:$16 sps:$4 sm:$0xff]  }
 0x1b7   :  { %5223 = vmatpush1.bf16.msra.mxu0 %v8194_v10  ;;  %5756 = vmatpush1.bf16.msra.mxu1 %v8197_v12  ;;  %v8289_v10 = vld [vmem:[%s11473_s1 + $0xf88] ss:$16 sps:$4 sm:$0xff]   ;;  %v8294_v12 = vld [vmem:[%s11473_s1 + $0xfa4] ss:$16 sps:$4 sm:$0xff]  }
 0x1b8   :  { %5224 = vmatprep.subr.bf16.mxu0 %v8202_v13  ;;  %5757 = vmatprep.subr.bf16.mxu1 %v8205_v15  ;;  %v8297_v13 = vld [vmem:[%s11473_s1 + $0xfac] ss:$16 sps:$4 sm:$0xff]   ;;  %v8292_v15 = vld [vmem:[%s11473_s1 + $0xfa0] ss:$16 sps:$4 sm:$0xff]  }
 0x1bb   :  { %5225 = vmatpush1.bf16.msra.mxu0 %v8200_v11  ;;  %5758 = vmatpush1.bf16.msra.mxu1 %v8203_v17  ;;  %v8295_v11 = vld [vmem:[%s11473_s1 + $0xfa8] ss:$16 sps:$4 sm:$0xff]   ;;  %v8300_v17 = vld [vmem:[%s11473_s1 + $0xfc4] ss:$16 sps:$4 sm:$0xff]  }
 0x1bc   :  { %5226 = vmatprep.subr.bf16.mxu0 %v8208_v14  ;;  %5759 = vmatprep.subr.bf16.mxu1 %v8211_v19  ;;  %v8303_v14 = vld [vmem:[%s11473_s1 + $0xfcc] ss:$16 sps:$4 sm:$0xff]   ;;  %v8298_v19 = vld [vmem:[%s11473_s1 + $0xfc0] ss:$16 sps:$4 sm:$0xff]  }
 0x1bf   :  { %5227 = vmatpush1.bf16.msra.mxu0 %v8206_v20  ;;  %5760 = vmatpush1.bf16.msra.mxu1 %v8209_v16  ;;  %v8301_v20 = vld [vmem:[%s11473_s1 + $0xfc8] ss:$16 sps:$4 sm:$0xff]   ;;  %v8306_v16 = vld [vmem:[%s11473_s1 + $0xfe4] ss:$16 sps:$4 sm:$0xff]  }
 0x1c0   :  { %5237 = vmatprep.subr.bf16.mxu0 %v8216_v22  ;;  %5770 = vmatprep.subr.bf16.mxu1 %v8219_v23  ;;  %v8309_v22 = vld [vmem:[%s11473_s1 + $0xfec] ss:$16 sps:$4 sm:$0xff]   ;;  %v8304_v23 = vld [vmem:[%s11473_s1 + $0xfe0] ss:$16 sps:$4 sm:$0xff]  }
 0x1c2   :  { %5229 = vmatmul.mubr.bf16.vlgmr.msra.gmra.mrb[0].mxu0 %v6497_v18  ;;  %5762 = vmatmul.mubr.bf16.vlgmr.msra.gmra.mrb[0].mxu1 %v6497_v18  ;;  %v8307_v18 = vld [vmem:[%s11473_s1 + $0xfe8] ss:$16 sps:$4 sm:$0xff]  }
 0x1c3   :  { %5238 = vmatpush1.bf16.msra.mxu0 %v8214_v25  ;;  %5771 = vmatpush1.bf16.msra.mxu1 %v8217_v26  ;;  %v8314_v25 = vld [vmem:[%s11473_s1 + $0x1004] ss:$16 sps:$4 sm:$0xff]   ;;  %v8317_v26 = vld [vmem:[%s11473_s1 + $0x100c] ss:$16 sps:$4 sm:$0xff]  }
 0x1c4   :  { %5239 = vmatprep.subr.bf16.mxu0 %v8222_v27  ;;  %5772 = vmatprep.subr.bf16.mxu1 %v8225_v21  ;;  %v6499_v27 = vcombine.low %v10244_v24, %v10244_v24  ;;  %v10447_v21 = vld [vmem:[%s11474_s0 + $0x40] sm:$0xff] }
 0x1c5   :  { %5269 = vmatprep.mubr.bf16.mxu0 %v6500_v28  ;;  %5802 = vmatprep.mubr.bf16.mxu1 %v6500_v28  ;;  %v8312_v28 = vld [vmem:[%s11473_s1 + $0x1000] ss:$16 sps:$4 sm:$0xff]   ;;  %v8320_v24 = vld [vmem:[%s11473_s1 + $0x1024] ss:$16 sps:$4 sm:$0xff]  }
 0x1c7   :  { %5240 = vmatpush1.bf16.msra.mxu0 %v8220_v29  ;;  %5773 = vmatpush1.bf16.msra.mxu1 %v8223_v30  ;;  %v8315_v29 = vld [vmem:[%s11473_s1 + $0x1008] ss:$16 sps:$4 sm:$0xff]   ;;  %v8323_v30 = vld [vmem:[%s11473_s1 + $0x102c] ss:$16 sps:$4 sm:$0xff]  }
 0x1c8   :  { %5241 = vmatprep.subr.bf16.mxu0 %v8228_v31  ;;  %5774 = vmatprep.subr.bf16.mxu1 %v8231_v32  ;;  %v6502_v31 = vcombine.high %v10447_v21, %v10447_v21  ;;  %v8318_v32 = vld [vmem:[%s11473_s1 + $0x1020] ss:$16 sps:$4 sm:$0xff]  }
 0x1cb   :  { %5242 = vmatpush1.bf16.msra.mxu0 %v8226_v33  ;;  %5775 = vmatpush1.bf16.msra.mxu1 %v8229_v34  ;;  %v8321_v33 = vld [vmem:[%s11473_s1 + $0x1028] ss:$16 sps:$4 sm:$0xff]   ;;  %v8326_v34 = vld [vmem:[%s11473_s1 + $0x1044] ss:$16 sps:$4 sm:$0xff]  }
 0x1cc   :  { %5243 = vmatprep.subr.bf16.mxu0 %v8234_v35  ;;  %5776 = vmatprep.subr.bf16.mxu1 %v8237_v36  ;;  %v8329_v35 = vld [vmem:[%s11473_s1 + $0x104c] ss:$16 sps:$4 sm:$0xff]   ;;  %v8324_v36 = vld [vmem:[%s11473_s1 + $0x1040] ss:$16 sps:$4 sm:$0xff]  }
 0x1cf   :  { %5244 = vmatpush1.bf16.msra.mxu0 %v8232_v37  ;;  %5777 = vmatpush1.bf16.msra.mxu1 %v8235_v38  ;;  %v8327_v37 = vld [vmem:[%s11473_s1 + $0x1048] ss:$16 sps:$4 sm:$0xff]   ;;  %v8332_v38 = vld [vmem:[%s11473_s1 + $0x1064] ss:$16 sps:$4 sm:$0xff]  }
 0x1d0   :  { %5245 = vmatprep.subr.bf16.mxu0 %v8240_v39  ;;  %5778 = vmatprep.subr.bf16.mxu1 %v8243_v40  ;;  %v8335_v39 = vld [vmem:[%s11473_s1 + $0x106c] ss:$16 sps:$4 sm:$0xff]   ;;  %v8330_v40 = vld [vmem:[%s11473_s1 + $0x1060] ss:$16 sps:$4 sm:$0xff]  }
 0x1d3   :  { %5246 = vmatpush1.bf16.msra.mxu0 %v8238_v41  ;;  %5779 = vmatpush1.bf16.msra.mxu1 %v8241_v42  ;;  %v8333_v41 = vld [vmem:[%s11473_s1 + $0x1068] ss:$16 sps:$4 sm:$0xff]   ;;  %v8338_v42 = vld [vmem:[%s11473_s1 + $0x1084] ss:$16 sps:$4 sm:$0xff]  }
 0x1d4   :  { %5247 = vmatprep.subr.bf16.mxu0 %v8246_v43  ;;  %5780 = vmatprep.subr.bf16.mxu1 %v8249_v44  ;;  %v8341_v43 = vld [vmem:[%s11473_s1 + $0x108c] ss:$16 sps:$4 sm:$0xff]   ;;  %v8336_v44 = vld [vmem:[%s11473_s1 + $0x1080] ss:$16 sps:$4 sm:$0xff]  }
 0x1d7   :  { %5248 = vmatpush1.bf16.msra.mxu0 %v8244_v45  ;;  %5781 = vmatpush1.bf16.msra.mxu1 %v8247_v46  ;;  %v8339_v45 = vld [vmem:[%s11473_s1 + $0x1088] ss:$16 sps:$4 sm:$0xff]   ;;  %v8344_v46 = vld [vmem:[%s11473_s1 + $0x10a4] ss:$16 sps:$4 sm:$0xff]  }
 0x1d8   :  { %5249 = vmatprep.subr.bf16.mxu0 %v8252_v47  ;;  %5782 = vmatprep.subr.bf16.mxu1 %v8255_v48  ;;  %v8347_v47 = vld [vmem:[%s11473_s1 + $0x10ac] ss:$16 sps:$4 sm:$0xff]   ;;  %v8342_v48 = vld [vmem:[%s11473_s1 + $0x10a0] ss:$16 sps:$4 sm:$0xff]  }
 0x1db   :  { %5250 = vmatpush1.bf16.msra.mxu0 %v8250_v49  ;;  %5783 = vmatpush1.bf16.msra.mxu1 %v8253_v50  ;;  %v8345_v49 = vld [vmem:[%s11473_s1 + $0x10a8] ss:$16 sps:$4 sm:$0xff]   ;;  %v8350_v50 = vld [vmem:[%s11473_s1 + $0x10c4] ss:$16 sps:$4 sm:$0xff]  }
 0x1dc   :  { %5251 = vmatprep.subr.bf16.mxu0 %v8258_v51  ;;  %5784 = vmatprep.subr.bf16.mxu1 %v8261_v52  ;;  %v8353_v51 = vld [vmem:[%s11473_s1 + $0x10cc] ss:$16 sps:$4 sm:$0xff]   ;;  %v8348_v52 = vld [vmem:[%s11473_s1 + $0x10c0] ss:$16 sps:$4 sm:$0xff]  }
 0x1df   :  { %5252 = vmatpush1.bf16.msra.mxu0 %v8256_v53  ;;  %5785 = vmatpush1.bf16.msra.mxu1 %v8259_v54  ;;  %v8351_v53 = vld [vmem:[%s11473_s1 + $0x10c8] ss:$16 sps:$4 sm:$0xff]   ;;  %v8356_v54 = vld [vmem:[%s11473_s1 + $0x10e4] ss:$16 sps:$4 sm:$0xff]  }
 0x1e0   :  { %5253 = vmatprep.subr.bf16.mxu0 %v8264_v55  ;;  %5786 = vmatprep.subr.bf16.mxu1 %v8267_v56  ;;  %v8359_v55 = vld [vmem:[%s11473_s1 + $0x10ec] ss:$16 sps:$4 sm:$0xff]   ;;  %v8354_v56 = vld [vmem:[%s11473_s1 + $0x10e0] ss:$16 sps:$4 sm:$0xff]  }
 0x1e3   :  { %5254 = vmatpush1.bf16.msra.mxu0 %v8262_v57  ;;  %5787 = vmatpush1.bf16.msra.mxu1 %v8265_v58  ;;  %v8357_v57 = vld [vmem:[%s11473_s1 + $0x10e8] ss:$16 sps:$4 sm:$0xff]   ;;  %v8362_v58 = vld [vmem:[%s11473_s1 + $0x1104] ss:$16 sps:$4 sm:$0xff]  }
 0x1e4   :  { %5255 = vmatprep.subr.bf16.mxu0 %v8270_v59  ;;  %5788 = vmatprep.subr.bf16.mxu1 %v8273_v60  ;;  %v8365_v59 = vld [vmem:[%s11473_s1 + $0x110c] ss:$16 sps:$4 sm:$0xff]   ;;  %v8360_v60 = vld [vmem:[%s11473_s1 + $0x1100] ss:$16 sps:$4 sm:$0xff]  }
 0x1e7   :  { %5256 = vmatpush1.bf16.msra.mxu0 %v8268_v61  ;;  %5789 = vmatpush1.bf16.msra.mxu1 %v8271_v62  ;;  %v8363_v61 = vld [vmem:[%s11473_s1 + $0x1108] ss:$16 sps:$4 sm:$0xff]   ;;  %v8368_v62 = vld [vmem:[%s11473_s1 + $0x1124] ss:$16 sps:$4 sm:$0xff]  }
 0x1e8   :  { %5257 = vmatprep.subr.bf16.mxu0 %v8276_v63  ;;  %5790 = vmatprep.subr.bf16.mxu1 %v8279_v0  ;;  %v8371_v63 = vld [vmem:[%s11473_s1 + $0x112c] ss:$16 sps:$4 sm:$0xff]   ;;  %v8366_v0 = vld [vmem:[%s11473_s1 + $0x1120] ss:$16 sps:$4 sm:$0xff]  }
 0x1eb   :  { %5258 = vmatpush1.bf16.msra.mxu0 %v8274_v1  ;;  %5791 = vmatpush1.bf16.msra.mxu1 %v8277_v2  ;;  %v8369_v1 = vld [vmem:[%s11473_s1 + $0x1128] ss:$16 sps:$4 sm:$0xff]   ;;  %v8374_v2 = vld [vmem:[%s11473_s1 + $0x1144] ss:$16 sps:$4 sm:$0xff]  }
 0x1ec   :  { %5259 = vmatprep.subr.bf16.mxu0 %v8282_v3  ;;  %5792 = vmatprep.subr.bf16.mxu1 %v8285_v4  ;;  %v8377_v3 = vld [vmem:[%s11473_s1 + $0x114c] ss:$16 sps:$4 sm:$0xff]   ;;  %v8372_v4 = vld [vmem:[%s11473_s1 + $0x1140] ss:$16 sps:$4 sm:$0xff]  }
 0x1ef   :  { %5260 = vmatpush1.bf16.msra.mxu0 %v8280_v5  ;;  %5793 = vmatpush1.bf16.msra.mxu1 %v8283_v6  ;;  %v8375_v5 = vld [vmem:[%s11473_s1 + $0x1148] ss:$16 sps:$4 sm:$0xff]   ;;  %v8380_v6 = vld [vmem:[%s11473_s1 + $0x1164] ss:$16 sps:$4 sm:$0xff]  }
 0x1f0   :  { %5261 = vmatprep.subr.bf16.mxu0 %v8288_v7  ;;  %5794 = vmatprep.subr.bf16.mxu1 %v8291_v8  ;;  %v8383_v7 = vld [vmem:[%s11473_s1 + $0x116c] ss:$16 sps:$4 sm:$0xff]   ;;  %v8378_v8 = vld [vmem:[%s11473_s1 + $0x1160] ss:$16 sps:$4 sm:$0xff]  }
 0x1f3   :  { %5262 = vmatpush1.bf16.msra.mxu0 %v8286_v9  ;;  %5795 = vmatpush1.bf16.msra.mxu1 %v8289_v10  ;;  %v8381_v9 = vld [vmem:[%s11473_s1 + $0x1168] ss:$16 sps:$4 sm:$0xff]   ;;  %v8386_v10 = vld [vmem:[%s11473_s1 + $0x1184] ss:$16 sps:$4 sm:$0xff]  }
 0x1f4   :  { %5263 = vmatprep.subr.bf16.mxu0 %v8294_v12  ;;  %5796 = vmatprep.subr.bf16.mxu1 %v8297_v13  ;;  %v8389_v12 = vld [vmem:[%s11473_s1 + $0x118c] ss:$16 sps:$4 sm:$0xff]   ;;  %v8384_v13 = vld [vmem:[%s11473_s1 + $0x1180] ss:$16 sps:$4 sm:$0xff]  }
 0x1f7   :  { %5264 = vmatpush1.bf16.msra.mxu0 %v8292_v15  ;;  %5797 = vmatpush1.bf16.msra.mxu1 %v8295_v11  ;;  %v8387_v15 = vld [vmem:[%s11473_s1 + $0x1188] ss:$16 sps:$4 sm:$0xff]   ;;  %v8392_v11 = vld [vmem:[%s11473_s1 + $0x11a4] ss:$16 sps:$4 sm:$0xff]  }
 0x1f8   :  { %5265 = vmatprep.subr.bf16.mxu0 %v8300_v17  ;;  %5798 = vmatprep.subr.bf16.mxu1 %v8303_v14  ;;  %v8395_v17 = vld [vmem:[%s11473_s1 + $0x11ac] ss:$16 sps:$4 sm:$0xff]   ;;  %v8390_v14 = vld [vmem:[%s11473_s1 + $0x11a0] ss:$16 sps:$4 sm:$0xff]  }
 0x1fb   :  { %5266 = vmatpush1.bf16.msra.mxu0 %v8298_v19  ;;  %5799 = vmatpush1.bf16.msra.mxu1 %v8301_v20  ;;  %v8393_v19 = vld [vmem:[%s11473_s1 + $0x11a8] ss:$16 sps:$4 sm:$0xff]   ;;  %v8398_v20 = vld [vmem:[%s11473_s1 + $0x11c4] ss:$16 sps:$4 sm:$0xff]  }
 0x1fc   :  { %5267 = vmatprep.subr.bf16.mxu0 %v8306_v16  ;;  %5800 = vmatprep.subr.bf16.mxu1 %v8309_v22  ;;  %v8401_v16 = vld [vmem:[%s11473_s1 + $0x11cc] ss:$16 sps:$4 sm:$0xff]   ;;  %v8396_v22 = vld [vmem:[%s11473_s1 + $0x11c0] ss:$16 sps:$4 sm:$0xff]  }
 0x1ff   :  { %5268 = vmatpush1.bf16.msra.mxu0 %v8304_v23  ;;  %5801 = vmatpush1.bf16.msra.mxu1 %v8307_v18  ;;  %v8399_v23 = vld [vmem:[%s11473_s1 + $0x11c8] ss:$16 sps:$4 sm:$0xff]   ;;  %v8404_v18 = vld [vmem:[%s11473_s1 + $0x11e4] ss:$16 sps:$4 sm:$0xff]  }
 0x200   :  { %5278 = vmatprep.subr.bf16.mxu0 %v8314_v25  ;;  %5811 = vmatprep.subr.bf16.mxu1 %v8317_v26  ;;  %v8407_v25 = vld [vmem:[%s11473_s1 + $0x11ec] ss:$16 sps:$4 sm:$0xff]   ;;  %v8402_v26 = vld [vmem:[%s11473_s1 + $0x11e0] ss:$16 sps:$4 sm:$0xff]  }
 0x202   :  { %5270 = vmatmul.mubr.bf16.vlgmr.msra.gmra.mrb[0].mxu0 %v6499_v27  ;;  %5803 = vmatmul.mubr.bf16.vlgmr.msra.gmra.mrb[0].mxu1 %v6499_v27  ;;  %v8405_v27 = vld [vmem:[%s11473_s1 + $0x11e8] ss:$16 sps:$4 sm:$0xff]  }
 0x203   :  { %5279 = vmatpush1.bf16.msra.mxu0 %v8312_v28  ;;  %5812 = vmatpush1.bf16.msra.mxu1 %v8315_v29  ;;  %v8412_v28 = vld [vmem:[%s11473_s1 + $0x1204] ss:$16 sps:$4 sm:$0xff]   ;;  %v8415_v29 = vld [vmem:[%s11473_s1 + $0x120c] ss:$16 sps:$4 sm:$0xff]  }
 0x204   :  { %5280 = vmatprep.subr.bf16.mxu0 %v8320_v24  ;;  %5813 = vmatprep.subr.bf16.mxu1 %v8323_v30  ;;  %v6501_v24 = vcombine.low %v10447_v21, %v10447_v21  ;;  %v10648_v30 = vld [vmem:[%s11474_s0 + $0x48] sm:$0xff]  ;;  %v8418_v21 = vld [vmem:[%s11473_s1 + $0x1224] ss:$16 sps:$4 sm:$0xff]  }
 0x205   :  { %5310 = vmatprep.mubr.bf16.mxu0 %v6502_v31  ;;  %5843 = vmatprep.mubr.bf16.mxu1 %v6502_v31  ;;  %v8410_v31 = vld [vmem:[%s11473_s1 + $0x1200] ss:$16 sps:$4 sm:$0xff]  }
 0x207   :  { %5281 = vmatpush1.bf16.msra.mxu0 %v8318_v32  ;;  %5814 = vmatpush1.bf16.msra.mxu1 %v8321_v33  ;;  %v8413_v32 = vld [vmem:[%s11473_s1 + $0x1208] ss:$16 sps:$4 sm:$0xff]   ;;  %v8421_v33 = vld [vmem:[%s11473_s1 + $0x122c] ss:$16 sps:$4 sm:$0xff]  }
 0x208   :  { %5282 = vmatprep.subr.bf16.mxu0 %v8326_v34  ;;  %5815 = vmatprep.subr.bf16.mxu1 %v8329_v35  ;;  %v6504_v34 = vcombine.high %v10648_v30, %v10648_v30  ;;  %v8416_v35 = vld [vmem:[%s11473_s1 + $0x1220] ss:$16 sps:$4 sm:$0xff]  }
 0x20b   :  { %5283 = vmatpush1.bf16.msra.mxu0 %v8324_v36  ;;  %5816 = vmatpush1.bf16.msra.mxu1 %v8327_v37  ;;  %v8419_v36 = vld [vmem:[%s11473_s1 + $0x1228] ss:$16 sps:$4 sm:$0xff]   ;;  %v8424_v37 = vld [vmem:[%s11473_s1 + $0x1244] ss:$16 sps:$4 sm:$0xff]  }
 0x20c   :  { %5284 = vmatprep.subr.bf16.mxu0 %v8332_v38  ;;  %5817 = vmatprep.subr.bf16.mxu1 %v8335_v39  ;;  %v8427_v38 = vld [vmem:[%s11473_s1 + $0x124c] ss:$16 sps:$4 sm:$0xff]   ;;  %v8422_v39 = vld [vmem:[%s11473_s1 + $0x1240] ss:$16 sps:$4 sm:$0xff]  }
 0x20f   :  { %5285 = vmatpush1.bf16.msra.mxu0 %v8330_v40  ;;  %5818 = vmatpush1.bf16.msra.mxu1 %v8333_v41  ;;  %v8425_v40 = vld [vmem:[%s11473_s1 + $0x1248] ss:$16 sps:$4 sm:$0xff]   ;;  %v8430_v41 = vld [vmem:[%s11473_s1 + $0x1264] ss:$16 sps:$4 sm:$0xff]  }
 0x210   :  { %5286 = vmatprep.subr.bf16.mxu0 %v8338_v42  ;;  %5819 = vmatprep.subr.bf16.mxu1 %v8341_v43  ;;  %v8433_v42 = vld [vmem:[%s11473_s1 + $0x126c] ss:$16 sps:$4 sm:$0xff]   ;;  %v8428_v43 = vld [vmem:[%s11473_s1 + $0x1260] ss:$16 sps:$4 sm:$0xff]  }
 0x213   :  { %5287 = vmatpush1.bf16.msra.mxu0 %v8336_v44  ;;  %5820 = vmatpush1.bf16.msra.mxu1 %v8339_v45  ;;  %v8431_v44 = vld [vmem:[%s11473_s1 + $0x1268] ss:$16 sps:$4 sm:$0xff]   ;;  %v8436_v45 = vld [vmem:[%s11473_s1 + $0x1284] ss:$16 sps:$4 sm:$0xff]  }
 0x214   :  { %5288 = vmatprep.subr.bf16.mxu0 %v8344_v46  ;;  %5821 = vmatprep.subr.bf16.mxu1 %v8347_v47  ;;  %v8439_v46 = vld [vmem:[%s11473_s1 + $0x128c] ss:$16 sps:$4 sm:$0xff]   ;;  %v8434_v47 = vld [vmem:[%s11473_s1 + $0x1280] ss:$16 sps:$4 sm:$0xff]  }
 0x217   :  { %5289 = vmatpush1.bf16.msra.mxu0 %v8342_v48  ;;  %5822 = vmatpush1.bf16.msra.mxu1 %v8345_v49  ;;  %v8437_v48 = vld [vmem:[%s11473_s1 + $0x1288] ss:$16 sps:$4 sm:$0xff]   ;;  %v8442_v49 = vld [vmem:[%s11473_s1 + $0x12a4] ss:$16 sps:$4 sm:$0xff]  }
 0x218   :  { %5290 = vmatprep.subr.bf16.mxu0 %v8350_v50  ;;  %5823 = vmatprep.subr.bf16.mxu1 %v8353_v51  ;;  %v8445_v50 = vld [vmem:[%s11473_s1 + $0x12ac] ss:$16 sps:$4 sm:$0xff]   ;;  %v8440_v51 = vld [vmem:[%s11473_s1 + $0x12a0] ss:$16 sps:$4 sm:$0xff]  }
 0x21b   :  { %5291 = vmatpush1.bf16.msra.mxu0 %v8348_v52  ;;  %5824 = vmatpush1.bf16.msra.mxu1 %v8351_v53  ;;  %v8443_v52 = vld [vmem:[%s11473_s1 + $0x12a8] ss:$16 sps:$4 sm:$0xff]   ;;  %v8448_v53 = vld [vmem:[%s11473_s1 + $0x12c4] ss:$16 sps:$4 sm:$0xff]  }
 0x21c   :  { %5292 = vmatprep.subr.bf16.mxu0 %v8356_v54  ;;  %5825 = vmatprep.subr.bf16.mxu1 %v8359_v55  ;;  %v8451_v54 = vld [vmem:[%s11473_s1 + $0x12cc] ss:$16 sps:$4 sm:$0xff]   ;;  %v8446_v55 = vld [vmem:[%s11473_s1 + $0x12c0] ss:$16 sps:$4 sm:$0xff]  }
 0x21f   :  { %5293 = vmatpush1.bf16.msra.mxu0 %v8354_v56  ;;  %5826 = vmatpush1.bf16.msra.mxu1 %v8357_v57  ;;  %v8449_v56 = vld [vmem:[%s11473_s1 + $0x12c8] ss:$16 sps:$4 sm:$0xff]   ;;  %v8454_v57 = vld [vmem:[%s11473_s1 + $0x12e4] ss:$16 sps:$4 sm:$0xff]  }
 0x220   :  { %5294 = vmatprep.subr.bf16.mxu0 %v8362_v58  ;;  %5827 = vmatprep.subr.bf16.mxu1 %v8365_v59  ;;  %v8457_v58 = vld [vmem:[%s11473_s1 + $0x12ec] ss:$16 sps:$4 sm:$0xff]   ;;  %v8452_v59 = vld [vmem:[%s11473_s1 + $0x12e0] ss:$16 sps:$4 sm:$0xff]  }
 0x223   :  { %5295 = vmatpush1.bf16.msra.mxu0 %v8360_v60  ;;  %5828 = vmatpush1.bf16.msra.mxu1 %v8363_v61  ;;  %v8455_v60 = vld [vmem:[%s11473_s1 + $0x12e8] ss:$16 sps:$4 sm:$0xff]   ;;  %v8460_v61 = vld [vmem:[%s11473_s1 + $0x1304] ss:$16 sps:$4 sm:$0xff]  }
 0x224   :  { %5296 = vmatprep.subr.bf16.mxu0 %v8368_v62  ;;  %5829 = vmatprep.subr.bf16.mxu1 %v8371_v63  ;;  %v8463_v62 = vld [vmem:[%s11473_s1 + $0x130c] ss:$16 sps:$4 sm:$0xff]   ;;  %v8458_v63 = vld [vmem:[%s11473_s1 + $0x1300] ss:$16 sps:$4 sm:$0xff]  }
 0x227   :  { %5297 = vmatpush1.bf16.msra.mxu0 %v8366_v0  ;;  %5830 = vmatpush1.bf16.msra.mxu1 %v8369_v1  ;;  %v8461_v0 = vld [vmem:[%s11473_s1 + $0x1308] ss:$16 sps:$4 sm:$0xff]   ;;  %v8466_v1 = vld [vmem:[%s11473_s1 + $0x1324] ss:$16 sps:$4 sm:$0xff]  }
 0x228   :  { %5298 = vmatprep.subr.bf16.mxu0 %v8374_v2  ;;  %5831 = vmatprep.subr.bf16.mxu1 %v8377_v3  ;;  %v8469_v2 = vld [vmem:[%s11473_s1 + $0x132c] ss:$16 sps:$4 sm:$0xff]   ;;  %v8464_v3 = vld [vmem:[%s11473_s1 + $0x1320] ss:$16 sps:$4 sm:$0xff]  }
 0x22b   :  { %5299 = vmatpush1.bf16.msra.mxu0 %v8372_v4  ;;  %5832 = vmatpush1.bf16.msra.mxu1 %v8375_v5  ;;  %v8467_v4 = vld [vmem:[%s11473_s1 + $0x1328] ss:$16 sps:$4 sm:$0xff]   ;;  %v8472_v5 = vld [vmem:[%s11473_s1 + $0x1344] ss:$16 sps:$4 sm:$0xff]  }
 0x22c   :  { %5300 = vmatprep.subr.bf16.mxu0 %v8380_v6  ;;  %5833 = vmatprep.subr.bf16.mxu1 %v8383_v7  ;;  %v8475_v6 = vld [vmem:[%s11473_s1 + $0x134c] ss:$16 sps:$4 sm:$0xff]   ;;  %v8470_v7 = vld [vmem:[%s11473_s1 + $0x1340] ss:$16 sps:$4 sm:$0xff]  }
 0x22f   :  { %5301 = vmatpush1.bf16.msra.mxu0 %v8378_v8  ;;  %5834 = vmatpush1.bf16.msra.mxu1 %v8381_v9  ;;  %v8473_v8 = vld [vmem:[%s11473_s1 + $0x1348] ss:$16 sps:$4 sm:$0xff]   ;;  %v8478_v9 = vld [vmem:[%s11473_s1 + $0x1364] ss:$16 sps:$4 sm:$0xff]  }
 0x230   :  { %5302 = vmatprep.subr.bf16.mxu0 %v8386_v10  ;;  %5835 = vmatprep.subr.bf16.mxu1 %v8389_v12  ;;  %v8481_v10 = vld [vmem:[%s11473_s1 + $0x136c] ss:$16 sps:$4 sm:$0xff]   ;;  %v8476_v12 = vld [vmem:[%s11473_s1 + $0x1360] ss:$16 sps:$4 sm:$0xff]  }
 0x233   :  { %5303 = vmatpush1.bf16.msra.mxu0 %v8384_v13  ;;  %5836 = vmatpush1.bf16.msra.mxu1 %v8387_v15  ;;  %v8479_v13 = vld [vmem:[%s11473_s1 + $0x1368] ss:$16 sps:$4 sm:$0xff]   ;;  %v8484_v15 = vld [vmem:[%s11473_s1 + $0x1384] ss:$16 sps:$4 sm:$0xff]  }
 0x234   :  { %5304 = vmatprep.subr.bf16.mxu0 %v8392_v11  ;;  %5837 = vmatprep.subr.bf16.mxu1 %v8395_v17  ;;  %v8487_v11 = vld [vmem:[%s11473_s1 + $0x138c] ss:$16 sps:$4 sm:$0xff]   ;;  %v8482_v17 = vld [vmem:[%s11473_s1 + $0x1380] ss:$16 sps:$4 sm:$0xff]  }
 0x237   :  { %5305 = vmatpush1.bf16.msra.mxu0 %v8390_v14  ;;  %5838 = vmatpush1.bf16.msra.mxu1 %v8393_v19  ;;  %v8485_v14 = vld [vmem:[%s11473_s1 + $0x1388] ss:$16 sps:$4 sm:$0xff]   ;;  %v8490_v19 = vld [vmem:[%s11473_s1 + $0x13a4] ss:$16 sps:$4 sm:$0xff]  }
 0x238   :  { %5306 = vmatprep.subr.bf16.mxu0 %v8398_v20  ;;  %5839 = vmatprep.subr.bf16.mxu1 %v8401_v16  ;;  %v8493_v20 = vld [vmem:[%s11473_s1 + $0x13ac] ss:$16 sps:$4 sm:$0xff]   ;;  %v8488_v16 = vld [vmem:[%s11473_s1 + $0x13a0] ss:$16 sps:$4 sm:$0xff]  }
 0x23b   :  { %5307 = vmatpush1.bf16.msra.mxu0 %v8396_v22  ;;  %5840 = vmatpush1.bf16.msra.mxu1 %v8399_v23  ;;  %v8491_v22 = vld [vmem:[%s11473_s1 + $0x13a8] ss:$16 sps:$4 sm:$0xff]   ;;  %v8496_v23 = vld [vmem:[%s11473_s1 + $0x13c4] ss:$16 sps:$4 sm:$0xff]  }
 0x23c   :  { %5308 = vmatprep.subr.bf16.mxu0 %v8404_v18  ;;  %5841 = vmatprep.subr.bf16.mxu1 %v8407_v25  ;;  %v8499_v18 = vld [vmem:[%s11473_s1 + $0x13cc] ss:$16 sps:$4 sm:$0xff]   ;;  %v8494_v25 = vld [vmem:[%s11473_s1 + $0x13c0] ss:$16 sps:$4 sm:$0xff]  }
 0x23f   :  { %5309 = vmatpush1.bf16.msra.mxu0 %v8402_v26  ;;  %5842 = vmatpush1.bf16.msra.mxu1 %v8405_v27  ;;  %v8497_v26 = vld [vmem:[%s11473_s1 + $0x13c8] ss:$16 sps:$4 sm:$0xff]   ;;  %v8502_v27 = vld [vmem:[%s11473_s1 + $0x13e4] ss:$16 sps:$4 sm:$0xff]  }
 0x240   :  { %5319 = vmatprep.subr.bf16.mxu0 %v8412_v28  ;;  %5852 = vmatprep.subr.bf16.mxu1 %v8415_v29  ;;  %v8505_v28 = vld [vmem:[%s11473_s1 + $0x13ec] ss:$16 sps:$4 sm:$0xff]   ;;  %v8500_v29 = vld [vmem:[%s11473_s1 + $0x13e0] ss:$16 sps:$4 sm:$0xff]  }
 0x242   :  { %5311 = vmatmul.mubr.bf16.vlgmr.msra.gmra.mrb[0].mxu0 %v6501_v24  ;;  %5844 = vmatmul.mubr.bf16.vlgmr.msra.gmra.mrb[0].mxu1 %v6501_v24  ;;  %v8503_v24 = vld [vmem:[%s11473_s1 + $0x13e8] ss:$16 sps:$4 sm:$0xff]  }
 0x243   :  { %5320 = vmatpush1.bf16.msra.mxu0 %v8410_v31  ;;  %5853 = vmatpush1.bf16.msra.mxu1 %v8413_v32  ;;  %v8510_v31 = vld [vmem:[%s11473_s1 + $0x1404] ss:$16 sps:$4 sm:$0xff]   ;;  %v8513_v32 = vld [vmem:[%s11473_s1 + $0x140c] ss:$16 sps:$4 sm:$0xff]  }
 0x244   :  { %5321 = vmatprep.subr.bf16.mxu0 %v8418_v21  ;;  %5854 = vmatprep.subr.bf16.mxu1 %v8421_v33  ;;  %v6503_v21 = vcombine.low %v10648_v30, %v10648_v30  ;;  %v10849_v33 = vld [vmem:[%s11474_s0 + $0x50] sm:$0xff] }
 0x245   :  { %5351 = vmatprep.mubr.bf16.mxu0 %v6504_v34  ;;  %5884 = vmatprep.mubr.bf16.mxu1 %v6504_v34  ;;  %v8508_v34 = vld [vmem:[%s11473_s1 + $0x1400] ss:$16 sps:$4 sm:$0xff]   ;;  %v8516_v30 = vld [vmem:[%s11473_s1 + $0x1424] ss:$16 sps:$4 sm:$0xff]  }
 0x247   :  { %5322 = vmatpush1.bf16.msra.mxu0 %v8416_v35  ;;  %5855 = vmatpush1.bf16.msra.mxu1 %v8419_v36  ;;  %v8511_v35 = vld [vmem:[%s11473_s1 + $0x1408] ss:$16 sps:$4 sm:$0xff]   ;;  %v8519_v36 = vld [vmem:[%s11473_s1 + $0x142c] ss:$16 sps:$4 sm:$0xff]  }
 0x248   :  { %5323 = vmatprep.subr.bf16.mxu0 %v8424_v37  ;;  %5856 = vmatprep.subr.bf16.mxu1 %v8427_v38  ;;  %v6506_v37 = vcombine.high %v10849_v33, %v10849_v33  ;;  %v8514_v38 = vld [vmem:[%s11473_s1 + $0x1420] ss:$16 sps:$4 sm:$0xff]  }
 0x24b   :  { %5324 = vmatpush1.bf16.msra.mxu0 %v8422_v39  ;;  %5857 = vmatpush1.bf16.msra.mxu1 %v8425_v40  ;;  %v8517_v39 = vld [vmem:[%s11473_s1 + $0x1428] ss:$16 sps:$4 sm:$0xff]   ;;  %v8522_v40 = vld [vmem:[%s11473_s1 + $0x1444] ss:$16 sps:$4 sm:$0xff]  }
 0x24c   :  { %5325 = vmatprep.subr.bf16.mxu0 %v8430_v41  ;;  %5858 = vmatprep.subr.bf16.mxu1 %v8433_v42  ;;  %v8525_v41 = vld [vmem:[%s11473_s1 + $0x144c] ss:$16 sps:$4 sm:$0xff]   ;;  %v8520_v42 = vld [vmem:[%s11473_s1 + $0x1440] ss:$16 sps:$4 sm:$0xff]  }
 0x24f   :  { %5326 = vmatpush1.bf16.msra.mxu0 %v8428_v43  ;;  %5859 = vmatpush1.bf16.msra.mxu1 %v8431_v44  ;;  %v8523_v43 = vld [vmem:[%s11473_s1 + $0x1448] ss:$16 sps:$4 sm:$0xff]   ;;  %v8528_v44 = vld [vmem:[%s11473_s1 + $0x1464] ss:$16 sps:$4 sm:$0xff]  }
 0x250   :  { %5327 = vmatprep.subr.bf16.mxu0 %v8436_v45  ;;  %5860 = vmatprep.subr.bf16.mxu1 %v8439_v46  ;;  %v8531_v45 = vld [vmem:[%s11473_s1 + $0x146c] ss:$16 sps:$4 sm:$0xff]   ;;  %v8526_v46 = vld [vmem:[%s11473_s1 + $0x1460] ss:$16 sps:$4 sm:$0xff]  }
 0x253   :  { %5328 = vmatpush1.bf16.msra.mxu0 %v8434_v47  ;;  %5861 = vmatpush1.bf16.msra.mxu1 %v8437_v48  ;;  %v8529_v47 = vld [vmem:[%s11473_s1 + $0x1468] ss:$16 sps:$4 sm:$0xff]   ;;  %v8534_v48 = vld [vmem:[%s11473_s1 + $0x1484] ss:$16 sps:$4 sm:$0xff]  }
 0x254   :  { %5329 = vmatprep.subr.bf16.mxu0 %v8442_v49  ;;  %5862 = vmatprep.subr.bf16.mxu1 %v8445_v50  ;;  %v8537_v49 = vld [vmem:[%s11473_s1 + $0x148c] ss:$16 sps:$4 sm:$0xff]   ;;  %v8532_v50 = vld [vmem:[%s11473_s1 + $0x1480] ss:$16 sps:$4 sm:$0xff]  }
 0x257   :  { %5330 = vmatpush1.bf16.msra.mxu0 %v8440_v51  ;;  %5863 = vmatpush1.bf16.msra.mxu1 %v8443_v52  ;;  %v8535_v51 = vld [vmem:[%s11473_s1 + $0x1488] ss:$16 sps:$4 sm:$0xff]   ;;  %v8540_v52 = vld [vmem:[%s11473_s1 + $0x14a4] ss:$16 sps:$4 sm:$0xff]  }
 0x258   :  { %5331 = vmatprep.subr.bf16.mxu0 %v8448_v53  ;;  %5864 = vmatprep.subr.bf16.mxu1 %v8451_v54  ;;  %v8543_v53 = vld [vmem:[%s11473_s1 + $0x14ac] ss:$16 sps:$4 sm:$0xff]   ;;  %v8538_v54 = vld [vmem:[%s11473_s1 + $0x14a0] ss:$16 sps:$4 sm:$0xff]  }
 0x25b   :  { %5332 = vmatpush1.bf16.msra.mxu0 %v8446_v55  ;;  %5865 = vmatpush1.bf16.msra.mxu1 %v8449_v56  ;;  %v8541_v55 = vld [vmem:[%s11473_s1 + $0x14a8] ss:$16 sps:$4 sm:$0xff]   ;;  %v8546_v56 = vld [vmem:[%s11473_s1 + $0x14c4] ss:$16 sps:$4 sm:$0xff]  }
 0x25c   :  { %5333 = vmatprep.subr.bf16.mxu0 %v8454_v57  ;;  %5866 = vmatprep.subr.bf16.mxu1 %v8457_v58  ;;  %v8549_v57 = vld [vmem:[%s11473_s1 + $0x14cc] ss:$16 sps:$4 sm:$0xff]   ;;  %v8544_v58 = vld [vmem:[%s11473_s1 + $0x14c0] ss:$16 sps:$4 sm:$0xff]  }
 0x25f   :  { %5334 = vmatpush1.bf16.msra.mxu0 %v8452_v59  ;;  %5867 = vmatpush1.bf16.msra.mxu1 %v8455_v60  ;;  %v8547_v59 = vld [vmem:[%s11473_s1 + $0x14c8] ss:$16 sps:$4 sm:$0xff]   ;;  %v8552_v60 = vld [vmem:[%s11473_s1 + $0x14e4] ss:$16 sps:$4 sm:$0xff]  }
 0x260   :  { %5335 = vmatprep.subr.bf16.mxu0 %v8460_v61  ;;  %5868 = vmatprep.subr.bf16.mxu1 %v8463_v62  ;;  %v8555_v61 = vld [vmem:[%s11473_s1 + $0x14ec] ss:$16 sps:$4 sm:$0xff]   ;;  %v8550_v62 = vld [vmem:[%s11473_s1 + $0x14e0] ss:$16 sps:$4 sm:$0xff]  }
 0x263   :  { %5336 = vmatpush1.bf16.msra.mxu0 %v8458_v63  ;;  %5869 = vmatpush1.bf16.msra.mxu1 %v8461_v0  ;;  %v8553_v63 = vld [vmem:[%s11473_s1 + $0x14e8] ss:$16 sps:$4 sm:$0xff]   ;;  %v8558_v0 = vld [vmem:[%s11473_s1 + $0x1504] ss:$16 sps:$4 sm:$0xff]  }
 0x264   :  { %5337 = vmatprep.subr.bf16.mxu0 %v8466_v1  ;;  %5870 = vmatprep.subr.bf16.mxu1 %v8469_v2  ;;  %v8561_v1 = vld [vmem:[%s11473_s1 + $0x150c] ss:$16 sps:$4 sm:$0xff]   ;;  %v8556_v2 = vld [vmem:[%s11473_s1 + $0x1500] ss:$16 sps:$4 sm:$0xff]  }
 0x267   :  { %5338 = vmatpush1.bf16.msra.mxu0 %v8464_v3  ;;  %5871 = vmatpush1.bf16.msra.mxu1 %v8467_v4  ;;  %v8559_v3 = vld [vmem:[%s11473_s1 + $0x1508] ss:$16 sps:$4 sm:$0xff]   ;;  %v8564_v4 = vld [vmem:[%s11473_s1 + $0x1524] ss:$16 sps:$4 sm:$0xff]  }
 0x268   :  { %5339 = vmatprep.subr.bf16.mxu0 %v8472_v5  ;;  %5872 = vmatprep.subr.bf16.mxu1 %v8475_v6  ;;  %v8567_v5 = vld [vmem:[%s11473_s1 + $0x152c] ss:$16 sps:$4 sm:$0xff]   ;;  %v8562_v6 = vld [vmem:[%s11473_s1 + $0x1520] ss:$16 sps:$4 sm:$0xff]  }
 0x26b   :  { %5340 = vmatpush1.bf16.msra.mxu0 %v8470_v7  ;;  %5873 = vmatpush1.bf16.msra.mxu1 %v8473_v8  ;;  %v8565_v7 = vld [vmem:[%s11473_s1 + $0x1528] ss:$16 sps:$4 sm:$0xff]   ;;  %v8570_v8 = vld [vmem:[%s11473_s1 + $0x1544] ss:$16 sps:$4 sm:$0xff]  }
 0x26c   :  { %5341 = vmatprep.subr.bf16.mxu0 %v8478_v9  ;;  %5874 = vmatprep.subr.bf16.mxu1 %v8481_v10  ;;  %v8573_v9 = vld [vmem:[%s11473_s1 + $0x154c] ss:$16 sps:$4 sm:$0xff]   ;;  %v8568_v10 = vld [vmem:[%s11473_s1 + $0x1540] ss:$16 sps:$4 sm:$0xff]  }
 0x26f   :  { %5342 = vmatpush1.bf16.msra.mxu0 %v8476_v12  ;;  %5875 = vmatpush1.bf16.msra.mxu1 %v8479_v13  ;;  %v8571_v12 = vld [vmem:[%s11473_s1 + $0x1548] ss:$16 sps:$4 sm:$0xff]   ;;  %v8576_v13 = vld [vmem:[%s11473_s1 + $0x1564] ss:$16 sps:$4 sm:$0xff]  }
 0x270   :  { %5343 = vmatprep.subr.bf16.mxu0 %v8484_v15  ;;  %5876 = vmatprep.subr.bf16.mxu1 %v8487_v11  ;;  %v8579_v15 = vld [vmem:[%s11473_s1 + $0x156c] ss:$16 sps:$4 sm:$0xff]   ;;  %v8574_v11 = vld [vmem:[%s11473_s1 + $0x1560] ss:$16 sps:$4 sm:$0xff]  }
 0x273   :  { %5344 = vmatpush1.bf16.msra.mxu0 %v8482_v17  ;;  %5877 = vmatpush1.bf16.msra.mxu1 %v8485_v14  ;;  %v8577_v17 = vld [vmem:[%s11473_s1 + $0x1568] ss:$16 sps:$4 sm:$0xff]   ;;  %v8582_v14 = vld [vmem:[%s11473_s1 + $0x1584] ss:$16 sps:$4 sm:$0xff]  }
 0x274   :  { %5345 = vmatprep.subr.bf16.mxu0 %v8490_v19  ;;  %5878 = vmatprep.subr.bf16.mxu1 %v8493_v20  ;;  %v8585_v19 = vld [vmem:[%s11473_s1 + $0x158c] ss:$16 sps:$4 sm:$0xff]   ;;  %v8580_v20 = vld [vmem:[%s11473_s1 + $0x1580] ss:$16 sps:$4 sm:$0xff]  }
 0x277   :  { %5346 = vmatpush1.bf16.msra.mxu0 %v8488_v16  ;;  %5879 = vmatpush1.bf16.msra.mxu1 %v8491_v22  ;;  %v8583_v16 = vld [vmem:[%s11473_s1 + $0x1588] ss:$16 sps:$4 sm:$0xff]   ;;  %v8588_v22 = vld [vmem:[%s11473_s1 + $0x15a4] ss:$16 sps:$4 sm:$0xff]  }
 0x278   :  { %5347 = vmatprep.subr.bf16.mxu0 %v8496_v23  ;;  %5880 = vmatprep.subr.bf16.mxu1 %v8499_v18  ;;  %v8591_v23 = vld [vmem:[%s11473_s1 + $0x15ac] ss:$16 sps:$4 sm:$0xff]   ;;  %v8586_v18 = vld [vmem:[%s11473_s1 + $0x15a0] ss:$16 sps:$4 sm:$0xff]  }
 0x27b   :  { %5348 = vmatpush1.bf16.msra.mxu0 %v8494_v25  ;;  %5881 = vmatpush1.bf16.msra.mxu1 %v8497_v26  ;;  %v8589_v25 = vld [vmem:[%s11473_s1 + $0x15a8] ss:$16 sps:$4 sm:$0xff]   ;;  %v8594_v26 = vld [vmem:[%s11473_s1 + $0x15c4] ss:$16 sps:$4 sm:$0xff]  }
 0x27c   :  { %5349 = vmatprep.subr.bf16.mxu0 %v8502_v27  ;;  %5882 = vmatprep.subr.bf16.mxu1 %v8505_v28  ;;  %v8597_v27 = vld [vmem:[%s11473_s1 + $0x15cc] ss:$16 sps:$4 sm:$0xff]   ;;  %v8592_v28 = vld [vmem:[%s11473_s1 + $0x15c0] ss:$16 sps:$4 sm:$0xff]  }
 0x27f   :  { %5350 = vmatpush1.bf16.msra.mxu0 %v8500_v29  ;;  %5883 = vmatpush1.bf16.msra.mxu1 %v8503_v24  ;;  %v8595_v29 = vld [vmem:[%s11473_s1 + $0x15c8] ss:$16 sps:$4 sm:$0xff]   ;;  %v8600_v24 = vld [vmem:[%s11473_s1 + $0x15e4] ss:$16 sps:$4 sm:$0xff]  }
 0x280   :  { %5360 = vmatprep.subr.bf16.mxu0 %v8510_v31  ;;  %5893 = vmatprep.subr.bf16.mxu1 %v8513_v32  ;;  %v8603_v31 = vld [vmem:[%s11473_s1 + $0x15ec] ss:$16 sps:$4 sm:$0xff]   ;;  %v8598_v32 = vld [vmem:[%s11473_s1 + $0x15e0] ss:$16 sps:$4 sm:$0xff]  }
 0x282   :  { %5352 = vmatmul.mubr.bf16.vlgmr.msra.gmra.mrb[0].mxu0 %v6503_v21  ;;  %5885 = vmatmul.mubr.bf16.vlgmr.msra.gmra.mrb[0].mxu1 %v6503_v21  ;;  %v8601_v21 = vld [vmem:[%s11473_s1 + $0x15e8] ss:$16 sps:$4 sm:$0xff]  }
 0x283   :  { %5361 = vmatpush1.bf16.msra.mxu0 %v8508_v34  ;;  %5894 = vmatpush1.bf16.msra.mxu1 %v8511_v35  ;;  %v8608_v34 = vld [vmem:[%s11473_s1 + $0x1604] ss:$16 sps:$4 sm:$0xff]   ;;  %v8611_v35 = vld [vmem:[%s11473_s1 + $0x160c] ss:$16 sps:$4 sm:$0xff]  }
 0x284   :  { %5362 = vmatprep.subr.bf16.mxu0 %v8516_v30  ;;  %5895 = vmatprep.subr.bf16.mxu1 %v8519_v36  ;;  %v11048_v30 = vld [vmem:[%s11474_s0 + $0x58] sm:$0xff]  ;;  %v8606_v36 = vld [vmem:[%s11473_s1 + $0x1600] ss:$16 sps:$4 sm:$0xff]  }
 0x285   :  { %5392 = vmatprep.mubr.bf16.mxu0 %v6506_v37  ;;  %5925 = vmatprep.mubr.bf16.mxu1 %v6506_v37  ;;  %v8609_v37 = vld [vmem:[%s11473_s1 + $0x1608] ss:$16 sps:$4 sm:$0xff]  }
 0x287   :  { %5363 = vmatpush1.bf16.msra.mxu0 %v8514_v38  ;;  %5896 = vmatpush1.bf16.msra.mxu1 %v8517_v39  ;;  %v6505_v38 = vcombine.low %v10849_v33, %v10849_v33  ;;  %v8614_v39 = vld [vmem:[%s11473_s1 + $0x1624] ss:$16 sps:$4 sm:$0xff]   ;;  %v8612_v33 = vld [vmem:[%s11473_s1 + $0x1620] ss:$16 sps:$4 sm:$0xff]  }
 0x288   :  { %5364 = vmatprep.subr.bf16.mxu0 %v8522_v40  ;;  %5897 = vmatprep.subr.bf16.mxu1 %v8525_v41  ;;  %v8617_v40 = vld [vmem:[%s11473_s1 + $0x162c] ss:$16 sps:$4 sm:$0xff]   ;;  %v6508_v41 = vcombine.high %v11048_v30, %v11048_v30 }
 0x28b   :  { %5365 = vmatpush1.bf16.msra.mxu0 %v8520_v42  ;;  %5898 = vmatpush1.bf16.msra.mxu1 %v8523_v43  ;;  %v8615_v42 = vld [vmem:[%s11473_s1 + $0x1628] ss:$16 sps:$4 sm:$0xff]   ;;  %v8620_v43 = vld [vmem:[%s11473_s1 + $0x1644] ss:$16 sps:$4 sm:$0xff]  }
 0x28c   :  { %5366 = vmatprep.subr.bf16.mxu0 %v8528_v44  ;;  %5899 = vmatprep.subr.bf16.mxu1 %v8531_v45  ;;  %v8623_v44 = vld [vmem:[%s11473_s1 + $0x164c] ss:$16 sps:$4 sm:$0xff]   ;;  %v8618_v45 = vld [vmem:[%s11473_s1 + $0x1640] ss:$16 sps:$4 sm:$0xff]  }
 0x28f   :  { %5367 = vmatpush1.bf16.msra.mxu0 %v8526_v46  ;;  %5900 = vmatpush1.bf16.msra.mxu1 %v8529_v47  ;;  %v8621_v46 = vld [vmem:[%s11473_s1 + $0x1648] ss:$16 sps:$4 sm:$0xff]   ;;  %v8626_v47 = vld [vmem:[%s11473_s1 + $0x1664] ss:$16 sps:$4 sm:$0xff]  }
 0x290   :  { %5368 = vmatprep.subr.bf16.mxu0 %v8534_v48  ;;  %5901 = vmatprep.subr.bf16.mxu1 %v8537_v49  ;;  %v8629_v48 = vld [vmem:[%s11473_s1 + $0x166c] ss:$16 sps:$4 sm:$0xff]   ;;  %v8624_v49 = vld [vmem:[%s11473_s1 + $0x1660] ss:$16 sps:$4 sm:$0xff]  }
 0x293   :  { %5369 = vmatpush1.bf16.msra.mxu0 %v8532_v50  ;;  %5902 = vmatpush1.bf16.msra.mxu1 %v8535_v51  ;;  %v8627_v50 = vld [vmem:[%s11473_s1 + $0x1668] ss:$16 sps:$4 sm:$0xff]   ;;  %v8632_v51 = vld [vmem:[%s11473_s1 + $0x1684] ss:$16 sps:$4 sm:$0xff]  }
 0x294   :  { %5370 = vmatprep.subr.bf16.mxu0 %v8540_v52  ;;  %5903 = vmatprep.subr.bf16.mxu1 %v8543_v53  ;;  %v8635_v52 = vld [vmem:[%s11473_s1 + $0x168c] ss:$16 sps:$4 sm:$0xff]   ;;  %v8630_v53 = vld [vmem:[%s11473_s1 + $0x1680] ss:$16 sps:$4 sm:$0xff]  }
 0x297   :  { %5371 = vmatpush1.bf16.msra.mxu0 %v8538_v54  ;;  %5904 = vmatpush1.bf16.msra.mxu1 %v8541_v55  ;;  %v8633_v54 = vld [vmem:[%s11473_s1 + $0x1688] ss:$16 sps:$4 sm:$0xff]   ;;  %v8638_v55 = vld [vmem:[%s11473_s1 + $0x16a4] ss:$16 sps:$4 sm:$0xff]  }
 0x298   :  { %5372 = vmatprep.subr.bf16.mxu0 %v8546_v56  ;;  %5905 = vmatprep.subr.bf16.mxu1 %v8549_v57  ;;  %v8641_v56 = vld [vmem:[%s11473_s1 + $0x16ac] ss:$16 sps:$4 sm:$0xff]   ;;  %v8636_v57 = vld [vmem:[%s11473_s1 + $0x16a0] ss:$16 sps:$4 sm:$0xff]  }
 0x29b   :  { %5373 = vmatpush1.bf16.msra.mxu0 %v8544_v58  ;;  %5906 = vmatpush1.bf16.msra.mxu1 %v8547_v59  ;;  %v8639_v58 = vld [vmem:[%s11473_s1 + $0x16a8] ss:$16 sps:$4 sm:$0xff]   ;;  %v8644_v59 = vld [vmem:[%s11473_s1 + $0x16c4] ss:$16 sps:$4 sm:$0xff]  }
 0x29c   :  { %5374 = vmatprep.subr.bf16.mxu0 %v8552_v60  ;;  %5907 = vmatprep.subr.bf16.mxu1 %v8555_v61  ;;  %v8647_v60 = vld [vmem:[%s11473_s1 + $0x16cc] ss:$16 sps:$4 sm:$0xff]   ;;  %v8642_v61 = vld [vmem:[%s11473_s1 + $0x16c0] ss:$16 sps:$4 sm:$0xff]  }
 0x29f   :  { %5375 = vmatpush1.bf16.msra.mxu0 %v8550_v62  ;;  %5908 = vmatpush1.bf16.msra.mxu1 %v8553_v63  ;;  %v8645_v62 = vld [vmem:[%s11473_s1 + $0x16c8] ss:$16 sps:$4 sm:$0xff]   ;;  %v8650_v63 = vld [vmem:[%s11473_s1 + $0x16e4] ss:$16 sps:$4 sm:$0xff]  }
 0x2a0   :  { %5376 = vmatprep.subr.bf16.mxu0 %v8558_v0  ;;  %5909 = vmatprep.subr.bf16.mxu1 %v8561_v1  ;;  %v8653_v0 = vld [vmem:[%s11473_s1 + $0x16ec] ss:$16 sps:$4 sm:$0xff]   ;;  %v8648_v1 = vld [vmem:[%s11473_s1 + $0x16e0] ss:$16 sps:$4 sm:$0xff]  }
 0x2a3   :  { %5377 = vmatpush1.bf16.msra.mxu0 %v8556_v2  ;;  %5910 = vmatpush1.bf16.msra.mxu1 %v8559_v3  ;;  %v8651_v2 = vld [vmem:[%s11473_s1 + $0x16e8] ss:$16 sps:$4 sm:$0xff]   ;;  %v8656_v3 = vld [vmem:[%s11473_s1 + $0x1704] ss:$16 sps:$4 sm:$0xff]  }
 0x2a4   :  { %5378 = vmatprep.subr.bf16.mxu0 %v8564_v4  ;;  %5911 = vmatprep.subr.bf16.mxu1 %v8567_v5  ;;  %v8659_v4 = vld [vmem:[%s11473_s1 + $0x170c] ss:$16 sps:$4 sm:$0xff]   ;;  %v8654_v5 = vld [vmem:[%s11473_s1 + $0x1700] ss:$16 sps:$4 sm:$0xff]  }
 0x2a7   :  { %5379 = vmatpush1.bf16.msra.mxu0 %v8562_v6  ;;  %5912 = vmatpush1.bf16.msra.mxu1 %v8565_v7  ;;  %v8657_v6 = vld [vmem:[%s11473_s1 + $0x1708] ss:$16 sps:$4 sm:$0xff]   ;;  %v8662_v7 = vld [vmem:[%s11473_s1 + $0x1724] ss:$16 sps:$4 sm:$0xff]  }
 0x2a8   :  { %5380 = vmatprep.subr.bf16.mxu0 %v8570_v8  ;;  %5913 = vmatprep.subr.bf16.mxu1 %v8573_v9  ;;  %v8665_v8 = vld [vmem:[%s11473_s1 + $0x172c] ss:$16 sps:$4 sm:$0xff]   ;;  %v8660_v9 = vld [vmem:[%s11473_s1 + $0x1720] ss:$16 sps:$4 sm:$0xff]  }
 0x2ab   :  { %5381 = vmatpush1.bf16.msra.mxu0 %v8568_v10  ;;  %5914 = vmatpush1.bf16.msra.mxu1 %v8571_v12  ;;  %v8663_v10 = vld [vmem:[%s11473_s1 + $0x1728] ss:$16 sps:$4 sm:$0xff]   ;;  %v8668_v12 = vld [vmem:[%s11473_s1 + $0x1744] ss:$16 sps:$4 sm:$0xff]  }
 0x2ac   :  { %5382 = vmatprep.subr.bf16.mxu0 %v8576_v13  ;;  %5915 = vmatprep.subr.bf16.mxu1 %v8579_v15  ;;  %v8671_v13 = vld [vmem:[%s11473_s1 + $0x174c] ss:$16 sps:$4 sm:$0xff]   ;;  %v8666_v15 = vld [vmem:[%s11473_s1 + $0x1740] ss:$16 sps:$4 sm:$0xff]  }
 0x2af   :  { %5383 = vmatpush1.bf16.msra.mxu0 %v8574_v11  ;;  %5916 = vmatpush1.bf16.msra.mxu1 %v8577_v17  ;;  %v8669_v11 = vld [vmem:[%s11473_s1 + $0x1748] ss:$16 sps:$4 sm:$0xff]   ;;  %v8674_v17 = vld [vmem:[%s11473_s1 + $0x1764] ss:$16 sps:$4 sm:$0xff]  }
 0x2b0   :  { %5384 = vmatprep.subr.bf16.mxu0 %v8582_v14  ;;  %5917 = vmatprep.subr.bf16.mxu1 %v8585_v19  ;;  %v8677_v14 = vld [vmem:[%s11473_s1 + $0x176c] ss:$16 sps:$4 sm:$0xff]   ;;  %v8672_v19 = vld [vmem:[%s11473_s1 + $0x1760] ss:$16 sps:$4 sm:$0xff]  }
 0x2b3   :  { %5385 = vmatpush1.bf16.msra.mxu0 %v8580_v20  ;;  %5918 = vmatpush1.bf16.msra.mxu1 %v8583_v16  ;;  %v8675_v20 = vld [vmem:[%s11473_s1 + $0x1768] ss:$16 sps:$4 sm:$0xff]   ;;  %v8680_v16 = vld [vmem:[%s11473_s1 + $0x1784] ss:$16 sps:$4 sm:$0xff]  }
 0x2b4   :  { %5386 = vmatprep.subr.bf16.mxu0 %v8588_v22  ;;  %5919 = vmatprep.subr.bf16.mxu1 %v8591_v23  ;;  %v8683_v22 = vld [vmem:[%s11473_s1 + $0x178c] ss:$16 sps:$4 sm:$0xff]   ;;  %v8678_v23 = vld [vmem:[%s11473_s1 + $0x1780] ss:$16 sps:$4 sm:$0xff]  }
 0x2b7   :  { %5387 = vmatpush1.bf16.msra.mxu0 %v8586_v18  ;;  %5920 = vmatpush1.bf16.msra.mxu1 %v8589_v25  ;;  %v8681_v18 = vld [vmem:[%s11473_s1 + $0x1788] ss:$16 sps:$4 sm:$0xff]   ;;  %v8686_v25 = vld [vmem:[%s11473_s1 + $0x17a4] ss:$16 sps:$4 sm:$0xff]  }
 0x2b8   :  { %5388 = vmatprep.subr.bf16.mxu0 %v8594_v26  ;;  %5921 = vmatprep.subr.bf16.mxu1 %v8597_v27  ;;  %v8689_v26 = vld [vmem:[%s11473_s1 + $0x17ac] ss:$16 sps:$4 sm:$0xff]   ;;  %v8684_v27 = vld [vmem:[%s11473_s1 + $0x17a0] ss:$16 sps:$4 sm:$0xff]  }
 0x2bb   :  { %5389 = vmatpush1.bf16.msra.mxu0 %v8592_v28  ;;  %5922 = vmatpush1.bf16.msra.mxu1 %v8595_v29  ;;  %v8687_v28 = vld [vmem:[%s11473_s1 + $0x17a8] ss:$16 sps:$4 sm:$0xff]   ;;  %v8692_v29 = vld [vmem:[%s11473_s1 + $0x17c4] ss:$16 sps:$4 sm:$0xff]  }
 0x2bc   :  { %5390 = vmatprep.subr.bf16.mxu0 %v8600_v24  ;;  %5923 = vmatprep.subr.bf16.mxu1 %v8603_v31  ;;  %v8695_v24 = vld [vmem:[%s11473_s1 + $0x17cc] ss:$16 sps:$4 sm:$0xff]   ;;  %v8690_v31 = vld [vmem:[%s11473_s1 + $0x17c0] ss:$16 sps:$4 sm:$0xff]  }
 0x2bf   :  { %5391 = vmatpush1.bf16.msra.mxu0 %v8598_v32  ;;  %5924 = vmatpush1.bf16.msra.mxu1 %v8601_v21  ;;  %v8693_v32 = vld [vmem:[%s11473_s1 + $0x17c8] ss:$16 sps:$4 sm:$0xff]   ;;  %v8698_v21 = vld [vmem:[%s11473_s1 + $0x17e4] ss:$16 sps:$4 sm:$0xff]  }
 0x2c0   :  { %5401 = vmatprep.subr.bf16.mxu0 %v8608_v34  ;;  %5934 = vmatprep.subr.bf16.mxu1 %v8611_v35  ;;  %v8701_v34 = vld [vmem:[%s11473_s1 + $0x17ec] ss:$16 sps:$4 sm:$0xff]   ;;  %v8696_v35 = vld [vmem:[%s11473_s1 + $0x17e0] ss:$16 sps:$4 sm:$0xff]  }
 0x2c2   :  { %5393 = vmatmul.mubr.bf16.vlgmr.msra.gmra.mrb[0].mxu0 %v6505_v38  ;;  %5926 = vmatmul.mubr.bf16.vlgmr.msra.gmra.mrb[0].mxu1 %v6505_v38  ;;  %v8709_v38 = vld [vmem:[%s11473_s1 + $0x180c] ss:$16 sps:$4 sm:$0xff]  }
 0x2c3   :  { %5402 = vmatpush1.bf16.msra.mxu0 %v8606_v36  ;;  %5935 = vmatpush1.bf16.msra.mxu1 %v8609_v37  ;;  %v8699_v36 = vld [vmem:[%s11473_s1 + $0x17e8] ss:$16 sps:$4 sm:$0xff]   ;;  %v8706_v37 = vld [vmem:[%s11473_s1 + $0x1804] ss:$16 sps:$4 sm:$0xff]  }
 0x2c4   :  { %5403 = vmatprep.subr.bf16.mxu0 %v8614_v39  ;;  %5936 = vmatprep.subr.bf16.mxu1 %v8617_v40  ;;  %v6507_v39 = vcombine.low %v11048_v30, %v11048_v30  ;;  %v8704_v40 = vld [vmem:[%s11473_s1 + $0x1800] ss:$16 sps:$4 sm:$0xff]   ;;  %v8715_v30 = vld [vmem:[%s11473_s1 + $0x182c] ss:$16 sps:$4 sm:$0xff]  }
 0x2c5   :  { %5433 = vmatprep.mubr.bf16.mxu0 %v6508_v41  ;;  %5966 = vmatprep.mubr.bf16.mxu1 %v6508_v41  ;;  %v8707_v41 = vld [vmem:[%s11473_s1 + $0x1808] ss:$16 sps:$4 sm:$0xff]  }
 0x2c7   :  { %5404 = vmatpush1.bf16.msra.mxu0 %v8612_v33  ;;  %5937 = vmatpush1.bf16.msra.mxu1 %v8615_v42  ;;  %v8712_v33 = vld [vmem:[%s11473_s1 + $0x1824] ss:$16 sps:$4 sm:$0xff]   ;;  %v8710_v42 = vld [vmem:[%s11473_s1 + $0x1820] ss:$16 sps:$4 sm:$0xff]  }
 0x2c8   :  { %5405 = vmatprep.subr.bf16.mxu0 %v8620_v43  ;;  %5938 = vmatprep.subr.bf16.mxu1 %v8623_v44  ;;  %v8713_v43 = vld [vmem:[%s11473_s1 + $0x1828] ss:$16 sps:$4 sm:$0xff]   ;;  %v8718_v44 = vld [vmem:[%s11473_s1 + $0x1844] ss:$16 sps:$4 sm:$0xff]  }
 0x2cb   :  { %5406 = vmatpush1.bf16.msra.mxu0 %v8618_v45  ;;  %5939 = vmatpush1.bf16.msra.mxu1 %v8621_v46  ;;  %v8721_v45 = vld [vmem:[%s11473_s1 + $0x184c] ss:$16 sps:$4 sm:$0xff]   ;;  %v8793_v46 = vmov 0  }
 0x2cc   :  { %5407 = vmatprep.subr.bf16.mxu0 %v8626_v47  ;;  %5940 = vmatprep.subr.bf16.mxu1 %v8629_v48  ;;  %v8716_v47 = vld [vmem:[%s11473_s1 + $0x1840] ss:$16 sps:$4 sm:$0xff]   ;;  %v8719_v48 = vld [vmem:[%s11473_s1 + $0x1848] ss:$16 sps:$4 sm:$0xff]  }
 0x2cf   :  { %5408 = vmatpush1.bf16.msra.mxu0 %v8624_v49  ;;  %5941 = vmatpush1.bf16.msra.mxu1 %v8627_v50  ;;  %v8724_v49 = vld [vmem:[%s11473_s1 + $0x1864] ss:$16 sps:$4 sm:$0xff]   ;;  %v8727_v50 = vld [vmem:[%s11473_s1 + $0x186c] ss:$16 sps:$4 sm:$0xff]  }
 0x2d0   :  { %5409 = vmatprep.subr.bf16.mxu0 %v8632_v51  ;;  %5942 = vmatprep.subr.bf16.mxu1 %v8635_v52  ;;  %v8722_v51 = vld [vmem:[%s11473_s1 + $0x1860] ss:$16 sps:$4 sm:$0xff]   ;;  %v8725_v52 = vld [vmem:[%s11473_s1 + $0x1868] ss:$16 sps:$4 sm:$0xff]  }
 0x2d3   :  { %5410 = vmatpush1.bf16.msra.mxu0 %v8630_v53  ;;  %5943 = vmatpush1.bf16.msra.mxu1 %v8633_v54  ;;  %v8730_v53 = vld [vmem:[%s11473_s1 + $0x1884] ss:$16 sps:$4 sm:$0xff]   ;;  %v8733_v54 = vld [vmem:[%s11473_s1 + $0x188c] ss:$16 sps:$4 sm:$0xff]  }
 0x2d4   :  { %5411 = vmatprep.subr.bf16.mxu0 %v8638_v55  ;;  %5944 = vmatprep.subr.bf16.mxu1 %v8641_v56  ;;  %v8728_v55 = vld [vmem:[%s11473_s1 + $0x1880] ss:$16 sps:$4 sm:$0xff]   ;;  %v8731_v56 = vld [vmem:[%s11473_s1 + $0x1888] ss:$16 sps:$4 sm:$0xff]  }
 0x2d7   :  { %5412 = vmatpush1.bf16.msra.mxu0 %v8636_v57  ;;  %5945 = vmatpush1.bf16.msra.mxu1 %v8639_v58  ;;  %v8736_v57 = vld [vmem:[%s11473_s1 + $0x18a4] ss:$16 sps:$4 sm:$0xff]   ;;  %v8739_v58 = vld [vmem:[%s11473_s1 + $0x18ac] ss:$16 sps:$4 sm:$0xff]  }
 0x2d8   :  { %5413 = vmatprep.subr.bf16.mxu0 %v8644_v59  ;;  %5946 = vmatprep.subr.bf16.mxu1 %v8647_v60  ;;  %v8734_v59 = vld [vmem:[%s11473_s1 + $0x18a0] ss:$16 sps:$4 sm:$0xff]   ;;  %v8737_v60 = vld [vmem:[%s11473_s1 + $0x18a8] ss:$16 sps:$4 sm:$0xff]  }
 0x2db   :  { %5414 = vmatpush1.bf16.msra.mxu0 %v8642_v61  ;;  %5947 = vmatpush1.bf16.msra.mxu1 %v8645_v62  ;;  %v8742_v61 = vld [vmem:[%s11473_s1 + $0x18c4] ss:$16 sps:$4 sm:$0xff]   ;;  %v8745_v62 = vld [vmem:[%s11473_s1 + $0x18cc] ss:$16 sps:$4 sm:$0xff]  }
 0x2dc   :  { %5415 = vmatprep.subr.bf16.mxu0 %v8650_v63  ;;  %5948 = vmatprep.subr.bf16.mxu1 %v8653_v0  ;;  %v8740_v63 = vld [vmem:[%s11473_s1 + $0x18c0] ss:$16 sps:$4 sm:$0xff]   ;;  %v8743_v0 = vld [vmem:[%s11473_s1 + $0x18c8] ss:$16 sps:$4 sm:$0xff]  }
 0x2df   :  { %5416 = vmatpush1.bf16.msra.mxu0 %v8648_v1  ;;  %5949 = vmatpush1.bf16.msra.mxu1 %v8651_v2  ;;  %v8748_v1 = vld [vmem:[%s11473_s1 + $0x18e4] ss:$16 sps:$4 sm:$0xff]   ;;  %v8751_v2 = vld [vmem:[%s11473_s1 + $0x18ec] ss:$16 sps:$4 sm:$0xff]  }
 0x2e0   :  { %5417 = vmatprep.subr.bf16.mxu0 %v8656_v3  ;;  %5950 = vmatprep.subr.bf16.mxu1 %v8659_v4  ;;  %v8746_v3 = vld [vmem:[%s11473_s1 + $0x18e0] ss:$16 sps:$4 sm:$0xff]   ;;  %v8749_v4 = vld [vmem:[%s11473_s1 + $0x18e8] ss:$16 sps:$4 sm:$0xff]  }
 0x2e3   :  { %5418 = vmatpush1.bf16.msra.mxu0 %v8654_v5  ;;  %5951 = vmatpush1.bf16.msra.mxu1 %v8657_v6  ;;  %v8753_v5 = vld [vmem:[%s11475_s3 + $0x40] sm:$0xff]  }
 0x2e4   :  { %5419 = vmatprep.subr.bf16.mxu0 %v8662_v7  ;;  %5952 = vmatprep.subr.bf16.mxu1 %v8665_v8  ;;  %v8754_v6 = vld [vmem:[%s11475_s3 + $0xc0] sm:$0xff]  }
 0x2e5   :  { %v8752_v7 = vld [vmem:[%s11474_s0 + $0x60] ss:$0 sps:$4 sm:$0xff]  }
 0x2e6   :  { %v8755_v8 = vld [vmem:[%s11475_s3] sm:$0xff]  }
 0x2e7   :  { %5420 = vmatpush1.bf16.msra.mxu0 %v8660_v9  ;;  %5953 = vmatpush1.bf16.msra.mxu1 %v8663_v10  ;;  %v8756_v9 = vld [vmem:[%s11475_s3 + $0x80] sm:$0xff]   ;;  %v8757_v10 = vld [vmem:[%s11475_s3 + $0x48] sm:$0xff]  }
 0x2e8   :  { %5421 = vmatprep.subr.bf16.mxu0 %v8668_v12  ;;  %5954 = vmatprep.subr.bf16.mxu1 %v8671_v13  ;;  %v8758_v12 = vld [vmem:[%s11475_s3 + $0xc8] sm:$0xff]  }
 0x2e9   :  { %v8759_v13 = vld [vmem:[%s11475_s3 + $0x8] sm:$0xff]  }
 0x2eb   :  { %5422 = vmatpush1.bf16.msra.mxu0 %v8666_v15  ;;  %5955 = vmatpush1.bf16.msra.mxu1 %v8669_v11  ;;  %v8760_v15 = vld [vmem:[%s11475_s3 + $0x88] sm:$0xff]   ;;  %v8761_v11 = vld [vmem:[%s11475_s3 + $0x50] sm:$0xff]  }
 0x2ec   :  { %5423 = vmatprep.subr.bf16.mxu0 %v8674_v17  ;;  %5956 = vmatprep.subr.bf16.mxu1 %v8677_v14  ;;  %v8762_v17 = vld [vmem:[%s11475_s3 + $0xd0] sm:$0xff]  }
 0x2ed   :  { %v8763_v14 = vld [vmem:[%s11475_s3 + $0x10] sm:$0xff]  }
 0x2ef   :  { %5424 = vmatpush1.bf16.msra.mxu0 %v8672_v19  ;;  %5957 = vmatpush1.bf16.msra.mxu1 %v8675_v20  ;;  %v8764_v19 = vld [vmem:[%s11475_s3 + $0x90] sm:$0xff]   ;;  %v8765_v20 = vld [vmem:[%s11475_s3 + $0x58] sm:$0xff]  }
 0x2f0   :  { %5425 = vmatprep.subr.bf16.mxu0 %v8680_v16  ;;  %5958 = vmatprep.subr.bf16.mxu1 %v8683_v22  ;;  %v8766_v16 = vld [vmem:[%s11475_s3 + $0xd8] sm:$0xff]  }
 0x2f1   :  { %v8767_v22 = vld [vmem:[%s11475_s3 + $0x18] sm:$0xff]  }
 0x2f3   :  { %5426 = vmatpush1.bf16.msra.mxu0 %v8678_v23  ;;  %5959 = vmatpush1.bf16.msra.mxu1 %v8681_v18  ;;  %v8768_v23 = vld [vmem:[%s11475_s3 + $0x98] sm:$0xff]   ;;  %v8769_v18 = vld [vmem:[%s11475_s3 + $0x60] sm:$0xff]  }
 0x2f4   :  { %5427 = vmatprep.subr.bf16.mxu0 %v8686_v25  ;;  %5960 = vmatprep.subr.bf16.mxu1 %v8689_v26  ;;  %v8770_v25 = vld [vmem:[%s11475_s3 + $0xe0] sm:$0xff]  }
 0x2f5   :  { %v8771_v26 = vld [vmem:[%s11475_s3 + $0x20] sm:$0xff]  }
 0x2f7   :  { %5428 = vmatpush1.bf16.msra.mxu0 %v8684_v27  ;;  %5961 = vmatpush1.bf16.msra.mxu1 %v8687_v28  ;;  %v8772_v27 = vld [vmem:[%s11475_s3 + $0xa0] sm:$0xff]   ;;  %v8773_v28 = vld [vmem:[%s11475_s3 + $0x68] sm:$0xff]  }
 0x2f8   :  { %5429 = vmatprep.subr.bf16.mxu0 %v8692_v29  ;;  %5962 = vmatprep.subr.bf16.mxu1 %v8695_v24  ;;  %v8774_v29 = vld [vmem:[%s11475_s3 + $0xe8] sm:$0xff]  }
 0x2f9   :  { %v8775_v24 = vld [vmem:[%s11475_s3 + $0x28] sm:$0xff]  }
 0x2fb   :  { %5430 = vmatpush1.bf16.msra.mxu0 %v8690_v31  ;;  %5963 = vmatpush1.bf16.msra.mxu1 %v8693_v32  ;;  %v8776_v31 = vld [vmem:[%s11475_s3 + $0xa8] sm:$0xff]   ;;  %v8777_v32 = vld [vmem:[%s11475_s3 + $0x70] sm:$0xff]  }
 0x2fc   :  { %5431 = vmatprep.subr.bf16.mxu0 %v8698_v21  ;;  %5964 = vmatprep.subr.bf16.mxu1 %v8701_v34  ;;  %v8778_v21 = vld [vmem:[%s11475_s3 + $0xf0] sm:$0xff]  }
 0x2fd   :  { %v8779_v34 = vld [vmem:[%s11475_s3 + $0x30] sm:$0xff]  }
 0x2ff   :  { %5432 = vmatpush1.bf16.msra.mxu0 %v8696_v35  ;;  %5965 = vmatpush1.bf16.msra.mxu1 %v8699_v36  ;;  %v8780_v35 = vld [vmem:[%s11475_s3 + $0xb0] sm:$0xff]   ;;  %v8781_v36 = vld [vmem:[%s11475_s3 + $0x78] sm:$0xff]  }
 0x300   :  { %5442 = vmatprep.subr.bf16.mxu0 %v8706_v37  ;;  %5975 = vmatprep.subr.bf16.mxu1 %v8709_v38  ;;  %v8782_v37 = vld [vmem:[%s11475_s3 + $0xf8] sm:$0xff]  }
 0x301   :  { %v8783_v38 = vld [vmem:[%s11475_s3 + $0x38] sm:$0xff]  }
 0x302   :  { %5434 = vmatmul.mubr.bf16.vlgmr.msra.gmra.mrb[0].mxu0 %v6507_v39  ;;  %5967 = vmatmul.mubr.bf16.vlgmr.msra.gmra.mrb[0].mxu1 %v6507_v39  ;;  %v8784_v39 = vld [vmem:[%s11475_s3 + $0xb8] sm:$0xff]  }
 0x303   :  { %5443 = vmatpush1.bf16.msra.mxu0 %v8704_v40  ;;  %5976 = vmatpush1.bf16.msra.mxu1 %v8707_v41  ;;  %v8794_v40 = vmov 0.0   ;;  %v842_v41 = vlaneseq }
 0x304   :  { %5444 = vmatprep.subr.bf16.mxu0 %v8712_v33  ;;  %5977 = vmatprep.subr.bf16.mxu1 %v8715_v30 }
 0x305   :  { %5474 = vmatprep.mubr.bf16.mxu0 %v8793_v46  ;;  %6007 = vmatprep.mubr.bf16.mxu1 %v8793_v46  ;;  %v843_v33 = vshrl.u32 %v842_v41, 7 }
 0x307   :  { %5445 = vmatpush1.bf16.msra.mxu0 %v8710_v42  ;;  %5978 = vmatpush1.bf16.msra.mxu1 %v8713_v43  ;;  %v844_v30 = vsub.s32 0, %v843_v33  ;;  %v852_v42 = vsub.s32 2, %v843_v33  ;;  %v840_v43 = vld [vmem:[%s11477_s2] sm:$0xf] }
 0x308   :  { %5446 = vmatprep.subr.bf16.mxu0 %v8718_v44  ;;  %5979 = vmatprep.subr.bf16.mxu1 %v8721_v45  ;;  %v848_v44 = vsub.s32 1, %v843_v33  ;;  %v856_v45 = vsub.s32 3, %v843_v33 }
 0x309   :  { %v845_v46 = vrot.slane %v840_v43, %v844_v30 }
 0x30b   :  { %5447 = vmatpush1.bf16.msra.mxu0 %v8716_v47  ;;  %5980 = vmatpush1.bf16.msra.mxu1 %v8719_v48  ;;  %v853_v47 = vrot.slane %v840_v43, %v852_v42  ;;  %v849_v48 = vrot.slane %v840_v43, %v848_v44 }
 0x30c   :  { %5448 = vmatprep.subr.bf16.mxu0 %v8724_v49  ;;  %5981 = vmatprep.subr.bf16.mxu1 %v8727_v50  ;;  %v857_v49 = vrot.slane %v840_v43, %v856_v45 }
 0x30f   :  { %5449 = vmatpush1.bf16.msra.mxu0 %v8722_v51  ;;  %5982 = vmatpush1.bf16.msra.mxu1 %v8725_v52 }
 0x310   :  { %5450 = vmatprep.subr.bf16.mxu0 %v8730_v53  ;;  %5983 = vmatprep.subr.bf16.mxu1 %v8733_v54 }
 0x313   :  { %5451 = vmatpush1.bf16.msra.mxu0 %v8728_v55  ;;  %5984 = vmatpush1.bf16.msra.mxu1 %v8731_v56 }
 0x314   :  { %5452 = vmatprep.subr.bf16.mxu0 %v8736_v57  ;;  %5985 = vmatprep.subr.bf16.mxu1 %v8739_v58 }
 0x317   :  { %5453 = vmatpush1.bf16.msra.mxu0 %v8734_v59  ;;  %5986 = vmatpush1.bf16.msra.mxu1 %v8737_v60 }
 0x318   :  { %5454 = vmatprep.subr.bf16.mxu0 %v8742_v61  ;;  %5987 = vmatprep.subr.bf16.mxu1 %v8745_v62 }
 0x31b   :  { %5455 = vmatpush1.bf16.msra.mxu0 %v8740_v63  ;;  %5988 = vmatpush1.bf16.msra.mxu1 %v8743_v0 }
 0x31c   :  { %5456 = vmatprep.subr.bf16.mxu0 %v8748_v1  ;;  %5989 = vmatprep.subr.bf16.mxu1 %v8751_v2 }
 0x31f   :  { %5457 = vmatpush1.bf16.msra.mxu0 %v8746_v3  ;;  %5990 = vmatpush1.bf16.msra.mxu1 %v8749_v4  ;;  %v8785_v4 = vld [vmem:[%s11476_s5] sm:$0xff]  }
 0x320   :  { %7352 = vmatprep.subr.bf16.mxu0 %v8753_v5  ;;  %7374 = vmatprep.subr.bf16.mxu1 %v8754_v6 }
 0x322   :  { %5475 = vmatmul.mubr.bf16.vlgmr.msra.gmra.mrb[0].mxu0 %v8752_v7  ;;  %6008 = vmatmul.mubr.bf16.vlgmr.msra.gmra.mrb[0].mxu1 %v8752_v7  ;;  %v8786_v7 = vld [vmem:[%s11476_s5 + $0x8] sm:$0xff]  }
 0x323   :  { %7353 = vmatpush3.bf16.msra.mxu0 %v8755_v8  ;;  %7375 = vmatpush3.bf16.msra.mxu1 %v8756_v9  ;;  %v8787_v8 = vld [vmem:[%s11476_s5 + $0x10] sm:$0xff]   ;;  %v8788_v9 = vld [vmem:[%s11476_s5 + $0x18] sm:$0xff]  }
 0x324   :  { %7354 = vmatprep.subr.bf16.mxu0 %v8757_v10  ;;  %7376 = vmatprep.subr.bf16.mxu1 %v8758_v12  ;;  %v8789_v10 = vld [vmem:[%s11476_s5 + $0x20] sm:$0xff]   ;;  %v8790_v12 = vld [vmem:[%s11476_s5 + $0x28] sm:$0xff]  }
 0x327   :  { %7355 = vmatpush3.bf16.msra.mxu0 %v8759_v13  ;;  %7377 = vmatpush3.bf16.msra.mxu1 %v8760_v15  ;;  %v8791_v13 = vld [vmem:[%s11476_s5 + $0x30] sm:$0xff]   ;;  %v8792_v15 = vld [vmem:[%s11476_s5 + $0x38] sm:$0xff]  }
 0x328   :  { %7356 = vmatprep.subr.bf16.mxu0 %v8761_v11  ;;  %7378 = vmatprep.subr.bf16.mxu1 %v8762_v17 }
 0x32b   :  { %7357 = vmatpush3.bf16.msra.mxu0 %v8763_v14  ;;  %7379 = vmatpush3.bf16.msra.mxu1 %v8764_v19  ;;  %v7310_v14 = vld [vmem:[%s11478_s4] ss:$0 sm:$0xff] }
 0x32c   :  { %7358 = vmatprep.subr.bf16.mxu0 %v8765_v20  ;;  %7380 = vmatprep.subr.bf16.mxu1 %v8766_v16 }
 0x32f   :  { %7359 = vmatpush3.bf16.msra.mxu0 %v8767_v22  ;;  %7381 = vmatpush3.bf16.msra.mxu1 %v8768_v23 }
 0x330   :  { %7360 = vmatprep.subr.bf16.mxu0 %v8769_v18  ;;  %7382 = vmatprep.subr.bf16.mxu1 %v8770_v25 }
 0x333   :  { %7361 = vmatpush3.bf16.msra.mxu0 %v8771_v26  ;;  %7383 = vmatpush3.bf16.msra.mxu1 %v8772_v27 }
 0x334   :  { %7362 = vmatprep.subr.bf16.mxu0 %v8773_v28  ;;  %7384 = vmatprep.subr.bf16.mxu1 %v8774_v29 }
 0x337   :  { %7363 = vmatpush3.bf16.msra.mxu0 %v8775_v24  ;;  %7385 = vmatpush3.bf16.msra.mxu1 %v8776_v31  ;;  %v7343_v31 = vld [vmem:[%s11479_s6] ss:$0 sm:$0xff] }
 0x338   :  { %7364 = vmatprep.subr.bf16.mxu0 %v8777_v32  ;;  %7386 = vmatprep.subr.bf16.mxu1 %v8778_v21 }
 0x33b   :  { %7365 = vmatpush3.bf16.msra.mxu0 %v8779_v34  ;;  %7387 = vmatpush3.bf16.msra.mxu1 %v8780_v35 }
 0x33c   :  { %7366 = vmatprep.subr.bf16.mxu0 %v8781_v36  ;;  %7388 = vmatprep.subr.bf16.mxu1 %v8782_v37 }
 0x33f   :  { %7367 = vmatpush3.bf16.msra.mxu0 %v8783_v38  ;;  %7389 = vmatpush3.bf16.msra.mxu1 %v8784_v39 }
 0x340   :  { %7405 = vmatprep.subr.bf16.mxu0 %v8794_v40 }
 0x3f5   :  { %v5476_v50 = vpop.f32.mrb[0].mxu0  ;;  %v6009_v51 = vpop.f32.mrb[0].mxu1 }
 0x3f6   :  { %v7425_v52 = vadd.f32 %v5476_v50, %v845_v46  ;;  %v7427_v53 = vadd.f32 %v6009_v51, %v853_v47  ;;  %v5478_v54 = vpop.f32.mrb[1].mxu0  ;;  %v6011_v55 = vpop.f32.mrb[1].mxu1 }
 0x3f7   :  { %v7426_v56 = vadd.f32 %v5478_v54, %v849_v48  ;;  %v7428_v57 = vadd.f32 %v6011_v55, %v857_v49  ;;  %v5480_v58 = vpop.f32.mrb[2].mxu0  ;;  %v6013_v59 = vpop.f32.mrb[2].mxu1 }
 0x3f8   :  { %v6016_v60 = vmax.f32 %v7425_v52, 0.0  ;;  %v6018_v61 = vmax.f32 %v7427_v53, 0.0  ;;  %v5481_v62 = vpop.f32.mrb[3].mxu0  ;;  %v6014_v63 = vpop.f32.mrb[3].mxu1 }
 0x3f9   :  { %v6017_v0 = vmax.f32 %v7426_v56, 0.0  ;;  %v6019_v1 = vmax.f32 %v7428_v57, 0.0 }
 0x3fa   :  { %v6020_v5 = vpack.c.bf16 %v6016_v60, %v6016_v60  ;;  %v6022_v6 = vpack.c.bf16 %v6018_v61, %v6018_v61 }
 0x3fb   :  { %v6021_v2 = vpack.c.bf16 %v6017_v0, %v6017_v0  ;;  %v6023_v3 = vpack.c.bf16 %v6019_v1, %v6019_v1 }
 0x3fd   :  { %6319 = vmatprep.mubr.bf16.mxu0 %v6021_v2  ;;  %6359 = vmatprep.mubr.bf16.mxu1 %v6023_v3 }
 0x3fe   :  { %6320 = vmatmul.mubr.bf16.vlgmr.msra.gmra.mrb[4].mxu0 %v6020_v5  ;;  %6360 = vmatmul.mubr.bf16.vlgmr.msra.gmra.mrb[4].mxu1 %v6022_v6 }
 0x3ff   :  { %7406 = vmatpush3.bf16.msra.mxu0 %v8785_v4  ;;  %7421 = vmatprep.mubr.msk.bf16.mxu0 %vm8795_vm0, %v8794_v40 }
 0x400   :  { %7407 = vmatprep.subr.bf16.mxu0 %v8794_v40 }
 0x403   :  { %7408 = vmatpush3.bf16.msra.mxu0 %v8786_v7 }
 0x404   :  { %7409 = vmatprep.subr.bf16.mxu0 %v8794_v40 }
 0x407   :  { %7410 = vmatpush3.bf16.msra.mxu0 %v8787_v8 }
 0x408   :  { %7411 = vmatprep.subr.bf16.mxu0 %v8794_v40 }
 0x40b   :  { %7412 = vmatpush3.bf16.msra.mxu0 %v8788_v9 }
 0x40c   :  { %7413 = vmatprep.subr.bf16.mxu0 %v8794_v40 }
 0x40f   :  { %7414 = vmatpush3.bf16.msra.mxu0 %v8789_v10 }
 0x410   :  { %7415 = vmatprep.subr.bf16.mxu0 %v8794_v40 }
 0x413   :  { %7416 = vmatpush3.bf16.msra.mxu0 %v8790_v12 }
 0x414   :  { %7417 = vmatprep.subr.bf16.mxu0 %v8794_v40 }
 0x417   :  { %7418 = vmatpush3.bf16.msra.mxu0 %v8791_v13 }
 0x418   :  { %7419 = vmatprep.subr.bf16.mxu0 %v8794_v40 }
 0x41b   :  { %7420 = vmatpush3.bf16.msra.mxu0 %v8792_v15 }
 0x4d1   :  { %v7368_v11 = vpop.f32.mrb[4].mxu0  ;;  %v7390_v17 = vpop.f32.mrb[4].mxu1 }
 0x4d2   :  { %v7369_v19 = vpop.f32.mrb[5].mxu0  ;;  %v7391_v20 = vpop.f32.mrb[5].mxu1 }
 0x4d3   :  { %v7370_v16 = vadd.f32 %v7369_v19, %v7368_v11  ;;  %v7392_v22 = vadd.f32 %v7391_v20, %v7390_v17  ;;  %v7371_v23 = vpop.f32.mrb[6].mxu0  ;;  %v7393_v18 = vpop.f32.mrb[6].mxu1 }
 0x4d4   :  { %v7372_v25 = vpop.f32.mrb[7].mxu0  ;;  %v7394_v26 = vpop.f32.mrb[7].mxu1 }
 0x4d5   :  { %v6322_v27 = vadd.f32 %v7370_v16, %v7310_v14 }
 0x4d7   :  { %v6362_v28 = vadd.f32 %v7392_v22, %v6322_v27 }
 0x4d9   :  { %v6367_v29 = vmax.f32 %v6362_v28, 0.0 }
 0x4db   :  { %v6368_v24 = vpack.c.bf16 %v6367_v29, %v6367_v29 }
 0x4dd   :  { %7422 = vmatmul.mubr.bf16.vlgmr.msra.gmra.mrb[8].mxu0 %v6368_v24 }
 0x5b0   :  { %v6474_v32 = vpop.f32.mrb[8].mxu0 }
 0x5b1   :  { %v6475_v21 = vadd.f32 %v7343_v31, %v6474_v32  ;;  %v7423_v34 = vpop.f32.mrb[9].mxu0 }
 0x5b2   :  { %v6477_v35 = vpop.f32.mrb[10].mxu0 }
 0x5b3   :  { %6480 = vst [vmem:[%s11480_s7] sm:$0xff] %v6475_v21  ;;  %v7424_v36 = vpop.f32.mrb[11].mxu0 }

</bundles_post_ra>
